<compile_context>
chip_gen: v7x
topology: tpu7x:2x2x1
jax: 0.10.0
libtpu: 0.0.40
codegen_flags: <defaults>
</compile_context>

<pallas_src>
import jax
import jax.numpy as jnp
import numpy as np
from jax.experimental import pallas as pl
from jax.experimental.pallas import tpu as pltpu

_BN_EPS = 1e-5
_C1, _C2 = 32, 64   # conv1 / conv2 output channels (fixed by the module)


# --------------------------------------------------------------------------
# Pallas kernel (one batch block of TB samples per grid step)
# --------------------------------------------------------------------------
def _make_kernel(w_in, tb):
    c1, c2 = _C1, _C2
    h1 = w_in + 1            # conv1 spatial output (k=2, s=1, p=1)
    e1 = (h1 // 2) * 2       # extent used by floor-mode maxpool
    p1 = h1 // 2             # pool1 spatial output
    h2 = p1 + 1              # conv2 spatial output
    e2 = (h2 // 2) * 2
    p2 = h2 // 2             # pool2 spatial output
    f32 = jnp.float32

    def kernel(xcol_ref, y_ref,
               w1_ref, s1_ref, t1_ref,
               w2_ref, s2_ref, t2_ref,
               w0_ref, b0_ref,
               w1a_ref, w1b_ref, b1_ref,
               w2f_ref, b2f_ref,
               out_ref):
        # ---- layer1: conv(1->32, k2, s1, p1) + BN(eval) + ReLU as one matmul
        xc = xcol_ref[...]                                     # (h1, h1, TB, 4)
        c1m = jnp.dot(xc.reshape(h1 * h1 * tb, 4), w1_ref[...],
                      preferred_element_type=f32)              # (M1, c1)
        a1 = jnp.maximum(c1m * s1_ref[...] + t1_ref[...], 0.0)
        a1 = a1.reshape(h1, h1, tb, c1)

        # ---- maxpool 2x2 / stride 2 (floor): leading-dim reshapes only
        a1 = a1[:e1, :e1]                                      # (e1, e1, TB, c1)
        a1 = a1.reshape(p1, 2 * e1, tb, c1)
        a1 = jnp.maximum(a1[:, :e1], a1[:, e1:])               # (p1, e1, TB, c1)
        a1 = a1.reshape(p1 * p1, 2, tb, c1)
        pool1 = jnp.maximum(a1[:, 0], a1[:, 1])                # (p1*p1, TB, c1)
        pool1 = pool1.reshape(p1, p1, tb, c1)

        # ---- layer2: zero-pad (leading-dim concat) + im2col (lane concat)
        zr = jnp.zeros((1, p1, tb, c1), f32)
        zc = jnp.zeros((p1 + 2, 1, tb, c1), f32)
        pad = jnp.concatenate([zr, pool1, zr], axis=0)         # (p1+2, p1, TB, c1)
        pad = jnp.concatenate([zc, pad, zc], axis=1)           # (p1+2, p1+2, TB, c1)
        slab = jnp.concatenate(
            [pad[di:di + h2, dj:dj + h2] for di in (0, 1) for dj in (0, 1)],
            axis=-1)                                           # (h2, h2, TB, 4*c1)
        c2m = jnp.dot(slab.reshape(h2 * h2 * tb, 4 * c1), w2_ref[...],
                      preferred_element_type=f32)              # (M2, c2)
        a2 = jnp.maximum(c2m * s2_ref[...] + t2_ref[...], 0.0)
        a2 = a2.reshape(h2, h2, tb, c2)

        # ---- maxpool 2x2 / stride 2 (floor)
        a2 = a2[:e2, :e2]
        a2 = a2.reshape(p2, 2 * e2, tb, c2)
        a2 = jnp.maximum(a2[:, :e2], a2[:, e2:])               # (p2, e2, TB, c2)
        a2 = a2.reshape(p2 * p2, 2, tb, c2)
        pool2 = jnp.maximum(a2[:, 0], a2[:, 1])                # (p2*p2, TB, c2)

        # ---- conv features flattened per sample in (H, W, C) order
        feat = jnp.concatenate([pool2[k] for k in range(p2 * p2)],
                               axis=-1)                        # (TB, p2*p2*c2)

        # ---- fc0(target) + ReLU (K=2: elementwise on the VPU)
        yv = y_ref[...]                                        # (TB, 2)
        w0 = w0_ref[...]                                       # (2, 32)
        yout = jnp.maximum(yv[:, 0:1] * w0[0:1] + yv[:, 1:2] * w0[1:2]
                           + b0_ref[...], 0.0)                 # (TB, 32)

        # ---- fc1 (two dots instead of a lane concat) + ReLU, then fc2
        hid = jnp.maximum(
            jnp.dot(feat, w1a_ref[...], preferred_element_type=f32)
            + jnp.dot(yout, w1b_ref[...], preferred_element_type=f32)
            + b1_ref[...], 0.0)                                # (TB, num_hidden)
        out_ref[...] = (jnp.dot(hid, w2f_ref[...], preferred_element_type=f32)
                        + b2f_ref[...])

    return kernel


# --------------------------------------------------------------------------
# Wrapper (glue: padding, im2col layout, weight folding / reordering)
# --------------------------------------------------------------------------
def mul_chan_conv_net_forward(sensor, target, params, num_hidden, num_action,
                              block_b=8):
    assert block_b % 8 == 0
    B = sensor.shape[0]
    w_in = sensor.shape[-1]
    c1, c2 = _C1, _C2
    h1 = w_in + 1
    p1 = h1 // 2
    h2 = p1 + 1
    p2 = h2 // 2
    feat = c2 * p2 * p2

    tb = block_b
    b_pad = ((B + tb - 1) // tb) * tb
    if b_pad != B:
        sensor = jnp.pad(sensor, ((0, b_pad - B), (0, 0), (0, 0), (0, 0)))
        target = jnp.pad(target, ((0, b_pad - B), (0, 0)))

    # conv1 im2col input, laid out (H, W, B, tap): pooling then stays on
    # leading dims inside the kernel and the batch block sits on sublanes.
    xpad = jnp.pad(sensor[:, 0, :, :], ((0, 0), (1, 1), (1, 1)))
    x_col = jnp.stack([xpad[:, di:di + h1, dj:dj + h1]
                       for di in (0, 1) for dj in (0, 1)], axis=-1)
    x_col = jnp.transpose(x_col, (1, 2, 0, 3)).astype(jnp.float32)  # (h1,h1,B,4)
    target = target.astype(jnp.float32)

    # conv weights -> im2col form; fold eval-mode BN (+conv bias) into scale/shift
    w1 = jnp.transpose(params["conv1_w"][:, 0, :, :], (1, 2, 0)).reshape(4, c1)
    w2 = jnp.transpose(params["conv2_w"], (2, 3, 1, 0)).reshape(4 * c1, c2)
    s1 = params["bn1_g"] / jnp.sqrt(params["bn1_v"] + _BN_EPS)
    t1 = (params["conv1_b"] - params["bn1_m"]) * s1 + params["bn1_b"]
    s2 = params["bn2_g"] / jnp.sqrt(params["bn2_v"] + _BN_EPS)
    t2 = (params["conv2_b"] - params["bn2_m"]) * s2 + params["bn2_b"]
    # fc0 / fc1 / fc2; reorder fc1's conv-feature columns from PyTorch (C,H,W)
    # flatten order to this kernel's (H,W,C) order.
    w0 = params["fc0_w"].T                      # (2, 32)
    b0 = params["fc0_b"][None, :]               # (1, 32)
    wf1 = params["fc1_w"]                       # (num_hidden, feat + 32)
    w1a = jnp.transpose(wf1[:, :feat].reshape(num_hidden, c2, p2, p2),
                        (2, 3, 1, 0)).reshape(p2 * p2 * c2, num_hidden)
    w1b = wf1[:, feat:].T                       # (32, num_hidden)
    b1 = params["fc1_b"][None, :]
    w2f = params["fc2_w"].T                     # (num_hidden, num_action)
    b2f = params["fc2_b"][None, :]

    weights = [w1, s1[None, :], t1[None, :], w2, s2[None, :], t2[None, :],
               w0, b0, w1a, w1b, b1, w2f, b2f]

    def full_spec(a):
        nd = a.ndim
        return pl.BlockSpec(a.shape, lambda b, _n=nd: (0,) * _n)

    in_specs = [
        pl.BlockSpec((h1, h1, tb, 4), lambda b: (0, 0, b, 0)),
        pl.BlockSpec((tb, 2), lambda b: (b, 0)),
    ] + [full_spec(w) for w in weights]

    kernel = _make_kernel(w_in, tb)
    out = pl.pallas_call(
        kernel,
        out_shape=jax.ShapeDtypeStruct((b_pad, num_action), jnp.float32),
        grid=(b_pad // tb,),
        in_specs=in_specs,
        out_specs=pl.BlockSpec((tb, num_action), lambda b: (b, 0)),
        compiler_params=pltpu.CompilerParams(
            dimension_semantics=("parallel",)),
    )(x_col, target, *weights)
    return out[:B]


# --------------------------------------------------------------------------
# Deterministic parameter init (PyTorch tensor layouts, xavier-style)
# --------------------------------------------------------------------------
def init_params(key, input_width, num_hidden, num_action):
    c1, c2 = _C1, _C2
    p1 = (input_width + 1) // 2
    p2 = (p1 + 1) // 2
    feat = c2 * p2 * p2

    def xavier(k, shape, fan_in, fan_out):
        bound = float(np.sqrt(6.0 / (fan_in + fan_out)))
        return jax.random.uniform(k, shape, jnp.float32, -bound, bound)

    ks = jax.random.split(key, 10)
    return {
        "conv1_w": xavier(ks[0], (c1, 1, 2, 2), 1 * 4, c1 * 4),
        "conv1_b": 0.1 * jax.random.normal(ks[1], (c1,), jnp.float32),
        "conv2_w": xavier(ks[2], (c2, c1, 2, 2), c1 * 4, c2 * 4),
        "conv2_b": 0.1 * jax.random.normal(ks[3], (c2,), jnp.float32),
        "fc0_w": xavier(ks[4], (32, 2), 2, 32),
        "fc0_b": 0.1 * jax.random.normal(ks[5], (32,), jnp.float32),
        "fc1_w": xavier(ks[6], (num_hidden, feat + 32), feat + 32, num_hidden),
        "fc1_b": 0.1 * jax.random.normal(ks[7], (num_hidden,), jnp.float32),
        "fc2_w": xavier(ks[8], (num_action, num_hidden), num_hidden, num_action),
        "fc2_b": 0.1 * jax.random.normal(ks[9], (num_action,), jnp.float32),
        # BatchNorm (PyTorch defaults: gamma=1, beta=0, mean=0, var=1)
        "bn1_g": jnp.ones((c1,), jnp.float32),
        "bn1_b": jnp.zeros((c1,), jnp.float32),
        "bn1_m": jnp.zeros((c1,), jnp.float32),
        "bn1_v": jnp.ones((c1,), jnp.float32),
        "bn2_g": jnp.ones((c2,), jnp.float32),
        "bn2_b": jnp.zeros((c2,), jnp.float32),
        "bn2_m": jnp.zeros((c2,), jnp.float32),
        "bn2_v": jnp.ones((c2,), jnp.float32),
    }


# --------------------------------------------------------------------------
# Pure-JAX reference (PyTorch semantics, NCHW, eval-mode BN) for validation
# --------------------------------------------------------------------------
def reference_forward(sensor, target, p):
    def conv(x, w, b):
        y = jax.lax.conv_general_dilated(
            x, w, window_strides=(1, 1), padding=((1, 1), (1, 1)),
            dimension_numbers=("NCHW", "OIHW", "NCHW"),
            precision=jax.lax.Precision.HIGHEST)
        return y + b[None, :, None, None]

    def bn(x, g, b, m, v):
        return (x - m[None, :, None, None]) * (
            g[None, :, None, None] / jnp.sqrt(v[None, :, None, None] + _BN_EPS)
        ) + b[None, :, None, None]

    def pool(x):
        return jax.lax.reduce_window(x, -jnp.inf, jax.lax.max,
                                     (1, 1, 2, 2), (1, 1, 2, 2), "VALID")

    x = sensor
    x = pool(jax.nn.relu(bn(conv(x, p["conv1_w"], p["conv1_b"]),
                            p["bn1_g"], p["bn1_b"], p["bn1_m"], p["bn1_v"])))
    x = pool(jax.nn.relu(bn(conv(x, p["conv2_w"], p["conv2_b"]),
                            p["bn2_g"], p["bn2_b"], p["bn2_m"], p["bn2_v"])))
    xout = x.reshape(x.shape[0], -1)
    yout = jax.nn.relu(target @ p["fc0_w"].T + p["fc0_b"])
    h = jnp.concatenate([xout, yout], axis=1)
    h = jax.nn.relu(h @ p["fc1_w"].T + p["fc1_b"])
    return h @ p["fc2_w"].T + p["fc2_b"]


if __name__ == "__main__":
    B, W_IN, NUM_HIDDEN, NUM_ACTION = 2, 16, 32, 4

    key = jax.random.PRNGKey(0)
    pkey, skey, tkey = jax.random.split(key, 3)
    params = init_params(pkey, W_IN, NUM_HIDDEN, NUM_ACTION)
    sensor = jax.random.normal(skey, (B, 1, W_IN, W_IN), jnp.float32)
    target = jax.random.normal(tkey, (B, 2), jnp.float32)

    out = mul_chan_conv_net_forward(sensor, target, params,
                                    NUM_HIDDEN, NUM_ACTION)
    out = jax.block_until_ready(out)

    with jax.default_matmul_precision("highest"):
        ref = jax.block_until_ready(reference_forward(sensor, target, params))

    err = np.max(np.abs(np.asarray(out) - np.asarray(ref)))
    if not np.allclose(np.asarray(out), np.asarray(ref), rtol=2e-3, atol=2e-3):
        raise AssertionError(f"kernel/reference mismatch, max abs err={err}")
    print("KERNEL_OK")
</pallas_src>

<mosaic_0001>
module attributes {stable_mosaic.version = 11 : i64} {
  func.func @kernel(%arg0: i32, %arg1: memref<17x17x8x4xf32, #tpu.memory_space<vmem>>, %arg2: memref<8x2xf32, #tpu.memory_space<vmem>>, %arg3: memref<4x32xf32, #tpu.memory_space<vmem>>, %arg4: memref<1x32xf32, #tpu.memory_space<vmem>>, %arg5: memref<1x32xf32, #tpu.memory_space<vmem>>, %arg6: memref<128x64xf32, #tpu.memory_space<vmem>>, %arg7: memref<1x64xf32, #tpu.memory_space<vmem>>, %arg8: memref<1x64xf32, #tpu.memory_space<vmem>>, %arg9: memref<2x32xf32, #tpu.memory_space<vmem>>, %arg10: memref<1x32xf32, #tpu.memory_space<vmem>>, %arg11: memref<1024x32xf32, #tpu.memory_space<vmem>>, %arg12: memref<32x32xf32, #tpu.memory_space<vmem>>, %arg13: memref<1x32xf32, #tpu.memory_space<vmem>>, %arg14: memref<32x4xf32, #tpu.memory_space<vmem>>, %arg15: memref<1x4xf32, #tpu.memory_space<vmem>>, %arg16: memref<8x4xf32, #tpu.memory_space<vmem>>) attributes {dimension_semantics = [#tpu.dimension_semantics<parallel>], iteration_bounds = array<i64: 1>, scalar_prefetch = 0 : i64, scratch_operands = 0 : i64, tpu.core_type = #tpu.core_type<tc>, window_params = [{transform_indices = @transform_0, window_bounds = array<i64: 17, 17, 8, 4>}, {transform_indices = @transform_1, window_bounds = array<i64: 8, 2>}, {pipeline_mode = #tpu.pipeline_mode<synchronous>, transform_indices = @transform_2, window_bounds = array<i64: 4, 32>}, {pipeline_mode = #tpu.pipeline_mode<synchronous>, transform_indices = @transform_3, window_bounds = array<i64: 1, 32>}, {pipeline_mode = #tpu.pipeline_mode<synchronous>, transform_indices = @transform_4, window_bounds = array<i64: 1, 32>}, {pipeline_mode = #tpu.pipeline_mode<synchronous>, transform_indices = @transform_5, window_bounds = array<i64: 128, 64>}, {pipeline_mode = #tpu.pipeline_mode<synchronous>, transform_indices = @transform_6, window_bounds = array<i64: 1, 64>}, {pipeline_mode = #tpu.pipeline_mode<synchronous>, transform_indices = @transform_7, window_bounds = array<i64: 1, 64>}, {pipeline_mode = #tpu.pipeline_mode<synchronous>, transform_indices = @transform_8, window_bounds = array<i64: 2, 32>}, {pipeline_mode = #tpu.pipeline_mode<synchronous>, transform_indices = @transform_9, window_bounds = array<i64: 1, 32>}, {pipeline_mode = #tpu.pipeline_mode<synchronous>, transform_indices = @transform_10, window_bounds = array<i64: 1024, 32>}, {pipeline_mode = #tpu.pipeline_mode<synchronous>, transform_indices = @transform_11, window_bounds = array<i64: 32, 32>}, {pipeline_mode = #tpu.pipeline_mode<synchronous>, transform_indices = @transform_12, window_bounds = array<i64: 1, 32>}, {pipeline_mode = #tpu.pipeline_mode<synchronous>, transform_indices = @transform_13, window_bounds = array<i64: 32, 4>}, {pipeline_mode = #tpu.pipeline_mode<synchronous>, transform_indices = @transform_14, window_bounds = array<i64: 1, 4>}, {transform_indices = @transform_15, window_bounds = array<i64: 8, 4>}]} {
    %c0 = arith.constant 0 : index
    %c0_0 = arith.constant 0 : index
    %c0_1 = arith.constant 0 : index
    %c0_2 = arith.constant 0 : index
    %0 = vector.load %arg1[%c0, %c0_0, %c0_1, %c0_2] : memref<17x17x8x4xf32, #tpu.memory_space<vmem>>, vector<17x17x8x4xf32>
    %1 = vector.shape_cast %0 : vector<17x17x8x4xf32> to vector<2312x4xf32>
    %c0_3 = arith.constant 0 : index
    %c0_4 = arith.constant 0 : index
    %2 = vector.load %arg3[%c0_3, %c0_4] : memref<4x32xf32, #tpu.memory_space<vmem>>, vector<4x32xf32>
    %cst = arith.constant dense<0.000000e+00> : vector<2312x32xf32>
    %3 = tpu.matmul %1, %2, %cst {dimension_numbers = #tpu.dot_dimension_numbers<[1], [0], [0], [1], [0, 0, 1, 1], [], []>} : vector<2312x4xf32>, vector<4x32xf32>, vector<2312x32xf32> -> vector<2312x32xf32>
    %c0_5 = arith.constant 0 : index
    %c0_6 = arith.constant 0 : index
    %4 = vector.load %arg4[%c0_5, %c0_6] : memref<1x32xf32, #tpu.memory_space<vmem>>, vector<1x32xf32>
    %5 = vector.broadcast %4 : vector<1x32xf32> to vector<2312x32xf32>
    %6 = arith.mulf %3, %5 : vector<2312x32xf32>
    %c0_7 = arith.constant 0 : index
    %c0_8 = arith.constant 0 : index
    %7 = vector.load %arg5[%c0_7, %c0_8] : memref<1x32xf32, #tpu.memory_space<vmem>>, vector<1x32xf32>
    %8 = vector.broadcast %7 : vector<1x32xf32> to vector<2312x32xf32>
    %9 = arith.addf %6, %8 : vector<2312x32xf32>
    %cst_9 = arith.constant 0.000000e+00 : f32
    %10 = vector.broadcast %cst_9 : f32 to vector<2312x32xf32>
    %11 = arith.maximumf %9, %10 : vector<2312x32xf32>
    %12 = vector.shape_cast %11 : vector<2312x32xf32> to vector<17x17x8x32xf32>
    %13 = vector.extract_strided_slice %12 {offsets = [0, 0, 0, 0], sizes = [16, 16, 8, 32], strides = [1, 1, 1, 1]} : vector<17x17x8x32xf32> to vector<16x16x8x32xf32>
    %14 = vector.shape_cast %13 : vector<16x16x8x32xf32> to vector<8x32x8x32xf32>
    %15 = vector.extract_strided_slice %14 {offsets = [0, 0, 0, 0], sizes = [8, 16, 8, 32], strides = [1, 1, 1, 1]} : vector<8x32x8x32xf32> to vector<8x16x8x32xf32>
    %16 = vector.extract_strided_slice %14 {offsets = [0, 16, 0, 0], sizes = [8, 16, 8, 32], strides = [1, 1, 1, 1]} : vector<8x32x8x32xf32> to vector<8x16x8x32xf32>
    %17 = arith.maximumf %15, %16 : vector<8x16x8x32xf32>
    %18 = vector.shape_cast %17 : vector<8x16x8x32xf32> to vector<64x2x8x32xf32>
    %19 = vector.extract_strided_slice %18 {offsets = [0, 0, 0, 0], sizes = [64, 1, 8, 32], strides = [1, 1, 1, 1]} : vector<64x2x8x32xf32> to vector<64x1x8x32xf32>
    %20 = vector.shape_cast %19 : vector<64x1x8x32xf32> to vector<64x8x32xf32>
    %21 = vector.extract_strided_slice %18 {offsets = [0, 1, 0, 0], sizes = [64, 1, 8, 32], strides = [1, 1, 1, 1]} : vector<64x2x8x32xf32> to vector<64x1x8x32xf32>
    %22 = vector.shape_cast %21 : vector<64x1x8x32xf32> to vector<64x8x32xf32>
    %23 = arith.maximumf %20, %22 : vector<64x8x32xf32>
    %24 = vector.shape_cast %23 : vector<64x8x32xf32> to vector<8x8x8x32xf32>
    %cst_10 = arith.constant 0.000000e+00 : f32
    %25 = vector.broadcast %cst_10 : f32 to vector<1x8x8x32xf32>
    %cst_11 = arith.constant 0.000000e+00 : f32
    %26 = vector.broadcast %cst_11 : f32 to vector<10x1x8x32xf32>
    %27 = tpu.concatenate %25, %24, %25 in 0 : vector<1x8x8x32xf32>, vector<8x8x8x32xf32>, vector<1x8x8x32xf32> -> vector<10x8x8x32xf32>
    %28 = tpu.concatenate %26, %27, %26 in 1 : vector<10x1x8x32xf32>, vector<10x8x8x32xf32>, vector<10x1x8x32xf32> -> vector<10x10x8x32xf32>
    %29 = vector.extract_strided_slice %28 {offsets = [0, 0, 0, 0], sizes = [9, 9, 8, 32], strides = [1, 1, 1, 1]} : vector<10x10x8x32xf32> to vector<9x9x8x32xf32>
    %30 = vector.extract_strided_slice %28 {offsets = [0, 1, 0, 0], sizes = [9, 9, 8, 32], strides = [1, 1, 1, 1]} : vector<10x10x8x32xf32> to vector<9x9x8x32xf32>
    %31 = vector.extract_strided_slice %28 {offsets = [1, 0, 0, 0], sizes = [9, 9, 8, 32], strides = [1, 1, 1, 1]} : vector<10x10x8x32xf32> to vector<9x9x8x32xf32>
    %32 = vector.extract_strided_slice %28 {offsets = [1, 1, 0, 0], sizes = [9, 9, 8, 32], strides = [1, 1, 1, 1]} : vector<10x10x8x32xf32> to vector<9x9x8x32xf32>
    %33 = tpu.concatenate %29, %30, %31, %32 in 3 : vector<9x9x8x32xf32>, vector<9x9x8x32xf32>, vector<9x9x8x32xf32>, vector<9x9x8x32xf32> -> vector<9x9x8x128xf32>
    %34 = vector.shape_cast %33 : vector<9x9x8x128xf32> to vector<648x128xf32>
    %c0_12 = arith.constant 0 : index
    %c0_13 = arith.constant 0 : index
    %35 = vector.load %arg6[%c0_12, %c0_13] : memref<128x64xf32, #tpu.memory_space<vmem>>, vector<128x64xf32>
    %cst_14 = arith.constant dense<0.000000e+00> : vector<648x64xf32>
    %36 = tpu.matmul %34, %35, %cst_14 {dimension_numbers = #tpu.dot_dimension_numbers<[1], [0], [0], [1], [0, 0, 1, 1], [], []>} : vector<648x128xf32>, vector<128x64xf32>, vector<648x64xf32> -> vector<648x64xf32>
    %c0_15 = arith.constant 0 : index
    %c0_16 = arith.constant 0 : index
    %37 = vector.load %arg7[%c0_15, %c0_16] : memref<1x64xf32, #tpu.memory_space<vmem>>, vector<1x64xf32>
    %38 = vector.broadcast %37 : vector<1x64xf32> to vector<648x64xf32>
    %39 = arith.mulf %36, %38 : vector<648x64xf32>
    %c0_17 = arith.constant 0 : index
    %c0_18 = arith.constant 0 : index
    %40 = vector.load %arg8[%c0_17, %c0_18] : memref<1x64xf32, #tpu.memory_space<vmem>>, vector<1x64xf32>
    %41 = vector.broadcast %40 : vector<1x64xf32> to vector<648x64xf32>
    %42 = arith.addf %39, %41 : vector<648x64xf32>
    %cst_19 = arith.constant 0.000000e+00 : f32
    %43 = vector.broadcast %cst_19 : f32 to vector<648x64xf32>
    %44 = arith.maximumf %42, %43 : vector<648x64xf32>
    %45 = vector.shape_cast %44 : vector<648x64xf32> to vector<9x9x8x64xf32>
    %46 = vector.extract_strided_slice %45 {offsets = [0, 0, 0, 0], sizes = [8, 8, 8, 64], strides = [1, 1, 1, 1]} : vector<9x9x8x64xf32> to vector<8x8x8x64xf32>
    %47 = vector.shape_cast %46 : vector<8x8x8x64xf32> to vector<4x16x8x64xf32>
    %48 = vector.extract_strided_slice %47 {offsets = [0, 0, 0, 0], sizes = [4, 8, 8, 64], strides = [1, 1, 1, 1]} : vector<4x16x8x64xf32> to vector<4x8x8x64xf32>
    %49 = vector.extract_strided_slice %47 {offsets = [0, 8, 0, 0], sizes = [4, 8, 8, 64], strides = [1, 1, 1, 1]} : vector<4x16x8x64xf32> to vector<4x8x8x64xf32>
    %50 = arith.maximumf %48, %49 : vector<4x8x8x64xf32>
    %51 = vector.shape_cast %50 : vector<4x8x8x64xf32> to vector<16x2x8x64xf32>
    %52 = vector.extract_strided_slice %51 {offsets = [0, 0, 0, 0], sizes = [16, 1, 8, 64], strides = [1, 1, 1, 1]} : vector<16x2x8x64xf32> to vector<16x1x8x64xf32>
    %53 = vector.shape_cast %52 : vector<16x1x8x64xf32> to vector<16x8x64xf32>
    %54 = vector.extract_strided_slice %51 {offsets = [0, 1, 0, 0], sizes = [16, 1, 8, 64], strides = [1, 1, 1, 1]} : vector<16x2x8x64xf32> to vector<16x1x8x64xf32>
    %55 = vector.shape_cast %54 : vector<16x1x8x64xf32> to vector<16x8x64xf32>
    %56 = arith.maximumf %53, %55 : vector<16x8x64xf32>
    %57 = vector.extract_strided_slice %56 {offsets = [0, 0, 0], sizes = [1, 8, 64], strides = [1, 1, 1]} : vector<16x8x64xf32> to vector<1x8x64xf32>
    %58 = vector.shape_cast %57 : vector<1x8x64xf32> to vector<8x64xf32>
    %59 = vector.extract_strided_slice %56 {offsets = [1, 0, 0], sizes = [1, 8, 64], strides = [1, 1, 1]} : vector<16x8x64xf32> to vector<1x8x64xf32>
    %60 = vector.shape_cast %59 : vector<1x8x64xf32> to vector<8x64xf32>
    %61 = vector.extract_strided_slice %56 {offsets = [2, 0, 0], sizes = [1, 8, 64], strides = [1, 1, 1]} : vector<16x8x64xf32> to vector<1x8x64xf32>
    %62 = vector.shape_cast %61 : vector<1x8x64xf32> to vector<8x64xf32>
    %63 = vector.extract_strided_slice %56 {offsets = [3, 0, 0], sizes = [1, 8, 64], strides = [1, 1, 1]} : vector<16x8x64xf32> to vector<1x8x64xf32>
    %64 = vector.shape_cast %63 : vector<1x8x64xf32> to vector<8x64xf32>
    %65 = vector.extract_strided_slice %56 {offsets = [4, 0, 0], sizes = [1, 8, 64], strides = [1, 1, 1]} : vector<16x8x64xf32> to vector<1x8x64xf32>
    %66 = vector.shape_cast %65 : vector<1x8x64xf32> to vector<8x64xf32>
    %67 = vector.extract_strided_slice %56 {offsets = [5, 0, 0], sizes = [1, 8, 64], strides = [1, 1, 1]} : vector<16x8x64xf32> to vector<1x8x64xf32>
    %68 = vector.shape_cast %67 : vector<1x8x64xf32> to vector<8x64xf32>
    %69 = vector.extract_strided_slice %56 {offsets = [6, 0, 0], sizes = [1, 8, 64], strides = [1, 1, 1]} : vector<16x8x64xf32> to vector<1x8x64xf32>
    %70 = vector.shape_cast %69 : vector<1x8x64xf32> to vector<8x64xf32>
    %71 = vector.extract_strided_slice %56 {offsets = [7, 0, 0], sizes = [1, 8, 64], strides = [1, 1, 1]} : vector<16x8x64xf32> to vector<1x8x64xf32>
    %72 = vector.shape_cast %71 : vector<1x8x64xf32> to vector<8x64xf32>
    %73 = vector.extract_strided_slice %56 {offsets = [8, 0, 0], sizes = [1, 8, 64], strides = [1, 1, 1]} : vector<16x8x64xf32> to vector<1x8x64xf32>
    %74 = vector.shape_cast %73 : vector<1x8x64xf32> to vector<8x64xf32>
    %75 = vector.extract_strided_slice %56 {offsets = [9, 0, 0], sizes = [1, 8, 64], strides = [1, 1, 1]} : vector<16x8x64xf32> to vector<1x8x64xf32>
    %76 = vector.shape_cast %75 : vector<1x8x64xf32> to vector<8x64xf32>
    %77 = vector.extract_strided_slice %56 {offsets = [10, 0, 0], sizes = [1, 8, 64], strides = [1, 1, 1]} : vector<16x8x64xf32> to vector<1x8x64xf32>
    %78 = vector.shape_cast %77 : vector<1x8x64xf32> to vector<8x64xf32>
    %79 = vector.extract_strided_slice %56 {offsets = [11, 0, 0], sizes = [1, 8, 64], strides = [1, 1, 1]} : vector<16x8x64xf32> to vector<1x8x64xf32>
    %80 = vector.shape_cast %79 : vector<1x8x64xf32> to vector<8x64xf32>
    %81 = vector.extract_strided_slice %56 {offsets = [12, 0, 0], sizes = [1, 8, 64], strides = [1, 1, 1]} : vector<16x8x64xf32> to vector<1x8x64xf32>
    %82 = vector.shape_cast %81 : vector<1x8x64xf32> to vector<8x64xf32>
    %83 = vector.extract_strided_slice %56 {offsets = [13, 0, 0], sizes = [1, 8, 64], strides = [1, 1, 1]} : vector<16x8x64xf32> to vector<1x8x64xf32>
    %84 = vector.shape_cast %83 : vector<1x8x64xf32> to vector<8x64xf32>
    %85 = vector.extract_strided_slice %56 {offsets = [14, 0, 0], sizes = [1, 8, 64], strides = [1, 1, 1]} : vector<16x8x64xf32> to vector<1x8x64xf32>
    %86 = vector.shape_cast %85 : vector<1x8x64xf32> to vector<8x64xf32>
    %87 = vector.extract_strided_slice %56 {offsets = [15, 0, 0], sizes = [1, 8, 64], strides = [1, 1, 1]} : vector<16x8x64xf32> to vector<1x8x64xf32>
    %88 = vector.shape_cast %87 : vector<1x8x64xf32> to vector<8x64xf32>
    %89 = tpu.concatenate %58, %60, %62, %64, %66, %68, %70, %72, %74, %76, %78, %80, %82, %84, %86, %88 in 1 : vector<8x64xf32>, vector<8x64xf32>, vector<8x64xf32>, vector<8x64xf32>, vector<8x64xf32>, vector<8x64xf32>, vector<8x64xf32>, vector<8x64xf32>, vector<8x64xf32>, vector<8x64xf32>, vector<8x64xf32>, vector<8x64xf32>, vector<8x64xf32>, vector<8x64xf32>, vector<8x64xf32>, vector<8x64xf32> -> vector<8x1024xf32>
    %c0_20 = arith.constant 0 : index
    %c0_21 = arith.constant 0 : index
    %90 = vector.load %arg2[%c0_20, %c0_21] : memref<8x2xf32, #tpu.memory_space<vmem>>, vector<8x2xf32>
    %c0_22 = arith.constant 0 : index
    %c0_23 = arith.constant 0 : index
    %91 = vector.load %arg9[%c0_22, %c0_23] : memref<2x32xf32, #tpu.memory_space<vmem>>, vector<2x32xf32>
    %92 = vector.extract_strided_slice %90 {offsets = [0, 0], sizes = [8, 1], strides = [1, 1]} : vector<8x2xf32> to vector<8x1xf32>
    %93 = vector.extract_strided_slice %91 {offsets = [0, 0], sizes = [1, 32], strides = [1, 1]} : vector<2x32xf32> to vector<1x32xf32>
    %94 = vector.broadcast %92 : vector<8x1xf32> to vector<8x32xf32>
    %95 = vector.broadcast %93 : vector<1x32xf32> to vector<8x32xf32>
    %96 = arith.mulf %94, %95 : vector<8x32xf32>
    %97 = vector.extract_strided_slice %90 {offsets = [0, 1], sizes = [8, 1], strides = [1, 1]} : vector<8x2xf32> to vector<8x1xf32>
    %98 = vector.extract_strided_slice %91 {offsets = [1, 0], sizes = [1, 32], strides = [1, 1]} : vector<2x32xf32> to vector<1x32xf32>
    %99 = vector.broadcast %97 : vector<8x1xf32> to vector<8x32xf32>
    %100 = vector.broadcast %98 : vector<1x32xf32> to vector<8x32xf32>
    %101 = arith.mulf %99, %100 : vector<8x32xf32>
    %102 = arith.addf %96, %101 : vector<8x32xf32>
    %c0_24 = arith.constant 0 : index
    %c0_25 = arith.constant 0 : index
    %103 = vector.load %arg10[%c0_24, %c0_25] : memref<1x32xf32, #tpu.memory_space<vmem>>, vector<1x32xf32>
    %104 = vector.broadcast %103 : vector<1x32xf32> to vector<8x32xf32>
    %105 = arith.addf %102, %104 : vector<8x32xf32>
    %cst_26 = arith.constant 0.000000e+00 : f32
    %106 = vector.broadcast %cst_26 : f32 to vector<8x32xf32>
    %107 = arith.maximumf %105, %106 : vector<8x32xf32>
    %c0_27 = arith.constant 0 : index
    %c0_28 = arith.constant 0 : index
    %108 = vector.load %arg11[%c0_27, %c0_28] : memref<1024x32xf32, #tpu.memory_space<vmem>>, vector<1024x32xf32>
    %cst_29 = arith.constant dense<0.000000e+00> : vector<8x32xf32>
    %109 = tpu.matmul %89, %108, %cst_29 {dimension_numbers = #tpu.dot_dimension_numbers<[1], [0], [0], [1], [0, 0, 1, 1], [], []>} : vector<8x1024xf32>, vector<1024x32xf32>, vector<8x32xf32> -> vector<8x32xf32>
    %c0_30 = arith.constant 0 : index
    %c0_31 = arith.constant 0 : index
    %110 = vector.load %arg12[%c0_30, %c0_31] : memref<32x32xf32, #tpu.memory_space<vmem>>, vector<32x32xf32>
    %cst_32 = arith.constant dense<0.000000e+00> : vector<8x32xf32>
    %111 = tpu.matmul %107, %110, %cst_32 {dimension_numbers = #tpu.dot_dimension_numbers<[1], [0], [0], [1], [0, 0, 1, 1], [], []>} : vector<8x32xf32>, vector<32x32xf32>, vector<8x32xf32> -> vector<8x32xf32>
    %112 = arith.addf %109, %111 : vector<8x32xf32>
    %c0_33 = arith.constant 0 : index
    %c0_34 = arith.constant 0 : index
    %113 = vector.load %arg13[%c0_33, %c0_34] : memref<1x32xf32, #tpu.memory_space<vmem>>, vector<1x32xf32>
    %114 = vector.broadcast %113 : vector<1x32xf32> to vector<8x32xf32>
    %115 = arith.addf %112, %114 : vector<8x32xf32>
    %cst_35 = arith.constant 0.000000e+00 : f32
    %116 = vector.broadcast %cst_35 : f32 to vector<8x32xf32>
    %117 = arith.maximumf %115, %116 : vector<8x32xf32>
    %c0_36 = arith.constant 0 : index
    %c0_37 = arith.constant 0 : index
    %118 = vector.load %arg14[%c0_36, %c0_37] : memref<32x4xf32, #tpu.memory_space<vmem>>, vector<32x4xf32>
    %cst_38 = arith.constant dense<0.000000e+00> : vector<8x4xf32>
    %119 = tpu.matmul %117, %118, %cst_38 {dimension_numbers = #tpu.dot_dimension_numbers<[1], [0], [0], [1], [0, 0, 1, 1], [], []>} : vector<8x32xf32>, vector<32x4xf32>, vector<8x4xf32> -> vector<8x4xf32>
    %c0_39 = arith.constant 0 : index
    %c0_40 = arith.constant 0 : index
    %120 = vector.load %arg15[%c0_39, %c0_40] : memref<1x4xf32, #tpu.memory_space<vmem>>, vector<1x4xf32>
    %121 = vector.broadcast %120 : vector<1x4xf32> to vector<8x4xf32>
    %122 = arith.addf %119, %121 : vector<8x4xf32>
    %c0_41 = arith.constant 0 : index
    %c0_42 = arith.constant 0 : index
    %123 = vector.load %arg16[%c0_41, %c0_42] : memref<8x4xf32, #tpu.memory_space<vmem>>, vector<8x4xf32>
    tpu.vector_store %arg16[%c0_41, %c0_42], %122 {strides = array<i32>} : memref<8x4xf32, #tpu.memory_space<vmem>>, vector<8x4xf32>,
    return
  }
  func.func @transform_0(%arg0: i32) -> (i32, i32, i32, i32) {
    %c0_i32 = arith.constant 0 : i32
    %c0_i32_0 = arith.constant 0 : i32
    %c0_i32_1 = arith.constant 0 : i32
    %c0_i32_2 = arith.constant 0 : i32
    return %c0_i32, %c0_i32_0, %arg0, %c0_i32_1 : i32, i32, i32, i32
  }
  func.func @transform_1(%arg0: i32) -> (i32, i32) {
    %c0_i32 = arith.constant 0 : i32
    %c0_i32_0 = arith.constant 0 : i32
    return %arg0, %c0_i32 : i32, i32
  }
  func.func @transform_2(%arg0: i32) -> (i32, i32) {
    %c0_i32 = arith.constant 0 : i32
    %c0_i32_0 = arith.constant 0 : i32
    %c0_i32_1 = arith.constant 0 : i32
    return %c0_i32, %c0_i32_0 : i32, i32
  }
  func.func @transform_3(%arg0: i32) -> (i32, i32) {
    %c0_i32 = arith.constant 0 : i32
    %c0_i32_0 = arith.constant 0 : i32
    %c0_i32_1 = arith.constant 0 : i32
    return %c0_i32, %c0_i32_0 : i32, i32
  }
  func.func @transform_4(%arg0: i32) -> (i32, i32) {
    %c0_i32 = arith.constant 0 : i32
    %c0_i32_0 = arith.constant 0 : i32
    %c0_i32_1 = arith.constant 0 : i32
    return %c0_i32, %c0_i32_0 : i32, i32
  }
  func.func @transform_5(%arg0: i32) -> (i32, i32) {
    %c0_i32 = arith.constant 0 : i32
    %c0_i32_0 = arith.constant 0 : i32
    %c0_i32_1 = arith.constant 0 : i32
    return %c0_i32, %c0_i32_0 : i32, i32
  }
  func.func @transform_6(%arg0: i32) -> (i32, i32) {
    %c0_i32 = arith.constant 0 : i32
    %c0_i32_0 = arith.constant 0 : i32
    %c0_i32_1 = arith.constant 0 : i32
    return %c0_i32, %c0_i32_0 : i32, i32
  }
  func.func @transform_7(%arg0: i32) -> (i32, i32) {
    %c0_i32 = arith.constant 0 : i32
    %c0_i32_0 = arith.constant 0 : i32
    %c0_i32_1 = arith.constant 0 : i32
    return %c0_i32, %c0_i32_0 : i32, i32
  }
  func.func @transform_8(%arg0: i32) -> (i32, i32) {
    %c0_i32 = arith.constant 0 : i32
    %c0_i32_0 = arith.constant 0 : i32
    %c0_i32_1 = arith.constant 0 : i32
    return %c0_i32, %c0_i32_0 : i32, i32
  }
  func.func @transform_9(%arg0: i32) -> (i32, i32) {
    %c0_i32 = arith.constant 0 : i32
    %c0_i32_0 = arith.constant 0 : i32
    %c0_i32_1 = arith.constant 0 : i32
    return %c0_i32, %c0_i32_0 : i32, i32
  }
  func.func @transform_10(%arg0: i32) -> (i32, i32) {
    %c0_i32 = arith.constant 0 : i32
    %c0_i32_0 = arith.constant 0 : i32
    %c0_i32_1 = arith.constant 0 : i32
    return %c0_i32, %c0_i32_0 : i32, i32
  }
  func.func @transform_11(%arg0: i32) -> (i32, i32) {
    %c0_i32 = arith.constant 0 : i32
    %c0_i32_0 = arith.constant 0 : i32
    %c0_i32_1 = arith.constant 0 : i32
    return %c0_i32, %c0_i32_0 : i32, i32
  }
  func.func @transform_12(%arg0: i32) -> (i32, i32) {
    %c0_i32 = arith.constant 0 : i32
    %c0_i32_0 = arith.constant 0 : i32
    %c0_i32_1 = arith.constant 0 : i32
    return %c0_i32, %c0_i32_0 : i32, i32
  }
  func.func @transform_13(%arg0: i32) -> (i32, i32) {
    %c0_i32 = arith.constant 0 : i32
    %c0_i32_0 = arith.constant 0 : i32
    %c0_i32_1 = arith.constant 0 : i32
    return %c0_i32, %c0_i32_0 : i32, i32
  }
  func.func @transform_14(%arg0: i32) -> (i32, i32) {
    %c0_i32 = arith.constant 0 : i32
    %c0_i32_0 = arith.constant 0 : i32
    %c0_i32_1 = arith.constant 0 : i32
    return %c0_i32, %c0_i32_0 : i32, i32
  }
  func.func @transform_15(%arg0: i32) -> (i32, i32) {
    %c0_i32 = arith.constant 0 : i32
    %c0_i32_0 = arith.constant 0 : i32
    return %arg0, %c0_i32 : i32, i32
  }
}

</mosaic_0001>

<bundles_post_ra>
// kernel: tpu_custom_call.1
= control target key start
LH: loop header
LB: loop body
LE: loop exit
PB: predicated region body
PF: predicated region fallthrough
CT: control target
= control target key end

     0   :  { %vm1208_vm0 = vcmask 1043456   ;;  %v13414_v0 = vmov 0.0   ;;  %vm340_vm1 = vcmask 31744   ;;  %vm8600_vm2 = vmmov 0   ;;  %s8602_s19 = smov 32   ;;  %s8604_s28 = smov 96   ;;  %s13396_s2 = inlined_call_operand.vmem [shape: f32[4,32], index: 2, kind: input, shape index: {}]   ;;  %s13397_s0 = inlined_call_operand.vmem [shape: f32[17,17,8,4], index: 0, kind: input, shape index: {}]   ;;  %s13398_s5 = inlined_call_operand.vmem [shape: f32[128,64], index: 5, kind: input, shape index: {}]   ;;  %s13399_s3 = inlined_call_operand.vmem [shape: f32[1,32], index: 3, kind: input, shape index: {}]   ;;  %s13400_s4 = inlined_call_operand.vmem [shape: f32[1,32], index: 4, kind: input, shape index: {}]   ;;  %s13401_s6 = inlined_call_operand.vmem [shape: f32[1,64], index: 6, kind: input, shape index: {}]   ;;  %s13402_s7 = inlined_call_operand.vmem [shape: f32[1,64], index: 7, kind: input, shape index: {}]   ;;  %s13403_s11 = inlined_call_operand.vmem [shape: f32[32,32], index: 11, kind: input, shape index: {}]   ;;  %s13404_s1 = inlined_call_operand.vmem [shape: f32[8,2], index: 1, kind: input, shape index: {}]   ;;  %s13405_s10 = inlined_call_operand.vmem [shape: f32[1024,32], index: 10, kind: input, shape index: {}]   ;;  %s13406_s8 = inlined_call_operand.vmem [shape: f32[2,32], index: 8, kind: input, shape index: {}]   ;;  %s13407_s9 = inlined_call_operand.vmem [shape: f32[1,32], index: 9, kind: input, shape index: {}]   ;;  %s13408_s13 = inlined_call_operand.vmem [shape: f32[32,4], index: 13, kind: input, shape index: {}]   ;;  %s13409_s12 = inlined_call_operand.vmem [shape: f32[1,32], index: 12, kind: input, shape index: {}]   ;;  %s13410_s14 = inlined_call_operand.vmem [shape: f32[1,4], index: 14, kind: input, shape index: {}]   ;;  %s13411_s15 = inlined_call_operand.vmem [shape: f32[8,4], index: 15, kind: output, shape index: {}]  }
   0x1   :  { %6764 = vmatprep.subr.mxu0 %v13414_v0  ;;  %8094 = vmatprep.subr.mxu1 %v13414_v0  ;;  %v339_v1 = vld [vmem:[%s13396_s2] sm:$0xf]  ;;  %v253_v3 = vld [vmem:[%s13397_s0 + $0x658] sm:$0xff]  ;;  %v51_v4 = vld [vmem:[%s13397_s0 + $0x8] sm:$0xff]  ;;  %s8603_s2 = smov 64   ;;  %vm4313_vm3 = vcmask 261120  }
   0x2   :  { %v50_v2 = vld [vmem:[%s13397_s0] sm:$0xff]  ;;  %6765 = vmatpush3.msk.msra.mxu0 %vm1208_vm0, %v339_v1  ;;  %8095 = vmatpush3.msk.msra.mxu1 %vm1208_vm0, %v339_v1  ;;  %v52_v6 = vld [vmem:[%s13397_s0 + $0x10] sm:$0xff]  ;;  %v255_v7 = vld [vmem:[%s13397_s0 + $0x668] sm:$0xff]  ;;  %vm4387_vm4 = vcmask 523264   ;;  %vm4469_vm5 = vcmask 785408  }
   0x3   :  { %6766 = vmatprep.mubr.msk.f32.mxu0 %vm8600_vm2, %v13414_v0  ;;  %7375 = vmatprep.mubr.msk.f32.mxu1 %vm8600_vm2, %v13414_v0  ;;  %v254_v5 = vld [vmem:[%s13397_s0 + $0x660] sm:$0xff]  ;;  %v53_v8 = vld [vmem:[%s13397_s0 + $0x18] sm:$0xff]  ;;  %v256_v9 = vld [vmem:[%s13397_s0 + $0x670] sm:$0xff] }
   0x4   :  { %6767 = vmatmul.mubr.msk.f32.vlgmr.msra.gmra.mrb[0].mxu0 %vm340_vm1, %v50_v2  ;;  %7376 = vmatmul.mubr.msk.f32.vlgmr.msra.gmra.mrb[0].mxu1 %vm340_vm1, %v253_v3  ;;  %v54_v10 = vld [vmem:[%s13397_s0 + $0x20] sm:$0xff]  ;;  %v257_v11 = vld [vmem:[%s13397_s0 + $0x678] sm:$0xff]  ;;  %v55_v12 = vld [vmem:[%s13397_s0 + $0x28] sm:$0xff] }
   0x5   :  { %6769 = vmatprep.mubr.msk.f32.mxu0 %vm8600_vm2, %v13414_v0  ;;  %7378 = vmatprep.mubr.msk.f32.mxu1 %vm8600_vm2, %v13414_v0  ;;  %v258_v13 = vld [vmem:[%s13397_s0 + $0x680] sm:$0xff]  ;;  %v56_v14 = vld [vmem:[%s13397_s0 + $0x30] sm:$0xff]  ;;  %v259_v15 = vld [vmem:[%s13397_s0 + $0x688] sm:$0xff] }
   0x6   :  { %v57_v16 = vld [vmem:[%s13397_s0 + $0x38] sm:$0xff]  ;;  %v260_v17 = vld [vmem:[%s13397_s0 + $0x690] sm:$0xff]  ;;  %v58_v18 = vld [vmem:[%s13397_s0 + $0x40] sm:$0xff] }
   0x7   :  { %v261_v19 = vld [vmem:[%s13397_s0 + $0x698] sm:$0xff]  ;;  %v59_v20 = vld [vmem:[%s13397_s0 + $0x48] sm:$0xff]  ;;  %v262_v21 = vld [vmem:[%s13397_s0 + $0x6a0] sm:$0xff] }
   0x8   :  { %6770 = vmatmul.mubr.msk.f32.gmra.mrb[2].mxu0 %vm340_vm1, %v51_v4  ;;  %7379 = vmatmul.mubr.msk.f32.gmra.mrb[2].mxu1 %vm340_vm1, %v254_v5  ;;  %v60_v22 = vld [vmem:[%s13397_s0 + $0x50] sm:$0xff]  ;;  %v263_v23 = vld [vmem:[%s13397_s0 + $0x6a8] sm:$0xff]  ;;  %v61_v24 = vld [vmem:[%s13397_s0 + $0x58] sm:$0xff] }
   0x9   :  { %6772 = vmatprep.mubr.msk.f32.mxu0 %vm8600_vm2, %v13414_v0  ;;  %7381 = vmatprep.mubr.msk.f32.mxu1 %vm8600_vm2, %v13414_v0  ;;  %v264_v25 = vld [vmem:[%s13397_s0 + $0x6b0] sm:$0xff]  ;;  %v62_v26 = vld [vmem:[%s13397_s0 + $0x60] sm:$0xff]  ;;  %v265_v27 = vld [vmem:[%s13397_s0 + $0x6b8] sm:$0xff] }
   0xa   :  { %v63_v28 = vld [vmem:[%s13397_s0 + $0x68] sm:$0xff]  ;;  %v266_v29 = vld [vmem:[%s13397_s0 + $0x6c0] sm:$0xff]  ;;  %v64_v30 = vld [vmem:[%s13397_s0 + $0x70] sm:$0xff] }
   0xb   :  { %v267_v31 = vld [vmem:[%s13397_s0 + $0x6c8] sm:$0xff]  ;;  %v65_v32 = vld [vmem:[%s13397_s0 + $0x78] sm:$0xff]  ;;  %v268_v33 = vld [vmem:[%s13397_s0 + $0x6d0] sm:$0xff] }
   0xc   :  { %6773 = vmatmul.mubr.msk.f32.gmra.mrb[4].mxu0 %vm340_vm1, %v52_v6  ;;  %7382 = vmatmul.mubr.msk.f32.gmra.mrb[4].mxu1 %vm340_vm1, %v255_v7  ;;  %v66_v34 = vld [vmem:[%s13397_s0 + $0x80] sm:$0xff]  ;;  %v269_v35 = vld [vmem:[%s13397_s0 + $0x6d8] sm:$0xff]  ;;  %v67_v36 = vld [vmem:[%s13397_s0 + $0x88] sm:$0xff] }
   0xd   :  { %6775 = vmatprep.mubr.msk.f32.mxu0 %vm8600_vm2, %v13414_v0  ;;  %7384 = vmatprep.mubr.msk.f32.mxu1 %vm8600_vm2, %v13414_v0  ;;  %v270_v37 = vld [vmem:[%s13397_s0 + $0x6e0] sm:$0xff]  ;;  %v68_v38 = vld [vmem:[%s13397_s0 + $0x90] sm:$0xff]  ;;  %v271_v39 = vld [vmem:[%s13397_s0 + $0x6e8] sm:$0xff] }
   0xe   :  { %v69_v40 = vld [vmem:[%s13397_s0 + $0x98] sm:$0xff]  ;;  %v272_v41 = vld [vmem:[%s13397_s0 + $0x6f0] sm:$0xff]  ;;  %v70_v42 = vld [vmem:[%s13397_s0 + $0xa0] sm:$0xff] }
   0xf   :  { %v273_v43 = vld [vmem:[%s13397_s0 + $0x6f8] sm:$0xff]  ;;  %v71_v44 = vld [vmem:[%s13397_s0 + $0xa8] sm:$0xff]  ;;  %v274_v45 = vld [vmem:[%s13397_s0 + $0x700] sm:$0xff] }
  0x10   :  { %6776 = vmatmul.mubr.msk.f32.gmra.mrb[6].mxu0 %vm340_vm1, %v53_v8  ;;  %7385 = vmatmul.mubr.msk.f32.gmra.mrb[6].mxu1 %vm340_vm1, %v256_v9  ;;  %v72_v46 = vld [vmem:[%s13397_s0 + $0xb0] sm:$0xff]  ;;  %v275_v47 = vld [vmem:[%s13397_s0 + $0x708] sm:$0xff]  ;;  %v73_v48 = vld [vmem:[%s13397_s0 + $0xb8] sm:$0xff] }
  0x11   :  { %6778 = vmatprep.mubr.msk.f32.mxu0 %vm8600_vm2, %v13414_v0  ;;  %7387 = vmatprep.mubr.msk.f32.mxu1 %vm8600_vm2, %v13414_v0  ;;  %v276_v49 = vld [vmem:[%s13397_s0 + $0x710] sm:$0xff]  ;;  %v74_v50 = vld [vmem:[%s13397_s0 + $0xc0] sm:$0xff]  ;;  %v277_v51 = vld [vmem:[%s13397_s0 + $0x718] sm:$0xff] }
  0x12   :  { %v75_v52 = vld [vmem:[%s13397_s0 + $0xc8] sm:$0xff]  ;;  %v278_v53 = vld [vmem:[%s13397_s0 + $0x720] sm:$0xff]  ;;  %v76_v54 = vld [vmem:[%s13397_s0 + $0xd0] sm:$0xff] }
  0x13   :  { %v279_v55 = vld [vmem:[%s13397_s0 + $0x728] sm:$0xff]  ;;  %v77_v56 = vld [vmem:[%s13397_s0 + $0xd8] sm:$0xff]  ;;  %v280_v57 = vld [vmem:[%s13397_s0 + $0x730] sm:$0xff] }
  0x14   :  { %6779 = vmatmul.mubr.msk.f32.gmra.mrb[8].mxu0 %vm340_vm1, %v54_v10  ;;  %7388 = vmatmul.mubr.msk.f32.gmra.mrb[8].mxu1 %vm340_vm1, %v257_v11  ;;  %v78_v58 = vld [vmem:[%s13397_s0 + $0xe0] sm:$0xff]  ;;  %v281_v59 = vld [vmem:[%s13397_s0 + $0x738] sm:$0xff]  ;;  %v79_v60 = vld [vmem:[%s13397_s0 + $0xe8] sm:$0xff] }
  0x15   :  { %6781 = vmatprep.mubr.msk.f32.mxu0 %vm8600_vm2, %v13414_v0  ;;  %7390 = vmatprep.mubr.msk.f32.mxu1 %vm8600_vm2, %v13414_v0  ;;  %v282_v61 = vld [vmem:[%s13397_s0 + $0x740] sm:$0xff]  ;;  %v80_v62 = vld [vmem:[%s13397_s0 + $0xf0] sm:$0xff]  ;;  %v283_v63 = vld [vmem:[%s13397_s0 + $0x748] sm:$0xff] }
  0x16   :  { %v81_v1 = vld [vmem:[%s13397_s0 + $0xf8] sm:$0xff]  ;;  %v284_v2 = vld [vmem:[%s13397_s0 + $0x750] sm:$0xff]  ;;  %v82_v3 = vld [vmem:[%s13397_s0 + $0x100] sm:$0xff] }
  0x17   :  { %v285_v4 = vld [vmem:[%s13397_s0 + $0x758] sm:$0xff]  ;;  %v83_v5 = vld [vmem:[%s13397_s0 + $0x108] sm:$0xff]  ;;  %v286_v6 = vld [vmem:[%s13397_s0 + $0x760] sm:$0xff] }
  0x18   :  { %6782 = vmatmul.mubr.msk.f32.gmra.mrb[10].mxu0 %vm340_vm1, %v55_v12  ;;  %7391 = vmatmul.mubr.msk.f32.gmra.mrb[10].mxu1 %vm340_vm1, %v258_v13  ;;  %v84_v7 = vld [vmem:[%s13397_s0 + $0x110] sm:$0xff]  ;;  %v287_v8 = vld [vmem:[%s13397_s0 + $0x768] sm:$0xff]  ;;  %v85_v9 = vld [vmem:[%s13397_s0 + $0x118] sm:$0xff] }
  0x19   :  { %6784 = vmatprep.mubr.msk.f32.mxu0 %vm8600_vm2, %v13414_v0  ;;  %7393 = vmatprep.mubr.msk.f32.mxu1 %vm8600_vm2, %v13414_v0  ;;  %v288_v10 = vld [vmem:[%s13397_s0 + $0x770] sm:$0xff]  ;;  %v86_v11 = vld [vmem:[%s13397_s0 + $0x120] sm:$0xff]  ;;  %v289_v12 = vld [vmem:[%s13397_s0 + $0x778] sm:$0xff] }
  0x1a   :  { %v87_v13 = vld [vmem:[%s13397_s0 + $0x128] sm:$0xff] }
  0x1c   :  { %6785 = vmatmul.mubr.msk.f32.gmra.mrb[12].mxu0 %vm340_vm1, %v56_v14  ;;  %7394 = vmatmul.mubr.msk.f32.gmra.mrb[12].mxu1 %vm340_vm1, %v259_v15  ;;  %v290_v14 = vld [vmem:[%s13397_s0 + $0x780] sm:$0xff]  ;;  %v88_v15 = vld [vmem:[%s13397_s0 + $0x130] sm:$0xff] }
  0x1d   :  { %6787 = vmatprep.mubr.msk.f32.mxu0 %vm8600_vm2, %v13414_v0  ;;  %7396 = vmatprep.mubr.msk.f32.mxu1 %vm8600_vm2, %v13414_v0 }
  0x20   :  { %6788 = vmatmul.mubr.msk.f32.gmra.mrb[14].mxu0 %vm340_vm1, %v57_v16  ;;  %7397 = vmatmul.mubr.msk.f32.gmra.mrb[14].mxu1 %vm340_vm1, %v260_v17  ;;  %v291_v16 = vld [vmem:[%s13397_s0 + $0x788] sm:$0xff]  ;;  %v89_v17 = vld [vmem:[%s13397_s0 + $0x138] sm:$0xff] }
  0x21   :  { %6790 = vmatprep.mubr.msk.f32.mxu0 %vm8600_vm2, %v13414_v0  ;;  %7399 = vmatprep.mubr.msk.f32.mxu1 %vm8600_vm2, %v13414_v0 }
  0x24   :  { %6791 = vmatmul.mubr.msk.f32.gmra.mrb[16].mxu0 %vm340_vm1, %v58_v18  ;;  %7400 = vmatmul.mubr.msk.f32.gmra.mrb[16].mxu1 %vm340_vm1, %v261_v19  ;;  %v292_v18 = vld [vmem:[%s13397_s0 + $0x790] sm:$0xff]  ;;  %v90_v19 = vld [vmem:[%s13397_s0 + $0x140] sm:$0xff] }
  0x25   :  { %6793 = vmatprep.mubr.msk.f32.mxu0 %vm8600_vm2, %v13414_v0  ;;  %7402 = vmatprep.mubr.msk.f32.mxu1 %vm8600_vm2, %v13414_v0 }
  0x28   :  { %6794 = vmatmul.mubr.msk.f32.gmra.mrb[18].mxu0 %vm340_vm1, %v59_v20  ;;  %7403 = vmatmul.mubr.msk.f32.gmra.mrb[18].mxu1 %vm340_vm1, %v262_v21  ;;  %v293_v20 = vld [vmem:[%s13397_s0 + $0x798] sm:$0xff]  ;;  %v91_v21 = vld [vmem:[%s13397_s0 + $0x148] sm:$0xff] }
  0x29   :  { %6796 = vmatprep.mubr.msk.f32.mxu0 %vm8600_vm2, %v13414_v0  ;;  %7405 = vmatprep.mubr.msk.f32.mxu1 %vm8600_vm2, %v13414_v0 }
  0x2c   :  { %6797 = vmatmul.mubr.msk.f32.gmra.mrb[20].mxu0 %vm340_vm1, %v60_v22  ;;  %7406 = vmatmul.mubr.msk.f32.gmra.mrb[20].mxu1 %vm340_vm1, %v263_v23  ;;  %v294_v22 = vld [vmem:[%s13397_s0 + $0x7a0] sm:$0xff]  ;;  %v92_v23 = vld [vmem:[%s13397_s0 + $0x150] sm:$0xff] }
  0x2d   :  { %6799 = vmatprep.mubr.msk.f32.mxu0 %vm8600_vm2, %v13414_v0  ;;  %7408 = vmatprep.mubr.msk.f32.mxu1 %vm8600_vm2, %v13414_v0 }
  0x30   :  { %6800 = vmatmul.mubr.msk.f32.gmra.mrb[22].mxu0 %vm340_vm1, %v61_v24  ;;  %7409 = vmatmul.mubr.msk.f32.gmra.mrb[22].mxu1 %vm340_vm1, %v264_v25  ;;  %v295_v24 = vld [vmem:[%s13397_s0 + $0x7a8] sm:$0xff]  ;;  %v93_v25 = vld [vmem:[%s13397_s0 + $0x158] sm:$0xff] }
  0x31   :  { %6802 = vmatprep.mubr.msk.f32.mxu0 %vm8600_vm2, %v13414_v0  ;;  %7411 = vmatprep.mubr.msk.f32.mxu1 %vm8600_vm2, %v13414_v0 }
  0x34   :  { %6803 = vmatmul.mubr.msk.f32.gmra.mrb[24].mxu0 %vm340_vm1, %v62_v26  ;;  %7412 = vmatmul.mubr.msk.f32.gmra.mrb[24].mxu1 %vm340_vm1, %v265_v27  ;;  %v296_v26 = vld [vmem:[%s13397_s0 + $0x7b0] sm:$0xff]  ;;  %v94_v27 = vld [vmem:[%s13397_s0 + $0x160] sm:$0xff] }
  0x35   :  { %6805 = vmatprep.mubr.msk.f32.mxu0 %vm8600_vm2, %v13414_v0  ;;  %7414 = vmatprep.mubr.msk.f32.mxu1 %vm8600_vm2, %v13414_v0 }
  0x38   :  { %6806 = vmatmul.mubr.msk.f32.gmra.mrb[26].mxu0 %vm340_vm1, %v63_v28  ;;  %7415 = vmatmul.mubr.msk.f32.gmra.mrb[26].mxu1 %vm340_vm1, %v266_v29  ;;  %v297_v28 = vld [vmem:[%s13397_s0 + $0x7b8] sm:$0xff]  ;;  %v95_v29 = vld [vmem:[%s13397_s0 + $0x168] sm:$0xff] }
  0x39   :  { %6808 = vmatprep.mubr.msk.f32.mxu0 %vm8600_vm2, %v13414_v0  ;;  %7417 = vmatprep.mubr.msk.f32.mxu1 %vm8600_vm2, %v13414_v0 }
  0x3c   :  { %6809 = vmatmul.mubr.msk.f32.gmra.mrb[28].mxu0 %vm340_vm1, %v64_v30  ;;  %7418 = vmatmul.mubr.msk.f32.gmra.mrb[28].mxu1 %vm340_vm1, %v267_v31  ;;  %v298_v30 = vld [vmem:[%s13397_s0 + $0x7c0] sm:$0xff]  ;;  %v96_v31 = vld [vmem:[%s13397_s0 + $0x170] sm:$0xff] }
  0x3d   :  { %6811 = vmatprep.mubr.msk.f32.mxu0 %vm8600_vm2, %v13414_v0  ;;  %7420 = vmatprep.mubr.msk.f32.mxu1 %vm8600_vm2, %v13414_v0 }
  0x40   :  { %6812 = vmatmul.mubr.msk.f32.gmra.mrb[30].mxu0 %vm340_vm1, %v65_v32  ;;  %7421 = vmatmul.mubr.msk.f32.gmra.mrb[30].mxu1 %vm340_vm1, %v268_v33  ;;  %v299_v32 = vld [vmem:[%s13397_s0 + $0x7c8] sm:$0xff]  ;;  %v97_v33 = vld [vmem:[%s13397_s0 + $0x178] sm:$0xff] }
  0x41   :  { %6814 = vmatprep.mubr.msk.f32.mxu0 %vm8600_vm2, %v13414_v0  ;;  %7423 = vmatprep.mubr.msk.f32.mxu1 %vm8600_vm2, %v13414_v0 }
  0x44   :  { %6815 = vmatmul.mubr.msk.f32.gmra.mrb[32].mxu0 %vm340_vm1, %v66_v34  ;;  %7424 = vmatmul.mubr.msk.f32.gmra.mrb[32].mxu1 %vm340_vm1, %v269_v35  ;;  %v300_v34 = vld [vmem:[%s13397_s0 + $0x7d0] sm:$0xff]  ;;  %v98_v35 = vld [vmem:[%s13397_s0 + $0x180] sm:$0xff] }
  0x45   :  { %6817 = vmatprep.mubr.msk.f32.mxu0 %vm8600_vm2, %v13414_v0  ;;  %7426 = vmatprep.mubr.msk.f32.mxu1 %vm8600_vm2, %v13414_v0 }
  0x48   :  { %6818 = vmatmul.mubr.msk.f32.gmra.mrb[34].mxu0 %vm340_vm1, %v67_v36  ;;  %7427 = vmatmul.mubr.msk.f32.gmra.mrb[34].mxu1 %vm340_vm1, %v270_v37  ;;  %v301_v36 = vld [vmem:[%s13397_s0 + $0x7d8] sm:$0xff]  ;;  %v99_v37 = vld [vmem:[%s13397_s0 + $0x188] sm:$0xff] }
  0x49   :  { %6820 = vmatprep.mubr.msk.f32.mxu0 %vm8600_vm2, %v13414_v0  ;;  %7429 = vmatprep.mubr.msk.f32.mxu1 %vm8600_vm2, %v13414_v0 }
  0x4c   :  { %6821 = vmatmul.mubr.msk.f32.gmra.mrb[36].mxu0 %vm340_vm1, %v68_v38  ;;  %7430 = vmatmul.mubr.msk.f32.gmra.mrb[36].mxu1 %vm340_vm1, %v271_v39  ;;  %v302_v38 = vld [vmem:[%s13397_s0 + $0x7e0] sm:$0xff]  ;;  %v100_v39 = vld [vmem:[%s13397_s0 + $0x190] sm:$0xff] }
  0x4d   :  { %6823 = vmatprep.mubr.msk.f32.mxu0 %vm8600_vm2, %v13414_v0  ;;  %7432 = vmatprep.mubr.msk.f32.mxu1 %vm8600_vm2, %v13414_v0 }
  0x50   :  { %6824 = vmatmul.mubr.msk.f32.gmra.mrb[38].mxu0 %vm340_vm1, %v69_v40  ;;  %7433 = vmatmul.mubr.msk.f32.gmra.mrb[38].mxu1 %vm340_vm1, %v272_v41  ;;  %v303_v40 = vld [vmem:[%s13397_s0 + $0x7e8] sm:$0xff]  ;;  %v101_v41 = vld [vmem:[%s13397_s0 + $0x198] sm:$0xff] }
  0x51   :  { %6826 = vmatprep.mubr.msk.f32.mxu0 %vm8600_vm2, %v13414_v0  ;;  %7435 = vmatprep.mubr.msk.f32.mxu1 %vm8600_vm2, %v13414_v0 }
  0x54   :  { %6827 = vmatmul.mubr.msk.f32.gmra.mrb[40].mxu0 %vm340_vm1, %v70_v42  ;;  %7436 = vmatmul.mubr.msk.f32.gmra.mrb[40].mxu1 %vm340_vm1, %v273_v43  ;;  %v304_v42 = vld [vmem:[%s13397_s0 + $0x7f0] sm:$0xff]  ;;  %v102_v43 = vld [vmem:[%s13397_s0 + $0x1a0] sm:$0xff] }
  0x55   :  { %6829 = vmatprep.mubr.msk.f32.mxu0 %vm8600_vm2, %v13414_v0  ;;  %7438 = vmatprep.mubr.msk.f32.mxu1 %vm8600_vm2, %v13414_v0 }
  0x58   :  { %6830 = vmatmul.mubr.msk.f32.gmra.mrb[42].mxu0 %vm340_vm1, %v71_v44  ;;  %7439 = vmatmul.mubr.msk.f32.gmra.mrb[42].mxu1 %vm340_vm1, %v274_v45  ;;  %v305_v44 = vld [vmem:[%s13397_s0 + $0x7f8] sm:$0xff]  ;;  %v103_v45 = vld [vmem:[%s13397_s0 + $0x1a8] sm:$0xff] }
  0x59   :  { %6832 = vmatprep.mubr.msk.f32.mxu0 %vm8600_vm2, %v13414_v0  ;;  %7441 = vmatprep.mubr.msk.f32.mxu1 %vm8600_vm2, %v13414_v0 }
  0x5c   :  { %6833 = vmatmul.mubr.msk.f32.gmra.mrb[44].mxu0 %vm340_vm1, %v72_v46  ;;  %7442 = vmatmul.mubr.msk.f32.gmra.mrb[44].mxu1 %vm340_vm1, %v275_v47  ;;  %v306_v46 = vld [vmem:[%s13397_s0 + $0x800] sm:$0xff] }
  0x5d   :  { %6835 = vmatprep.mubr.msk.f32.mxu0 %vm8600_vm2, %v13414_v0  ;;  %7444 = vmatprep.mubr.msk.f32.mxu1 %vm8600_vm2, %v13414_v0 }
  0x60   :  { %6836 = vmatmul.mubr.msk.f32.gmra.mrb[46].mxu0 %vm340_vm1, %v73_v48  ;;  %7445 = vmatmul.mubr.msk.f32.gmra.mrb[46].mxu1 %vm340_vm1, %v276_v49 }
  0x61   :  { %6838 = vmatprep.mubr.msk.f32.mxu0 %vm8600_vm2, %v13414_v0  ;;  %7447 = vmatprep.mubr.msk.f32.mxu1 %vm8600_vm2, %v13414_v0 }
  0x64   :  { %6839 = vmatmul.mubr.msk.f32.gmra.mrb[48].mxu0 %vm340_vm1, %v74_v50  ;;  %7448 = vmatmul.mubr.msk.f32.gmra.mrb[48].mxu1 %vm340_vm1, %v277_v51  ;;  %v104_v51 = vld [vmem:[%s13397_s0 + $0x1b0] sm:$0xff] }
  0x65   :  { %6841 = vmatprep.mubr.msk.f32.mxu0 %vm8600_vm2, %v13414_v0  ;;  %7450 = vmatprep.mubr.msk.f32.mxu1 %vm8600_vm2, %v13414_v0 }
  0x68   :  { %6842 = vmatmul.mubr.msk.f32.gmra.mrb[50].mxu0 %vm340_vm1, %v75_v52  ;;  %7451 = vmatmul.mubr.msk.f32.gmra.mrb[50].mxu1 %vm340_vm1, %v278_v53  ;;  %v307_v52 = vld [vmem:[%s13397_s0 + $0x808] sm:$0xff] }
  0x69   :  { %6844 = vmatprep.mubr.msk.f32.mxu0 %vm8600_vm2, %v13414_v0  ;;  %7453 = vmatprep.mubr.msk.f32.mxu1 %vm8600_vm2, %v13414_v0 }
  0x6c   :  { %6845 = vmatmul.mubr.msk.f32.gmra.mrb[52].mxu0 %vm340_vm1, %v76_v54  ;;  %7454 = vmatmul.mubr.msk.f32.gmra.mrb[52].mxu1 %vm340_vm1, %v279_v55 }
  0x6d   :  { %6847 = vmatprep.mubr.msk.f32.mxu0 %vm8600_vm2, %v13414_v0  ;;  %7456 = vmatprep.mubr.msk.f32.mxu1 %vm8600_vm2, %v13414_v0 }
  0x70   :  { %6848 = vmatmul.mubr.msk.f32.gmra.mrb[54].mxu0 %vm340_vm1, %v77_v56  ;;  %7457 = vmatmul.mubr.msk.f32.gmra.mrb[54].mxu1 %vm340_vm1, %v280_v57  ;;  %v105_v57 = vld [vmem:[%s13397_s0 + $0x1b8] sm:$0xff] }
  0x71   :  { %6850 = vmatprep.mubr.msk.f32.mxu0 %vm8600_vm2, %v13414_v0  ;;  %7459 = vmatprep.mubr.msk.f32.mxu1 %vm8600_vm2, %v13414_v0 }
  0x74   :  { %6851 = vmatmul.mubr.msk.f32.gmra.mrb[56].mxu0 %vm340_vm1, %v78_v58  ;;  %7460 = vmatmul.mubr.msk.f32.gmra.mrb[56].mxu1 %vm340_vm1, %v281_v59  ;;  %v308_v58 = vld [vmem:[%s13397_s0 + $0x810] sm:$0xff] }
  0x75   :  { %6853 = vmatprep.mubr.msk.f32.mxu0 %vm8600_vm2, %v13414_v0  ;;  %7462 = vmatprep.mubr.msk.f32.mxu1 %vm8600_vm2, %v13414_v0 }
  0x78   :  { %6854 = vmatmul.mubr.msk.f32.gmra.mrb[58].mxu0 %vm340_vm1, %v79_v60  ;;  %7463 = vmatmul.mubr.msk.f32.gmra.mrb[58].mxu1 %vm340_vm1, %v282_v61 }
  0x79   :  { %6856 = vmatprep.mubr.msk.f32.mxu0 %vm8600_vm2, %v13414_v0  ;;  %7465 = vmatprep.mubr.msk.f32.mxu1 %vm8600_vm2, %v13414_v0 }
  0x7c   :  { %6857 = vmatmul.mubr.msk.f32.gmra.mrb[60].mxu0 %vm340_vm1, %v80_v62  ;;  %7466 = vmatmul.mubr.msk.f32.gmra.mrb[60].mxu1 %vm340_vm1, %v283_v63  ;;  %v106_v63 = vld [vmem:[%s13397_s0 + $0x1c0] sm:$0xff] }
  0x7d   :  { %6859 = vmatprep.mubr.msk.f32.mxu0 %vm8600_vm2, %v13414_v0  ;;  %7468 = vmatprep.mubr.msk.f32.mxu1 %vm8600_vm2, %v13414_v0 }
  0x80   :  { %6860 = vmatmul.mubr.msk.f32.gmra.mrb[62].mxu0 %vm340_vm1, %v81_v1  ;;  %7469 = vmatmul.mubr.msk.f32.gmra.mrb[62].mxu1 %vm340_vm1, %v284_v2  ;;  %v309_v1 = vld [vmem:[%s13397_s0 + $0x818] sm:$0xff] }
  0x81   :  { %6862 = vmatprep.mubr.msk.f32.mxu0 %vm8600_vm2, %v13414_v0  ;;  %7471 = vmatprep.mubr.msk.f32.mxu1 %vm8600_vm2, %v13414_v0 }
  0x84   :  { %6863 = vmatmul.mubr.msk.f32.gmra.mrb[64].mxu0 %vm340_vm1, %v82_v3  ;;  %7472 = vmatmul.mubr.msk.f32.gmra.mrb[64].mxu1 %vm340_vm1, %v285_v4 }
  0x85   :  { %6865 = vmatprep.mubr.msk.f32.mxu0 %vm8600_vm2, %v13414_v0  ;;  %7474 = vmatprep.mubr.msk.f32.mxu1 %vm8600_vm2, %v13414_v0 }
  0x88   :  { %6866 = vmatmul.mubr.msk.f32.gmra.mrb[66].mxu0 %vm340_vm1, %v83_v5  ;;  %7475 = vmatmul.mubr.msk.f32.gmra.mrb[66].mxu1 %vm340_vm1, %v286_v6  ;;  %v107_v6 = vld [vmem:[%s13397_s0 + $0x1c8] sm:$0xff] }
  0x89   :  { %6868 = vmatprep.mubr.msk.f32.mxu0 %vm8600_vm2, %v13414_v0  ;;  %7477 = vmatprep.mubr.msk.f32.mxu1 %vm8600_vm2, %v13414_v0 }
  0x8c   :  { %6869 = vmatmul.mubr.msk.f32.gmra.mrb[68].mxu0 %vm340_vm1, %v84_v7  ;;  %7478 = vmatmul.mubr.msk.f32.gmra.mrb[68].mxu1 %vm340_vm1, %v287_v8  ;;  %v310_v7 = vld [vmem:[%s13397_s0 + $0x820] sm:$0xff] }
  0x8d   :  { %6871 = vmatprep.mubr.msk.f32.mxu0 %vm8600_vm2, %v13414_v0  ;;  %7480 = vmatprep.mubr.msk.f32.mxu1 %vm8600_vm2, %v13414_v0 }
  0x90   :  { %6872 = vmatmul.mubr.msk.f32.gmra.mrb[70].mxu0 %vm340_vm1, %v85_v9  ;;  %7481 = vmatmul.mubr.msk.f32.gmra.mrb[70].mxu1 %vm340_vm1, %v288_v10 }
  0x91   :  { %6874 = vmatprep.mubr.msk.f32.mxu0 %vm8600_vm2, %v13414_v0  ;;  %7483 = vmatprep.mubr.msk.f32.mxu1 %vm8600_vm2, %v13414_v0 }
  0x94   :  { %6875 = vmatmul.mubr.msk.f32.gmra.mrb[72].mxu0 %vm340_vm1, %v86_v11  ;;  %7484 = vmatmul.mubr.msk.f32.gmra.mrb[72].mxu1 %vm340_vm1, %v289_v12  ;;  %v108_v12 = vld [vmem:[%s13397_s0 + $0x1d0] sm:$0xff] }
  0x95   :  { %6877 = vmatprep.mubr.msk.f32.mxu0 %vm8600_vm2, %v13414_v0  ;;  %7486 = vmatprep.mubr.msk.f32.mxu1 %vm8600_vm2, %v13414_v0 }
  0x98   :  { %6878 = vmatmul.mubr.msk.f32.gmra.mrb[74].mxu0 %vm340_vm1, %v87_v13  ;;  %7487 = vmatmul.mubr.msk.f32.gmra.mrb[74].mxu1 %vm340_vm1, %v290_v14  ;;  %v311_v13 = vld [vmem:[%s13397_s0 + $0x828] sm:$0xff] }
  0x99   :  { %6880 = vmatprep.mubr.msk.f32.mxu0 %vm8600_vm2, %v13414_v0  ;;  %7489 = vmatprep.mubr.msk.f32.mxu1 %vm8600_vm2, %v13414_v0 }
  0x9c   :  { %6881 = vmatmul.mubr.msk.f32.gmra.mrb[76].mxu0 %vm340_vm1, %v88_v15  ;;  %7490 = vmatmul.mubr.msk.f32.gmra.mrb[76].mxu1 %vm340_vm1, %v291_v16 }
  0x9d   :  { %6883 = vmatprep.mubr.msk.f32.mxu0 %vm8600_vm2, %v13414_v0  ;;  %7492 = vmatprep.mubr.msk.f32.mxu1 %vm8600_vm2, %v13414_v0 }
  0xa0   :  { %6884 = vmatmul.mubr.msk.f32.gmra.mrb[78].mxu0 %vm340_vm1, %v89_v17  ;;  %7493 = vmatmul.mubr.msk.f32.gmra.mrb[78].mxu1 %vm340_vm1, %v292_v18  ;;  %v109_v18 = vld [vmem:[%s13397_s0 + $0x1d8] sm:$0xff] }
  0xa1   :  { %6886 = vmatprep.mubr.msk.f32.mxu0 %vm8600_vm2, %v13414_v0  ;;  %7495 = vmatprep.mubr.msk.f32.mxu1 %vm8600_vm2, %v13414_v0 }
  0xa4   :  { %6887 = vmatmul.mubr.msk.f32.gmra.mrb[80].mxu0 %vm340_vm1, %v90_v19  ;;  %7496 = vmatmul.mubr.msk.f32.gmra.mrb[80].mxu1 %vm340_vm1, %v293_v20  ;;  %v312_v19 = vld [vmem:[%s13397_s0 + $0x830] sm:$0xff] }
  0xa5   :  { %6889 = vmatprep.mubr.msk.f32.mxu0 %vm8600_vm2, %v13414_v0  ;;  %7498 = vmatprep.mubr.msk.f32.mxu1 %vm8600_vm2, %v13414_v0 }
  0xa8   :  { %6890 = vmatmul.mubr.msk.f32.gmra.mrb[82].mxu0 %vm340_vm1, %v91_v21  ;;  %7499 = vmatmul.mubr.msk.f32.gmra.mrb[82].mxu1 %vm340_vm1, %v294_v22 }
  0xa9   :  { %6892 = vmatprep.mubr.msk.f32.mxu0 %vm8600_vm2, %v13414_v0  ;;  %7501 = vmatprep.mubr.msk.f32.mxu1 %vm8600_vm2, %v13414_v0 }
  0xac   :  { %6893 = vmatmul.mubr.msk.f32.gmra.mrb[84].mxu0 %vm340_vm1, %v92_v23  ;;  %7502 = vmatmul.mubr.msk.f32.gmra.mrb[84].mxu1 %vm340_vm1, %v295_v24  ;;  %v110_v24 = vld [vmem:[%s13397_s0 + $0x1e0] sm:$0xff] }
  0xad   :  { %6895 = vmatprep.mubr.msk.f32.mxu0 %vm8600_vm2, %v13414_v0  ;;  %7504 = vmatprep.mubr.msk.f32.mxu1 %vm8600_vm2, %v13414_v0 }
  0xb0   :  { %6896 = vmatmul.mubr.msk.f32.gmra.mrb[86].mxu0 %vm340_vm1, %v93_v25  ;;  %7505 = vmatmul.mubr.msk.f32.gmra.mrb[86].mxu1 %vm340_vm1, %v296_v26  ;;  %v313_v25 = vld [vmem:[%s13397_s0 + $0x838] sm:$0xff] }
  0xb1   :  { %6898 = vmatprep.mubr.msk.f32.mxu0 %vm8600_vm2, %v13414_v0  ;;  %7507 = vmatprep.mubr.msk.f32.mxu1 %vm8600_vm2, %v13414_v0 }
  0xb4   :  { %6899 = vmatmul.mubr.msk.f32.gmra.mrb[88].mxu0 %vm340_vm1, %v94_v27  ;;  %7508 = vmatmul.mubr.msk.f32.gmra.mrb[88].mxu1 %vm340_vm1, %v297_v28 }
  0xb5   :  { %6901 = vmatprep.mubr.msk.f32.mxu0 %vm8600_vm2, %v13414_v0  ;;  %7510 = vmatprep.mubr.msk.f32.mxu1 %vm8600_vm2, %v13414_v0 }
  0xb8   :  { %6902 = vmatmul.mubr.msk.f32.gmra.mrb[90].mxu0 %vm340_vm1, %v95_v29  ;;  %7511 = vmatmul.mubr.msk.f32.gmra.mrb[90].mxu1 %vm340_vm1, %v298_v30  ;;  %v111_v30 = vld [vmem:[%s13397_s0 + $0x1e8] sm:$0xff] }
  0xb9   :  { %6904 = vmatprep.mubr.msk.f32.mxu0 %vm8600_vm2, %v13414_v0  ;;  %7513 = vmatprep.mubr.msk.f32.mxu1 %vm8600_vm2, %v13414_v0 }
  0xbc   :  { %6905 = vmatmul.mubr.msk.f32.gmra.mrb[92].mxu0 %vm340_vm1, %v96_v31  ;;  %7514 = vmatmul.mubr.msk.f32.gmra.mrb[92].mxu1 %vm340_vm1, %v299_v32  ;;  %v314_v31 = vld [vmem:[%s13397_s0 + $0x840] sm:$0xff] }
  0xbd   :  { %6907 = vmatprep.mubr.msk.f32.mxu0 %vm8600_vm2, %v13414_v0  ;;  %7516 = vmatprep.mubr.msk.f32.mxu1 %vm8600_vm2, %v13414_v0 }
  0xc0   :  { %6908 = vmatmul.mubr.msk.f32.gmra.mrb[94].mxu0 %vm340_vm1, %v97_v33  ;;  %7517 = vmatmul.mubr.msk.f32.gmra.mrb[94].mxu1 %vm340_vm1, %v300_v34 }
  0xc1   :  { %6910 = vmatprep.mubr.msk.f32.mxu0 %vm8600_vm2, %v13414_v0  ;;  %7519 = vmatprep.mubr.msk.f32.mxu1 %vm8600_vm2, %v13414_v0 }
  0xc4   :  { %6911 = vmatmul.mubr.msk.f32.gmra.mrb[96].mxu0 %vm340_vm1, %v98_v35  ;;  %7520 = vmatmul.mubr.msk.f32.gmra.mrb[96].mxu1 %vm340_vm1, %v301_v36  ;;  %v112_v36 = vld [vmem:[%s13397_s0 + $0x1f0] sm:$0xff] }
  0xc5   :  { %6913 = vmatprep.mubr.msk.f32.mxu0 %vm8600_vm2, %v13414_v0  ;;  %7522 = vmatprep.mubr.msk.f32.mxu1 %vm8600_vm2, %v13414_v0 }
  0xc8   :  { %6914 = vmatmul.mubr.msk.f32.gmra.mrb[98].mxu0 %vm340_vm1, %v99_v37  ;;  %7523 = vmatmul.mubr.msk.f32.gmra.mrb[98].mxu1 %vm340_vm1, %v302_v38  ;;  %v315_v37 = vld [vmem:[%s13397_s0 + $0x848] sm:$0xff] }
  0xc9   :  { %6916 = vmatprep.mubr.msk.f32.mxu0 %vm8600_vm2, %v13414_v0  ;;  %7525 = vmatprep.mubr.msk.f32.mxu1 %vm8600_vm2, %v13414_v0 }
  0xcc   :  { %6917 = vmatmul.mubr.msk.f32.gmra.mrb[100].mxu0 %vm340_vm1, %v100_v39  ;;  %7526 = vmatmul.mubr.msk.f32.gmra.mrb[100].mxu1 %vm340_vm1, %v303_v40 }
  0xcd   :  { %6919 = vmatprep.mubr.msk.f32.mxu0 %vm8600_vm2, %v13414_v0  ;;  %7528 = vmatprep.mubr.msk.f32.mxu1 %vm8600_vm2, %v13414_v0 }
  0xd0   :  { %6920 = vmatmul.mubr.msk.f32.gmra.mrb[102].mxu0 %vm340_vm1, %v101_v41  ;;  %7529 = vmatmul.mubr.msk.f32.gmra.mrb[102].mxu1 %vm340_vm1, %v304_v42  ;;  %v113_v42 = vld [vmem:[%s13397_s0 + $0x1f8] sm:$0xff] }
  0xd1   :  { %6922 = vmatprep.mubr.msk.f32.mxu0 %vm8600_vm2, %v13414_v0  ;;  %7531 = vmatprep.mubr.msk.f32.mxu1 %vm8600_vm2, %v13414_v0 }
  0xd4   :  { %6923 = vmatmul.mubr.msk.f32.gmra.mrb[104].mxu0 %vm340_vm1, %v102_v43  ;;  %7532 = vmatmul.mubr.msk.f32.gmra.mrb[104].mxu1 %vm340_vm1, %v305_v44  ;;  %v316_v43 = vld [vmem:[%s13397_s0 + $0x850] sm:$0xff] }
  0xd5   :  { %6925 = vmatprep.mubr.msk.f32.mxu0 %vm8600_vm2, %v13414_v0  ;;  %7534 = vmatprep.mubr.msk.f32.mxu1 %vm8600_vm2, %v13414_v0 }
  0xd7   :  { %v9338_v47 = vpop.f32.mrb[0].mxu0  ;;  %v2282_v48 = vpop.f32.mrb[0].mxu1 }
  0xd8   :  { %v6768_v49 = vpop.f32.mrb[1].mxu0  ;;  %6926 = vmatmul.mubr.msk.f32.gmra.mrb[106].mxu0 %vm340_vm1, %v103_v45  ;;  %7535 = vmatmul.mubr.msk.f32.gmra.mrb[106].mxu1 %vm340_vm1, %v306_v46  ;;  %v7377_v50 = vpop.f32.mrb[1].mxu1 }
  0xd9   :  { %6928 = vmatprep.mubr.msk.f32.mxu0 %vm8600_vm2, %v13414_v0  ;;  %7537 = vmatprep.mubr.msk.f32.mxu1 %vm8600_vm2, %v13414_v0  ;;  %v114_v49 = vld [vmem:[%s13397_s0 + $0x200] sm:$0xff]  ;;  %v317_v50 = vld [vmem:[%s13397_s0 + $0x858] sm:$0xff] }
  0xdb   :  { %v9352_v53 = vpop.f32.mrb[2].mxu0  ;;  %v9354_v54 = vpop.f32.mrb[2].mxu1 }
  0xdc   :  { %v6771_v55 = vpop.f32.mrb[3].mxu0  ;;  %6929 = vmatmul.mubr.msk.f32.gmra.mrb[108].mxu0 %vm340_vm1, %v104_v51  ;;  %7538 = vmatmul.mubr.msk.f32.gmra.mrb[108].mxu1 %vm340_vm1, %v307_v52  ;;  %v7380_v56 = vpop.f32.mrb[3].mxu1 }
  0xdd   :  { %6931 = vmatprep.mubr.msk.f32.mxu0 %vm8600_vm2, %v13414_v0  ;;  %7540 = vmatprep.mubr.msk.f32.mxu1 %vm8600_vm2, %v13414_v0 }
  0xdf   :  { %v9368_v59 = vpop.f32.mrb[4].mxu0  ;;  %v9370_v60 = vpop.f32.mrb[4].mxu1 }
  0xe0   :  { %v6774_v61 = vpop.f32.mrb[5].mxu0  ;;  %6932 = vmatmul.mubr.msk.f32.gmra.mrb[110].mxu0 %vm340_vm1, %v105_v57  ;;  %7541 = vmatmul.mubr.msk.f32.gmra.mrb[110].mxu1 %vm340_vm1, %v308_v58  ;;  %v7383_v62 = vpop.f32.mrb[5].mxu1  ;;  %v115_v57 = vld [vmem:[%s13397_s0 + $0x208] sm:$0xff]  ;;  %v318_v58 = vld [vmem:[%s13397_s0 + $0x860] sm:$0xff] }
  0xe1   :  { %6934 = vmatprep.mubr.msk.f32.mxu0 %vm8600_vm2, %v13414_v0  ;;  %7543 = vmatprep.mubr.msk.f32.mxu1 %vm8600_vm2, %v13414_v0 }
  0xe3   :  { %v9384_v2 = vpop.f32.mrb[6].mxu0  ;;  %v9386_v3 = vpop.f32.mrb[6].mxu1 }
  0xe4   :  { %v6777_v4 = vpop.f32.mrb[7].mxu0  ;;  %6935 = vmatmul.mubr.msk.f32.gmra.mrb[112].mxu0 %vm340_vm1, %v106_v63  ;;  %7544 = vmatmul.mubr.msk.f32.gmra.mrb[112].mxu1 %vm340_vm1, %v309_v1  ;;  %v7386_v5 = vpop.f32.mrb[7].mxu1 }
  0xe5   :  { %6937 = vmatprep.mubr.msk.f32.mxu0 %vm8600_vm2, %v13414_v0  ;;  %7546 = vmatprep.mubr.msk.f32.mxu1 %vm8600_vm2, %v13414_v0  ;;  %v4551_v4 = vld [vmem:[%s13398_s5] sm:$0xff]  ;;  %v4552_v5 = vld [vmem:[%s13398_s5 + $0x8] sm:$0xff] }
  0xe7   :  { %v9400_v8 = vpop.f32.mrb[8].mxu0  ;;  %v9402_v9 = vpop.f32.mrb[8].mxu1 }
  0xe8   :  { %v6780_v10 = vpop.f32.mrb[9].mxu0  ;;  %6938 = vmatmul.mubr.msk.f32.gmra.mrb[114].mxu0 %vm340_vm1, %v107_v6  ;;  %7547 = vmatmul.mubr.msk.f32.gmra.mrb[114].mxu1 %vm340_vm1, %v310_v7  ;;  %v7389_v11 = vpop.f32.mrb[9].mxu1  ;;  %v116_v6 = vld [vmem:[%s13397_s0 + $0x210] sm:$0xff]  ;;  %v319_v7 = vld [vmem:[%s13397_s0 + $0x868] sm:$0xff] }
  0xe9   :  { %6940 = vmatprep.mubr.msk.f32.mxu0 %vm8600_vm2, %v13414_v0  ;;  %7549 = vmatprep.mubr.msk.f32.mxu1 %vm8600_vm2, %v13414_v0  ;;  %v7931_v10 = vpack.c.bf16 %v4552_v5, %v4551_v4  ;;  %v13412_v11 = vmov 0.0|0.0   ;;  %v4559_v5 = vld [vmem:[%s13398_s5 + $0x40] sm:$0xff] }
  0xea   :  { %7930 = vmatprep.subr.bf16.mxu1 %v13412_v11 }
  0xeb   :  { %v9416_v14 = vpop.f32.mrb[10].mxu0  ;;  %v9418_v15 = vpop.f32.mrb[10].mxu1  ;;  %7932 = vmatpush3.bf16.msra.mxu1 %v7931_v10  ;;  %v120_v10 = vld [vmem:[%s13397_s0 + $0x230] sm:$0xff] }
  0xec   :  { %v6783_v16 = vpop.f32.mrb[11].mxu0  ;;  %6941 = vmatmul.mubr.msk.f32.gmra.mrb[116].mxu0 %vm340_vm1, %v108_v12  ;;  %7550 = vmatmul.mubr.msk.f32.gmra.mrb[116].mxu1 %vm340_vm1, %v311_v13  ;;  %v7392_v17 = vpop.f32.mrb[11].mxu1 }
  0xed   :  { %6943 = vmatprep.mubr.msk.f32.mxu0 %vm8600_vm2, %v13414_v0  ;;  %7552 = vmatprep.mubr.msk.f32.mxu1 %vm8600_vm2, %v13414_v0 }
  0xee   :  { %7933 = vmatprep.subr.bf16.mxu1 %v13412_v11 }
  0xef   :  { %v9432_v20 = vpop.f32.mrb[12].mxu0  ;;  %v9434_v21 = vpop.f32.mrb[12].mxu1 }
  0xf0   :  { %v6786_v22 = vpop.f32.mrb[13].mxu0  ;;  %6944 = vmatmul.mubr.msk.f32.gmra.mrb[118].mxu0 %vm340_vm1, %v109_v18  ;;  %7553 = vmatmul.mubr.msk.f32.gmra.mrb[118].mxu1 %vm340_vm1, %v312_v19  ;;  %v7395_v23 = vpop.f32.mrb[13].mxu1  ;;  %v4553_v18 = vld [vmem:[%s13398_s5 + $0x10] sm:$0xff]  ;;  %v4554_v19 = vld [vmem:[%s13398_s5 + $0x18] sm:$0xff] }
  0xf1   :  { %6946 = vmatprep.mubr.msk.f32.mxu0 %vm8600_vm2, %v13414_v0  ;;  %7555 = vmatprep.mubr.msk.f32.mxu1 %vm8600_vm2, %v13414_v0  ;;  %v117_v22 = vld [vmem:[%s13397_s0 + $0x218] sm:$0xff]  ;;  %v320_v23 = vld [vmem:[%s13397_s0 + $0x870] sm:$0xff] }
  0xf3   :  { %v9448_v26 = vpop.f32.mrb[14].mxu0  ;;  %v9450_v27 = vpop.f32.mrb[14].mxu1 }
  0xf4   :  { %v6789_v28 = vpop.f32.mrb[15].mxu0  ;;  %6947 = vmatmul.mubr.msk.f32.gmra.mrb[120].mxu0 %vm340_vm1, %v110_v24  ;;  %7556 = vmatmul.mubr.msk.f32.gmra.mrb[120].mxu1 %vm340_vm1, %v313_v25  ;;  %v7398_v29 = vpop.f32.mrb[15].mxu1  ;;  %v7934_v24 = vpack.c.bf16 %v4554_v19, %v4553_v18 }
  0xf5   :  { %6949 = vmatprep.mubr.msk.f32.mxu0 %vm8600_vm2, %v13414_v0  ;;  %7558 = vmatprep.mubr.msk.f32.mxu1 %vm8600_vm2, %v13414_v0 }
  0xf6   :  { %7935 = vmatpush3.bf16.msra.mxu1 %v7934_v24 }
  0xf7   :  { %v9464_v32 = vpop.f32.mrb[16].mxu0  ;;  %v9466_v33 = vpop.f32.mrb[16].mxu1  ;;  %7936 = vmatprep.subr.bf16.mxu1 %v13412_v11 }
  0xf8   :  { %v6792_v34 = vpop.f32.mrb[17].mxu0  ;;  %6950 = vmatmul.mubr.msk.f32.gmra.mrb[122].mxu0 %vm340_vm1, %v111_v30  ;;  %7559 = vmatmul.mubr.msk.f32.gmra.mrb[122].mxu1 %vm340_vm1, %v314_v31  ;;  %v7401_v35 = vpop.f32.mrb[17].mxu1  ;;  %v4555_v31 = vld [vmem:[%s13398_s5 + $0x20] sm:$0xff] }
  0xf9   :  { %6952 = vmatprep.mubr.msk.f32.mxu0 %vm8600_vm2, %v13414_v0  ;;  %7561 = vmatprep.mubr.msk.f32.mxu1 %vm8600_vm2, %v13414_v0  ;;  %v4556_v34 = vld [vmem:[%s13398_s5 + $0x28] sm:$0xff]  ;;  %v118_v35 = vld [vmem:[%s13397_s0 + $0x220] sm:$0xff] }
  0xfb   :  { %v9480_v38 = vpop.f32.mrb[18].mxu0  ;;  %v9482_v39 = vpop.f32.mrb[18].mxu1 }
  0xfc   :  { %v6795_v40 = vpop.f32.mrb[19].mxu0  ;;  %6953 = vmatmul.mubr.msk.f32.gmra.mrb[124].mxu0 %vm340_vm1, %v112_v36  ;;  %7562 = vmatmul.mubr.msk.f32.gmra.mrb[124].mxu1 %vm340_vm1, %v315_v37  ;;  %v7404_v41 = vpop.f32.mrb[19].mxu1  ;;  %v321_v36 = vld [vmem:[%s13397_s0 + $0x878] sm:$0xff]  ;;  %v7937_v37 = vpack.c.bf16 %v4556_v34, %v4555_v31 }
  0xfd   :  { %6955 = vmatprep.mubr.msk.f32.mxu0 %vm8600_vm2, %v13414_v0  ;;  %7564 = vmatprep.mubr.msk.f32.mxu1 %vm8600_vm2, %v13414_v0  ;;  %v121_v34 = vld [vmem:[%s13397_s0 + $0x238] sm:$0xff] }
  0xfe   :  { %7938 = vmatpush3.bf16.msra.mxu1 %v7937_v37 }
  0xff   :  { %v9496_v44 = vpop.f32.mrb[20].mxu0  ;;  %v9498_v45 = vpop.f32.mrb[20].mxu1  ;;  %7939 = vmatprep.subr.bf16.mxu1 %v13412_v11 }
 0x100   :  { %v6798_v46 = vpop.f32.mrb[21].mxu0  ;;  %6956 = vmatmul.mubr.msk.f32.gmra.mrb[126].mxu0 %vm340_vm1, %v113_v42  ;;  %7565 = vmatmul.mubr.msk.f32.gmra.mrb[126].mxu1 %vm340_vm1, %v316_v43  ;;  %v7407_v48 = vpop.f32.mrb[21].mxu1 }
 0x101   :  { %6958 = vmatprep.mubr.msk.f32.mxu0 %vm8600_vm2, %v13414_v0  ;;  %7567 = vmatprep.mubr.msk.f32.mxu1 %vm8600_vm2, %v13414_v0  ;;  %v4557_v46 = vld [vmem:[%s13398_s5 + $0x30] sm:$0xff]  ;;  %v4558_v48 = vld [vmem:[%s13398_s5 + $0x38] sm:$0xff] }
 0x103   :  { %v9512_v51 = vpop.f32.mrb[22].mxu0  ;;  %v9514_v52 = vpop.f32.mrb[22].mxu1 }
 0x104   :  { %v6801_v55 = vpop.f32.mrb[23].mxu0  ;;  %6959 = vmatmul.mubr.msk.f32.gmra.mrb[128].mxu0 %vm340_vm1, %v114_v49  ;;  %7568 = vmatmul.mubr.msk.f32.gmra.mrb[128].mxu1 %vm340_vm1, %v317_v50  ;;  %v7410_v56 = vpop.f32.mrb[23].mxu1  ;;  %v9612_v49 = vld [vmem:[%s13399_s3] ss:$0 sm:$0xff]  ;;  %v119_v50 = vld [vmem:[%s13397_s0 + $0x228] sm:$0xff] }
 0x105   :  { %6961 = vmatprep.mubr.msk.f32.mxu0 %vm8600_vm2, %v13414_v0  ;;  %7570 = vmatprep.mubr.msk.f32.mxu1 %vm8600_vm2, %v13414_v0  ;;  %v322_v55 = vld [vmem:[%s13397_s0 + $0x880] sm:$0xff]  ;;  %v7940_v56 = vpack.c.bf16 %v4558_v48, %v4557_v46  ;;  %v2888_v18 = vmul.f32 %v9612_v49, %v9354_v54  ;;  %v4562_v54 = vld [vmem:[%s13398_s5 + $0x58] sm:$0xff]  ;;  %v2889_v48 = vmul.f32 %v9612_v49, %v9370_v60  ;;  %v4564_v60 = vld [vmem:[%s13398_s5 + $0x68] sm:$0xff] }
 0x107   :  { %v9528_v61 = vpop.f32.mrb[24].mxu0  ;;  %v9530_v62 = vpop.f32.mrb[24].mxu1  ;;  %7941 = vmatpush3.bf16.msra.mxu1 %v7940_v56 }
 0x108   :  { %v6804_v63 = vpop.f32.mrb[25].mxu0  ;;  %6962 = vmatmul.mubr.msk.f32.gmra.mrb[130].mxu0 %vm340_vm1, %v115_v57  ;;  %7571 = vmatmul.mubr.msk.f32.gmra.mrb[130].mxu1 %vm340_vm1, %v318_v58  ;;  %v7413_v1 = vpop.f32.mrb[25].mxu1 }
 0x109   :  { %6964 = vmatprep.mubr.msk.f32.mxu0 %vm8600_vm2, %v13414_v0  ;;  %7573 = vmatprep.mubr.msk.f32.mxu1 %vm8600_vm2, %v13414_v0  ;;  %v2696_v63 = vmul.f32 %v9612_v49, %v9338_v47  ;;  %v2697_v47 = vmul.f32 %v9612_v49, %v9352_v53 }
 0x10a   :  { %7942 = vmatprep.subr.bf16.mxu1 %v13412_v11 }
 0x10b   :  { %v9551_v12 = vpop.f32.mrb[26].mxu0  ;;  %v9553_v13 = vpop.f32.mrb[26].mxu1 }
 0x10c   :  { %v6807_v16 = vpop.f32.mrb[27].mxu0  ;;  %6965 = vmatmul.mubr.msk.f32.gmra.mrb[132].mxu0 %vm340_vm1, %v116_v6  ;;  %7574 = vmatmul.mubr.msk.f32.gmra.mrb[132].mxu1 %vm340_vm1, %v319_v7  ;;  %v7416_v17 = vpop.f32.mrb[27].mxu1  ;;  %v4560_v6 = vld [vmem:[%s13398_s5 + $0x48] sm:$0xff]  ;;  %v9640_v7 = vld [vmem:[%s13400_s4] ss:$0 sm:$0xff] }
 0x10d   :  { %6967 = vmatprep.mubr.msk.f32.mxu0 %vm8600_vm2, %v13414_v0  ;;  %7576 = vmatprep.mubr.msk.f32.mxu1 %vm8600_vm2, %v13414_v0  ;;  %v323_v16 = vld [vmem:[%s13397_s0 + $0x888] sm:$0xff]  ;;  %v7943_v17 = vpack.c.bf16 %v4560_v6, %v4559_v5  ;;  %v2960_v31 = vadd.f32 %v9640_v7, %v2697_v47  ;;  %v2699_v6 = vmul.f32 %v9612_v49, %v9384_v2  ;;  %v122_v47 = vld [vmem:[%s13397_s0 + $0x240] sm:$0xff] }
 0x10f   :  { %v9574_v25 = vpop.f32.mrb[28].mxu0  ;;  %v9576_v28 = vpop.f32.mrb[28].mxu1  ;;  %7944 = vmatpush3.bf16.msra.mxu1 %v7943_v17  ;;  %v3216_v5 = vmax.f32 %v2960_v31, 0.0 }
 0x110   :  { %v6810_v29 = vpop.f32.mrb[29].mxu0  ;;  %6968 = vmatmul.mubr.msk.f32.gmra.mrb[134].mxu0 %vm340_vm1, %v117_v22  ;;  %7577 = vmatmul.mubr.msk.f32.gmra.mrb[134].mxu1 %vm340_vm1, %v320_v23  ;;  %v7419_v30 = vpop.f32.mrb[29].mxu1  ;;  %v2959_v22 = vadd.f32 %v9640_v7, %v2696_v63 }
 0x111   :  { %6970 = vmatprep.mubr.msk.f32.mxu0 %vm8600_vm2, %v13414_v0  ;;  %7579 = vmatprep.mubr.msk.f32.mxu1 %vm8600_vm2, %v13414_v0  ;;  %v4561_v30 = vld [vmem:[%s13398_s5 + $0x50] sm:$0xff] }
 0x112   :  { %7945 = vmatprep.subr.bf16.mxu1 %v13412_v11 }
 0x113   :  { %v9597_v40 = vpop.f32.mrb[30].mxu0  ;;  %v9599_v41 = vpop.f32.mrb[30].mxu1 }
 0x114   :  { %v6813_v42 = vpop.f32.mrb[31].mxu0  ;;  %6971 = vmatmul.mubr.msk.f32.gmra.mrb[136].mxu0 %vm340_vm1, %v118_v35  ;;  %7580 = vmatmul.mubr.msk.f32.gmra.mrb[136].mxu1 %vm340_vm1, %v321_v36  ;;  %v7422_v43 = vpop.f32.mrb[31].mxu1  ;;  %v324_v35 = vld [vmem:[%s13397_s0 + $0x890] sm:$0xff]  ;;  %v7946_v36 = vpack.c.bf16 %v4562_v54, %v4561_v30 }
 0x115   :  { %6973 = vmatprep.mubr.msk.f32.mxu0 %vm8600_vm2, %v13414_v0  ;;  %7582 = vmatprep.mubr.msk.f32.mxu1 %vm8600_vm2, %v13414_v0  ;;  %v3151_v42 = vadd.f32 %v9640_v7, %v2888_v18  ;;  %v2698_v43 = vmul.f32 %v9612_v49, %v9368_v59  ;;  %v4563_v59 = vld [vmem:[%s13398_s5 + $0x60] sm:$0xff] }
 0x116   :  { %7947 = vmatpush3.bf16.msra.mxu1 %v7946_v36  ;;  %v7949_v17 = vpack.c.bf16 %v4564_v60, %v4563_v59 }
 0x117   :  { %v1358_v57 = vpop.f32.mrb[32].mxu0  ;;  %v9625_v58 = vpop.f32.mrb[32].mxu1  ;;  %7948 = vmatprep.subr.bf16.mxu1 %v13412_v11 }
 0x118   :  { %v6816_v1 = vpop.f32.mrb[33].mxu0  ;;  %6974 = vmatmul.mubr.msk.f32.gmra.mrb[138].mxu0 %vm340_vm1, %v119_v50  ;;  %7583 = vmatmul.mubr.msk.f32.gmra.mrb[138].mxu1 %vm340_vm1, %v322_v55  ;;  %v7425_v4 = vpop.f32.mrb[33].mxu1  ;;  %v3215_v55 = vmax.f32 %v2959_v22, 0.0  ;;  %v2961_v22 = vadd.f32 %v9640_v7, %v2698_v43  ;;  %v123_v43 = vld [vmem:[%s13397_s0 + $0x248] sm:$0xff] }
 0x119   :  { %6976 = vmatprep.mubr.msk.f32.mxu0 %vm8600_vm2, %v13414_v0  ;;  %7585 = vmatprep.mubr.msk.f32.mxu1 %vm8600_vm2, %v13414_v0 }
 0x11a   :  { %7950 = vmatpush3.bf16.msra.mxu1 %v7949_v17 }
 0x11b   :  { %v1362_v53 = vpop.f32.mrb[34].mxu0  ;;  %v2366_v19 = vpop.f32.mrb[34].mxu1  ;;  %7951 = vmatprep.subr.bf16.mxu1 %v13412_v11 }
 0x11c   :  { %v2712_v23 = vmul.f32 %v9612_v49, %v1362_v53  ;;  %v6819_v24 = vpop.f32.mrb[35].mxu0  ;;  %6977 = vmatmul.mubr.msk.f32.gmra.mrb[140].mxu0 %vm340_vm1, %v120_v10  ;;  %7586 = vmatmul.mubr.msk.f32.gmra.mrb[140].mxu1 %vm340_vm1, %v323_v16  ;;  %v7428_v29 = vpop.f32.mrb[35].mxu1  ;;  %v2890_v10 = vmul.f32 %v9612_v49, %v9386_v3  ;;  %v325_v16 = vld [vmem:[%s13397_s0 + $0x898] sm:$0xff]  ;;  %v3407_v53 = vmax.f32 %v3151_v42, 0.0  ;;  %v2700_v3 = vmul.f32 %v9612_v49, %v9400_v8 }
 0x11d   :  { %6979 = vmatprep.mubr.msk.f32.mxu0 %vm8600_vm2, %v13414_v0  ;;  %7588 = vmatprep.mubr.msk.f32.mxu1 %vm8600_vm2, %v13414_v0  ;;  %v3152_v24 = vadd.f32 %v9640_v7, %v2889_v48  ;;  %v2891_v29 = vmul.f32 %v9612_v49, %v9402_v9  ;;  %v4566_v9 = vld [vmem:[%s13398_s5 + $0x78] sm:$0xff]  ;;  %v2962_v42 = vadd.f32 %v9640_v7, %v2699_v6  ;;  %v326_v48 = vld [vmem:[%s13397_s0 + $0x8a0] sm:$0xff] }
 0x11e   :  { %v2975_v37 = vadd.f32 %v9640_v7, %v2712_v23 }
 0x11f   :  { %v1367_v46 = vpop.f32.mrb[36].mxu0  ;;  %v2370_v50 = vpop.f32.mrb[36].mxu1  ;;  %v3408_v60 = vmax.f32 %v3152_v24, 0.0  ;;  %v9749_v6 = vadd.f32 %v9640_v7, %v2891_v29 }
 0x120   :  { %v3231_v56 = vmax.f32 %v2975_v37, 0.0  ;;  %v2713_v57 = vmul.f32 %v9612_v49, %v1367_v46  ;;  %v6822_v63 = vpop.f32.mrb[37].mxu0  ;;  %6980 = vmatmul.mubr.msk.f32.gmra.mrb[142].mxu0 %vm340_vm1, %v121_v34  ;;  %7589 = vmatmul.mubr.msk.f32.gmra.mrb[142].mxu1 %vm340_vm1, %v324_v35  ;;  %v2904_v1 = vmul.f32 %v9612_v49, %v2370_v50  ;;  %v7431_v4 = vpop.f32.mrb[37].mxu1  ;;  %v4565_v37 = vld [vmem:[%s13398_s5 + $0x70] sm:$0xff]  ;;  %v9735_v46 = vadd.f32 %v9640_v7, %v2890_v10 }
 0x121   :  { %6982 = vmatprep.mubr.msk.f32.mxu0 %vm8600_vm2, %v13414_v0  ;;  %7591 = vmatprep.mubr.msk.f32.mxu1 %vm8600_vm2, %v13414_v0  ;;  %v7952_v50 = vpack.c.bf16 %v4566_v9, %v4565_v37  ;;  %v9746_v4 = vadd.f32 %v9640_v7, %v2700_v3  ;;  %v124_v3 = vld [vmem:[%s13397_s0 + $0x250] sm:$0xff] }
 0x122   :  { %v3471_v18 = vmax.f32 %v3215_v55, %v3231_v56  ;;  %v2976_v2 = vadd.f32 %v9640_v7, %v2713_v57  ;;  %v3167_v19 = vadd.f32 %v9640_v7, %v2904_v1  ;;  %v3217_v1 = vmax.f32 %v2961_v22, 0.0 }
 0x123   :  { %v1372_v23 = vpop.f32.mrb[38].mxu0  ;;  %v2375_v30 = vpop.f32.mrb[38].mxu1  ;;  %7953 = vmatpush3.bf16.msra.mxu1 %v7952_v50  ;;  %v2701_v22 = vmul.f32 %v9612_v49, %v9416_v14  ;;  %v3409_v14 = vmax.f32 %v9735_v46, 0.0  ;;  %v125_v50 = vld [vmem:[%s13397_s0 + $0x258] sm:$0xff] }
 0x124   :  { %v3232_v54 = vmax.f32 %v2976_v2, 0.0  ;;  %v2714_v31 = vmul.f32 %v9612_v49, %v1372_v23  ;;  %v6825_v34 = vpop.f32.mrb[39].mxu0  ;;  %6983 = vmatmul.mubr.msk.f32.gmra.mrb[144].mxu0 %vm340_vm1, %v122_v47  ;;  %7592 = vmatmul.mubr.msk.f32.gmra.mrb[144].mxu1 %vm340_vm1, %v325_v16  ;;  %v3423_v35 = vmax.f32 %v3167_v19, 0.0  ;;  %v2905_v36 = vmul.f32 %v9612_v49, %v2375_v30  ;;  %v7434_v8 = vpop.f32.mrb[39].mxu1  ;;  %v327_v30 = vld [vmem:[%s13397_s0 + $0x8a8] sm:$0xff] }
 0x125   :  { %6985 = vmatprep.mubr.msk.f32.mxu0 %vm8600_vm2, %v13414_v0  ;;  %7594 = vmatprep.mubr.msk.f32.mxu1 %vm8600_vm2, %v13414_v0  ;;  %v3218_v19 = vmax.f32 %v2962_v42, 0.0  ;;  %v2892_v34 = vmul.f32 %v9612_v49, %v9418_v15  ;;  %v2964_v15 = vadd.f32 %v9640_v7, %v2701_v22 }
 0x126   :  { %v3472_v55 = vmax.f32 %v3216_v5, %v3232_v54  ;;  %v2977_v56 = vadd.f32 %v9640_v7, %v2714_v31  ;;  %v3567_v57 = vmax.f32 %v3407_v53, %v3423_v35  ;;  %v3168_v63 = vadd.f32 %v9640_v7, %v2905_v36  ;;  %7954 = vmatprep.subr.bf16.mxu1 %v13412_v11 }
 0x127   :  { %v1377_v59 = vpop.f32.mrb[40].mxu0  ;;  %v2380_v47 = vpop.f32.mrb[40].mxu1  ;;  %v3219_v54 = vmax.f32 %v9746_v4, 0.0 }
 0x128   :  { %v3233_v10 = vmax.f32 %v2977_v56, 0.0  ;;  %v2715_v5 = vmul.f32 %v9612_v49, %v1377_v59  ;;  %v6828_v16 = vpop.f32.mrb[41].mxu0  ;;  %6986 = vmatmul.mubr.msk.f32.gmra.mrb[146].mxu0 %vm340_vm1, %v123_v43  ;;  %v9753_v17 = vmax.f32 %v3471_v18, %v3472_v55  ;;  %7595 = vmatmul.mubr.msk.f32.gmra.mrb[146].mxu1 %vm340_vm1, %v326_v48  ;;  %v3424_v2 = vmax.f32 %v3168_v63, 0.0  ;;  %v7437_v53 = vpop.f32.mrb[41].mxu1 }
 0x129   :  { %6988 = vmatprep.mubr.msk.f32.mxu0 %vm8600_vm2, %v13414_v0  ;;  %7597 = vmatprep.mubr.msk.f32.mxu1 %vm8600_vm2, %v13414_v0  ;;  %v2906_v18 = vmul.f32 %v9612_v49, %v2380_v47  ;;  %v3410_v43 = vmax.f32 %v9749_v6, 0.0  ;;  %v2893_v55 = vmul.f32 %v9612_v49, %v9434_v21  ;;  %v2702_v21 = vmul.f32 %v9612_v49, %v9432_v20 }
 0x12a   :  { %v3473_v23 = vmax.f32 %v3217_v1, %v3233_v10  ;;  %v2978_v24 = vadd.f32 %v9640_v7, %v2715_v5  ;;  %v8104_v29 = vpack.i.bf16 %v9753_v17, %v13414_v0  ;;  %v3568_v35 = vmax.f32 %v3408_v60, %v3424_v2  ;;  %v328_v60 = vld [vmem:[%s13397_s0 + $0x8b0] sm:$0xff] }
 0x12b   :  { %v1382_v31 = vpop.f32.mrb[42].mxu0  ;;  %v3169_v36 = vadd.f32 %v9640_v7, %v2906_v18  ;;  %v2385_v8 = vpop.f32.mrb[42].mxu1  ;;  %v3155_v47 = vadd.f32 %v9640_v7, %v2892_v34  ;;  %v3156_v18 = vadd.f32 %v9640_v7, %v2893_v55  ;;  %v329_v34 = vld [vmem:[%s13397_s0 + $0x8b8] sm:$0xff] }
 0x12c   :  { %v3234_v37 = vmax.f32 %v2978_v24, 0.0  ;;  %v2716_v9 = vmul.f32 %v9612_v49, %v1382_v31  ;;  %6989 = vmatmul.mubr.msk.f32.gmra.mrb[148].mxu0 %vm340_vm1, %v124_v3  ;;  %8105 = vrot.lane.b32.xlu0 %v8104_v29, %s8602_s19  ;;  %v6831_v42 = vpop.f32.mrb[43].mxu0  ;;  %v2907_v46 = vmul.f32 %v9612_v49, %v2385_v8  ;;  %v7440_v48 = vpop.f32.mrb[43].mxu1  ;;  %v9791_v56 = vmax.f32 %v3567_v57, %v3568_v35 }
 0x12d   :  { %6991 = vmatprep.mubr.msk.f32.mxu0 %vm8600_vm2, %v13414_v0  ;;  %7598 = vmatmul.mubr.msk.f32.gmra.mrb[148].mxu1 %vm340_vm1, %v327_v30  ;;  %v3425_v63 = vmax.f32 %v3169_v36, 0.0  ;;  %v2703_v57 = vmul.f32 %v9612_v49, %v9448_v26  ;;  %v3220_v3 = vmax.f32 %v2964_v15, 0.0  ;;  %v126_v26 = vld [vmem:[%s13397_s0 + $0x260] sm:$0xff]  ;;  %v2894_v24 = vmul.f32 %v9612_v49, %v9450_v27 }
 0x12e   :  { %13448 = vst [vmem:[#allocation2_spill] sm:$0xff] %v9791_v56  ;;  %v3474_v1 = vmax.f32 %v3218_v19, %v3234_v37  ;;  %v2979_v4 = vadd.f32 %v9640_v7, %v2716_v9  ;;  %7600 = vmatprep.mubr.msk.f32.mxu1 %vm8600_vm2, %v13414_v0  ;;  %v3170_v59 = vadd.f32 %v9640_v7, %v2907_v46 }
 0x12f   :  { %v1387_v6 = vpop.f32.mrb[44].mxu0  ;;  %v3569_v10 = vmax.f32 %v3409_v14, %v3425_v63  ;;  %v2390_v5 = vpop.f32.mrb[44].mxu1  ;;  %v2965_v27 = vadd.f32 %v9640_v7, %v2702_v21  ;;  %v9831_v35 = vadd.f32 %v9640_v7, %v2703_v57  ;;  %v9846_v55 = vadd.f32 %v9640_v7, %v2894_v24  ;;  %v330_v57 = vld [vmem:[%s13397_s0 + $0x8c0] sm:$0xff] }
 0x130   :  { %v3235_v16 = vmax.f32 %v2979_v4, 0.0  ;;  %v2717_v2 = vmul.f32 %v9612_v49, %v1387_v6  ;;  %6992 = vmatmul.mubr.msk.f32.gmra.mrb[150].mxu0 %vm340_vm1, %v125_v50  ;;  %8110 = vrot.lane.b32.xlu0 %v8104_v29, %s8603_s2  ;;  %v6834_v53 = vpop.f32.mrb[45].mxu0  ;;  %v9809_v19 = vmax.f32 %v3473_v23, %v3474_v1  ;;  %v3426_v20 = vmax.f32 %v3170_v59, 0.0  ;;  %v7443_v22 = vpop.f32.mrb[45].mxu1  ;;  %v127_v50 = vld [vmem:[%s13397_s0 + $0x268] sm:$0xff] }
 0x131   :  { %6994 = vmatprep.mubr.msk.f32.mxu0 %vm8600_vm2, %v13414_v0  ;;  %7601 = vmatmul.mubr.msk.f32.gmra.mrb[150].mxu1 %vm340_vm1, %v328_v60  ;;  %v2908_v23 = vmul.f32 %v9612_v49, %v2390_v5  ;;  %v2895_v63 = vmul.f32 %v9612_v49, %v9466_v33  ;;  %v3412_v60 = vmax.f32 %v3156_v18, 0.0  ;;  %v3221_v6 = vmax.f32 %v2965_v27, 0.0 }
 0x132   :  { %v3475_v29 = vmax.f32 %v3219_v54, %v3235_v16  ;;  %v2980_v14 = vadd.f32 %v9640_v7, %v2717_v2  ;;  %v8114_v30 = vpack.i.bf16 %v9809_v19, %v9753_v17  ;;  %v3570_v31 = vmax.f32 %v3410_v43, %v3426_v20  ;;  %7603 = vmatprep.mubr.msk.f32.mxu1 %vm8600_vm2, %v13414_v0 }
 0x133   :  { %v1392_v36 = vpop.f32.mrb[46].mxu0  ;;  %v3411_v54 = vmax.f32 %v3155_v47, 0.0  ;;  %v3171_v8 = vadd.f32 %v9640_v7, %v2908_v23  ;;  %v2395_v37 = vpop.f32.mrb[46].mxu1  ;;  %v3222_v47 = vmax.f32 %v9831_v35, 0.0  ;;  %v2704_v33 = vmul.f32 %v9612_v49, %v9464_v32  ;;  %v128_v32 = vld [vmem:[%s13397_s0 + $0x270] sm:$0xff] }
 0x134   :  { %v3236_v9 = vmax.f32 %v2980_v14, 0.0  ;;  %v2718_v42 = vmul.f32 %v9612_v49, %v1392_v36  ;;  %6995 = vmatmul.mubr.msk.f32.gmra.mrb[152].mxu0 %vm340_vm1, %v126_v26  ;;  %8115 = vrot.lane.b32.xlu1 %v8114_v30, %s8604_s28  ;;  %v6837_v43 = vpop.f32.mrb[47].mxu0  ;;  %v9837_v46 = vmax.f32 %v3569_v10, %v3570_v31  ;;  %v2909_v48 = vmul.f32 %v9612_v49, %v2395_v37  ;;  %v7446_v15 = vpop.f32.mrb[47].mxu1 }
 0x135   :  { %6997 = vmatprep.mubr.msk.f32.mxu0 %vm8600_vm2, %v13414_v0  ;;  %v3427_v1 = vmax.f32 %v3171_v8, 0.0  ;;  %7604 = vmatmul.mubr.msk.f32.gmra.mrb[152].mxu1 %vm340_vm1, %v329_v34  ;;  %v2705_v18 = vmul.f32 %v9612_v49, %v9480_v38  ;;  %v3413_v24 = vmax.f32 %v9846_v55, 0.0  ;;  %v3158_v23 = vadd.f32 %v9640_v7, %v2895_v63  ;;  %v331_v34 = vld [vmem:[%s13397_s0 + $0x8c8] sm:$0xff] }
 0x136   :  { %13449 = vst [vmem:[#allocation3_spill] sm:$0xff] %v9837_v46  ;;  %v3476_v4 = vmax.f32 %v3220_v3, %v3236_v9  ;;  %v2981_v59 = vadd.f32 %v9640_v7, %v2718_v42  ;;  %v3172_v21 = vadd.f32 %v9640_v7, %v2909_v48  ;;  %7606 = vmatprep.mubr.msk.f32.mxu1 %vm8600_vm2, %v13414_v0 }
 0x137   :  { %v1397_v10 = vpop.f32.mrb[48].mxu0  ;;  %v3571_v5 = vmax.f32 %v3411_v54, %v3427_v1  ;;  %v2400_v16 = vpop.f32.mrb[48].mxu1  ;;  %v2967_v27 = vadd.f32 %v9640_v7, %v2704_v33  ;;  %v2706_v35 = vmul.f32 %v9612_v49, %v9496_v44  ;;  %v2896_v54 = vmul.f32 %v9612_v49, %v9482_v39  ;;  %v129_v39 = vld [vmem:[%s13397_s0 + $0x278] sm:$0xff] }
 0x138   :  { %v9861_v2 = vmax.f32 %v3475_v29, %v3476_v4  ;;  %v3237_v53 = vmax.f32 %v2981_v59, 0.0  ;;  %v2719_v20 = vmul.f32 %v9612_v49, %v1397_v10  ;;  %v6840_v22 = vpop.f32.mrb[49].mxu0  ;;  %6998 = vmatmul.mubr.msk.f32.gmra.mrb[154].mxu0 %vm340_vm1, %v127_v50  ;;  %v3428_v3 = vmax.f32 %v3172_v21, 0.0  ;;  %v7449_v26 = vpop.f32.mrb[49].mxu1  ;;  %v332_v21 = vld [vmem:[%s13397_s0 + $0x8d0] sm:$0xff] }
 0x139   :  { %7000 = vmatprep.mubr.msk.f32.mxu0 %vm8600_vm2, %v13414_v0  ;;  %v2910_v29 = vmul.f32 %v9612_v49, %v2400_v16  ;;  %7607 = vmatmul.mubr.msk.f32.gmra.mrb[154].mxu1 %vm340_vm1, %v330_v57  ;;  %v2968_v50 = vadd.f32 %v9640_v7, %v2705_v18  ;;  %v2897_v55 = vmul.f32 %v9612_v49, %v9498_v45  ;;  %v3414_v59 = vmax.f32 %v3158_v23, 0.0 }
 0x13a   :  { %v3477_v14 = vmax.f32 %v3221_v6, %v3237_v53  ;;  %v2982_v30 = vadd.f32 %v9640_v7, %v2719_v20  ;;  %v9879_v38 = vpack.i.bf16 %v9861_v2, %v9809_v19  ;;  %v3572_v31 = vmax.f32 %v3412_v60, %v3428_v3  ;;  %7609 = vmatprep.mubr.msk.f32.mxu1 %vm8600_vm2, %v13414_v0 }
 0x13b   :  { %v1402_v36 = vpop.f32.mrb[50].mxu0  ;;  %v3173_v8 = vadd.f32 %v9640_v7, %v2910_v29  ;;  %v2405_v37 = vpop.f32.mrb[50].mxu1  ;;  %v3223_v57 = vmax.f32 %v2967_v27, 0.0  ;;  %v9916_v6 = vadd.f32 %v9640_v7, %v2706_v35  ;;  %v3159_v33 = vadd.f32 %v9640_v7, %v2896_v54 }
 0x13c   :  { %v3238_v9 = vmax.f32 %v2982_v30, 0.0  ;;  %v2720_v42 = vmul.f32 %v9612_v49, %v1402_v36  ;;  %7001 = vmatmul.mubr.msk.f32.gmra.mrb[156].mxu0 %vm340_vm1, %v128_v32  ;;  %8120 = vrot.lane.b32.xlu1 %v9879_v38, %s8603_s2  ;;  %v6843_v43 = vpop.f32.mrb[51].mxu0  ;;  %v9896_v48 = vmax.f32 %v3571_v5, %v3572_v31  ;;  %v2911_v44 = vmul.f32 %v9612_v49, %v2405_v37  ;;  %v7452_v15 = vpop.f32.mrb[51].mxu1  ;;  %v130_v32 = vld [vmem:[%s13397_s0 + $0x280] sm:$0xff]  ;;  %v333_v31 = vld [vmem:[%s13397_s0 + $0x8d8] sm:$0xff] }
 0x13d   :  { %7003 = vmatprep.mubr.msk.f32.mxu0 %vm8600_vm2, %v13414_v0  ;;  %v3429_v63 = vmax.f32 %v3173_v8, 0.0  ;;  %7610 = vmatmul.mubr.msk.f32.gmra.mrb[156].mxu1 %vm340_vm1, %v331_v34  ;;  %v3224_v26 = vmax.f32 %v2968_v50, 0.0  ;;  %v2707_v18 = vmul.f32 %v9612_v49, %v9512_v51  ;;  %v3415_v27 = vmax.f32 %v3159_v33, 0.0 }
 0x13e   :  { %13450 = vst [vmem:[#allocation4_spill] sm:$0xff] %v9896_v48  ;;  %v3478_v1 = vmax.f32 %v3222_v47, %v3238_v9  ;;  %v2983_v4 = vadd.f32 %v9640_v7, %v2720_v42  ;;  %v3174_v60 = vadd.f32 %v9640_v7, %v2911_v44  ;;  %7612 = vmatprep.mubr.msk.f32.mxu1 %vm8600_vm2, %v13414_v0 }
 0x13f   :  { %v1407_v45 = vpop.f32.mrb[52].mxu0  ;;  %v3573_v47 = vmax.f32 %v3413_v24, %v3429_v63  ;;  %v2410_v10 = vpop.f32.mrb[52].mxu1  ;;  %v3160_v24 = vadd.f32 %v9640_v7, %v2897_v55  ;;  %v2898_v35 = vmul.f32 %v9612_v49, %v9514_v52  ;;  %v2899_v36 = vmul.f32 %v9612_v49, %v9530_v62  ;;  %v131_v62 = vld [vmem:[%s13397_s0 + $0x288] sm:$0xff] }
 0x140   :  { %v9919_v5 = vmax.f32 %v3477_v14, %v3478_v1  ;;  %v3239_v16 = vmax.f32 %v2983_v4, 0.0  ;;  %v2721_v53 = vmul.f32 %v9612_v49, %v1407_v45  ;;  %v6846_v20 = vpop.f32.mrb[53].mxu0  ;;  %7004 = vmatmul.mubr.msk.f32.gmra.mrb[158].mxu0 %vm340_vm1, %v129_v39  ;;  %v3430_v22 = vmax.f32 %v3174_v60, 0.0  ;;  %v7455_v3 = vpop.f32.mrb[53].mxu1 }
 0x141   :  { %7006 = vmatprep.mubr.msk.f32.mxu0 %vm8600_vm2, %v13414_v0  ;;  %v2912_v23 = vmul.f32 %v9612_v49, %v2410_v10  ;;  %7613 = vmatmul.mubr.msk.f32.gmra.mrb[158].mxu1 %vm340_vm1, %v332_v21  ;;  %v3225_v52 = vmax.f32 %v9916_v6, 0.0  ;;  %v3416_v50 = vmax.f32 %v3160_v24, 0.0  ;;  %v2970_v55 = vadd.f32 %v9640_v7, %v2707_v18  ;;  %v132_v3 = vld [vmem:[%s13397_s0 + $0x290] sm:$0xff] }
 0x142   :  { %v3479_v29 = vmax.f32 %v3223_v57, %v3239_v16  ;;  %v2984_v14 = vadd.f32 %v9640_v7, %v2721_v53  ;;  %v8124_v30 = vpack.i.bf16 %v9919_v5, %v9861_v2  ;;  %v3574_v51 = vmax.f32 %v3414_v59, %v3430_v22  ;;  %7615 = vmatprep.mubr.msk.f32.mxu1 %vm8600_vm2, %v13414_v0  ;;  %v334_v59 = vld [vmem:[%s13397_s0 + $0x8e0] sm:$0xff] }
 0x143   :  { %v1412_v34 = vpop.f32.mrb[54].mxu0  ;;  %v3175_v54 = vadd.f32 %v9640_v7, %v2912_v23  ;;  %v2415_v8 = vpop.f32.mrb[54].mxu1  ;;  %v2708_v60 = vmul.f32 %v9612_v49, %v9528_v61  ;;  %v3161_v57 = vadd.f32 %v9640_v7, %v2898_v35  ;;  %v9971_v6 = vadd.f32 %v9640_v7, %v2899_v36 }
 0x144   :  { %v3240_v37 = vmax.f32 %v2984_v14, 0.0  ;;  %v2722_v9 = vmul.f32 %v9612_v49, %v1412_v34  ;;  %7007 = vmatmul.mubr.msk.f32.gmra.mrb[160].mxu0 %vm340_vm1, %v130_v32  ;;  %8125 = vrot.lane.b32.xlu0 %v8124_v30, %s8604_s28  ;;  %v6849_v42 = vpop.f32.mrb[55].mxu0  ;;  %v9949_v43 = vmax.f32 %v3573_v47, %v3574_v51  ;;  %v2913_v44 = vmul.f32 %v9612_v49, %v2415_v8  ;;  %v7458_v15 = vpop.f32.mrb[55].mxu1 }
 0x145   :  { %7009 = vmatprep.mubr.msk.f32.mxu0 %vm8600_vm2, %v13414_v0  ;;  %v3431_v39 = vmax.f32 %v3175_v54, 0.0  ;;  %7616 = vmatmul.mubr.msk.f32.gmra.mrb[160].mxu1 %vm340_vm1, %v333_v31  ;;  %v2709_v61 = vmul.f32 %v9612_v49, %v9551_v12  ;;  %v2971_v14 = vadd.f32 %v9640_v7, %v2708_v60  ;;  %v3417_v51 = vmax.f32 %v3161_v57, 0.0  ;;  %v133_v42 = vld [vmem:[%s13397_s0 + $0x298] sm:$0xff] }
 0x146   :  { %13451 = vst [vmem:[#allocation5_spill] sm:$0xff] %v9949_v43  ;;  %v3480_v63 = vmax.f32 %v3224_v26, %v3240_v37  ;;  %v2985_v1 = vadd.f32 %v9640_v7, %v2722_v9  ;;  %v3176_v4 = vadd.f32 %v9640_v7, %v2913_v44  ;;  %7618 = vmatprep.mubr.msk.f32.mxu1 %vm8600_vm2, %v13414_v0 }
 0x147   :  { %v1417_v21 = vpop.f32.mrb[56].mxu0  ;;  %v3575_v45 = vmax.f32 %v3415_v27, %v3431_v39  ;;  %v2420_v33 = vpop.f32.mrb[56].mxu1  ;;  %v2900_v26 = vmul.f32 %v9612_v49, %v9553_v13  ;;  %v3226_v13 = vmax.f32 %v2970_v55, 0.0  ;;  %v2972_v9 = vadd.f32 %v9640_v7, %v2709_v61 }
 0x148   :  { %v9973_v47 = vmax.f32 %v3479_v29, %v3480_v63  ;;  %v3241_v10 = vmax.f32 %v2985_v1, 0.0  ;;  %v2723_v16 = vmul.f32 %v9612_v49, %v1417_v21  ;;  %v6852_v53 = vpop.f32.mrb[57].mxu0  ;;  %7010 = vmatmul.mubr.msk.f32.gmra.mrb[162].mxu0 %vm340_vm1, %v131_v62  ;;  %v3432_v20 = vmax.f32 %v3176_v4, 0.0  ;;  %v7461_v22 = vpop.f32.mrb[57].mxu1  ;;  %v335_v29 = vld [vmem:[%s13397_s0 + $0x8e8] sm:$0xff]  ;;  %v336_v63 = vld [vmem:[%s13397_s0 + $0x8f0] sm:$0xff] }
 0x149   :  { %7012 = vmatprep.mubr.msk.f32.mxu0 %vm8600_vm2, %v13414_v0  ;;  %v2914_v18 = vmul.f32 %v9612_v49, %v2420_v33  ;;  %7619 = vmatmul.mubr.msk.f32.gmra.mrb[162].mxu1 %vm340_vm1, %v334_v59  ;;  %v10014_v44 = vadd.f32 %v9640_v7, %v2900_v26  ;;  %v2901_v15 = vmul.f32 %v9612_v49, %v9576_v28  ;;  %v3418_v39 = vmax.f32 %v9971_v6, 0.0 }
 0x14a   :  { %v3481_v32 = vmax.f32 %v3225_v52, %v3241_v10  ;;  %v2986_v24 = vadd.f32 %v9640_v7, %v2723_v16  ;;  %v9991_v12 = vpack.i.bf16 %v9973_v47, %v9919_v5  ;;  %v3576_v23 = vmax.f32 %v3416_v50, %v3432_v20  ;;  %7621 = vmatprep.mubr.msk.f32.mxu1 %vm8600_vm2, %v13414_v0 }
 0x14b   :  { %v1422_v30 = vpop.f32.mrb[58].mxu0  ;;  %v3177_v31 = vadd.f32 %v9640_v7, %v2914_v18  ;;  %v2425_v34 = vpop.f32.mrb[58].mxu1  ;;  %v3227_v1 = vmax.f32 %v2971_v14, 0.0  ;;  %v2710_v28 = vmul.f32 %v9612_v49, %v9574_v25  ;;  %v3228_v16 = vmax.f32 %v2972_v9, 0.0  ;;  %v134_v25 = vld [vmem:[%s13397_s0 + $0x2a0] sm:$0xff] }
 0x14c   :  { %v3242_v27 = vmax.f32 %v2986_v24, 0.0  ;;  %v2724_v35 = vmul.f32 %v9612_v49, %v1422_v30  ;;  %7013 = vmatmul.mubr.msk.f32.gmra.mrb[164].mxu0 %vm340_vm1, %v132_v3  ;;  %8130 = vrot.lane.b32.xlu1 %v9991_v12, %s8603_s2  ;;  %v6855_v36 = vpop.f32.mrb[59].mxu0  ;;  %v10004_v54 = vmax.f32 %v3575_v45, %v3576_v23  ;;  %v2915_v8 = vmul.f32 %v9612_v49, %v2425_v34  ;;  %v7464_v37 = vpop.f32.mrb[59].mxu1 }
 0x14d   :  { %7015 = vmatprep.mubr.msk.f32.mxu0 %vm8600_vm2, %v13414_v0  ;;  %v3433_v52 = vmax.f32 %v3177_v31, 0.0  ;;  %7622 = vmatmul.mubr.msk.f32.gmra.mrb[164].mxu1 %vm340_vm1, %v335_v29  ;;  %v3419_v53 = vmax.f32 %v10014_v44, 0.0  ;;  %v3164_v20 = vadd.f32 %v9640_v7, %v2901_v15  ;;  %v2973_v24 = vadd.f32 %v9640_v7, %v2710_v28  ;;  %v338_v15 = vld [vmem:[%s13397_s0 + $0x900] sm:$0xff] }
 0x14e   :  { %13452 = vst [vmem:[#allocation6_spill] sm:$0xff] %v10004_v54  ;;  %v3482_v62 = vmax.f32 %v3226_v13, %v3242_v27  ;;  %v2987_v50 = vadd.f32 %v9640_v7, %v2724_v35  ;;  %v3178_v55 = vadd.f32 %v9640_v7, %v2915_v8  ;;  %7624 = vmatprep.mubr.msk.f32.mxu1 %vm8600_vm2, %v13414_v0 }
 0x14f   :  { %v1427_v4 = vpop.f32.mrb[60].mxu0  ;;  %v3577_v59 = vmax.f32 %v3417_v51, %v3433_v52  ;;  %v2430_v60 = vpop.f32.mrb[60].mxu1  ;;  %v2711_v23 = vmul.f32 %v9612_v49, %v9597_v40  ;;  %v2902_v13 = vmul.f32 %v9612_v49, %v9599_v41  ;;  %v135_v41 = vld [vmem:[%s13397_s0 + $0x2a8] sm:$0xff]  ;;  %v2903_v36 = vmul.f32 %v9612_v49, %v9625_v58 }
 0x150   :  { %v10029_v21 = vmax.f32 %v3481_v32, %v3482_v62  ;;  %v3243_v57 = vmax.f32 %v2987_v50, 0.0  ;;  %v2725_v6 = vmul.f32 %v9612_v49, %v1427_v4  ;;  %v6858_v45 = vpop.f32.mrb[61].mxu0  ;;  %7016 = vmatmul.mubr.msk.f32.gmra.mrb[166].mxu0 %vm340_vm1, %v133_v42  ;;  %v3434_v33 = vmax.f32 %v3178_v55, 0.0  ;;  %v7467_v10 = vpop.f32.mrb[61].mxu1  ;;  %v337_v32 = vld [vmem:[%s13397_s0 + $0x8f8] sm:$0xff] }
 0x151   :  { %7018 = vmatprep.mubr.msk.f32.mxu0 %vm8600_vm2, %v13414_v0  ;;  %v2916_v22 = vmul.f32 %v9612_v49, %v2430_v60  ;;  %7625 = vmatmul.mubr.msk.f32.gmra.mrb[166].mxu1 %vm340_vm1, %v336_v63  ;;  %v3420_v42 = vmax.f32 %v3164_v20, 0.0  ;;  %v3229_v52 = vmax.f32 %v2973_v24, 0.0  ;;  %v2974_v62 = vadd.f32 %v9640_v7, %v2711_v23 }
 0x152   :  { %13453 = vst [vmem:[#allocation7_spill] sm:$0xff] %v10029_v21  ;;  %v3483_v61 = vmax.f32 %v3227_v1, %v3243_v57  ;;  %v2988_v3 = vadd.f32 %v9640_v7, %v2725_v6  ;;  %v8134_v26 = vpack.i.bf16 %v10029_v21, %v9973_v47  ;;  %v3578_v18 = vmax.f32 %v3418_v39, %v3434_v33  ;;  %v136_v57 = vld [vmem:[%s13397_s0 + $0x2b0] sm:$0xff] }
 0x153   :  { %7627 = vmatprep.mubr.msk.f32.mxu1 %vm8600_vm2, %v13414_v0  ;;  %v1432_v29 = vpop.f32.mrb[62].mxu0  ;;  %v3179_v14 = vadd.f32 %v9640_v7, %v2916_v22  ;;  %v2435_v30 = vpop.f32.mrb[62].mxu1  ;;  %v3165_v50 = vadd.f32 %v9640_v7, %v2902_v13  ;;  %v3166_v6 = vadd.f32 %v9640_v7, %v2903_v36 }
 0x154   :  { %v3244_v51 = vmax.f32 %v2988_v3, 0.0  ;;  %v2726_v31 = vmul.f32 %v9612_v49, %v1432_v29  ;;  %7019 = vmatmul.mubr.msk.f32.gmra.mrb[168].mxu0 %vm340_vm1, %v134_v25  ;;  %8135 = vrot.lane.b32.xlu0 %v8134_v26, %s8604_s28  ;;  %v6861_v34 = vpop.f32.mrb[63].mxu0  ;;  %v10059_v27 = vmax.f32 %v3577_v59, %v3578_v18  ;;  %v2917_v35 = vmul.f32 %v9612_v49, %v2435_v30  ;;  %v7470_v40 = vpop.f32.mrb[63].mxu1  ;;  %v137_v29 = vld [vmem:[%s13397_s0 + $0x2b8] sm:$0xff] }
 0x155   :  { %7021 = vmatprep.mubr.msk.f32.mxu0 %vm8600_vm2, %v13414_v0  ;;  %v3435_v8 = vmax.f32 %v3179_v14, 0.0  ;;  %7628 = vmatmul.mubr.msk.f32.gmra.mrb[168].mxu1 %vm340_vm1, %v337_v32  ;;  %v3421_v20 = vmax.f32 %v3165_v50, 0.0  ;;  %v3230_v3 = vmax.f32 %v2974_v62, 0.0  ;;  %v3422_v30 = vmax.f32 %v3166_v6, 0.0  ;;  %v139_v62 = vld [vmem:[%s13397_s0 + $0x2c8] sm:$0xff] }
 0x156   :  { %13454 = vst [vmem:[#allocation8_spill] sm:$0xff] %v10059_v27  ;;  %v3484_v37 = vmax.f32 %v3228_v16, %v3244_v51  ;;  %v2989_v9 = vadd.f32 %v9640_v7, %v2726_v31  ;;  %v3180_v44 = vadd.f32 %v9640_v7, %v2917_v35  ;;  %7630 = vmatprep.mubr.msk.f32.mxu1 %vm8600_vm2, %v13414_v0 }
 0x157   :  { %v1437_v58 = vpop.f32.mrb[64].mxu0  ;;  %v3579_v39 = vmax.f32 %v3419_v53, %v3435_v8  ;;  %v2440_v55 = vpop.f32.mrb[64].mxu1  ;;  %v138_v8 = vld [vmem:[%s13397_s0 + $0x2c0] sm:$0xff] }
 0x158   :  { %v10079_v63 = vmax.f32 %v3483_v61, %v3484_v37  ;;  %v3245_v1 = vmax.f32 %v2989_v9, 0.0  ;;  %v2727_v28 = vmul.f32 %v9612_v49, %v1437_v58  ;;  %v6864_v4 = vpop.f32.mrb[65].mxu0  ;;  %7022 = vmatmul.mubr.msk.f32.gmra.mrb[170].mxu0 %vm340_vm1, %v135_v41  ;;  %v3436_v59 = vmax.f32 %v3180_v44, 0.0  ;;  %v7473_v60 = vpop.f32.mrb[65].mxu1 }
 0x159   :  { %7024 = vmatprep.mubr.msk.f32.mxu0 %vm8600_vm2, %v13414_v0  ;;  %v2918_v45 = vmul.f32 %v9612_v49, %v2440_v55  ;;  %7631 = vmatmul.mubr.msk.f32.gmra.mrb[170].mxu1 %vm340_vm1, %v338_v15 }
 0x15a   :  { %13455 = vst [vmem:[#allocation9_spill] sm:$0xff] %v10079_v63  ;;  %v3485_v33 = vmax.f32 %v3229_v52, %v3245_v1  ;;  %v2990_v10 = vadd.f32 %v9640_v7, %v2727_v28  ;;  %v10094_v16 = vpack.i.bf16 %v10079_v63, %v10029_v21  ;;  %v3580_v25 = vmax.f32 %v3420_v42, %v3436_v59  ;;  %v140_v1 = vld [vmem:[%s13397_s0 + $0x2d0] sm:$0xff] }
 0x15b   :  { %7665 = vmatprep.mubr.msk.f32.mxu1 %vm8600_vm2, %v13414_v0  ;;  %v1442_v53 = vpop.f32.mrb[66].mxu0  ;;  %v3181_v22 = vadd.f32 %v9640_v7, %v2918_v45  ;;  %v2445_v61 = vpop.f32.mrb[66].mxu1 }
 0x15c   :  { %v3246_v26 = vmax.f32 %v2990_v10, 0.0  ;;  %7025 = vmatmul.mubr.msk.f32.gmra.mrb[172].mxu0 %vm340_vm1, %v136_v57  ;;  %8140 = vrot.lane.b32.xlu1 %v10094_v16, %s8603_s2  ;;  %v6867_v18 = vpop.f32.mrb[67].mxu0  ;;  %v10102_v32 = vmax.f32 %v3579_v39, %v3580_v25  ;;  %v2919_v24 = vmul.f32 %v9612_v49, %v2445_v61  ;;  %v7476_v23 = vpop.f32.mrb[67].mxu1  ;;  %v141_v57 = vld [vmem:[%s13397_s0 + $0x2d8] sm:$0xff]  ;;  %v142_v25 = vld [vmem:[%s13397_s0 + $0x2e0] sm:$0xff] }
 0x15d   :  { %7027 = vmatprep.mubr.msk.f32.mxu0 %vm8600_vm2, %v13414_v0  ;;  %v3437_v13 = vmax.f32 %v3181_v22, 0.0 }
 0x15e   :  { %13456 = vst [vmem:[#allocation10_spill] sm:$0xff] %v10102_v32  ;;  %v3486_v14 = vmax.f32 %v3230_v3, %v3246_v26  ;;  %v3182_v51 = vadd.f32 %v9640_v7, %v2919_v24  ;;  %v143_v3 = vld [vmem:[%s13397_s0 + $0x2e8] sm:$0xff] }
 0x15f   :  { %v10111_v31 = vpop.f32.mrb[68].mxu0  ;;  %v3581_v34 = vmax.f32 %v3421_v20, %v3437_v13  ;;  %v2450_v35 = vpop.f32.mrb[68].mxu1 }
 0x160   :  { %v10113_v40 = vmax.f32 %v3485_v33, %v3486_v14  ;;  %v6870_v49 = vpop.f32.mrb[69].mxu0  ;;  %7028 = vmatmul.mubr.msk.f32.gmra.mrb[174].mxu0 %vm340_vm1, %v137_v29  ;;  %v3438_v41 = vmax.f32 %v3182_v51, 0.0  ;;  %v7479_v36 = vpop.f32.mrb[69].mxu1  ;;  %v144_v29 = vld [vmem:[%s13397_s0 + $0x2f0] sm:$0xff] }
 0x161   :  { %7030 = vmatprep.mubr.msk.f32.mxu0 %vm8600_vm2, %v13414_v0 }
 0x162   :  { %13457 = vst [vmem:[#allocation11_spill] sm:$0xff] %v10113_v40  ;;  %v8144_v7 = vpack.i.bf16 %v10113_v40, %v10079_v63  ;;  %v3582_v37 = vmax.f32 %v3422_v30, %v3438_v41 }
 0x163   :  { %v10123_v9 = vpop.f32.mrb[70].mxu0  ;;  %v10125_v42 = vpop.f32.mrb[70].mxu1 }
 0x164   :  { %7031 = vmatmul.mubr.msk.f32.gmra.mrb[176].mxu0 %vm340_vm1, %v138_v8  ;;  %8145 = vrot.lane.b32.xlu0 %v8144_v7, %s8604_s28  ;;  %v6873_v44 = vpop.f32.mrb[71].mxu0  ;;  %v10129_v15 = vmax.f32 %v3581_v34, %v3582_v37  ;;  %v7482_v52 = vpop.f32.mrb[71].mxu1  ;;  %v145_v34 = vld [vmem:[%s13397_s0 + $0x2f8] sm:$0xff]  ;;  %v146_v8 = vld [vmem:[%s13397_s0 + $0x300] sm:$0xff] }
 0x165   :  { %7033 = vmatprep.mubr.msk.f32.mxu0 %vm8600_vm2, %v13414_v0 }
 0x166   :  { %13458 = vst [vmem:[#allocation12_spill] sm:$0xff] %v10129_v15 }
 0x167   :  { %v10136_v58 = vpop.f32.mrb[72].mxu0  ;;  %v10138_v50 = vpop.f32.mrb[72].mxu1 }
 0x168   :  { %v6876_v39 = vpop.f32.mrb[73].mxu0  ;;  %7034 = vmatmul.mubr.msk.f32.gmra.mrb[178].mxu0 %vm340_vm1, %v139_v62  ;;  %v7485_v55 = vpop.f32.mrb[73].mxu1  ;;  %v147_v62 = vld [vmem:[%s13397_s0 + $0x308] sm:$0xff] }
 0x169   :  { %7036 = vmatprep.mubr.msk.f32.mxu0 %vm8600_vm2, %v13414_v0 }
 0x16b   :  { %v10146_v28 = vpop.f32.mrb[74].mxu0  ;;  %v10148_v4 = vpop.f32.mrb[74].mxu1 }
 0x16c   :  { %v6879_v59 = vpop.f32.mrb[75].mxu0  ;;  %7037 = vmatmul.mubr.msk.f32.gmra.mrb[180].mxu0 %vm340_vm1, %v140_v1  ;;  %v7488_v60 = vpop.f32.mrb[75].mxu1 }
 0x16d   :  { %7039 = vmatprep.mubr.msk.f32.mxu0 %vm8600_vm2, %v13414_v0  ;;  %v148_v60 = vld [vmem:[%s13397_s0 + $0x310] sm:$0xff] }
 0x16f   :  { %v10156_v6 = vpop.f32.mrb[76].mxu0  ;;  %v10158_v45 = vpop.f32.mrb[76].mxu1 }
 0x170   :  { %v6882_v33 = vpop.f32.mrb[77].mxu0  ;;  %7040 = vmatmul.mubr.msk.f32.gmra.mrb[182].mxu0 %vm340_vm1, %v141_v57  ;;  %v7491_v10 = vpop.f32.mrb[77].mxu1 }
 0x171   :  { %7042 = vmatprep.mubr.msk.f32.mxu0 %vm8600_vm2, %v13414_v0 }
 0x173   :  { %v10166_v53 = vpop.f32.mrb[78].mxu0  ;;  %v10168_v20 = vpop.f32.mrb[78].mxu1 }
 0x174   :  { %v6885_v22 = vpop.f32.mrb[79].mxu0  ;;  %7043 = vmatmul.mubr.msk.f32.gmra.mrb[184].mxu0 %vm340_vm1, %v142_v25  ;;  %v7494_v61 = vpop.f32.mrb[79].mxu1 }
 0x175   :  { %7045 = vmatprep.mubr.msk.f32.mxu0 %vm8600_vm2, %v13414_v0  ;;  %v149_v22 = vld [vmem:[%s13397_s0 + $0x318] sm:$0xff] }
 0x177   :  { %v10176_v26 = vpop.f32.mrb[80].mxu0  ;;  %v10178_v18 = vpop.f32.mrb[80].mxu1 }
 0x178   :  { %v6888_v24 = vpop.f32.mrb[81].mxu0  ;;  %7046 = vmatmul.mubr.msk.f32.gmra.mrb[186].mxu0 %vm340_vm1, %v143_v3  ;;  %v7497_v23 = vpop.f32.mrb[81].mxu1 }
 0x179   :  { %7048 = vmatprep.mubr.msk.f32.mxu0 %vm8600_vm2, %v13414_v0 }
 0x17b   :  { %v10186_v13 = vpop.f32.mrb[82].mxu0  ;;  %v10188_v14 = vpop.f32.mrb[82].mxu1 }
 0x17c   :  { %v6891_v30 = vpop.f32.mrb[83].mxu0  ;;  %7049 = vmatmul.mubr.msk.f32.gmra.mrb[188].mxu0 %vm340_vm1, %v144_v29  ;;  %v7500_v51 = vpop.f32.mrb[83].mxu1  ;;  %v150_v29 = vld [vmem:[%s13397_s0 + $0x320] sm:$0xff] }
 0x17d   :  { %7051 = vmatprep.mubr.msk.f32.mxu0 %vm8600_vm2, %v13414_v0 }
 0x17f   :  { %v10196_v35 = vpop.f32.mrb[84].mxu0  ;;  %v10198_v49 = vpop.f32.mrb[84].mxu1 }
 0x180   :  { %v6894_v41 = vpop.f32.mrb[85].mxu0  ;;  %7052 = vmatmul.mubr.msk.f32.gmra.mrb[190].mxu0 %vm340_vm1, %v145_v34  ;;  %v7503_v36 = vpop.f32.mrb[85].mxu1 }
 0x181   :  { %7054 = vmatprep.mubr.msk.f32.mxu0 %vm8600_vm2, %v13414_v0  ;;  %v151_v36 = vld [vmem:[%s13397_s0 + $0x328] sm:$0xff] }
 0x183   :  { %v10206_v7 = vpop.f32.mrb[86].mxu0  ;;  %v10208_v37 = vpop.f32.mrb[86].mxu1 }
 0x184   :  { %v6897_v44 = vpop.f32.mrb[87].mxu0  ;;  %7055 = vmatmul.mubr.msk.f32.gmra.mrb[192].mxu0 %vm340_vm1, %v146_v8  ;;  %v7506_v52 = vpop.f32.mrb[87].mxu1 }
 0x185   :  { %7057 = vmatprep.mubr.msk.f32.mxu0 %vm8600_vm2, %v13414_v0 }
 0x187   :  { %v10216_v39 = vpop.f32.mrb[88].mxu0  ;;  %v10218_v55 = vpop.f32.mrb[88].mxu1 }
 0x188   :  { %v6900_v1 = vpop.f32.mrb[89].mxu0  ;;  %7058 = vmatmul.mubr.msk.f32.gmra.mrb[194].mxu0 %vm340_vm1, %v147_v62  ;;  %v7509_v59 = vpop.f32.mrb[89].mxu1 }
 0x189   :  { %7060 = vmatprep.mubr.msk.f32.mxu0 %vm8600_vm2, %v13414_v0  ;;  %v152_v1 = vld [vmem:[%s13397_s0 + $0x330] sm:$0xff] }
 0x18b   :  { %v10226_v57 = vpop.f32.mrb[90].mxu0  ;;  %v10228_v33 = vpop.f32.mrb[90].mxu1 }
 0x18c   :  { %v6903_v10 = vpop.f32.mrb[91].mxu0  ;;  %7061 = vmatmul.mubr.msk.f32.gmra.mrb[196].mxu0 %vm340_vm1, %v148_v60  ;;  %v7512_v25 = vpop.f32.mrb[91].mxu1 }
 0x18d   :  { %7063 = vmatprep.mubr.msk.f32.mxu0 %vm8600_vm2, %v13414_v0  ;;  %v10273_v10 = vld [vmem:[%s13399_s3] ss:$0 sm:$0xff] }
 0x18e   :  { %v2728_v25 = vmul.f32 %v10273_v10, %v10111_v31  ;;  %v153_v31 = vld [vmem:[%s13397_s0 + $0x338] sm:$0xff] }
 0x18f   :  { %v10236_v61 = vpop.f32.mrb[92].mxu0  ;;  %v10238_v3 = vpop.f32.mrb[92].mxu1 }
 0x190   :  { %v6906_v24 = vpop.f32.mrb[93].mxu0  ;;  %7064 = vmatmul.mubr.msk.f32.gmra.mrb[198].mxu0 %vm340_vm1, %v149_v22  ;;  %v7515_v23 = vpop.f32.mrb[93].mxu1  ;;  %v2729_v22 = vmul.f32 %v10273_v10, %v10123_v9  ;;  %v2920_v9 = vmul.f32 %v10273_v10, %v10125_v42 }
 0x191   :  { %7066 = vmatprep.mubr.msk.f32.mxu0 %vm8600_vm2, %v13414_v0 }
 0x193   :  { %v10246_v30 = vpop.f32.mrb[94].mxu0  ;;  %v10248_v51 = vpop.f32.mrb[94].mxu1 }
 0x194   :  { %v6909_v34 = vpop.f32.mrb[95].mxu0  ;;  %7067 = vmatmul.mubr.msk.f32.gmra.mrb[200].mxu0 %vm340_vm1, %v150_v29  ;;  %v7518_v41 = vpop.f32.mrb[95].mxu1  ;;  %v2730_v29 = vmul.f32 %v10273_v10, %v10136_v58  ;;  %v2922_v58 = vmul.f32 %v10273_v10, %v10148_v4 }
 0x195   :  { %7069 = vmatprep.mubr.msk.f32.mxu0 %vm8600_vm2, %v13414_v0  ;;  %v2731_v34 = vmul.f32 %v10273_v10, %v10146_v28  ;;  %v2921_v41 = vmul.f32 %v10273_v10, %v10138_v50 }
 0x197   :  { %v10256_v8 = vpop.f32.mrb[96].mxu0  ;;  %v10258_v44 = vpop.f32.mrb[96].mxu1 }
 0x198   :  { %v6912_v52 = vpop.f32.mrb[97].mxu0  ;;  %7070 = vmatmul.mubr.msk.f32.gmra.mrb[202].mxu0 %vm340_vm1, %v151_v36  ;;  %v7521_v62 = vpop.f32.mrb[97].mxu1 }
 0x199   :  { %7072 = vmatprep.mubr.msk.f32.mxu0 %vm8600_vm2, %v13414_v0  ;;  %v10302_v62 = vld [vmem:[%s13400_s4] ss:$0 sm:$0xff] }
 0x19a   :  { %v10306_v42 = vadd.f32 %v10302_v62, %v2729_v22  ;;  %v10310_v4 = vadd.f32 %v10302_v62, %v2730_v29  ;;  %v154_v22 = vld [vmem:[%s13397_s0 + $0x340] sm:$0xff]  ;;  %v2732_v29 = vmul.f32 %v10273_v10, %v10156_v6 }
 0x19b   :  { %v10266_v59 = vpop.f32.mrb[98].mxu0  ;;  %v10268_v60 = vpop.f32.mrb[98].mxu1 }
 0x19c   :  { %v6915_v24 = vpop.f32.mrb[99].mxu0  ;;  %7073 = vmatmul.mubr.msk.f32.gmra.mrb[204].mxu0 %vm340_vm1, %v152_v1  ;;  %v7524_v23 = vpop.f32.mrb[99].mxu1  ;;  %v2991_v1 = vadd.f32 %v10302_v62, %v2728_v25  ;;  %v10318_v25 = vadd.f32 %v10302_v62, %v2920_v9 }
 0x19d   :  { %7075 = vmatprep.mubr.msk.f32.mxu0 %vm8600_vm2, %v13414_v0  ;;  %v10313_v23 = vadd.f32 %v10302_v62, %v2731_v34  ;;  %v10329_v34 = vadd.f32 %v10302_v62, %v2922_v58 }
 0x19e   :  { %v10293_v36 = vpop.permute.xlu0 %8105  ;;  %v3439_v54 = vmax.f32 %v10318_v25, 0.0  ;;  %v2733_v25 = vmul.f32 %v10273_v10, %v10166_v53 }
 0x19f   :  { %v1526_v52 = vpop.f32.mrb[100].mxu0  ;;  %v10297_v28 = vpop.f32.mrb[100].mxu1  ;;  %v10334_v9 = vunpack.i.l.bf16 %v10293_v36 }
 0x1a0   :  { %v6918_v50 = vpop.f32.mrb[101].mxu0  ;;  %7076 = vmatmul.mubr.msk.f32.gmra.mrb[206].mxu0 %vm340_vm1, %v153_v31  ;;  %v7527_v24 = vpop.f32.mrb[101].mxu1  ;;  %v10324_v31 = vadd.f32 %v10302_v62, %v2921_v41  ;;  %v3248_v41 = vmax.f32 %v10306_v42, 0.0 }
 0x1a1   :  { %7078 = vmatprep.mubr.msk.f32.mxu0 %vm8600_vm2, %v13414_v0  ;;  %v2923_v50 = vmul.f32 %v10273_v10, %v10158_v45  ;;  %13459 = vst [vmem:[#allocation13_spill] sm:$0xff] %v10334_v9  ;;  %v3247_v0 = vmax.f32 %v2991_v1, 0.0  ;;  %v155_v1 = vld [vmem:[%s13397_s0 + $0x348] sm:$0xff]  ;;  %v10362_v48 = vsel %vm4313_vm3, 0.0, %v10334_v9 }
 0x1a2   :  { %v8111_v52 = vpop.permute.xlu0 %8110 }
 0x1a3   :  { %v1530_v24 = vpop.f32.mrb[102].mxu0  ;;  %v2534_v11 = vpop.f32.mrb[102].mxu1  ;;  %v10337_v15 = vunpack.i.l.bf16 %v8111_v52  ;;  %v8113_v45 = vunpack.i.h.bf16 %v8111_v52 }
 0x1a4   :  { %v2744_v6 = vmul.f32 %v10273_v10, %v1530_v24  ;;  %v6921_v32 = vpop.f32.mrb[103].mxu0  ;;  %7079 = vmatmul.mubr.msk.f32.gmra.mrb[208].mxu0 %vm340_vm1, %v154_v22  ;;  %v7530_v58 = vpop.f32.mrb[103].mxu1  ;;  %v13460_v11 = vmov 0.0   ;;  %v2734_v24 = vmul.f32 %v10273_v10, %v10176_v26 }
 0x1a5   :  { %7081 = vmatprep.mubr.msk.f32.mxu0 %vm8600_vm2, %v13460_v11  ;;  %v10351_v32 = vadd.f32 %v10302_v62, %v2732_v29  ;;  %v10356_v58 = vadd.f32 %v10302_v62, %v2923_v50  ;;  %v4388_v50 = vsel %vm4387_vm4, %v10362_v48, %v10337_v15 }
 0x1a6   :  { %v3007_v42 = vadd.f32 %v10302_v62, %v2744_v6  ;;  %v8116_v22 = vpop.permute.xlu1 %8115 }
 0x1a7   :  { %v8117_v43 = vunpack.i.l.bf16 %v8116_v22  ;;  %v1535_v27 = vpop.f32.mrb[104].mxu0  ;;  %v2538_v29 = vpop.f32.mrb[104].mxu1  ;;  %v8118_v63 = vunpack.i.h.bf16 %v8116_v22  ;;  %v2735_v22 = vmul.f32 %v10273_v10, %v10186_v13 }
 0x1a8   :  { %v3263_v46 = vmax.f32 %v3007_v42, 0.0  ;;  %v2745_v6 = vmul.f32 %v10273_v10, %v1535_v27  ;;  %v6924_v56 = vpop.f32.mrb[105].mxu0  ;;  %7082 = vmatmul.mubr.msk.f32.gmra.mrb[210].mxu0 %vm340_vm1, %v155_v1  ;;  %v2936_v53 = vmul.f32 %v10273_v10, %v2538_v29  ;;  %v7533_v52 = vpop.f32.mrb[105].mxu1  ;;  %v156_v27 = vld [vmem:[%s13397_s0 + $0x350] sm:$0xff]  ;;  %v10398_v1 = vadd.f32 %v10302_v62, %v2734_v24 }
 0x1a9   :  { %v4470_v9 = vsel %vm4469_vm5, %v4388_v50, %v8117_v43  ;;  %7084 = vmatprep.mubr.msk.f32.mxu0 %vm8600_vm2, %v13460_v11  ;;  %v2924_v56 = vmul.f32 %v10273_v10, %v10168_v20  ;;  %v10384_v43 = vadd.f32 %v10302_v62, %v2733_v25  ;;  %v2925_v20 = vmul.f32 %v10273_v10, %v10178_v18 }
 0x1aa   :  { %v3487_v42 = vmax.f32 %v3247_v0, %v3263_v46  ;;  %v3008_v29 = vadd.f32 %v10302_v62, %v2745_v6  ;;  %7666 = vmatmul.mubr.f32.vlgmr.msra.gmra.mrb[172].mxu1 %v4470_v9  ;;  %v3199_v26 = vadd.f32 %v10302_v62, %v2936_v53  ;;  %v4389_v0 = vsel %vm4387_vm4, %v10362_v48, %v8113_v45 }
 0x1ab   :  { %v1540_v50 = vpop.f32.mrb[106].mxu0  ;;  %7668 = vmatprep.mubr.msk.f32.mxu1 %vm8600_vm2, %v13460_v11  ;;  %v2543_v46 = vpop.f32.mrb[106].mxu1  ;;  %v10401_v18 = vadd.f32 %v10302_v62, %v2924_v56  ;;  %v4471_v21 = vsel %vm4469_vm5, %v4389_v0, %v8118_v63  ;;  %v2926_v45 = vmul.f32 %v10273_v10, %v10188_v14  ;;  %v10417_v0 = vadd.f32 %v10302_v62, %v2735_v22 }
 0x1ac   :  { %v3264_v9 = vmax.f32 %v3008_v29, 0.0  ;;  %v2746_v6 = vmul.f32 %v10273_v10, %v1540_v50  ;;  %v6927_v53 = vpop.f32.mrb[107].mxu0  ;;  %7085 = vmatmul.mubr.msk.f32.gmra.mrb[212].mxu0 %vm340_vm1, %v156_v27  ;;  %v3455_v25 = vmax.f32 %v3199_v26, 0.0  ;;  %v2937_v13 = vmul.f32 %v10273_v10, %v2543_v46  ;;  %v7536_v52 = vpop.f32.mrb[107].mxu1  ;;  %v157_v27 = vld [vmem:[%s13397_s0 + $0x358] sm:$0xff] }
 0x1ad   :  { %7087 = vmatprep.mubr.msk.f32.mxu0 %vm8600_vm2, %v13460_v11  ;;  %v10421_v46 = vadd.f32 %v10302_v62, %v2925_v20  ;;  %v10432_v52 = vadd.f32 %v10302_v62, %v2926_v45  ;;  %v13463_v20 = vmax.f32 %v10324_v31, 0.0  ;;  %v2736_v31 = vmul.f32 %v10273_v10, %v10196_v35 }
 0x1ae   :  { %v3488_v29 = vmax.f32 %v3248_v41, %v3264_v9  ;;  %v3009_v26 = vadd.f32 %v10302_v62, %v2746_v6  ;;  %7669 = vmatmul.mubr.f32.gmra.mrb[174].mxu1 %v4471_v21  ;;  %v10412_v24 = vpop.permute.xlu1 %8120  ;;  %v3583_v56 = vmax.f32 %v3439_v54, %v3455_v25  ;;  %v3200_v50 = vadd.f32 %v10302_v62, %v2937_v13 }
 0x1af   :  { %v1545_v53 = vpop.f32.mrb[108].mxu0  ;;  %7671 = vmatprep.mubr.msk.f32.mxu1 %vm8600_vm2, %v13460_v11  ;;  %v2548_v21 = vpop.f32.mrb[108].mxu1  ;;  %v2927_v35 = vmul.f32 %v10273_v10, %v10198_v49 }
 0x1b0   :  { %v10425_v41 = vmax.f32 %v3487_v42, %v3488_v29  ;;  %v3265_v54 = vmax.f32 %v3009_v26, 0.0  ;;  %v2747_v9 = vmul.f32 %v10273_v10, %v1545_v53  ;;  %v6930_v6 = vpop.f32.mrb[109].mxu0  ;;  %7088 = vmatmul.mubr.msk.f32.gmra.mrb[214].mxu0 %vm340_vm1, %v157_v27  ;;  %v3456_v22 = vmax.f32 %v3200_v50, 0.0  ;;  %v7539_v25 = vpop.f32.mrb[109].mxu1  ;;  %v158_v42 = vld [vmem:[%s13397_s0 + $0x360] sm:$0xff] }
 0x1b1   :  { %7090 = vmatprep.mubr.msk.f32.mxu0 %vm8600_vm2, %v13460_v11  ;;  %v2938_v29 = vmul.f32 %v10273_v10, %v2548_v21  ;;  %v13462_v27 = vmax.f32 %v10310_v4, 0.0  ;;  %v8122_v25 = vunpack.i.l.bf16 %v10412_v24 }
 0x1b2   :  { %13461 = vst [vmem:[#allocation14_spill] sm:$0xff] %v10425_v41  ;;  %v3010_v50 = vadd.f32 %v10302_v62, %v2747_v9  ;;  %v8154_v53 = vpack.i.bf16 %v10425_v41, %v13460_v11  ;;  %v10447_v45 = vpack.i.bf16 %v10425_v41, %v10113_v40  ;;  %v3584_v21 = vmax.f32 %v13463_v20, %v3456_v22 }
 0x1b3   :  { %v3489_v26 = vmax.f32 %v13462_v27, %v3265_v54  ;;  %v1550_v13 = vpop.f32.mrb[110].mxu0  ;;  %v3201_v4 = vadd.f32 %v10302_v62, %v2938_v29  ;;  %v2553_v54 = vpop.f32.mrb[110].mxu1 }
 0x1b4   :  { %v3266_v27 = vmax.f32 %v3010_v50, 0.0  ;;  %v2748_v63 = vmul.f32 %v10273_v10, %v1550_v13  ;;  %7091 = vmatmul.mubr.msk.f32.gmra.mrb[216].mxu0 %vm340_vm1, %v158_v42  ;;  %8155 = vrot.lane.b32.xlu0 %v8154_v53, %s8604_s28  ;;  %v6933_v14 = vpop.f32.mrb[111].mxu0  ;;  %v2939_v6 = vmul.f32 %v10273_v10, %v2553_v54  ;;  %v7542_v41 = vpop.f32.mrb[111].mxu1  ;;  %v159_v13 = vld [vmem:[%s13397_s0 + $0x368] sm:$0xff]  ;;  %v10469_v20 = vmax.f32 %v3583_v56, %v3584_v21 }
 0x1b5   :  { %8150 = vrot.lane.b32.xlu1 %v10447_v45, %s8603_s2  ;;  %7093 = vmatprep.mubr.msk.f32.mxu0 %vm8600_vm2, %v13460_v11  ;;  %v3457_v14 = vmax.f32 %v3201_v4, 0.0  ;;  %v13465_v41 = vmax.f32 %v10313_v23, 0.0  ;;  %v8123_v54 = vunpack.i.h.bf16 %v10412_v24  ;;  %v4390_v56 = vsel %vm4387_vm4, %v10362_v48, %v8122_v25 }
 0x1b6   :  { %13464 = vst [vmem:[#allocation15_spill] sm:$0xff] %v10469_v20  ;;  %v3011_v29 = vadd.f32 %v10302_v62, %v2748_v63  ;;  %v8126_v50 = vpop.permute.xlu0 %8125  ;;  %v3202_v53 = vadd.f32 %v10302_v62, %v2939_v6  ;;  %v13466_v21 = vmax.f32 %v10329_v34, 0.0  ;;  %v2737_v24 = vmul.f32 %v10273_v10, %v10206_v7 }
 0x1b7   :  { %v3490_v42 = vmax.f32 %v13465_v41, %v3266_v27  ;;  %v8127_v22 = vunpack.i.l.bf16 %v8126_v50  ;;  %v1555_v9 = vpop.f32.mrb[112].mxu0  ;;  %v2558_v23 = vpop.f32.mrb[112].mxu1  ;;  %v8128_v40 = vunpack.i.h.bf16 %v8126_v50  ;;  %v13467_v7 = vmax.f32 %v10351_v32, 0.0 }
 0x1b8   :  { %v3585_v4 = vmax.f32 %v13466_v21, %v3457_v14  ;;  %v3267_v41 = vmax.f32 %v3011_v29, 0.0  ;;  %v2749_v49 = vmul.f32 %v10273_v10, %v1555_v9  ;;  %7094 = vmatmul.mubr.msk.f32.gmra.mrb[218].mxu0 %vm340_vm1, %v159_v13  ;;  %v6936_v63 = vpop.f32.mrb[113].mxu0  ;;  %v3458_v6 = vmax.f32 %v3202_v53, 0.0  ;;  %v7545_v20 = vpop.f32.mrb[113].mxu1 }
 0x1b9   :  { %v10482_v27 = vmax.f32 %v3489_v26, %v3490_v42  ;;  %8160 = vrot.lane.b32.xlu1 %v9879_v38, %s8602_s19  ;;  %v4472_v34 = vsel %vm4469_vm5, %v4390_v56, %v8127_v22  ;;  %7096 = vmatprep.mubr.msk.f32.mxu0 %vm8600_vm2, %v13460_v11  ;;  %v160_v26 = vld [vmem:[%s13397_s0 + $0x370] sm:$0xff]  ;;  %v2940_v25 = vmul.f32 %v10273_v10, %v2558_v23  ;;  %v13468_v38 = vmax.f32 %v10356_v58, 0.0 }
 0x1ba   :  { %v10498_v9 = vadd.f32 %v10302_v62, %v2736_v31  ;;  %v3491_v13 = vmax.f32 %v13467_v7, %v3267_v41  ;;  %v3012_v20 = vadd.f32 %v10302_v62, %v2749_v49  ;;  %7672 = vmatmul.mubr.f32.gmra.mrb[176].mxu1 %v4472_v34  ;;  %v10506_v14 = vadd.f32 %v10302_v62, %v2927_v35  ;;  %v161_v49 = vld [vmem:[%s13397_s0 + $0x378] sm:$0xff] }
 0x1bb   :  { %v3586_v22 = vmax.f32 %v13468_v38, %v3458_v6  ;;  %v2928_v42 = vmul.f32 %v10273_v10, %v10208_v37  ;;  %v1560_v29 = vpop.f32.mrb[114].mxu0  ;;  %7674 = vmatprep.mubr.msk.f32.mxu1 %vm8600_vm2, %v13460_v11  ;;  %v4391_v32 = vsel %vm4387_vm4, %v10362_v48, %v8123_v54  ;;  %v3203_v31 = vadd.f32 %v10302_v62, %v2940_v25  ;;  %v2563_v50 = vpop.f32.mrb[114].mxu1 }
 0x1bc   :  { %v3268_v53 = vmax.f32 %v3012_v20, 0.0  ;;  %v2750_v58 = vmul.f32 %v10273_v10, %v1560_v29  ;;  %v6939_v56 = vpop.f32.mrb[115].mxu0  ;;  %7097 = vmatmul.mubr.msk.f32.gmra.mrb[220].mxu0 %vm340_vm1, %v160_v26  ;;  %v2941_v37 = vmul.f32 %v10273_v10, %v2563_v50  ;;  %v7548_v21 = vpop.f32.mrb[115].mxu1  ;;  %v10521_v23 = vadd.f32 %v10302_v62, %v2737_v24 }
 0x1bd   :  { %v10517_v35 = vmax.f32 %v3585_v4, %v3586_v22  ;;  %v2738_v54 = vmul.f32 %v10273_v10, %v10216_v39  ;;  %v4473_v41 = vsel %vm4469_vm5, %v4391_v32, %v8128_v40  ;;  %7099 = vmatprep.mubr.msk.f32.mxu0 %vm8600_vm2, %v13460_v11  ;;  %v3459_v4 = vmax.f32 %v3203_v31, 0.0 }
 0x1be   :  { %v3255_v63 = vmax.f32 %v10498_v9, 0.0  ;;  %v13470_v6 = vmax.f32 %v10384_v43, 0.0  ;;  %v3013_v24 = vadd.f32 %v10302_v62, %v2750_v58  ;;  %7675 = vmatmul.mubr.f32.gmra.mrb[178].mxu1 %v4473_v41  ;;  %v10535_v26 = vpop.permute.xlu1 %8130  ;;  %v3204_v40 = vadd.f32 %v10302_v62, %v2941_v37 }
 0x1bf   :  { %13469 = vst [vmem:[#allocation16_spill] sm:$0xff] %v10517_v35  ;;  %v3446_v39 = vmax.f32 %v10506_v14, 0.0  ;;  %v10540_v25 = vadd.f32 %v10302_v62, %v2928_v42  ;;  %v2929_v7 = vmul.f32 %v10273_v10, %v10218_v55  ;;  %v1565_v20 = vpop.f32.mrb[116].mxu0  ;;  %7677 = vmatprep.mubr.msk.f32.mxu1 %vm8600_vm2, %v13460_v11  ;;  %v13471_v43 = vmax.f32 %v10401_v18, 0.0  ;;  %v2568_v22 = vpop.f32.mrb[116].mxu1 }
 0x1c0   :  { %v3492_v34 = vmax.f32 %v13470_v6, %v3268_v53  ;;  %v3269_v32 = vmax.f32 %v3013_v24, 0.0  ;;  %v2751_v31 = vmul.f32 %v10273_v10, %v1565_v20  ;;  %v6942_v50 = vpop.f32.mrb[117].mxu0  ;;  %7100 = vmatmul.mubr.msk.f32.gmra.mrb[222].mxu0 %vm340_vm1, %v161_v49  ;;  %v3460_v42 = vmax.f32 %v3204_v40, 0.0  ;;  %v7551_v53 = vpop.f32.mrb[117].mxu1 }
 0x1c1   :  { %v3587_v38 = vmax.f32 %v13471_v43, %v3459_v4  ;;  %v3256_v55 = vmax.f32 %v10521_v23, 0.0  ;;  %v10554_v58 = vadd.f32 %v10302_v62, %v2738_v54  ;;  %v2739_v18 = vmul.f32 %v10273_v10, %v10226_v57  ;;  %7102 = vmatprep.mubr.msk.f32.mxu0 %vm8600_vm2, %v13460_v11 }
 0x1c2   :  { %v10548_v29 = vmax.f32 %v3491_v13, %v3492_v34  ;;  %v162_v13 = vld [vmem:[%s13397_s0 + $0x380] sm:$0xff]  ;;  %v2942_v56 = vmul.f32 %v10273_v10, %v2568_v22  ;;  %v13472_v37 = vmax.f32 %v10398_v1, 0.0  ;;  %v3014_v41 = vadd.f32 %v10302_v62, %v2751_v31 }
 0x1c3   :  { %v3447_v57 = vmax.f32 %v10540_v25, 0.0  ;;  %v8132_v49 = vunpack.i.l.bf16 %v10535_v26  ;;  %v1570_v4 = vpop.f32.mrb[118].mxu0  ;;  %v13473_v6 = vmax.f32 %v10421_v46, 0.0  ;;  %v2573_v40 = vpop.f32.mrb[118].mxu1  ;;  %v10577_v1 = vadd.f32 %v10302_v62, %v2929_v7  ;;  %v163_v7 = vld [vmem:[%s13397_s0 + $0x388] sm:$0xff] }
 0x1c4   :  { %v3493_v21 = vmax.f32 %v13472_v37, %v3269_v32  ;;  %v10569_v54 = vpack.i.bf16 %v10548_v29, %v10482_v27  ;;  %v3205_v24 = vadd.f32 %v10302_v62, %v2942_v56  ;;  %v3270_v20 = vmax.f32 %v3014_v41, 0.0  ;;  %7103 = vmatmul.mubr.msk.f32.gmra.mrb[224].mxu0 %vm340_vm1, %v162_v13  ;;  %v6945_v22 = vpop.f32.mrb[119].mxu0  ;;  %v7554_v31 = vpop.f32.mrb[119].mxu1 }
 0x1c5   :  { %v3588_v34 = vmax.f32 %v13473_v6, %v3460_v42  ;;  %v2752_v43 = vmul.f32 %v10273_v10, %v1570_v4  ;;  %v2943_v32 = vmul.f32 %v10273_v10, %v2573_v40  ;;  %v2930_v50 = vmul.f32 %v10273_v10, %v10228_v33  ;;  %7105 = vmatprep.mubr.msk.f32.mxu0 %vm8600_vm2, %v13460_v11 }
 0x1c6   :  { %8170 = vrot.lane.b32.xlu1 %v10569_v54, %s8603_s2  ;;  %8165 = vrot.lane.b32.xlu0 %v10569_v54, %s8604_s28  ;;  %v3461_v53 = vmax.f32 %v3205_v24, 0.0  ;;  %v10597_v13 = vadd.f32 %v10302_v62, %v2739_v18  ;;  %v13475_v56 = vmax.f32 %v10417_v0, 0.0  ;;  %v8136_v41 = vpop.permute.xlu0 %8135  ;;  %v8133_v6 = vunpack.i.h.bf16 %v10535_v26 }
 0x1c7   :  { %v10594_v42 = vmax.f32 %v3587_v38, %v3588_v34  ;;  %v3015_v33 = vadd.f32 %v10302_v62, %v2752_v43  ;;  %v3206_v4 = vadd.f32 %v10302_v62, %v2943_v32  ;;  %v8137_v40 = vunpack.i.l.bf16 %v8136_v41  ;;  %v1575_v22 = vpop.f32.mrb[120].mxu0  ;;  %v2578_v18 = vpop.f32.mrb[120].mxu1 }
 0x1c8   :  { %v3494_v37 = vmax.f32 %v13475_v56, %v3270_v20  ;;  %v4392_v38 = vsel %vm4387_vm4, %v10362_v48, %v8132_v49  ;;  %v13476_v34 = vmax.f32 %v10432_v52, 0.0  ;;  %v2753_v20 = vmul.f32 %v10273_v10, %v1575_v22  ;;  %7106 = vmatmul.mubr.msk.f32.gmra.mrb[226].mxu0 %vm340_vm1, %v163_v7  ;;  %v6948_v43 = vpop.f32.mrb[121].mxu0  ;;  %v7557_v56 = vpop.f32.mrb[121].mxu1 }
 0x1c9   :  { %13474 = vst [vmem:[#allocation17_spill] sm:$0xff] %v10594_v42  ;;  %v3271_v0 = vmax.f32 %v3015_v33, 0.0  ;;  %v3462_v32 = vmax.f32 %v3206_v4, 0.0  ;;  %v2740_v26 = vmul.f32 %v10273_v10, %v10236_v61  ;;  %v8138_v46 = vunpack.i.h.bf16 %v8136_v41  ;;  %7108 = vmatprep.mubr.msk.f32.mxu0 %vm8600_vm2, %v13460_v11  ;;  %v13489_v42 = vld [vmem:[#allocation11_spill] sm:$0xff] }
 0x1ca   :  { %v3589_v24 = vmax.f32 %v13476_v34, %v3461_v53  ;;  %v10608_v31 = vmax.f32 %v3493_v21, %v3494_v37  ;;  %8175 = vrot.lane.b32.xlu0 %v9991_v12, %s8602_s19  ;;  %v4474_v52 = vsel %vm4469_vm5, %v4392_v38, %v8137_v40  ;;  %v164_v21 = vld [vmem:[%s13397_s0 + $0x390] sm:$0xff]  ;;  %v2944_v49 = vmul.f32 %v10273_v10, %v2578_v18  ;;  %v165_v34 = vld [vmem:[%s13397_s0 + $0x398] sm:$0xff] }
 0x1cb   :  { %v10624_v7 = vadd.f32 %v10302_v62, %v2930_v50  ;;  %v3495_v61 = vmax.f32 %v3255_v63, %v3271_v0  ;;  %v3016_v53 = vadd.f32 %v10302_v62, %v2753_v20  ;;  %7678 = vmatmul.mubr.f32.gmra.mrb[180].mxu1 %v4474_v52  ;;  %v3590_v12 = vmax.f32 %v3446_v39, %v3462_v32  ;;  %v1580_v41 = vpop.f32.mrb[122].mxu0  ;;  %v2583_v50 = vpop.f32.mrb[122].mxu1 }
 0x1cc   :  { %v2741_v37 = vmul.f32 %v10273_v10, %v10246_v30  ;;  %v2931_v33 = vmul.f32 %v10273_v10, %v10238_v3  ;;  %7680 = vmatprep.mubr.msk.f32.mxu1 %vm8600_vm2, %v13460_v11  ;;  %v4393_v9 = vsel %vm4387_vm4, %v10362_v48, %v8133_v6  ;;  %v3207_v63 = vadd.f32 %v10302_v62, %v2944_v49  ;;  %v6951_v39 = vpop.f32.mrb[123].mxu0  ;;  %v7560_v40 = vpop.f32.mrb[123].mxu1 }
 0x1cd   :  { %v3272_v4 = vmax.f32 %v3016_v53, 0.0  ;;  %v2754_v14 = vmul.f32 %v10273_v10, %v1580_v41  ;;  %7109 = vmatmul.mubr.msk.f32.gmra.mrb[228].mxu0 %vm340_vm1, %v164_v21  ;;  %v10642_v30 = vmax.f32 %v3589_v24, %v3590_v12  ;;  %v2945_v3 = vmul.f32 %v10273_v10, %v2583_v50 }
 0x1ce   :  { %v10646_v22 = vadd.f32 %v10302_v62, %v2740_v26  ;;  %v2932_v6 = vmul.f32 %v10273_v10, %v10248_v51  ;;  %v4475_v38 = vsel %vm4469_vm5, %v4393_v9, %v8138_v46  ;;  %7111 = vmatprep.mubr.msk.f32.mxu0 %vm8600_vm2, %v13460_v11  ;;  %v3463_v24 = vmax.f32 %v3207_v63, 0.0  ;;  %v10660_v43 = vpop.permute.xlu1 %8140 }
 0x1cf   :  { %13477 = vst [vmem:[#allocation18_spill] sm:$0xff] %v10642_v30  ;;  %v3448_v18 = vmax.f32 %v10577_v1, 0.0  ;;  %v3496_v0 = vmax.f32 %v3256_v55, %v3272_v4  ;;  %v3017_v20 = vadd.f32 %v10302_v62, %v2754_v14  ;;  %7681 = vmatmul.mubr.f32.gmra.mrb[182].mxu1 %v4475_v38  ;;  %v3208_v51 = vadd.f32 %v10302_v62, %v2945_v3  ;;  %v1585_v26 = vpop.f32.mrb[124].mxu0  ;;  %v2588_v55 = vpop.f32.mrb[124].mxu1 }
 0x1d0   :  { %v3258_v46 = vmax.f32 %v10597_v13, 0.0  ;;  %v10665_v32 = vadd.f32 %v10302_v62, %v2741_v37  ;;  %v10668_v56 = vadd.f32 %v10302_v62, %v2931_v33  ;;  %v3591_v23 = vmax.f32 %v3447_v57, %v3463_v24  ;;  %7683 = vmatprep.mubr.msk.f32.mxu1 %vm8600_vm2, %v13460_v11  ;;  %v6954_v13 = vpop.f32.mrb[125].mxu0  ;;  %v7563_v53 = vpop.f32.mrb[125].mxu1  ;;  %v166_v57 = vld [vmem:[%s13397_s0 + $0x3a0] sm:$0xff] }
 0x1d1   :  { %v10674_v1 = vmax.f32 %v3495_v61, %v3496_v0  ;;  %v3273_v52 = vmax.f32 %v3017_v20, 0.0  ;;  %v2755_v21 = vmul.f32 %v10273_v10, %v1585_v26  ;;  %7112 = vmatmul.mubr.msk.f32.gmra.mrb[230].mxu0 %vm340_vm1, %v165_v34  ;;  %v3464_v49 = vmax.f32 %v3208_v51, 0.0  ;;  %v167_v20 = vld [vmem:[%s13397_s0 + $0x3a8] sm:$0xff] }
 0x1d2   :  { %v3259_v12 = vmax.f32 %v10646_v22, 0.0  ;;  %v3449_v37 = vmax.f32 %v10624_v7, 0.0  ;;  %v10681_v25 = vadd.f32 %v10302_v62, %v2932_v6  ;;  %7114 = vmatprep.mubr.msk.f32.mxu0 %vm8600_vm2, %v13460_v11  ;;  %v2946_v61 = vmul.f32 %v10273_v10, %v2588_v55 }
 0x1d3   :  { %v13478_v33 = vmax.f32 %v10554_v58, 0.0  ;;  %v3018_v9 = vadd.f32 %v10302_v62, %v2755_v21  ;;  %v10694_v7 = vpack.i.bf16 %v10674_v1, %v10608_v31  ;;  %v3450_v63 = vmax.f32 %v10668_v56, 0.0  ;;  %v1590_v4 = vpop.f32.mrb[126].mxu0  ;;  %v2593_v3 = vpop.f32.mrb[126].mxu1 }
 0x1d4   :  { %v8142_v50 = vunpack.i.l.bf16 %v10660_v43  ;;  %v3592_v14 = vmax.f32 %v3448_v18, %v3464_v49  ;;  %v3209_v39 = vadd.f32 %v10302_v62, %v2946_v61  ;;  %v3260_v40 = vmax.f32 %v10665_v32, 0.0  ;;  %v6957_v6 = vpop.f32.mrb[127].mxu0  ;;  %v7566_v34 = vpop.f32.mrb[127].mxu1 }
 0x1d5   :  { %v3497_v41 = vmax.f32 %v13478_v33, %v3273_v52  ;;  %v3274_v22 = vmax.f32 %v3018_v9, 0.0  ;;  %v2756_v58 = vmul.f32 %v10273_v10, %v1590_v4  ;;  %7115 = vmatmul.mubr.msk.f32.gmra.mrb[232].mxu0 %vm340_vm1, %v166_v57  ;;  %8185 = vrot.lane.b32.xlu0 %v10694_v7, %s8603_s2  ;;  %v2947_v38 = vmul.f32 %v10273_v10, %v2593_v3 }
 0x1d6   :  { %v2742_v24 = vmul.f32 %v10273_v10, %v10256_v8  ;;  %v3451_v18 = vmax.f32 %v10681_v25, 0.0  ;;  %8180 = vrot.lane.b32.xlu1 %v10694_v7, %s8604_s28  ;;  %7117 = vmatprep.mubr.msk.f32.mxu0 %vm8600_vm2, %v13460_v11  ;;  %v10712_v0 = vmax.f32 %v3591_v23, %v3592_v14  ;;  %v3465_v51 = vmax.f32 %v3209_v39, 0.0  ;;  %v8146_v55 = vpop.permute.xlu0 %8145 }
 0x1d7   :  { %v2933_v56 = vmul.f32 %v10273_v10, %v10258_v44  ;;  %v3498_v26 = vmax.f32 %v3258_v46, %v3274_v22  ;;  %v3019_v8 = vadd.f32 %v10302_v62, %v2756_v58  ;;  %v3210_v52 = vadd.f32 %v10302_v62, %v2947_v38  ;;  %v1595_v49 = vpop.f32.mrb[128].mxu0  ;;  %v2598_v57 = vpop.f32.mrb[128].mxu1 }
 0x1d8   :  { %13479 = vst [vmem:[#allocation19_spill] sm:$0xff] %v10712_v0  ;;  %v8143_v21 = vunpack.i.h.bf16 %v10660_v43  ;;  %v8147_v13 = vunpack.i.l.bf16 %v8146_v55  ;;  %v3593_v23 = vmax.f32 %v3449_v37, %v3465_v51  ;;  %v4394_v53 = vsel %vm4387_vm4, %v10362_v48, %v8142_v50  ;;  %v6960_v46 = vpop.f32.mrb[129].mxu0  ;;  %v7569_v4 = vpop.f32.mrb[129].mxu1 }
 0x1d9   :  { %v10724_v61 = vmax.f32 %v3497_v41, %v3498_v26  ;;  %v3275_v33 = vmax.f32 %v3019_v8, 0.0  ;;  %v2757_v44 = vmul.f32 %v10273_v10, %v1595_v49  ;;  %7118 = vmatmul.mubr.msk.f32.gmra.mrb[234].mxu0 %vm340_vm1, %v167_v20  ;;  %v3466_v9 = vmax.f32 %v3210_v52, 0.0  ;;  %v168_v41 = vld [vmem:[%s13397_s0 + $0x3b0] sm:$0xff]  ;;  %v169_v52 = vld [vmem:[%s13397_s0 + $0x3b8] sm:$0xff] }
 0x1da   :  { %v3005_v14 = vadd.f32 %v10302_v62, %v2742_v24  ;;  %v8148_v43 = vunpack.i.h.bf16 %v8146_v55  ;;  %8190 = vrot.lane.b32.xlu1 %v10094_v16, %s8602_s19  ;;  %v4476_v37 = vsel %vm4469_vm5, %v4394_v53, %v8147_v13  ;;  %7120 = vmatprep.mubr.msk.f32.mxu0 %vm8600_vm2, %v13460_v11  ;;  %v2948_v50 = vmul.f32 %v10273_v10, %v2598_v57 }
 0x1db   :  { %v3196_v39 = vadd.f32 %v10302_v62, %v2933_v56  ;;  %v3499_v3 = vmax.f32 %v3259_v12, %v3275_v33  ;;  %v3020_v22 = vadd.f32 %v10302_v62, %v2757_v44  ;;  %7684 = vmatmul.mubr.f32.gmra.mrb[184].mxu1 %v4476_v37  ;;  %v3594_v58 = vmax.f32 %v3450_v63, %v3466_v9  ;;  %v1600_v38 = vpop.f32.mrb[130].mxu0  ;;  %v2603_v12 = vpop.f32.mrb[130].mxu1 }
 0x1dc   :  { %v2743_v16 = vmul.f32 %v10273_v10, %v10266_v59  ;;  %v2934_v6 = vmul.f32 %v10273_v10, %v10268_v60  ;;  %v3211_v34 = vadd.f32 %v10302_v62, %v2948_v50  ;;  %7686 = vmatprep.mubr.msk.f32.mxu1 %vm8600_vm2, %v13460_v11  ;;  %v4395_v24 = vsel %vm4387_vm4, %v10362_v48, %v8143_v21  ;;  %v6963_v56 = vpop.f32.mrb[131].mxu0  ;;  %v7572_v60 = vpop.f32.mrb[131].mxu1 }
 0x1dd   :  { %v3276_v20 = vmax.f32 %v3020_v22, 0.0  ;;  %v2758_v51 = vmul.f32 %v10273_v10, %v1600_v38  ;;  %v10750_v63 = vmax.f32 %v3593_v23, %v3594_v58  ;;  %7121 = vmatmul.mubr.msk.f32.gmra.mrb[236].mxu0 %vm340_vm1, %v168_v41  ;;  %v2949_v59 = vmul.f32 %v10273_v10, %v2603_v12 }
 0x1de   :  { %v2935_v26 = vmul.f32 %v10273_v10, %v10297_v28  ;;  %v3467_v8 = vmax.f32 %v3211_v34, 0.0  ;;  %v4477_v55 = vsel %vm4469_vm5, %v4395_v24, %v8148_v43  ;;  %7123 = vmatprep.mubr.msk.f32.mxu0 %vm8600_vm2, %v13460_v11  ;;  %v3452_v21 = vmax.f32 %v3196_v39, 0.0 }
 0x1df   :  { %13480 = vst [vmem:[#allocation20_spill] sm:$0xff] %v10750_v63  ;;  %v3500_v13 = vmax.f32 %v3260_v40, %v3276_v20  ;;  %v3021_v49 = vadd.f32 %v10302_v62, %v2758_v51  ;;  %7687 = vmatmul.mubr.f32.gmra.mrb[186].mxu1 %v4477_v55  ;;  %v3212_v23 = vadd.f32 %v10302_v62, %v2949_v59  ;;  %v3261_v28 = vmax.f32 %v3005_v14, 0.0  ;;  %v1605_v44 = vpop.f32.mrb[132].mxu0  ;;  %v2608_v46 = vpop.f32.mrb[132].mxu1  ;;  %v171_v59 = vld [vmem:[%s13397_s0 + $0x3c8] sm:$0xff] }
 0x1e0   :  { %v3006_v53 = vadd.f32 %v10302_v62, %v2743_v16  ;;  %v3197_v57 = vadd.f32 %v10302_v62, %v2934_v6  ;;  %v3595_v33 = vmax.f32 %v3451_v18, %v3467_v8  ;;  %7689 = vmatprep.mubr.msk.f32.mxu1 %vm8600_vm2, %v13460_v11  ;;  %v2759_v9 = vmul.f32 %v10273_v10, %v1605_v44  ;;  %v6966_v43 = vpop.f32.mrb[133].mxu0  ;;  %v7575_v14 = vpop.f32.mrb[133].mxu1  ;;  %v170_v18 = vld [vmem:[%s13397_s0 + $0x3c0] sm:$0xff] }
 0x1e1   :  { %v10772_v32 = vmax.f32 %v3499_v3, %v3500_v13  ;;  %v3277_v40 = vmax.f32 %v3021_v49, 0.0  ;;  %v3468_v4 = vmax.f32 %v3212_v23, 0.0  ;;  %7124 = vmatmul.mubr.msk.f32.gmra.mrb[238].mxu0 %vm340_vm1, %v169_v52  ;;  %v3198_v37 = vadd.f32 %v10302_v62, %v2935_v26  ;;  %v174_v14 = vld [vmem:[%s13397_s0 + $0x3e0] sm:$0xff] }
 0x1e2   :  { %v2950_v25 = vmul.f32 %v10273_v10, %v2608_v46  ;;  %7126 = vmatprep.mubr.msk.f32.mxu0 %vm8600_vm2, %v13460_v11  ;;  %v3022_v50 = vadd.f32 %v10302_v62, %v2759_v9  ;;  %v3453_v22 = vmax.f32 %v3197_v57, 0.0  ;;  %v3262_v38 = vmax.f32 %v3006_v53, 0.0 }
 0x1e3   :  { %v3501_v41 = vmax.f32 %v3261_v28, %v3277_v40  ;;  %v3596_v39 = vmax.f32 %v3452_v21, %v3468_v4  ;;  %v10786_v3 = vpack.i.bf16 %v10772_v32, %v10724_v61  ;;  %v1610_v16 = vpop.f32.mrb[134].mxu0  ;;  %v2613_v6 = vpop.f32.mrb[134].mxu1  ;;  %v3454_v60 = vmax.f32 %v3198_v37, 0.0 }
 0x1e4   :  { %v3213_v58 = vadd.f32 %v10302_v62, %v2950_v25  ;;  %v3278_v34 = vmax.f32 %v3022_v50, 0.0  ;;  %v2951_v12 = vmul.f32 %v10273_v10, %v2613_v6  ;;  %v6969_v20 = vpop.f32.mrb[135].mxu0  ;;  %v7578_v51 = vpop.f32.mrb[135].mxu1  ;;  %v175_v50 = vld [vmem:[%s13397_s0 + $0x3e8] sm:$0xff]  ;;  %v176_v6 = vld [vmem:[%s13397_s0 + $0x3f0] sm:$0xff] }
 0x1e5   :  { %v10789_v24 = vmax.f32 %v3595_v33, %v3596_v39  ;;  %7127 = vmatmul.mubr.msk.f32.gmra.mrb[240].mxu0 %vm340_vm1, %v170_v18  ;;  %8200 = vrot.lane.b32.xlu1 %v10786_v3, %s8603_s2  ;;  %v177_v51 = vld [vmem:[%s13397_s0 + $0x3f8] sm:$0xff] }
 0x1e6   :  { %v3469_v56 = vmax.f32 %v3213_v58, 0.0  ;;  %8195 = vrot.lane.b32.xlu0 %v10786_v3, %s8604_s28  ;;  %7129 = vmatprep.mubr.msk.f32.mxu0 %vm8600_vm2, %v13460_v11  ;;  %v3502_v10 = vmax.f32 %v3262_v38, %v3278_v34  ;;  %v3214_v26 = vadd.f32 %v10302_v62, %v2951_v12  ;;  %v172_v62 = vld [vmem:[%s13397_s0 + $0x3d0] sm:$0xff] }
 0x1e7   :  { %13481 = vst [vmem:[#allocation21_spill] sm:$0xff] %v10789_v24  ;;  %v10803_v55 = vpop.f32.mrb[136].mxu0  ;;  %v2618_v52 = vpop.f32.mrb[136].mxu1 }
 0x1e8   :  { %v3597_v8 = vmax.f32 %v3453_v22, %v3469_v56  ;;  %v10805_v21 = vmax.f32 %v3501_v41, %v3502_v10  ;;  %v3470_v13 = vmax.f32 %v3214_v26, 0.0  ;;  %v6972_v49 = vpop.f32.mrb[137].mxu0  ;;  %v7581_v23 = vpop.f32.mrb[137].mxu1  ;;  %v178_v10 = vld [vmem:[%s13397_s0 + $0x400] sm:$0xff] }
 0x1e9   :  { %7130 = vmatmul.mubr.msk.f32.gmra.mrb[242].mxu0 %vm340_vm1, %v171_v59  ;;  %v179_v49 = vld [vmem:[%s13397_s0 + $0x408] sm:$0xff] }
 0x1ea   :  { %8205 = vrot.lane.b32.xlu0 %v10447_v45, %s8602_s19  ;;  %7132 = vmatprep.mubr.msk.f32.mxu0 %vm8600_vm2, %v13460_v11  ;;  %v3598_v28 = vmax.f32 %v3454_v60, %v3470_v13  ;;  %v173_v45 = vld [vmem:[%s13397_s0 + $0x3d8] sm:$0xff] }
 0x1eb   :  { %v10815_v53 = vpop.f32.mrb[138].mxu0  ;;  %v2622_v57 = vpop.f32.mrb[138].mxu1 }
 0x1ec   :  { %v10817_v33 = vmax.f32 %v3597_v8, %v3598_v28  ;;  %v6975_v44 = vpop.f32.mrb[139].mxu0  ;;  %v7584_v46 = vpop.f32.mrb[139].mxu1 }
 0x1ed   :  { %7133 = vmatmul.mubr.msk.f32.gmra.mrb[244].mxu0 %vm340_vm1, %v172_v62  ;;  %v180_v44 = vld [vmem:[%s13397_s0 + $0x410] sm:$0xff] }
 0x1ee   :  { %13482 = vst [vmem:[#allocation22_spill] sm:$0xff] %v10817_v33  ;;  %7135 = vmatprep.mubr.msk.f32.mxu0 %vm8600_vm2, %v13460_v11 }
 0x1ef   :  { %v10825_v40 = vpop.f32.mrb[140].mxu0  ;;  %v2626_v9 = vpop.f32.mrb[140].mxu1 }
 0x1f0   :  { %v6978_v4 = vpop.f32.mrb[141].mxu0  ;;  %v7587_v43 = vpop.f32.mrb[141].mxu1 }
 0x1f1   :  { %7136 = vmatmul.mubr.msk.f32.gmra.mrb[246].mxu0 %vm340_vm1, %v173_v45  ;;  %v181_v43 = vld [vmem:[%s13397_s0 + $0x418] sm:$0xff] }
 0x1f2   :  { %7138 = vmatprep.mubr.msk.f32.mxu0 %vm8600_vm2, %v13460_v11 }
 0x1f3   :  { %v10833_v37 = vpop.f32.mrb[142].mxu0  ;;  %v2630_v25 = vpop.f32.mrb[142].mxu1 }
 0x1f4   :  { %v6981_v18 = vpop.f32.mrb[143].mxu0  ;;  %v7590_v41 = vpop.f32.mrb[143].mxu1 }
 0x1f5   :  { %7139 = vmatmul.mubr.msk.f32.gmra.mrb[248].mxu0 %vm340_vm1, %v174_v14 }
 0x1f6   :  { %7141 = vmatprep.mubr.msk.f32.mxu0 %vm8600_vm2, %v13460_v11 }
 0x1f7   :  { %v10841_v39 = vpop.f32.mrb[144].mxu0  ;;  %v2634_v22 = vpop.f32.mrb[144].mxu1 }
 0x1f8   :  { %v6984_v58 = vpop.f32.mrb[145].mxu0  ;;  %v7593_v16 = vpop.f32.mrb[145].mxu1 }
 0x1f9   :  { %7142 = vmatmul.mubr.msk.f32.gmra.mrb[250].mxu0 %vm340_vm1, %v175_v50  ;;  %v182_v50 = vld [vmem:[%s13397_s0 + $0x420] sm:$0xff] }
 0x1fa   :  { %7144 = vmatprep.mubr.msk.f32.mxu0 %vm8600_vm2, %v13460_v11 }
 0x1fb   :  { %v10849_v38 = vpop.f32.mrb[146].mxu0  ;;  %v2638_v34 = vpop.f32.mrb[146].mxu1 }
 0x1fc   :  { %v6987_v12 = vpop.f32.mrb[147].mxu0  ;;  %v7596_v20 = vpop.f32.mrb[147].mxu1  ;;  %v183_v34 = vld [vmem:[%s13397_s0 + $0x428] sm:$0xff] }
 0x1fd   :  { %7145 = vmatmul.mubr.msk.f32.gmra.mrb[252].mxu0 %vm340_vm1, %v176_v6 }
 0x1fe   :  { %7147 = vmatprep.mubr.msk.f32.mxu0 %vm8600_vm2, %v13460_v11 }
 0x1ff   :  { %v10857_v56 = vpop.f32.mrb[148].mxu0 }
 0x200   :  { %v6990_v59 = vpop.f32.mrb[149].mxu0  ;;  %v2642_v60 = vpop.f32.mrb[148].mxu1 }
 0x201   :  { %7148 = vmatmul.mubr.msk.f32.gmra.mrb[254].mxu0 %vm340_vm1, %v177_v51  ;;  %v7599_v26 = vpop.f32.mrb[149].mxu1  ;;  %v184_v60 = vld [vmem:[%s13397_s0 + $0x430] sm:$0xff] }
 0x202   :  { %7150 = vmatprep.mubr.msk.f32.mxu0 %vm8600_vm2, %v13460_v11 }
 0x203   :  { %v10865_v8 = vpop.f32.mrb[150].mxu0 }
 0x204   :  { %v6993_v52 = vpop.f32.mrb[151].mxu0  ;;  %v2646_v13 = vpop.f32.mrb[150].mxu1 }
 0x205   :  { %7151 = vmatmul.mubr.msk.f32.gmra.mrb[0].mxu0 %vm340_vm1, %v178_v10  ;;  %v7602_v23 = vpop.f32.mrb[151].mxu1 }
 0x206   :  { %7153 = vmatprep.mubr.msk.f32.mxu0 %vm8600_vm2, %v13460_v11 }
 0x207   :  { %v10873_v62 = vpop.f32.mrb[152].mxu0 }
 0x208   :  { %v6996_v28 = vpop.f32.mrb[153].mxu0  ;;  %v2650_v57 = vpop.f32.mrb[152].mxu1 }
 0x209   :  { %7154 = vmatmul.mubr.msk.f32.gmra.mrb[2].mxu0 %vm340_vm1, %v179_v49  ;;  %v7605_v46 = vpop.f32.mrb[153].mxu1  ;;  %v185_v49 = vld [vmem:[%s13397_s0 + $0x438] sm:$0xff] }
 0x20a   :  { %7156 = vmatprep.mubr.msk.f32.mxu0 %vm8600_vm2, %v13460_v11  ;;  %v186_v46 = vld [vmem:[%s13397_s0 + $0x440] sm:$0xff] }
 0x20b   :  { %v10881_v45 = vpop.f32.mrb[154].mxu0 }
 0x20c   :  { %v6999_v9 = vpop.f32.mrb[155].mxu0  ;;  %v2654_v4 = vpop.f32.mrb[154].mxu1 }
 0x20d   :  { %7157 = vmatmul.mubr.msk.f32.gmra.mrb[4].mxu0 %vm340_vm1, %v180_v44  ;;  %v7608_v14 = vpop.f32.mrb[155].mxu1 }
 0x20e   :  { %7159 = vmatprep.mubr.msk.f32.mxu0 %vm8600_vm2, %v13460_v11 }
 0x20f   :  { %v10889_v25 = vpop.f32.mrb[156].mxu0 }
 0x210   :  { %v7002_v18 = vpop.f32.mrb[157].mxu0  ;;  %v2658_v41 = vpop.f32.mrb[156].mxu1 }
 0x211   :  { %7160 = vmatmul.mubr.msk.f32.gmra.mrb[6].mxu0 %vm340_vm1, %v181_v43  ;;  %v7611_v22 = vpop.f32.mrb[157].mxu1  ;;  %v187_v18 = vld [vmem:[%s13397_s0 + $0x448] sm:$0xff] }
 0x212   :  { %7162 = vmatprep.mubr.msk.f32.mxu0 %vm8600_vm2, %v13460_v11 }
 0x213   :  { %v10897_v58 = vpop.f32.mrb[158].mxu0 }
 0x214   :  { %v7005_v16 = vpop.f32.mrb[159].mxu0  ;;  %v2662_v6 = vpop.f32.mrb[158].mxu1 }
 0x215   :  { %7163 = vmatmul.mubr.msk.f32.gmra.mrb[8].mxu0 %vm340_vm1, %v182_v50  ;;  %v7614_v12 = vpop.f32.mrb[159].mxu1 }
 0x216   :  { %7165 = vmatprep.mubr.msk.f32.mxu0 %vm8600_vm2, %v13460_v11 }
 0x217   :  { %v10905_v20 = vpop.f32.mrb[160].mxu0 }
 0x218   :  { %v7008_v51 = vpop.f32.mrb[161].mxu0  ;;  %v2666_v59 = vpop.f32.mrb[160].mxu1 }
 0x219   :  { %7166 = vmatmul.mubr.msk.f32.gmra.mrb[10].mxu0 %vm340_vm1, %v183_v34  ;;  %v7617_v10 = vpop.f32.mrb[161].mxu1  ;;  %v10944_v34 = vld [vmem:[%s13399_s3] ss:$0 sm:$0xff] }
 0x21a   :  { %7168 = vmatprep.mubr.msk.f32.mxu0 %vm8600_vm2, %v13460_v11  ;;  %v2760_v12 = vmul.f32 %v10944_v34, %v10803_v55  ;;  %v8108_v10 = vunpack.i.h.bf16 %v10293_v36  ;;  %v10963_v36 = vld [vmem:[%s13400_s4] ss:$0 sm:$0xff] }
 0x21b   :  { %v10913_v26 = vpop.f32.mrb[162].mxu0 }
 0x21c   :  { %v7011_v52 = vpop.f32.mrb[163].mxu0  ;;  %v2670_v13 = vpop.f32.mrb[162].mxu1 }
 0x21d   :  { %7169 = vmatmul.mubr.msk.f32.gmra.mrb[12].mxu0 %vm340_vm1, %v184_v60  ;;  %v7620_v23 = vpop.f32.mrb[163].mxu1  ;;  %v188_v52 = vld [vmem:[%s13397_s0 + $0x450] sm:$0xff] }
 0x21e   :  { %7171 = vmatprep.mubr.msk.f32.mxu0 %vm8600_vm2, %v13460_v11 }
 0x21f   :  { %v10921_v28 = vpop.f32.mrb[164].mxu0 }
 0x220   :  { %v7014_v57 = vpop.f32.mrb[165].mxu0  ;;  %v2674_v44 = vpop.f32.mrb[164].mxu1 }
 0x221   :  { %7172 = vmatmul.mubr.msk.f32.gmra.mrb[14].mxu0 %vm340_vm1, %v185_v49  ;;  %v7623_v9 = vpop.f32.mrb[165].mxu1  ;;  %v3023_v44 = vadd.f32 %v10963_v36, %v2760_v12 }
 0x222   :  { %7174 = vmatprep.mubr.msk.f32.mxu0 %vm8600_vm2, %v13460_v11 }
 0x223   :  { %v10929_v4 = vpop.f32.mrb[166].mxu0 }
 0x224   :  { %v7017_v43 = vpop.f32.mrb[167].mxu0  ;;  %v2678_v14 = vpop.f32.mrb[166].mxu1 }
 0x225   :  { %7175 = vmatmul.mubr.msk.f32.gmra.mrb[16].mxu0 %vm340_vm1, %v186_v46  ;;  %v7626_v41 = vpop.f32.mrb[167].mxu1  ;;  %v2761_v46 = vmul.f32 %v10944_v34, %v10815_v53  ;;  %v4315_v14 = vsel %vm4313_vm3, 0.0, %v8108_v10 }
 0x226   :  { %7177 = vmatprep.mubr.msk.f32.mxu0 %vm8600_vm2, %v13460_v11  ;;  %v8156_v50 = vpop.permute.xlu0 %8155 }
 0x227   :  { %v10937_v22 = vunpack.i.l.bf16 %v8156_v50  ;;  %v10939_v16 = vpop.permute.xlu1 %8150  ;;  %v1694_v6 = vpop.f32.mrb[168].mxu0  ;;  %v8158_v55 = vunpack.i.h.bf16 %v8156_v50  ;;  %v4397_v50 = vsel %vm4387_vm4, %v4315_v14, %v10337_v15  ;;  %v3024_v10 = vadd.f32 %v10963_v36, %v2761_v46 }
 0x228   :  { %v8152_v51 = vunpack.i.l.bf16 %v10939_v16  ;;  %v7020_v59 = vpop.f32.mrb[169].mxu0  ;;  %v2682_v60 = vpop.f32.mrb[168].mxu1  ;;  %v2762_v6 = vmul.f32 %v10944_v34, %v10825_v40  ;;  %v190_v40 = vld [vmem:[%s13397_s0 + $0x460] sm:$0xff]  ;;  %v2763_v46 = vmul.f32 %v10944_v34, %v10833_v37 }
 0x229   :  { %7178 = vmatmul.mubr.msk.f32.gmra.mrb[18].mxu0 %vm340_vm1, %v187_v18  ;;  %v7629_v13 = vpop.f32.mrb[169].mxu1  ;;  %v189_v18 = vld [vmem:[%s13397_s0 + $0x458] sm:$0xff]  ;;  %v4479_v59 = vsel %vm4469_vm5, %v4397_v50, %v8158_v55  ;;  %v3279_v60 = vmax.f32 %v3023_v44, 0.0 }
 0x22a   :  { %7180 = vmatprep.mubr.msk.f32.mxu0 %vm8600_vm2, %v13460_v11  ;;  %v4396_v49 = vsel %vm4387_vm4, %v10362_v48, %v8152_v51  ;;  %v3025_v44 = vadd.f32 %v10963_v36, %v2762_v6 }
 0x22b   :  { %v1698_v23 = vpop.f32.mrb[170].mxu0  ;;  %v4478_v57 = vsel %vm4469_vm5, %v4396_v49, %v10937_v22  ;;  %v8161_v12 = vpop.permute.xlu1 %8160 }
 0x22c   :  { %v2776_v9 = vmul.f32 %v10944_v34, %v1698_v23  ;;  %7690 = vmatmul.mubr.f32.gmra.mrb[188].mxu1 %v4478_v57  ;;  %v7023_v43 = vpop.f32.mrb[171].mxu0  ;;  %v2686_v48 = vpop.f32.mrb[170].mxu1  ;;  %v8162_v55 = vunpack.i.l.bf16 %v8161_v12 }
 0x22d   :  { %7181 = vmatmul.mubr.msk.f32.gmra.mrb[20].mxu0 %vm340_vm1, %v188_v52  ;;  %7692 = vmatprep.mubr.msk.f32.mxu1 %vm8600_vm2, %v13460_v11  ;;  %v7632_v53 = vpop.f32.mrb[171].mxu1  ;;  %v3280_v43 = vmax.f32 %v3024_v10, 0.0 }
 0x22e   :  { %7183 = vmatprep.mubr.msk.f32.mxu0 %vm8600_vm2, %v13460_v11  ;;  %v3039_v41 = vadd.f32 %v10963_v36, %v2776_v9  ;;  %v8163_v53 = vunpack.i.h.bf16 %v8161_v12  ;;  %v8153_v12 = vunpack.i.h.bf16 %v10939_v16  ;;  %v192_v16 = vld [vmem:[%s13397_s0 + $0x470] sm:$0xff] }
 0x22f   :  { %v1703_v51 = vpop.f32.mrb[172].mxu0 }
 0x230   :  { %v3295_v52 = vmax.f32 %v3039_v41, 0.0  ;;  %v2777_v13 = vmul.f32 %v10944_v34, %v1703_v51  ;;  %7693 = vmatmul.mubr.f32.gmra.mrb[190].mxu1 %v4479_v59  ;;  %v7026_v49 = vpop.f32.mrb[173].mxu0  ;;  %v191_v41 = vld [vmem:[%s13397_s0 + $0x468] sm:$0xff]  ;;  %v4316_v51 = vsel %vm4313_vm3, %v9753_v17, %v8162_v55  ;;  %v3281_v59 = vmax.f32 %v3025_v44, 0.0 }
 0x231   :  { %7184 = vmatmul.mubr.msk.f32.gmra.mrb[22].mxu0 %vm340_vm1, %v189_v18  ;;  %7695 = vmatprep.mubr.msk.f32.mxu1 %vm8600_vm2, %v13460_v11  ;;  %v2764_v49 = vmul.f32 %v10944_v34, %v10841_v39  ;;  %v4398_v44 = vsel %vm4387_vm4, %v4316_v51, %v8153_v12  ;;  %v4317_v39 = vsel %vm4313_vm3, %v9809_v19, %v8163_v53 }
 0x232   :  { %7186 = vmatprep.mubr.msk.f32.mxu0 %vm8600_vm2, %v13460_v11  ;;  %v3503_v23 = vmax.f32 %v3279_v60, %v3295_v52  ;;  %v3040_v57 = vadd.f32 %v10963_v36, %v2777_v13  ;;  %v3026_v60 = vadd.f32 %v10963_v36, %v2763_v46 }
 0x233   :  { %v1708_v9 = vpop.f32.mrb[174].mxu0 }
 0x234   :  { %v3296_v48 = vmax.f32 %v3040_v57, 0.0  ;;  %v2778_v14 = vmul.f32 %v10944_v34, %v1708_v9  ;;  %v7029_v18 = vpop.f32.mrb[175].mxu0  ;;  %v3282_v51 = vmax.f32 %v3026_v60, 0.0  ;;  %v2766_v60 = vmul.f32 %v10944_v34, %v10857_v56  ;;  %v194_v56 = vld [vmem:[%s13397_s0 + $0x480] sm:$0xff] }
 0x235   :  { %7187 = vmatmul.mubr.msk.f32.gmra.mrb[24].mxu0 %vm340_vm1, %v190_v40 }
 0x236   :  { %7189 = vmatprep.mubr.msk.f32.mxu0 %vm8600_vm2, %v13460_v11  ;;  %v3504_v50 = vmax.f32 %v3280_v43, %v3296_v48  ;;  %v3041_v6 = vadd.f32 %v10963_v36, %v2778_v14 }
 0x237   :  { %v1713_v13 = vpop.f32.mrb[176].mxu0 }
 0x238   :  { %v11006_v37 = vpop.permute.xlu1 %8170  ;;  %v8166_v52 = vpop.permute.xlu0 %8165  ;;  %v11015_v40 = vmax.f32 %v3503_v23, %v3504_v50  ;;  %v3297_v57 = vmax.f32 %v3041_v6, 0.0  ;;  %v2779_v55 = vmul.f32 %v10944_v34, %v1713_v13  ;;  %v3027_v50 = vadd.f32 %v10963_v36, %v2764_v49 }
 0x239   :  { %v8172_v10 = vunpack.i.l.bf16 %v11006_v37  ;;  %v8167_v9 = vunpack.i.l.bf16 %v8166_v52  ;;  %v7032_v43 = vpop.f32.mrb[177].mxu0  ;;  %7190 = vmatmul.mubr.msk.f32.gmra.mrb[26].mxu0 %vm340_vm1, %v191_v41  ;;  %v8168_v17 = vunpack.i.h.bf16 %v8166_v52  ;;  %v2765_v6 = vmul.f32 %v10944_v34, %v10849_v38  ;;  %v193_v38 = vld [vmem:[%s13397_s0 + $0x478] sm:$0xff] }
 0x23a   :  { %7192 = vmatprep.mubr.msk.f32.mxu0 %vm8600_vm2, %v13460_v11  ;;  %v3505_v23 = vmax.f32 %v3281_v59, %v3297_v57  ;;  %v11030_v48 = vpack.i.bf16 %v11015_v40, %v10805_v21  ;;  %v3042_v14 = vadd.f32 %v10963_v36, %v2779_v55  ;;  %v3283_v57 = vmax.f32 %v3027_v50, 0.0 }
 0x23b   :  { %v4480_v46 = vsel %vm4469_vm5, %v4398_v44, %v8167_v9  ;;  %v1718_v18 = vpop.f32.mrb[178].mxu0  ;;  %v4399_v41 = vsel %vm4387_vm4, %v4317_v39, %v8172_v10  ;;  %v3028_v9 = vadd.f32 %v10963_v36, %v2765_v6 }
 0x23c   :  { %7696 = vmatmul.mubr.f32.gmra.mrb[192].mxu1 %v4480_v46  ;;  %v2780_v19 = vmul.f32 %v10944_v34, %v1718_v18  ;;  %8215 = vrot.lane.b32.xlu0 %v11030_v48, %s8603_s2  ;;  %v7035_v53 = vpop.f32.mrb[179].mxu0  ;;  %v3298_v59 = vmax.f32 %v3042_v14, 0.0  ;;  %v4481_v10 = vsel %vm4469_vm5, %v4399_v41, %v8168_v17  ;;  %v8176_v13 = vpop.permute.xlu0 %8175  ;;  %v3029_v14 = vadd.f32 %v10963_v36, %v2766_v60 }
 0x23d   :  { %7193 = vmatmul.mubr.msk.f32.gmra.mrb[28].mxu0 %vm340_vm1, %v192_v16  ;;  %8210 = vrot.lane.b32.xlu1 %v11030_v48, %s8604_s28  ;;  %v8177_v16 = vunpack.i.l.bf16 %v8176_v13  ;;  %v3284_v41 = vmax.f32 %v3028_v9, 0.0  ;;  %v195_v53 = vld [vmem:[%s13397_s0 + $0x488] sm:$0xff]  ;;  %v8173_v60 = vunpack.i.h.bf16 %v11006_v37  ;;  %v196_v37 = vld [vmem:[%s13397_s0 + $0x490] sm:$0xff] }
 0x23e   :  { %7698 = vmatprep.mubr.msk.f32.mxu1 %vm8600_vm2, %v13460_v11  ;;  %v3043_v12 = vadd.f32 %v10963_v36, %v2780_v19  ;;  %7195 = vmatprep.mubr.msk.f32.mxu0 %vm8600_vm2, %v13460_v11  ;;  %v3506_v52 = vmax.f32 %v3282_v51, %v3298_v59  ;;  %v8178_v19 = vunpack.i.h.bf16 %v8176_v13 }
 0x23f   :  { %v1723_v49 = vpop.f32.mrb[180].mxu0 }
 0x240   :  { %7699 = vmatmul.mubr.f32.gmra.mrb[194].mxu1 %v4481_v10  ;;  %v3299_v43 = vmax.f32 %v3043_v12, 0.0  ;;  %v2781_v55 = vmul.f32 %v10944_v34, %v1723_v49  ;;  %v7038_v44 = vpop.f32.mrb[181].mxu0  ;;  %v11059_v17 = vmax.f32 %v3505_v23, %v3506_v52  ;;  %v2767_v23 = vmul.f32 %v10944_v34, %v10865_v8 }
 0x241   :  { %7196 = vmatmul.mubr.msk.f32.gmra.mrb[30].mxu0 %vm340_vm1, %v193_v38  ;;  %7701 = vmatprep.mubr.msk.f32.mxu1 %vm8600_vm2, %v13460_v11  ;;  %v4318_v38 = vsel %vm4313_vm3, %v9861_v2, %v8177_v16  ;;  %v3285_v12 = vmax.f32 %v3029_v14, 0.0 }
 0x242   :  { %8220 = vrot.lane.b32.xlu1 %v10569_v54, %s8602_s19  ;;  %7198 = vmatprep.mubr.msk.f32.mxu0 %vm8600_vm2, %v13460_v11  ;;  %v3507_v39 = vmax.f32 %v3283_v57, %v3299_v43  ;;  %v3044_v46 = vadd.f32 %v10963_v36, %v2781_v55  ;;  %v3030_v10 = vadd.f32 %v10963_v36, %v2767_v23 }
 0x243   :  { %v1728_v18 = vpop.f32.mrb[182].mxu0  ;;  %v2768_v57 = vmul.f32 %v10944_v34, %v10873_v62  ;;  %v4400_v16 = vsel %vm4387_vm4, %v4318_v38, %v8173_v60  ;;  %v4319_v62 = vsel %vm4313_vm3, %v9919_v5, %v8178_v19  ;;  %v2770_v38 = vmul.f32 %v10944_v34, %v10889_v25  ;;  %v198_v25 = vld [vmem:[%s13397_s0 + $0x4a0] sm:$0xff] }
 0x244   :  { %v3300_v50 = vmax.f32 %v3044_v46, 0.0  ;;  %v2782_v54 = vmul.f32 %v10944_v34, %v1728_v18  ;;  %v7041_v6 = vpop.f32.mrb[183].mxu0  ;;  %v3286_v19 = vmax.f32 %v3030_v10, 0.0 }
 0x245   :  { %7199 = vmatmul.mubr.msk.f32.gmra.mrb[32].mxu0 %vm340_vm1, %v194_v56 }
 0x246   :  { %7201 = vmatprep.mubr.msk.f32.mxu0 %vm8600_vm2, %v13460_v11  ;;  %v3508_v51 = vmax.f32 %v3284_v41, %v3300_v50  ;;  %v3045_v59 = vadd.f32 %v10963_v36, %v2782_v54  ;;  %v3031_v50 = vadd.f32 %v10963_v36, %v2768_v57  ;;  %v2769_v54 = vmul.f32 %v10944_v34, %v10881_v45  ;;  %v197_v45 = vld [vmem:[%s13397_s0 + $0x498] sm:$0xff] }
 0x247   :  { %v11080_v8 = vpop.permute.xlu0 %8185  ;;  %v1733_v49 = vpop.f32.mrb[184].mxu0 }
 0x248   :  { %v8187_v52 = vunpack.i.l.bf16 %v11080_v8  ;;  %v8181_v13 = vpop.permute.xlu1 %8180  ;;  %v11089_v9 = vmax.f32 %v3507_v39, %v3508_v51  ;;  %v3301_v43 = vmax.f32 %v3045_v59, 0.0  ;;  %v7044_v44 = vpop.f32.mrb[185].mxu0  ;;  %v2783_v56 = vmul.f32 %v10944_v34, %v1733_v49 }
 0x249   :  { %v8182_v55 = vunpack.i.l.bf16 %v8181_v13  ;;  %7202 = vmatmul.mubr.msk.f32.gmra.mrb[34].mxu0 %vm340_vm1, %v195_v53  ;;  %v8183_v2 = vunpack.i.h.bf16 %v8181_v13  ;;  %v3032_v13 = vadd.f32 %v10963_v36, %v2769_v54 }
 0x24a   :  { %7204 = vmatprep.mubr.msk.f32.mxu0 %vm8600_vm2, %v13460_v11  ;;  %v3509_v39 = vmax.f32 %v3285_v12, %v3301_v43  ;;  %v11104_v14 = vpack.i.bf16 %v11089_v9, %v11059_v17  ;;  %v3046_v23 = vadd.f32 %v10963_v36, %v2783_v56  ;;  %v4401_v41 = vsel %vm4387_vm4, %v4319_v62, %v8187_v52 }
 0x24b   :  { %v4482_v46 = vsel %vm4469_vm5, %v4400_v16, %v8182_v55  ;;  %v1738_v18 = vpop.f32.mrb[186].mxu0  ;;  %v4483_v59 = vsel %vm4469_vm5, %v4401_v41, %v8183_v2  ;;  %v3287_v52 = vmax.f32 %v3031_v50, 0.0  ;;  %v3033_v16 = vadd.f32 %v10963_v36, %v2770_v38  ;;  %v199_v41 = vld [vmem:[%s13397_s0 + $0x4a8] sm:$0xff] }
 0x24c   :  { %7702 = vmatmul.mubr.f32.gmra.mrb[196].mxu1 %v4482_v46  ;;  %v2784_v5 = vmul.f32 %v10944_v34, %v1738_v18  ;;  %8230 = vrot.lane.b32.xlu1 %v11104_v14, %s8603_s2  ;;  %v7047_v6 = vpop.f32.mrb[187].mxu0  ;;  %v3302_v53 = vmax.f32 %v3046_v23, 0.0  ;;  %v8191_v10 = vpop.permute.xlu1 %8190  ;;  %v2772_v38 = vmul.f32 %v10944_v34, %v10905_v20  ;;  %v13483_v20 = vld [vmem:[#allocation7_spill] sm:$0xff] }
 0x24d   :  { %7205 = vmatmul.mubr.msk.f32.gmra.mrb[36].mxu0 %vm340_vm1, %v196_v37  ;;  %8225 = vrot.lane.b32.xlu0 %v11104_v14, %s8604_s28  ;;  %v8192_v44 = vunpack.i.l.bf16 %v8191_v10  ;;  %v2771_v37 = vmul.f32 %v10944_v34, %v10897_v58  ;;  %v8193_v18 = vunpack.i.h.bf16 %v8191_v10  ;;  %v3289_v6 = vmax.f32 %v3033_v16, 0.0 }
 0x24e   :  { %7704 = vmatprep.mubr.msk.f32.mxu1 %vm8600_vm2, %v13460_v11  ;;  %v3047_v51 = vadd.f32 %v10963_v36, %v2784_v5  ;;  %7207 = vmatprep.mubr.msk.f32.mxu0 %vm8600_vm2, %v13460_v11  ;;  %v3510_v12 = vmax.f32 %v3286_v19, %v3302_v53  ;;  %v8188_v53 = vunpack.i.h.bf16 %v11080_v8  ;;  %v200_v8 = vld [vmem:[%s13397_s0 + $0x4b0] sm:$0xff] }
 0x24f   :  { %v1743_v60 = vpop.f32.mrb[188].mxu0  ;;  %v4320_v5 = vsel %vm4313_vm3, %v9973_v47, %v8192_v44  ;;  %v3034_v19 = vadd.f32 %v10963_v36, %v2771_v37  ;;  %v3035_v37 = vadd.f32 %v10963_v36, %v2772_v38 }
 0x250   :  { %7705 = vmatmul.mubr.f32.gmra.mrb[198].mxu1 %v4483_v59  ;;  %v3303_v49 = vmax.f32 %v3047_v51, 0.0  ;;  %v2785_v57 = vmul.f32 %v10944_v34, %v1743_v60  ;;  %v7050_v43 = vpop.f32.mrb[189].mxu0  ;;  %v11133_v55 = vmax.f32 %v3509_v39, %v3510_v12  ;;  %v3288_v39 = vmax.f32 %v3032_v13, 0.0 }
 0x251   :  { %7208 = vmatmul.mubr.msk.f32.gmra.mrb[38].mxu0 %vm340_vm1, %v197_v45  ;;  %7707 = vmatprep.mubr.msk.f32.mxu1 %vm8600_vm2, %v13460_v11 }
 0x252   :  { %8235 = vrot.lane.b32.xlu0 %v10694_v7, %s8602_s19  ;;  %7210 = vmatprep.mubr.msk.f32.mxu0 %vm8600_vm2, %v13460_v11  ;;  %v3511_v2 = vmax.f32 %v3287_v52, %v3303_v49  ;;  %v3048_v56 = vadd.f32 %v10963_v36, %v2785_v57  ;;  %v4402_v49 = vsel %vm4387_vm4, %v4320_v5, %v8188_v53 }
 0x253   :  { %v1748_v62 = vpop.f32.mrb[190].mxu0  ;;  %v4321_v57 = vsel %vm4313_vm3, %v13483_v20, %v8193_v18  ;;  %v203_v20 = vld [vmem:[%s13397_s0 + $0x4c8] sm:$0xff] }
 0x254   :  { %v3304_v46 = vmax.f32 %v3048_v56, 0.0  ;;  %v2786_v7 = vmul.f32 %v10944_v34, %v1748_v62  ;;  %v7053_v23 = vpop.f32.mrb[191].mxu0  ;;  %v2773_v62 = vmul.f32 %v10944_v34, %v10913_v26  ;;  %v201_v26 = vld [vmem:[%s13397_s0 + $0x4b8] sm:$0xff] }
 0x255   :  { %7211 = vmatmul.mubr.msk.f32.gmra.mrb[40].mxu0 %vm340_vm1, %v198_v25 }
 0x256   :  { %7213 = vmatprep.mubr.msk.f32.mxu0 %vm8600_vm2, %v13460_v11  ;;  %v3512_v50 = vmax.f32 %v3288_v39, %v3304_v46  ;;  %v3049_v54 = vadd.f32 %v10963_v36, %v2786_v7  ;;  %v3290_v7 = vmax.f32 %v3034_v19, 0.0  ;;  %v3036_v19 = vadd.f32 %v10963_v36, %v2773_v62 }
 0x257   :  { %v11154_v58 = vpop.permute.xlu1 %8200  ;;  %v1753_v59 = vpop.f32.mrb[192].mxu0 }
 0x258   :  { %v8202_v45 = vunpack.i.l.bf16 %v11154_v58  ;;  %v8196_v51 = vpop.permute.xlu0 %8195  ;;  %v11163_v12 = vmax.f32 %v3511_v2, %v3512_v50  ;;  %v3305_v10 = vmax.f32 %v3049_v54, 0.0  ;;  %v7056_v52 = vpop.f32.mrb[193].mxu0  ;;  %v2787_v13 = vmul.f32 %v10944_v34, %v1753_v59 }
 0x259   :  { %v8197_v60 = vunpack.i.l.bf16 %v8196_v51  ;;  %7214 = vmatmul.mubr.msk.f32.gmra.mrb[42].mxu0 %vm340_vm1, %v199_v41  ;;  %v8198_v47 = vunpack.i.h.bf16 %v8196_v51  ;;  %v2774_v50 = vmul.f32 %v10944_v34, %v10921_v28  ;;  %v202_v28 = vld [vmem:[%s13397_s0 + $0x4c0] sm:$0xff] }
 0x25a   :  { %7216 = vmatprep.mubr.msk.f32.mxu0 %vm8600_vm2, %v13460_v11  ;;  %v3513_v43 = vmax.f32 %v3289_v6, %v3305_v10  ;;  %v11178_v44 = vpack.i.bf16 %v11163_v12, %v11133_v55  ;;  %v3050_v2 = vadd.f32 %v10963_v36, %v2787_v13  ;;  %v4403_v16 = vsel %vm4387_vm4, %v4321_v57, %v8202_v45 }
 0x25b   :  { %v4484_v25 = vsel %vm4469_vm5, %v4402_v49, %v8197_v60  ;;  %v1758_v56 = vpop.f32.mrb[194].mxu0  ;;  %v4485_v41 = vsel %vm4469_vm5, %v4403_v16, %v8198_v47  ;;  %v3291_v6 = vmax.f32 %v3035_v37, 0.0  ;;  %v3037_v60 = vadd.f32 %v10963_v36, %v2774_v50 }
 0x25c   :  { %7708 = vmatmul.mubr.f32.gmra.mrb[200].mxu1 %v4484_v25  ;;  %v2788_v39 = vmul.f32 %v10944_v34, %v1758_v56  ;;  %8245 = vrot.lane.b32.xlu0 %v11178_v44, %s8603_s2  ;;  %v7059_v46 = vpop.f32.mrb[195].mxu0  ;;  %v3306_v23 = vmax.f32 %v3050_v2, 0.0  ;;  %v3292_v47 = vmax.f32 %v3036_v19, 0.0  ;;  %v2775_v13 = vmul.f32 %v10944_v34, %v10929_v4 }
 0x25d   :  { %7217 = vmatmul.mubr.msk.f32.gmra.mrb[44].mxu0 %vm340_vm1, %v200_v8  ;;  %8240 = vrot.lane.b32.xlu1 %v11178_v44, %s8604_s28  ;;  %v3293_v25 = vmax.f32 %v3037_v60, 0.0  ;;  %v208_v60 = vld [vmem:[%s13397_s0 + $0x4f0] sm:$0xff] }
 0x25e   :  { %7710 = vmatprep.mubr.msk.f32.mxu1 %vm8600_vm2, %v13460_v11  ;;  %v3051_v18 = vadd.f32 %v10963_v36, %v2788_v39  ;;  %7219 = vmatprep.mubr.msk.f32.mxu0 %vm8600_vm2, %v13460_v11  ;;  %v3514_v54 = vmax.f32 %v3290_v7, %v3306_v23  ;;  %v3038_v4 = vadd.f32 %v10963_v36, %v2775_v13  ;;  %v204_v39 = vld [vmem:[%s13397_s0 + $0x4d0] sm:$0xff] }
 0x25f   :  { %v1763_v5 = vpop.f32.mrb[196].mxu0 }
 0x260   :  { %7711 = vmatmul.mubr.f32.gmra.mrb[202].mxu1 %v4485_v41  ;;  %v3307_v53 = vmax.f32 %v3051_v18, 0.0  ;;  %v2789_v45 = vmul.f32 %v10944_v34, %v1763_v5  ;;  %v7062_v51 = vpop.f32.mrb[197].mxu0  ;;  %v11207_v59 = vmax.f32 %v3513_v43, %v3514_v54  ;;  %v3294_v18 = vmax.f32 %v3038_v4, 0.0  ;;  %v205_v54 = vld [vmem:[%s13397_s0 + $0x4d8] sm:$0xff] }
 0x261   :  { %7220 = vmatmul.mubr.msk.f32.gmra.mrb[46].mxu0 %vm340_vm1, %v201_v26  ;;  %7713 = vmatprep.mubr.msk.f32.mxu1 %vm8600_vm2, %v13460_v11 }
 0x262   :  { %13484 = vst [vmem:[#allocation7_spill] sm:$0xff] %v11207_v59  ;;  %8250 = vrot.lane.b32.xlu1 %v10786_v3, %s8602_s19  ;;  %7222 = vmatprep.mubr.msk.f32.mxu0 %vm8600_vm2, %v13460_v11  ;;  %v3515_v38 = vmax.f32 %v3291_v6, %v3307_v53  ;;  %v3052_v10 = vadd.f32 %v10963_v36, %v2789_v45  ;;  %v206_v45 = vld [vmem:[%s13397_s0 + $0x4e0] sm:$0xff] }
 0x263   :  { %v1768_v52 = vpop.f32.mrb[198].mxu0 }
 0x264   :  { %v3308_v49 = vmax.f32 %v3052_v10, 0.0  ;;  %v2790_v3 = vmul.f32 %v10944_v34, %v1768_v52  ;;  %v7065_v8 = vpop.f32.mrb[199].mxu0 }
 0x265   :  { %7223 = vmatmul.mubr.msk.f32.gmra.mrb[48].mxu0 %vm340_vm1, %v202_v28 }
 0x266   :  { %7225 = vmatprep.mubr.msk.f32.mxu0 %vm8600_vm2, %v13460_v11  ;;  %v3516_v57 = vmax.f32 %v3292_v47, %v3308_v49  ;;  %v3053_v43 = vadd.f32 %v10963_v36, %v2790_v3  ;;  %v209_v49 = vld [vmem:[%s13397_s0 + $0x4f8] sm:$0xff] }
 0x267   :  { %v1773_v2 = vpop.f32.mrb[200].mxu0 }
 0x268   :  { %v11229_v56 = vmax.f32 %v3515_v38, %v3516_v57  ;;  %v3309_v16 = vmax.f32 %v3053_v43, 0.0  ;;  %v2791_v37 = vmul.f32 %v10944_v34, %v1773_v2  ;;  %v7068_v62 = vpop.f32.mrb[201].mxu0  ;;  %v207_v38 = vld [vmem:[%s13397_s0 + $0x4e8] sm:$0xff]  ;;  %v210_v43 = vld [vmem:[%s13397_s0 + $0x500] sm:$0xff] }
 0x269   :  { %7226 = vmatmul.mubr.msk.f32.gmra.mrb[50].mxu0 %vm340_vm1, %v203_v20 }
 0x26a   :  { %13485 = vst [vmem:[#allocation23_spill] sm:$0xff] %v11229_v56  ;;  %7228 = vmatprep.mubr.msk.f32.mxu0 %vm8600_vm2, %v13460_v11  ;;  %v3517_v46 = vmax.f32 %v3293_v25, %v3309_v16  ;;  %v3054_v7 = vadd.f32 %v10963_v36, %v2791_v37  ;;  %v11241_v23 = vpack.i.bf16 %v11229_v56, %v11207_v59  ;;  %v211_v16 = vld [vmem:[%s13397_s0 + $0x508] sm:$0xff] }
 0x26b   :  { %v1778_v26 = vpop.f32.mrb[202].mxu0 }
 0x26c   :  { %v3310_v41 = vmax.f32 %v3054_v7, 0.0  ;;  %8260 = vrot.lane.b32.xlu1 %v11241_v23, %s8603_s2  ;;  %v7071_v50 = vpop.f32.mrb[203].mxu0  ;;  %8255 = vrot.lane.b32.xlu0 %v11241_v23, %s8604_s28 }
 0x26d   :  { %7229 = vmatmul.mubr.msk.f32.gmra.mrb[52].mxu0 %vm340_vm1, %v204_v39  ;;  %v212_v39 = vld [vmem:[%s13397_s0 + $0x510] sm:$0xff] }
 0x26e   :  { %7231 = vmatprep.mubr.msk.f32.mxu0 %vm8600_vm2, %v13460_v11  ;;  %v3518_v5 = vmax.f32 %v3294_v18, %v3310_v41  ;;  %v213_v18 = vld [vmem:[%s13397_s0 + $0x518] sm:$0xff] }
 0x26f   :  { %v11253_v6 = vpop.f32.mrb[204].mxu0 }
 0x270   :  { %v11255_v19 = vmax.f32 %v3517_v46, %v3518_v5  ;;  %v7074_v53 = vpop.f32.mrb[205].mxu0  ;;  %8265 = vrot.lane.b32.xlu0 %v11030_v48, %s8602_s19  ;;  %v2792_v24 = vmul.f32 %v10944_v34, %v11253_v6  ;;  %v13488_v6 = vld [vmem:[#allocation13_spill] sm:$0xff] }
 0x271   :  { %7232 = vmatmul.mubr.msk.f32.gmra.mrb[54].mxu0 %vm340_vm1, %v205_v54  ;;  %v214_v53 = vld [vmem:[%s13397_s0 + $0x520] sm:$0xff] }
 0x272   :  { %7234 = vmatprep.mubr.msk.f32.mxu0 %vm8600_vm2, %v13460_v11 }
 0x273   :  { %v11265_v51 = vpop.f32.mrb[206].mxu0 }
 0x274   :  { %v7077_v28 = vpop.f32.mrb[207].mxu0 }
 0x275   :  { %7235 = vmatmul.mubr.msk.f32.gmra.mrb[56].mxu0 %vm340_vm1, %v206_v45 }
 0x276   :  { %7237 = vmatprep.mubr.msk.f32.mxu0 %vm8600_vm2, %v13460_v11 }
 0x277   :  { %v11273_v48 = vpop.f32.mrb[208].mxu0 }
 0x278   :  { %v7080_v10 = vpop.f32.mrb[209].mxu0 }
 0x279   :  { %7238 = vmatmul.mubr.msk.f32.gmra.mrb[58].mxu0 %vm340_vm1, %v207_v38  ;;  %v215_v10 = vld [vmem:[%s13397_s0 + $0x528] sm:$0xff] }
 0x27a   :  { %7240 = vmatprep.mubr.msk.f32.mxu0 %vm8600_vm2, %v13460_v11 }
 0x27b   :  { %v11281_v52 = vpop.f32.mrb[210].mxu0 }
 0x27c   :  { %v7083_v47 = vpop.f32.mrb[211].mxu0 }
 0x27d   :  { %7241 = vmatmul.mubr.msk.f32.gmra.mrb[60].mxu0 %vm340_vm1, %v208_v60  ;;  %v11284_v13 = vpop.f32.mrb[172].mxu1 }
 0x27e   :  { %7243 = vmatprep.mubr.msk.f32.mxu0 %vm8600_vm2, %v13460_v11  ;;  %v7667_v3 = vpop.f32.mrb[173].mxu1 }
 0x27f   :  { %v11291_v8 = vpop.f32.mrb[212].mxu0 }
 0x280   :  { %v7086_v20 = vpop.f32.mrb[213].mxu0 }
 0x281   :  { %7244 = vmatmul.mubr.msk.f32.gmra.mrb[62].mxu0 %vm340_vm1, %v209_v49  ;;  %v11294_v57 = vpop.f32.mrb[174].mxu1  ;;  %v216_v49 = vld [vmem:[%s13397_s0 + $0x530] sm:$0xff] }
 0x282   :  { %7246 = vmatprep.mubr.msk.f32.mxu0 %vm8600_vm2, %v13460_v11  ;;  %v7670_v25 = vpop.f32.mrb[175].mxu1 }
 0x283   :  { %v11301_v2 = vpop.f32.mrb[214].mxu0  ;;  %v217_v25 = vld [vmem:[%s13397_s0 + $0x538] sm:$0xff] }
 0x284   :  { %v7089_v4 = vpop.f32.mrb[215].mxu0 }
 0x285   :  { %7247 = vmatmul.mubr.msk.f32.gmra.mrb[64].mxu0 %vm340_vm1, %v210_v43 }
 0x286   :  { %7249 = vmatprep.mubr.msk.f32.mxu0 %vm8600_vm2, %v13460_v11 }
 0x287   :  { %v11309_v37 = vpop.f32.mrb[216].mxu0 }
 0x288   :  { %v7092_v62 = vpop.f32.mrb[217].mxu0 }
 0x289   :  { %7250 = vmatmul.mubr.msk.f32.gmra.mrb[66].mxu0 %vm340_vm1, %v211_v16 }
 0x28a   :  { %7252 = vmatprep.mubr.msk.f32.mxu0 %vm8600_vm2, %v13460_v11 }
 0x28b   :  { %v11317_v46 = vpop.f32.mrb[218].mxu0 }
 0x28c   :  { %v7095_v7 = vpop.f32.mrb[219].mxu0 }
 0x28d   :  { %7253 = vmatmul.mubr.msk.f32.gmra.mrb[68].mxu0 %vm340_vm1, %v212_v39  ;;  %v11320_v26 = vpop.f32.mrb[176].mxu1  ;;  %v218_v7 = vld [vmem:[%s13397_s0 + $0x540] sm:$0xff] }
 0x28e   :  { %7255 = vmatprep.mubr.msk.f32.mxu0 %vm8600_vm2, %v13460_v11  ;;  %v7673_v41 = vpop.f32.mrb[177].mxu1 }
 0x28f   :  { %v11327_v50 = vpop.f32.mrb[220].mxu0 }
 0x290   :  { %v7098_v54 = vpop.f32.mrb[221].mxu0 }
 0x291   :  { %7256 = vmatmul.mubr.msk.f32.gmra.mrb[70].mxu0 %vm340_vm1, %v213_v18  ;;  %v11330_v5 = vpop.f32.mrb[178].mxu1 }
 0x292   :  { %7258 = vmatprep.mubr.msk.f32.mxu0 %vm8600_vm2, %v13460_v11  ;;  %v7676_v45 = vpop.f32.mrb[179].mxu1 }
 0x293   :  { %v11337_v28 = vpop.f32.mrb[222].mxu0  ;;  %v8206_v45 = vpop.permute.xlu0 %8205 }
 0x294   :  { %v7101_v38 = vpop.f32.mrb[223].mxu0 }
 0x295   :  { %7259 = vmatmul.mubr.msk.f32.gmra.mrb[72].mxu0 %vm340_vm1, %v214_v53  ;;  %v219_v53 = vld [vmem:[%s13397_s0 + $0x548] sm:$0xff] }
 0x296   :  { %7261 = vmatprep.mubr.msk.f32.mxu0 %vm8600_vm2, %v13460_v11 }
 0x297   :  { %v11345_v60 = vpop.f32.mrb[224].mxu0 }
 0x298   :  { %v7104_v47 = vpop.f32.mrb[225].mxu0 }
 0x299   :  { %7262 = vmatmul.mubr.msk.f32.gmra.mrb[74].mxu0 %vm340_vm1, %v215_v10  ;;  %v220_v47 = vld [vmem:[%s13397_s0 + $0x550] sm:$0xff] }
 0x29a   :  { %7264 = vmatprep.mubr.msk.f32.mxu0 %vm8600_vm2, %v13460_v11 }
 0x29b   :  { %v11353_v3 = vpop.f32.mrb[226].mxu0 }
 0x29c   :  { %v7107_v20 = vpop.f32.mrb[227].mxu0 }
 0x29d   :  { %7265 = vmatmul.mubr.msk.f32.gmra.mrb[76].mxu0 %vm340_vm1, %v216_v49  ;;  %v8207_v49 = vunpack.i.l.bf16 %v8206_v45 }
 0x29e   :  { %v11356_v43 = vpop.f32.mrb[180].mxu1  ;;  %7267 = vmatprep.mubr.msk.f32.mxu0 %vm8600_vm2, %v13460_v11 }
 0x29f   :  { %v7679_v4 = vpop.f32.mrb[181].mxu1 }
 0x2a0   :  { %v11363_v16 = vpop.f32.mrb[228].mxu0 }
 0x2a1   :  { %v7110_v62 = vpop.f32.mrb[229].mxu0  ;;  %7268 = vmatmul.mubr.msk.f32.gmra.mrb[78].mxu0 %vm340_vm1, %v217_v25 }
 0x2a2   :  { %v11366_v39 = vpop.f32.mrb[182].mxu1  ;;  %7270 = vmatprep.mubr.msk.f32.mxu0 %vm8600_vm2, %v13460_v11  ;;  %v221_v62 = vld [vmem:[%s13397_s0 + $0x558] sm:$0xff] }
 0x2a3   :  { %v7682_v18 = vpop.f32.mrb[183].mxu1 }
 0x2a4   :  { %v11373_v41 = vpop.f32.mrb[230].mxu0 }
 0x2a5   :  { %v7113_v54 = vpop.f32.mrb[231].mxu0  ;;  %7271 = vmatmul.mubr.msk.f32.gmra.mrb[80].mxu0 %vm340_vm1, %v218_v7 }
 0x2a6   :  { %7273 = vmatprep.mubr.msk.f32.mxu0 %vm8600_vm2, %v13460_v11  ;;  %v13486_v54 = vld [vmem:[#allocation9_spill] sm:$0xff] }
 0x2a8   :  { %v11381_v38 = vpop.f32.mrb[232].mxu0 }
 0x2a9   :  { %v7116_v10 = vpop.f32.mrb[233].mxu0  ;;  %7274 = vmatmul.mubr.msk.f32.gmra.mrb[82].mxu0 %vm340_vm1, %v219_v53  ;;  %v4322_v53 = vsel %vm4313_vm3, %v13486_v54, %v8207_v49  ;;  %v8208_v49 = vunpack.i.h.bf16 %v8206_v45  ;;  %v2794_v45 = vmul.f32 %v10944_v34, %v11273_v48 }
 0x2aa   :  { %7276 = vmatprep.mubr.msk.f32.mxu0 %vm8600_vm2, %v13460_v11  ;;  %v8203_v10 = vunpack.i.h.bf16 %v11154_v58  ;;  %v222_v58 = vld [vmem:[%s13397_s0 + $0x560] sm:$0xff] }
 0x2ac   :  { %v11389_v20 = vpop.f32.mrb[234].mxu0 }
 0x2ad   :  { %v7119_v25 = vpop.f32.mrb[235].mxu0  ;;  %7277 = vmatmul.mubr.msk.f32.gmra.mrb[84].mxu0 %vm340_vm1, %v220_v47 }
 0x2ae   :  { %v11392_v4 = vpop.f32.mrb[184].mxu1  ;;  %7279 = vmatprep.mubr.msk.f32.mxu0 %vm8600_vm2, %v13460_v11  ;;  %v11399_v18 = vpop.permute.xlu0 %8215 }
 0x2af   :  { %v7685_v7 = vpop.f32.mrb[185].mxu1  ;;  %v8217_v25 = vunpack.i.l.bf16 %v11399_v18  ;;  %v8211_v47 = vpop.permute.xlu1 %8210 }
 0x2b0   :  { %v1862_v33 = vpop.f32.mrb[236].mxu0  ;;  %v8212_v63 = vunpack.i.l.bf16 %v8211_v47  ;;  %v4404_v7 = vsel %vm4387_vm4, %v4322_v53, %v8203_v10  ;;  %v3055_v53 = vadd.f32 %v10963_v36, %v2792_v24  ;;  %v2793_v10 = vmul.f32 %v10944_v34, %v11265_v51 }
 0x2b1   :  { %v7122_v0 = vpop.f32.mrb[237].mxu0  ;;  %7280 = vmatmul.mubr.msk.f32.gmra.mrb[86].mxu0 %vm340_vm1, %v221_v62  ;;  %v8213_v24 = vunpack.i.h.bf16 %v8211_v47 }
 0x2b2   :  { %v11408_v30 = vpop.f32.mrb[186].mxu1  ;;  %7282 = vmatprep.mubr.msk.f32.mxu0 %vm8600_vm2, %v13460_v11  ;;  %v4486_v54 = vsel %vm4469_vm5, %v4404_v7, %v8212_v63  ;;  %v4323_v0 = vsel %vm4313_vm3, %v13489_v42, %v13488_v6  ;;  %v223_v42 = vld [vmem:[%s13397_s0 + $0x568] sm:$0xff]  ;;  %v4324_v63 = vsel %vm4313_vm3, 0.0, %v8208_v49 }
 0x2b3   :  { %13487 = vst [vmem:[#allocation9_spill] sm:$0xff] %v11408_v30  ;;  %v7688_v33 = vpop.f32.mrb[187].mxu1  ;;  %7714 = vmatmul.mubr.f32.gmra.mrb[204].mxu1 %v4486_v54  ;;  %v4405_v35 = vsel %vm4387_vm4, %v4323_v0, %v8217_v25 }
 0x2b4   :  { %v1866_v62 = vpop.f32.mrb[238].mxu0  ;;  %7716 = vmatprep.mubr.msk.f32.mxu1 %vm8600_vm2, %v13460_v11  ;;  %v8221_v25 = vpop.permute.xlu1 %8220  ;;  %v3056_v33 = vadd.f32 %v10963_v36, %v2793_v10  ;;  %v3057_v10 = vadd.f32 %v10963_v36, %v2794_v45 }
 0x2b5   :  { %v2808_v56 = vmul.f32 %v10944_v34, %v1866_v62  ;;  %v7125_v30 = vpop.f32.mrb[239].mxu0  ;;  %7283 = vmatmul.mubr.msk.f32.gmra.mrb[88].mxu0 %vm340_vm1, %v222_v58  ;;  %v3311_v58 = vmax.f32 %v3055_v53, 0.0  ;;  %v8222_v48 = vunpack.i.l.bf16 %v8221_v25 }
 0x2b6   :  { %7285 = vmatprep.mubr.msk.f32.mxu0 %vm8600_vm2, %v13460_v11  ;;  %v4487_v30 = vsel %vm4469_vm5, %v4405_v35, %v10937_v22  ;;  %v4406_v35 = vsel %vm4387_vm4, %v4324_v63, %v10337_v15 }
 0x2b7   :  { %v3071_v51 = vadd.f32 %v10963_v36, %v2808_v56  ;;  %7717 = vmatmul.mubr.f32.gmra.mrb[206].mxu1 %v4487_v30  ;;  %v224_v56 = vld [vmem:[%s13397_s0 + $0x570] sm:$0xff]  ;;  %v4488_v53 = vsel %vm4469_vm5, %v4406_v35, %v8213_v24  ;;  %v3313_v35 = vmax.f32 %v3057_v10, 0.0 }
 0x2b8   :  { %v1871_v7 = vpop.f32.mrb[240].mxu0  ;;  %7719 = vmatprep.mubr.msk.f32.mxu1 %vm8600_vm2, %v13460_v11 }
 0x2b9   :  { %v3327_v54 = vmax.f32 %v3071_v51, 0.0  ;;  %v2809_v0 = vmul.f32 %v10944_v34, %v1871_v7  ;;  %v7128_v62 = vpop.f32.mrb[241].mxu0  ;;  %7286 = vmatmul.mubr.msk.f32.gmra.mrb[90].mxu0 %vm340_vm1, %v223_v42  ;;  %v2795_v42 = vmul.f32 %v10944_v34, %v11281_v52  ;;  %v3312_v51 = vmax.f32 %v3056_v33, 0.0  ;;  %v225_v52 = vld [vmem:[%s13397_s0 + $0x578] sm:$0xff] }
 0x2ba   :  { %7288 = vmatprep.mubr.msk.f32.mxu0 %vm8600_vm2, %v13460_v11 }
 0x2bb   :  { %v3519_v47 = vmax.f32 %v3311_v58, %v3327_v54  ;;  %v3072_v49 = vadd.f32 %v10963_v36, %v2809_v0  ;;  %7720 = vmatmul.mubr.f32.gmra.mrb[208].mxu1 %v4488_v53  ;;  %v8223_v58 = vunpack.i.h.bf16 %v8221_v25  ;;  %v13490_v54 = vld [vmem:[#allocation14_spill] sm:$0xff]  ;;  %v8218_v25 = vunpack.i.h.bf16 %v11399_v18 }
 0x2bc   :  { %v1876_v63 = vpop.f32.mrb[242].mxu0  ;;  %7722 = vmatprep.mubr.msk.f32.mxu1 %vm8600_vm2, %v13460_v11  ;;  %v4325_v0 = vsel %vm4313_vm3, %v13490_v54, %v8222_v48  ;;  %v226_v18 = vld [vmem:[%s13397_s0 + $0x580] sm:$0xff] }
 0x2bd   :  { %v3328_v30 = vmax.f32 %v3072_v49, 0.0  ;;  %v2810_v7 = vmul.f32 %v10944_v34, %v1876_v63  ;;  %v7131_v62 = vpop.f32.mrb[243].mxu0  ;;  %7289 = vmatmul.mubr.msk.f32.gmra.mrb[92].mxu0 %vm340_vm1, %v224_v56  ;;  %v3058_v56 = vadd.f32 %v10963_v36, %v2795_v42  ;;  %v4407_v42 = vsel %vm4387_vm4, %v4325_v0, %v8218_v25 }
 0x2be   :  { %7291 = vmatprep.mubr.msk.f32.mxu0 %vm8600_vm2, %v13460_v11  ;;  %v11466_v33 = vpop.permute.xlu1 %8230  ;;  %v2796_v62 = vmul.f32 %v10944_v34, %v11291_v8  ;;  %v4326_v8 = vsel %vm4313_vm3, %v10482_v27, %v8223_v58  ;;  %v2797_v25 = vmul.f32 %v10944_v34, %v11301_v2  ;;  %v227_v2 = vld [vmem:[%s13397_s0 + $0x588] sm:$0xff] }
 0x2bf   :  { %v3520_v24 = vmax.f32 %v3312_v51, %v3328_v30  ;;  %v3073_v45 = vadd.f32 %v10963_v36, %v2810_v7  ;;  %v8232_v49 = vunpack.i.l.bf16 %v11466_v33  ;;  %v8226_v53 = vpop.permute.xlu0 %8225 }
 0x2c0   :  { %v1881_v63 = vpop.f32.mrb[244].mxu0  ;;  %v8227_v7 = vunpack.i.l.bf16 %v8226_v53  ;;  %v8228_v48 = vunpack.i.h.bf16 %v8226_v53  ;;  %v3059_v0 = vadd.f32 %v10963_v36, %v2796_v62 }
 0x2c1   :  { %v11475_v51 = vmax.f32 %v3519_v47, %v3520_v24  ;;  %v3329_v30 = vmax.f32 %v3073_v45, 0.0  ;;  %v7134_v59 = vpop.f32.mrb[245].mxu0  ;;  %7292 = vmatmul.mubr.msk.f32.gmra.mrb[94].mxu0 %vm340_vm1, %v225_v52  ;;  %v2811_v10 = vmul.f32 %v10944_v34, %v1881_v63  ;;  %v4408_v54 = vsel %vm4387_vm4, %v4326_v8, %v8232_v49  ;;  %v11518_v8 = vld [vmem:[%s13399_s3] ss:$0 sm:$0xff] }
 0x2c2   :  { %7294 = vmatprep.mubr.msk.f32.mxu0 %vm8600_vm2, %v13460_v11  ;;  %v4489_v59 = vsel %vm4469_vm5, %v4407_v42, %v8227_v7  ;;  %v4490_v63 = vsel %vm4469_vm5, %v4408_v54, %v8228_v48  ;;  %v3060_v42 = vadd.f32 %v10963_v36, %v2797_v25 }
 0x2c3   :  { %v3521_v47 = vmax.f32 %v3313_v35, %v3329_v30  ;;  %v11490_v52 = vpack.i.bf16 %v11475_v51, %v11255_v19  ;;  %v3074_v24 = vadd.f32 %v10963_v36, %v2811_v10  ;;  %7723 = vmatmul.mubr.f32.gmra.mrb[210].mxu1 %v4489_v59  ;;  %v3314_v35 = vmax.f32 %v3058_v56, 0.0 }
 0x2c4   :  { %v1886_v45 = vpop.f32.mrb[246].mxu0  ;;  %7725 = vmatprep.mubr.msk.f32.mxu1 %vm8600_vm2, %v13460_v11  ;;  %v2798_v56 = vmul.f32 %v10944_v34, %v11309_v37  ;;  %v8236_v30 = vpop.permute.xlu0 %8235  ;;  %v3315_v10 = vmax.f32 %v3059_v0, 0.0  ;;  %v3316_v25 = vmax.f32 %v3060_v42, 0.0 }
 0x2c5   :  { %v2812_v27 = vmul.f32 %v10944_v34, %v1886_v45  ;;  %7295 = vmatmul.mubr.msk.f32.gmra.mrb[96].mxu0 %vm340_vm1, %v226_v18  ;;  %8275 = vrot.lane.b32.xlu0 %v11490_v52, %s8603_s2  ;;  %v7137_v58 = vpop.f32.mrb[247].mxu0  ;;  %v3330_v53 = vmax.f32 %v3074_v24, 0.0  ;;  %v8237_v37 = vunpack.i.l.bf16 %v8236_v30  ;;  %v11536_v45 = vld [vmem:[%s13400_s4] ss:$0 sm:$0xff] }
 0x2c6   :  { %8270 = vrot.lane.b32.xlu1 %v11490_v52, %s8604_s28  ;;  %7297 = vmatprep.mubr.msk.f32.mxu0 %vm8600_vm2, %v13460_v11  ;;  %v3061_v54 = vadd.f32 %v11536_v45, %v2798_v56 }
 0x2c7   :  { %v3075_v49 = vadd.f32 %v10963_v36, %v2812_v27  ;;  %v3522_v62 = vmax.f32 %v3314_v35, %v3330_v53  ;;  %7726 = vmatmul.mubr.f32.gmra.mrb[212].mxu1 %v4490_v63  ;;  %v228_v36 = vld [vmem:[%s13397_s0 + $0x590] sm:$0xff]  ;;  %v8238_v53 = vunpack.i.h.bf16 %v8236_v30  ;;  %v4327_v56 = vsel %vm4313_vm3, %v10548_v29, %v8237_v37 }
 0x2c8   :  { %v1891_v7 = vpop.f32.mrb[248].mxu0  ;;  %7728 = vmatprep.mubr.msk.f32.mxu1 %vm8600_vm2, %v13460_v11  ;;  %v8233_v30 = vunpack.i.h.bf16 %v11466_v33  ;;  %v230_v33 = vld [vmem:[%s13397_s0 + $0x5a0] sm:$0xff] }
 0x2c9   :  { %v3331_v18 = vmax.f32 %v3075_v49, 0.0  ;;  %v2813_v48 = vmul.f32 %v11518_v8, %v1891_v7  ;;  %7298 = vmatmul.mubr.msk.f32.gmra.mrb[98].mxu0 %vm340_vm1, %v227_v2  ;;  %v7140_v59 = vpop.f32.mrb[249].mxu0  ;;  %v11524_v34 = vmax.f32 %v3521_v47, %v3522_v62  ;;  %v229_v2 = vld [vmem:[%s13397_s0 + $0x598] sm:$0xff]  ;;  %v3317_v62 = vmax.f32 %v3061_v54, 0.0 }
 0x2ca   :  { %8280 = vrot.lane.b32.xlu1 %v11104_v14, %s8602_s19  ;;  %7300 = vmatprep.mubr.msk.f32.mxu0 %vm8600_vm2, %v13460_v11  ;;  %v2799_v14 = vmul.f32 %v11518_v8, %v11317_v46  ;;  %v4409_v54 = vsel %vm4387_vm4, %v4327_v56, %v8233_v30 }
 0x2cb   :  { %v3523_v24 = vmax.f32 %v3315_v10, %v3331_v18  ;;  %v3076_v47 = vadd.f32 %v11536_v45, %v2813_v48  ;;  %v2800_v48 = vmul.f32 %v11518_v8, %v11327_v50  ;;  %v4328_v50 = vsel %vm4313_vm3, %v10608_v31, %v8238_v53 }
 0x2cc   :  { %v1896_v0 = vpop.f32.mrb[250].mxu0  ;;  %v3062_v7 = vadd.f32 %v11536_v45, %v2799_v14 }
 0x2cd   :  { %v3332_v27 = vmax.f32 %v3076_v47, 0.0  ;;  %v2814_v58 = vmul.f32 %v11518_v8, %v1896_v0  ;;  %v7143_v35 = vpop.f32.mrb[251].mxu0  ;;  %7301 = vmatmul.mubr.msk.f32.gmra.mrb[100].mxu0 %vm340_vm1, %v228_v36 }
 0x2ce   :  { %7303 = vmatprep.mubr.msk.f32.mxu0 %vm8600_vm2, %v13460_v11  ;;  %v11550_v46 = vpop.permute.xlu0 %8245 }
 0x2cf   :  { %v3524_v49 = vmax.f32 %v3316_v25, %v3332_v27  ;;  %v3077_v63 = vadd.f32 %v11536_v45, %v2814_v58  ;;  %v8247_v10 = vunpack.i.l.bf16 %v11550_v46  ;;  %v8241_v42 = vpop.permute.xlu1 %8240 }
 0x2d0   :  { %v1901_v18 = vpop.f32.mrb[252].mxu0  ;;  %v8242_v47 = vunpack.i.l.bf16 %v8241_v42  ;;  %v8243_v29 = vunpack.i.h.bf16 %v8241_v42 }
 0x2d1   :  { %v11559_v59 = vmax.f32 %v3523_v24, %v3524_v49  ;;  %v3333_v36 = vmax.f32 %v3077_v63, 0.0  ;;  %v7146_v0 = vpop.f32.mrb[253].mxu0  ;;  %7304 = vmatmul.mubr.msk.f32.gmra.mrb[102].mxu0 %vm340_vm1, %v229_v2  ;;  %v2815_v37 = vmul.f32 %v11518_v8, %v1901_v18  ;;  %v4410_v35 = vsel %vm4387_vm4, %v4328_v50, %v8247_v10 }
 0x2d2   :  { %7306 = vmatprep.mubr.msk.f32.mxu0 %vm8600_vm2, %v13460_v11  ;;  %v4491_v14 = vsel %vm4469_vm5, %v4409_v54, %v8242_v47  ;;  %v3063_v2 = vadd.f32 %v11536_v45, %v2800_v48  ;;  %v2801_v49 = vmul.f32 %v11518_v8, %v11337_v28  ;;  %v3318_v63 = vmax.f32 %v3062_v7, 0.0  ;;  %v231_v28 = vld [vmem:[%s13397_s0 + $0x5a8] sm:$0xff] }
 0x2d3   :  { %v3525_v24 = vmax.f32 %v3317_v62, %v3333_v36  ;;  %v11574_v25 = vpack.i.bf16 %v11559_v59, %v11524_v34  ;;  %v3078_v27 = vadd.f32 %v11536_v45, %v2815_v37  ;;  %7729 = vmatmul.mubr.f32.gmra.mrb[214].mxu1 %v4491_v14  ;;  %v4492_v30 = vsel %vm4469_vm5, %v4410_v35, %v8243_v29 }
 0x2d4   :  { %v1906_v58 = vpop.f32.mrb[254].mxu0  ;;  %7731 = vmatprep.mubr.msk.f32.mxu1 %vm8600_vm2, %v13460_v11  ;;  %v2802_v7 = vmul.f32 %v11518_v8, %v11345_v60  ;;  %v8251_v42 = vpop.permute.xlu1 %8250  ;;  %v3319_v48 = vmax.f32 %v3063_v2, 0.0  ;;  %v3064_v36 = vadd.f32 %v11536_v45, %v2801_v49  ;;  %v232_v60 = vld [vmem:[%s13397_s0 + $0x5b0] sm:$0xff] }
 0x2d5   :  { %v2816_v31 = vmul.f32 %v11518_v8, %v1906_v58  ;;  %7307 = vmatmul.mubr.msk.f32.gmra.mrb[104].mxu0 %vm340_vm1, %v230_v33  ;;  %8290 = vrot.lane.b32.xlu1 %v11574_v25, %s8603_s2  ;;  %v7149_v53 = vpop.f32.mrb[255].mxu0  ;;  %v3334_v56 = vmax.f32 %v3078_v27, 0.0  ;;  %v8252_v54 = vunpack.i.l.bf16 %v8251_v42  ;;  %v8253_v49 = vunpack.i.h.bf16 %v8251_v42 }
 0x2d6   :  { %8285 = vrot.lane.b32.xlu0 %v11574_v25, %s8604_s28  ;;  %7309 = vmatprep.mubr.msk.f32.mxu0 %vm8600_vm2, %v13460_v11  ;;  %v3065_v14 = vadd.f32 %v11536_v45, %v2802_v7  ;;  %v3320_v58 = vmax.f32 %v3064_v36, 0.0 }
 0x2d7   :  { %v3079_v62 = vadd.f32 %v11536_v45, %v2816_v31  ;;  %v3526_v10 = vmax.f32 %v3318_v63, %v3334_v56  ;;  %7732 = vmatmul.mubr.f32.gmra.mrb[216].mxu1 %v4492_v30  ;;  %v233_v31 = vld [vmem:[%s13397_s0 + $0x5b8] sm:$0xff]  ;;  %v4329_v56 = vsel %vm4313_vm3, %v10674_v1, %v8252_v54  ;;  %v8248_v30 = vunpack.i.h.bf16 %v11550_v46  ;;  %v234_v46 = vld [vmem:[%s13397_s0 + $0x5c0] sm:$0xff] }
 0x2d8   :  { %v1911_v18 = vpop.f32.mrb[0].mxu0  ;;  %7734 = vmatprep.mubr.msk.f32.mxu1 %vm8600_vm2, %v13460_v11 }
 0x2d9   :  { %v3335_v47 = vmax.f32 %v3079_v62, 0.0  ;;  %v2817_v0 = vmul.f32 %v11518_v8, %v1911_v18  ;;  %7310 = vmatmul.mubr.msk.f32.gmra.mrb[106].mxu0 %vm340_vm1, %v231_v28  ;;  %v7152_v37 = vpop.f32.mrb[1].mxu0  ;;  %v11603_v29 = vmax.f32 %v3525_v24, %v3526_v10  ;;  %v2803_v24 = vmul.f32 %v11518_v8, %v11353_v3 }
 0x2da   :  { %8295 = vrot.lane.b32.xlu0 %v11178_v44, %s8602_s19  ;;  %7312 = vmatprep.mubr.msk.f32.mxu0 %vm8600_vm2, %v13460_v11  ;;  %v3321_v28 = vmax.f32 %v3065_v14, 0.0  ;;  %v2804_v18 = vmul.f32 %v11518_v8, %v11363_v16  ;;  %v4330_v16 = vsel %vm4313_vm3, %v10724_v61, %v8253_v49 }
 0x2db   :  { %v3527_v33 = vmax.f32 %v3319_v48, %v3335_v47  ;;  %v3080_v50 = vadd.f32 %v11536_v45, %v2817_v0  ;;  %v3066_v62 = vadd.f32 %v11536_v45, %v2803_v24 }
 0x2dc   :  { %v1916_v27 = vpop.f32.mrb[2].mxu0 }
 0x2dd   :  { %v3336_v35 = vmax.f32 %v3080_v50, 0.0  ;;  %v2818_v44 = vmul.f32 %v11518_v8, %v1916_v27  ;;  %v7155_v2 = vpop.f32.mrb[3].mxu0  ;;  %7313 = vmatmul.mubr.msk.f32.gmra.mrb[108].mxu0 %vm340_vm1, %v232_v60  ;;  %v4411_v60 = vsel %vm4387_vm4, %v4329_v56, %v8248_v30 }
 0x2de   :  { %7315 = vmatprep.mubr.msk.f32.mxu0 %vm8600_vm2, %v13460_v11  ;;  %v11624_v3 = vpop.permute.xlu1 %8260  ;;  %v8256_v10 = vpop.permute.xlu0 %8255  ;;  %v3322_v2 = vmax.f32 %v3066_v62, 0.0 }
 0x2df   :  { %v3528_v53 = vmax.f32 %v3320_v58, %v3336_v35  ;;  %v3081_v63 = vadd.f32 %v11536_v45, %v2818_v44  ;;  %v8262_v7 = vunpack.i.l.bf16 %v11624_v3  ;;  %v8257_v47 = vunpack.i.l.bf16 %v8256_v10 }
 0x2e0   :  { %v1921_v42 = vpop.f32.mrb[4].mxu0  ;;  %v8258_v1 = vunpack.i.h.bf16 %v8256_v10  ;;  %v3067_v58 = vadd.f32 %v11536_v45, %v2804_v18  ;;  %v2805_v35 = vmul.f32 %v11518_v8, %v11373_v41  ;;  %v235_v41 = vld [vmem:[%s13397_s0 + $0x5c8] sm:$0xff] }
 0x2e1   :  { %v11633_v48 = vmax.f32 %v3527_v33, %v3528_v53  ;;  %v3337_v36 = vmax.f32 %v3081_v63, 0.0  ;;  %v7158_v0 = vpop.f32.mrb[5].mxu0  ;;  %7316 = vmatmul.mubr.msk.f32.gmra.mrb[110].mxu0 %vm340_vm1, %v233_v31  ;;  %v2819_v37 = vmul.f32 %v11518_v8, %v1921_v42  ;;  %v4493_v33 = vsel %vm4469_vm5, %v4411_v60, %v8257_v47 }
 0x2e2   :  { %7318 = vmatprep.mubr.msk.f32.mxu0 %vm8600_vm2, %v13460_v11  ;;  %7735 = vmatmul.mubr.f32.gmra.mrb[218].mxu1 %v4493_v33  ;;  %v4412_v27 = vsel %vm4387_vm4, %v4330_v16, %v8262_v7  ;;  %v2806_v63 = vmul.f32 %v11518_v8, %v11381_v38  ;;  %v3323_v62 = vmax.f32 %v3067_v58, 0.0  ;;  %v3068_v30 = vadd.f32 %v11536_v45, %v2805_v35  ;;  %v236_v38 = vld [vmem:[%s13397_s0 + $0x5d0] sm:$0xff] }
 0x2e3   :  { %v3529_v54 = vmax.f32 %v3321_v28, %v3337_v36  ;;  %v11648_v50 = vpack.i.bf16 %v11633_v48, %v11603_v29  ;;  %v3082_v14 = vadd.f32 %v11536_v45, %v2819_v37  ;;  %7737 = vmatprep.mubr.msk.f32.mxu1 %vm8600_vm2, %v13460_v11  ;;  %v4494_v53 = vsel %vm4469_vm5, %v4412_v27, %v8258_v1 }
 0x2e4   :  { %v1926_v24 = vpop.f32.mrb[6].mxu0  ;;  %v3069_v0 = vadd.f32 %v11536_v45, %v2806_v63  ;;  %v3324_v37 = vmax.f32 %v3068_v30, 0.0  ;;  %v2807_v60 = vmul.f32 %v11518_v8, %v11389_v20 }
 0x2e5   :  { %v2820_v61 = vmul.f32 %v11518_v8, %v1926_v24  ;;  %7319 = vmatmul.mubr.msk.f32.gmra.mrb[112].mxu0 %vm340_vm1, %v234_v46  ;;  %8305 = vrot.lane.b32.xlu0 %v11648_v50, %s8603_s2  ;;  %v7161_v44 = vpop.f32.mrb[7].mxu0  ;;  %v3338_v49 = vmax.f32 %v3082_v14, 0.0 }
 0x2e6   :  { %8300 = vrot.lane.b32.xlu1 %v11648_v50, %s8604_s28  ;;  %7321 = vmatprep.mubr.msk.f32.mxu0 %vm8600_vm2, %v13460_v11  ;;  %v3325_v24 = vmax.f32 %v3069_v0, 0.0  ;;  %v3070_v20 = vadd.f32 %v11536_v45, %v2807_v60  ;;  %v11741_v0 = vld [vmem:[%s13401_s6] ss:$0 sm:$0xff] }
 0x2e7   :  { %v3083_v31 = vadd.f32 %v11536_v45, %v2820_v61  ;;  %v3530_v56 = vmax.f32 %v3322_v2, %v3338_v49  ;;  %7738 = vmatmul.mubr.f32.gmra.mrb[220].mxu1 %v4494_v53  ;;  %v238_v2 = vld [vmem:[%s13397_s0 + $0x5e0] sm:$0xff]  ;;  %v5027_v60 = vmul.f32 %v11741_v0, %v11284_v13 }
 0x2e8   :  { %v1931_v28 = vpop.f32.mrb[8].mxu0  ;;  %7740 = vmatprep.mubr.msk.f32.mxu1 %vm8600_vm2, %v13460_v11  ;;  %v3326_v63 = vmax.f32 %v3070_v20, 0.0 }
 0x2e9   :  { %v3339_v7 = vmax.f32 %v3083_v31, 0.0  ;;  %v2821_v10 = vmul.f32 %v11518_v8, %v1931_v28  ;;  %7322 = vmatmul.mubr.msk.f32.gmra.mrb[114].mxu0 %vm340_vm1, %v235_v41  ;;  %v7164_v42 = vpop.f32.mrb[9].mxu0  ;;  %v11677_v18 = vmax.f32 %v3529_v54, %v3530_v56  ;;  %v237_v54 = vld [vmem:[%s13397_s0 + $0x5d8] sm:$0xff] }
 0x2ea   :  { %8310 = vrot.lane.b32.xlu1 %v11241_v23, %s8602_s19  ;;  %7324 = vmatprep.mubr.msk.f32.mxu0 %vm8600_vm2, %v13460_v11 }
 0x2eb   :  { %v3531_v36 = vmax.f32 %v3323_v62, %v3339_v7  ;;  %v3084_v47 = vadd.f32 %v11536_v45, %v2821_v10  ;;  %v239_v62 = vld [vmem:[%s13397_s0 + $0x5e8] sm:$0xff] }
 0x2ec   :  { %v1936_v1 = vpop.f32.mrb[10].mxu0 }
 0x2ed   :  { %v3340_v46 = vmax.f32 %v3084_v47, 0.0  ;;  %v2822_v23 = vmul.f32 %v11518_v8, %v1936_v1  ;;  %v7167_v16 = vpop.f32.mrb[11].mxu0  ;;  %7325 = vmatmul.mubr.msk.f32.gmra.mrb[116].mxu0 %vm340_vm1, %v236_v38  ;;  %v240_v38 = vld [vmem:[%s13397_s0 + $0x5f0] sm:$0xff] }
 0x2ee   :  { %7327 = vmatprep.mubr.msk.f32.mxu0 %vm8600_vm2, %v13460_v11  ;;  %v11756_v16 = vld [vmem:[%s13402_s7] ss:$0 sm:$0xff] }
 0x2ef   :  { %v3532_v33 = vmax.f32 %v3324_v37, %v3340_v46  ;;  %v3085_v14 = vadd.f32 %v11536_v45, %v2822_v23  ;;  %v5098_v13 = vadd.f32 %v11756_v16, %v5027_v60 }
 0x2f0   :  { %v1941_v27 = vpop.f32.mrb[12].mxu0 }
 0x2f1   :  { %v11699_v58 = vmax.f32 %v3531_v36, %v3532_v33  ;;  %v3341_v35 = vmax.f32 %v3085_v14, 0.0  ;;  %v2823_v61 = vmul.f32 %v11518_v8, %v1941_v27  ;;  %v7170_v44 = vpop.f32.mrb[13].mxu0  ;;  %7328 = vmatmul.mubr.msk.f32.gmra.mrb[118].mxu0 %vm340_vm1, %v237_v54  ;;  %v242_v54 = vld [vmem:[%s13397_s0 + $0x600] sm:$0xff] }
 0x2f2   :  { %7330 = vmatprep.mubr.msk.f32.mxu0 %vm8600_vm2, %v13460_v11 }
 0x2f3   :  { %13491 = vst [vmem:[#allocation13_spill] sm:$0xff] %v11699_v58  ;;  %v3533_v49 = vmax.f32 %v3325_v24, %v3341_v35  ;;  %v3086_v41 = vadd.f32 %v11536_v45, %v2823_v61  ;;  %v11711_v31 = vpack.i.bf16 %v11699_v58, %v11677_v18  ;;  %v243_v35 = vld [vmem:[%s13397_s0 + $0x608] sm:$0xff] }
 0x2f4   :  { %v1946_v53 = vpop.f32.mrb[14].mxu0 }
 0x2f5   :  { %v3342_v56 = vmax.f32 %v3086_v41, 0.0  ;;  %7331 = vmatmul.mubr.msk.f32.gmra.mrb[120].mxu0 %vm340_vm1, %v238_v2  ;;  %8320 = vrot.lane.b32.xlu1 %v11711_v31, %s8603_s2  ;;  %v7173_v28 = vpop.f32.mrb[15].mxu0  ;;  %v5162_v2 = vmax.f32 %v5098_v13, 0.0  ;;  %v244_v53 = vld [vmem:[%s13397_s0 + $0x610] sm:$0xff] }
 0x2f6   :  { %8315 = vrot.lane.b32.xlu0 %v11711_v31, %s8604_s28  ;;  %7333 = vmatprep.mubr.msk.f32.mxu0 %vm8600_vm2, %v13460_v11 }
 0x2f7   :  { %v3534_v30 = vmax.f32 %v3326_v63, %v3342_v56  ;;  %v5028_v56 = vmul.f32 %v11741_v0, %v11294_v57 }
 0x2f8   :  { %v11723_v7 = vpop.f32.mrb[16].mxu0 }
 0x2f9   :  { %v11725_v10 = vmax.f32 %v3533_v49, %v3534_v30  ;;  %7334 = vmatmul.mubr.msk.f32.gmra.mrb[122].mxu0 %vm340_vm1, %v239_v62  ;;  %v7176_v42 = vpop.f32.mrb[17].mxu0  ;;  %v245_v30 = vld [vmem:[%s13397_s0 + $0x618] sm:$0xff] }
 0x2fa   :  { %8325 = vrot.lane.b32.xlu0 %v11490_v52, %s8602_s19  ;;  %7336 = vmatprep.mubr.msk.f32.mxu0 %vm8600_vm2, %v13460_v11  ;;  %v241_v52 = vld [vmem:[%s13397_s0 + $0x5f8] sm:$0xff] }
 0x2fc   :  { %v11735_v36 = vpop.f32.mrb[18].mxu0 }
 0x2fd   :  { %v7179_v47 = vpop.f32.mrb[19].mxu0  ;;  %7337 = vmatmul.mubr.msk.f32.gmra.mrb[124].mxu0 %vm340_vm1, %v240_v38  ;;  %v5099_v38 = vadd.f32 %v11756_v16, %v5028_v56 }
 0x2fe   :  { %7339 = vmatprep.mubr.msk.f32.mxu0 %vm8600_vm2, %v13460_v11  ;;  %v5029_v47 = vmul.f32 %v11741_v0, %v11320_v26 }
 0x2ff   :  { %v4673_v1 = vpop.f32.mrb[188].mxu1 }
 0x300   :  { %v11748_v37 = vpop.f32.mrb[20].mxu0  ;;  %v7691_v46 = vpop.f32.mrb[189].mxu1  ;;  %v5100_v26 = vadd.f32 %v11756_v16, %v5029_v47  ;;  %v5030_v47 = vmul.f32 %v11741_v0, %v11330_v5 }
 0x301   :  { %v7182_v23 = vpop.f32.mrb[21].mxu0  ;;  %7340 = vmatmul.mubr.msk.f32.gmra.mrb[126].mxu0 %vm340_vm1, %v241_v52 }
 0x302   :  { %7342 = vmatprep.mubr.msk.f32.mxu0 %vm8600_vm2, %v13460_v11  ;;  %v246_v23 = vld [vmem:[%s13397_s0 + $0x620] sm:$0xff] }
 0x303   :  { %v4677_v33 = vpop.f32.mrb[190].mxu1 }
 0x304   :  { %v11763_v14 = vpop.f32.mrb[22].mxu0  ;;  %v5035_v24 = vmul.f32 %v11741_v0, %v4677_v33  ;;  %v7694_v27 = vpop.f32.mrb[191].mxu1  ;;  %v5163_v33 = vmax.f32 %v5099_v38, 0.0  ;;  %v248_v38 = vld [vmem:[%s13397_s0 + $0x630] sm:$0xff] }
 0x305   :  { %v7185_v20 = vpop.f32.mrb[23].mxu0  ;;  %7343 = vmatmul.mubr.msk.f32.gmra.mrb[128].mxu0 %vm340_vm1, %v242_v54 }
 0x306   :  { %7345 = vmatprep.mubr.msk.f32.mxu0 %vm8600_vm2, %v13460_v11  ;;  %v5106_v61 = vadd.f32 %v11756_v16, %v5035_v24 }
 0x308   :  { %v11774_v44 = vpop.f32.mrb[24].mxu0  ;;  %v5170_v49 = vmax.f32 %v5106_v61, 0.0 }
 0x309   :  { %v7188_v41 = vpop.f32.mrb[25].mxu0  ;;  %7346 = vmatmul.mubr.msk.f32.gmra.mrb[130].mxu0 %vm340_vm1, %v243_v35 }
 0x30a   :  { %7348 = vmatprep.mubr.msk.f32.mxu0 %vm8600_vm2, %v13460_v11  ;;  %v11782_v63 = vmax.f32 %v5162_v2, %v5170_v49  ;;  %v247_v49 = vld [vmem:[%s13397_s0 + $0x628] sm:$0xff]  ;;  %v5164_v41 = vmax.f32 %v5100_v26, 0.0 }
 0x30c   :  { %13492 = vst [vmem:[#allocation11_spill] sm:$0xff] %v11782_v63  ;;  %v11786_v28 = vpop.f32.mrb[26].mxu0 }
 0x30d   :  { %v7191_v62 = vpop.f32.mrb[27].mxu0  ;;  %7349 = vmatmul.mubr.msk.f32.gmra.mrb[132].mxu0 %vm340_vm1, %v244_v53 }
 0x30e   :  { %7351 = vmatprep.mubr.msk.f32.mxu0 %vm8600_vm2, %v13460_v11 }
 0x30f   :  { %v4682_v42 = vpop.f32.mrb[192].mxu1 }
 0x310   :  { %v5036_v57 = vmul.f32 %v11741_v0, %v4682_v42  ;;  %v7697_v52 = vpop.f32.mrb[193].mxu1  ;;  %v11798_v1 = vpop.f32.mrb[28].mxu0 }
 0x311   :  { %v7194_v60 = vpop.f32.mrb[29].mxu0  ;;  %7352 = vmatmul.mubr.msk.f32.gmra.mrb[134].mxu0 %vm340_vm1, %v245_v30 }
 0x312   :  { %v5107_v46 = vadd.f32 %v11756_v16, %v5036_v57  ;;  %7354 = vmatprep.mubr.msk.f32.mxu0 %vm8600_vm2, %v13460_v11  ;;  %v249_v60 = vld [vmem:[%s13397_s0 + $0x638] sm:$0xff] }
 0x313   :  { %v4687_v54 = vpop.f32.mrb[194].mxu1 }
 0x314   :  { %v5171_v13 = vmax.f32 %v5107_v46, 0.0  ;;  %v5037_v24 = vmul.f32 %v11741_v0, %v4687_v54  ;;  %v7700_v27 = vpop.f32.mrb[195].mxu1  ;;  %v11809_v20 = vpop.f32.mrb[30].mxu0  ;;  %v5031_v54 = vmul.f32 %v11741_v0, %v11356_v43 }
 0x315   :  { %v7197_v35 = vpop.f32.mrb[31].mxu0  ;;  %7355 = vmatmul.mubr.msk.f32.gmra.mrb[136].mxu0 %vm340_vm1, %v246_v23  ;;  %v5101_v23 = vadd.f32 %v11756_v16, %v5030_v47  ;;  %v250_v27 = vld [vmem:[%s13397_s0 + $0x640] sm:$0xff] }
 0x316   :  { %v11812_v61 = vmax.f32 %v5163_v33, %v5171_v13  ;;  %v5108_v2 = vadd.f32 %v11756_v16, %v5037_v24  ;;  %7357 = vmatprep.mubr.msk.f32.mxu0 %vm8600_vm2, %v13460_v11  ;;  %v5102_v43 = vadd.f32 %v11756_v16, %v5031_v54 }
 0x318   :  { %13493 = vst [vmem:[#allocation14_spill] sm:$0xff] %v11812_v61  ;;  %v5172_v56 = vmax.f32 %v5108_v2, 0.0  ;;  %v11822_v62 = vpop.f32.mrb[32].mxu0  ;;  %v5165_v2 = vmax.f32 %v5101_v23, 0.0 }
 0x319   :  { %v7200_v30 = vpop.f32.mrb[33].mxu0  ;;  %7358 = vmatmul.mubr.msk.f32.gmra.mrb[138].mxu0 %vm340_vm1, %v247_v49 }
 0x31a   :  { %v11825_v42 = vmax.f32 %v5164_v41, %v5172_v56  ;;  %7360 = vmatprep.mubr.msk.f32.mxu0 %vm8600_vm2, %v13460_v11 }
 0x31c   :  { %v11834_v57 = vpop.f32.mrb[34].mxu0 }
 0x31d   :  { %v7203_v52 = vpop.f32.mrb[35].mxu0  ;;  %7361 = vmatmul.mubr.msk.f32.gmra.mrb[140].mxu0 %vm340_vm1, %v248_v38 }
 0x31e   :  { %7363 = vmatprep.mubr.msk.f32.mxu0 %vm8600_vm2, %v13460_v11 }
 0x31f   :  { %v4692_v46 = vpop.f32.mrb[196].mxu1 }
 0x320   :  { %v5038_v5 = vmul.f32 %v11741_v0, %v4692_v46  ;;  %v7703_v33 = vpop.f32.mrb[197].mxu1  ;;  %v11846_v26 = vpop.f32.mrb[36].mxu0  ;;  %v5166_v46 = vmax.f32 %v5102_v43, 0.0  ;;  %v5033_v43 = vmul.f32 %v11741_v0, %v11392_v4 }
 0x321   :  { %v7206_v13 = vpop.f32.mrb[37].mxu0  ;;  %7364 = vmatmul.mubr.msk.f32.gmra.mrb[142].mxu0 %vm340_vm1, %v249_v60  ;;  %v251_v60 = vld [vmem:[%s13397_s0 + $0x648] sm:$0xff] }
 0x322   :  { %v5109_v24 = vadd.f32 %v11756_v16, %v5038_v5  ;;  %7366 = vmatprep.mubr.msk.f32.mxu0 %vm8600_vm2, %v13460_v11 }
 0x323   :  { %v4697_v35 = vpop.f32.mrb[198].mxu1 }
 0x324   :  { %v5173_v49 = vmax.f32 %v5109_v24, 0.0  ;;  %v5039_v41 = vmul.f32 %v11741_v0, %v4697_v35  ;;  %v7706_v56 = vpop.f32.mrb[199].mxu1  ;;  %v11857_v30 = vpop.f32.mrb[38].mxu0  ;;  %v252_v24 = vld [vmem:[%s13397_s0 + $0x650] sm:$0xff] }
 0x325   :  { %v7209_v38 = vpop.f32.mrb[39].mxu0  ;;  %7367 = vmatmul.mubr.msk.f32.gmra.mrb[144].mxu0 %vm340_vm1, %v250_v27  ;;  %v5032_v27 = vmul.f32 %v11741_v0, %v11366_v39 }
 0x326   :  { %v11860_v47 = vmax.f32 %v5165_v2, %v5173_v49  ;;  %v5110_v52 = vadd.f32 %v11756_v16, %v5039_v41  ;;  %7369 = vmatprep.mubr.msk.f32.mxu0 %vm8600_vm2, %v13460_v11  ;;  %v8266_v49 = vpop.permute.xlu0 %8265 }
 0x327   :  { %v5103_v56 = vadd.f32 %v11756_v16, %v5032_v27 }
 0x328   :  { %v5174_v54 = vmax.f32 %v5110_v52, 0.0  ;;  %v11870_v5 = vpop.f32.mrb[40].mxu0 }
 0x329   :  { %v7212_v33 = vpop.f32.mrb[41].mxu0  ;;  %7370 = vmatmul.mubr.msk.f32.gmra.mrb[146].mxu0 %vm340_vm1, %v251_v60 }
 0x32a   :  { %v11873_v13 = vmax.f32 %v5166_v46, %v5174_v54  ;;  %7372 = vmatprep.mubr.msk.f32.mxu0 %vm8600_vm2, %v13460_v11  ;;  %v5104_v54 = vadd.f32 %v11756_v16, %v5033_v43  ;;  %v8267_v33 = vunpack.i.l.bf16 %v8266_v49 }
 0x32c   :  { %13494 = vst [vmem:[#allocation24_spill] sm:$0xff] %v11873_v13  ;;  %v11882_v35 = vpop.f32.mrb[42].mxu0  ;;  %v4331_v43 = vsel %vm4313_vm3, %v10772_v32, %v8267_v33  ;;  %v8268_v32 = vunpack.i.h.bf16 %v8266_v49  ;;  %v4332_v33 = vsel %vm4313_vm3, %v10805_v21, %v13488_v6 }
 0x32d   :  { %v7215_v2 = vpop.f32.mrb[43].mxu0  ;;  %7373 = vmatmul.mubr.msk.f32.gmra.mrb[148].mxu0 %vm340_vm1, %v252_v24  ;;  %v5167_v24 = vmax.f32 %v5103_v56, 0.0 }
 0x32f   :  { %v4702_v41 = vpop.f32.mrb[200].mxu1 }
 0x330   :  { %v5040_v38 = vmul.f32 %v11741_v0, %v4702_v41  ;;  %v7709_v52 = vpop.f32.mrb[201].mxu1  ;;  %v11889_v60 = vpop.f32.mrb[44].mxu0 }
 0x331   :  { %v7218_v46 = vpop.f32.mrb[45].mxu0  ;;  %v5168_v52 = vmax.f32 %v5104_v54, 0.0 }
 0x332   :  { %v5111_v39 = vadd.f32 %v11756_v16, %v5040_v38  ;;  %v8263_v38 = vunpack.i.h.bf16 %v11624_v3 }
 0x333   :  { %v4707_v2 = vpop.f32.mrb[202].mxu1 }
 0x334   :  { %v5175_v53 = vmax.f32 %v5111_v39, 0.0  ;;  %v5041_v4 = vmul.f32 %v11741_v0, %v4707_v2  ;;  %v7712_v23 = vpop.f32.mrb[203].mxu1  ;;  %v11894_v61 = vpop.f32.mrb[46].mxu0  ;;  %v4413_v58 = vsel %vm4387_vm4, %v4331_v43, %v8263_v38  ;;  %v2826_v38 = vmul.f32 %v11518_v8, %v11748_v37 }
 0x335   :  { %v7221_v27 = vpop.f32.mrb[47].mxu0 }
 0x336   :  { %v11896_v63 = vmax.f32 %v5167_v24, %v5175_v53  ;;  %v5112_v41 = vadd.f32 %v11756_v16, %v5041_v4  ;;  %v2824_v53 = vmul.f32 %v11518_v8, %v11723_v7  ;;  %v2825_v7 = vmul.f32 %v11518_v8, %v11735_v36 }
 0x337   :  { %v11899_v46 = vpop.permute.xlu0 %8275 }
 0x338   :  { %13495 = vst [vmem:[#allocation25_spill] sm:$0xff] %v11896_v63  ;;  %v5176_v56 = vmax.f32 %v5112_v41, 0.0  ;;  %v8277_v39 = vunpack.i.l.bf16 %v11899_v46  ;;  %v8271_v2 = vpop.permute.xlu1 %8270  ;;  %v2030_v23 = vpop.f32.mrb[48].mxu0  ;;  %v3087_v27 = vadd.f32 %v11536_v45, %v2824_v53 }
 0x339   :  { %v8272_v24 = vunpack.i.l.bf16 %v8271_v2  ;;  %v7224_v54 = vpop.f32.mrb[49].mxu0  ;;  %v8273_v49 = vunpack.i.h.bf16 %v8271_v2 }
 0x33a   :  { %v11909_v4 = vmax.f32 %v5168_v52, %v5176_v56  ;;  %v4414_v23 = vsel %vm4387_vm4, %v4332_v33, %v8277_v39  ;;  %v3343_v53 = vmax.f32 %v3087_v27, 0.0  ;;  %v3089_v27 = vadd.f32 %v11536_v45, %v2826_v38 }
 0x33b   :  { %v4495_v3 = vsel %vm4469_vm5, %v4413_v58, %v8272_v24  ;;  %v4333_v58 = vsel %vm4313_vm3, 0.0, %v8268_v32  ;;  %v4496_v43 = vsel %vm4469_vm5, %v4414_v23, %v10937_v22  ;;  %v3088_v24 = vadd.f32 %v11536_v45, %v2825_v7 }
 0x33c   :  { %7741 = vmatmul.mubr.f32.gmra.mrb[222].mxu1 %v4495_v3  ;;  %v2034_v41 = vpop.f32.mrb[50].mxu0  ;;  %v8281_v39 = vpop.permute.xlu1 %8280  ;;  %v4415_v2 = vsel %vm4387_vm4, %v4333_v58, %v10337_v15  ;;  %v2827_v7 = vmul.f32 %v11518_v8, %v11763_v14  ;;  %v3345_v14 = vmax.f32 %v3089_v27, 0.0 }
 0x33d   :  { %v2840_v52 = vmul.f32 %v11518_v8, %v2034_v41  ;;  %v7227_v56 = vpop.f32.mrb[51].mxu0  ;;  %7743 = vmatprep.mubr.msk.f32.mxu1 %vm8600_vm2, %v13460_v11  ;;  %v8282_v32 = vunpack.i.l.bf16 %v8281_v39  ;;  %v4497_v23 = vsel %vm4469_vm5, %v4415_v2, %v8273_v49  ;;  %v8283_v58 = vunpack.i.h.bf16 %v8281_v39 }
 0x33e   :  { %v3344_v56 = vmax.f32 %v3088_v24, 0.0  ;;  %v8278_v24 = vunpack.i.h.bf16 %v11899_v46  ;;  %v2828_v39 = vmul.f32 %v11518_v8, %v11774_v44 }
 0x33f   :  { %v3103_v21 = vadd.f32 %v11536_v45, %v2840_v52  ;;  %v4334_v38 = vsel %vm4313_vm3, %v11015_v40, %v8282_v32  ;;  %v4335_v46 = vsel %vm4313_vm3, %v11059_v17, %v8283_v58 }
 0x340   :  { %7744 = vmatmul.mubr.f32.gmra.mrb[224].mxu1 %v4496_v43  ;;  %v2039_v36 = vpop.f32.mrb[52].mxu0  ;;  %v4416_v32 = vsel %vm4387_vm4, %v4334_v38, %v8278_v24  ;;  %v2829_v38 = vmul.f32 %v11518_v8, %v11786_v28  ;;  %v2830_v28 = vmul.f32 %v11518_v8, %v11798_v1 }
 0x341   :  { %v3359_v54 = vmax.f32 %v3103_v21, 0.0  ;;  %v2841_v3 = vmul.f32 %v11518_v8, %v2039_v36  ;;  %v7230_v33 = vpop.f32.mrb[53].mxu0  ;;  %7746 = vmatprep.mubr.msk.f32.mxu1 %vm8600_vm2, %v13460_v11 }
 0x343   :  { %v3535_v41 = vmax.f32 %v3343_v53, %v3359_v54  ;;  %v3104_v37 = vadd.f32 %v11536_v45, %v2841_v3  ;;  %v3090_v3 = vadd.f32 %v11536_v45, %v2827_v7 }
 0x344   :  { %7747 = vmatmul.mubr.f32.gmra.mrb[226].mxu1 %v4497_v23  ;;  %v2044_v52 = vpop.f32.mrb[54].mxu0 }
 0x345   :  { %v3360_v21 = vmax.f32 %v3104_v37, 0.0  ;;  %v2842_v43 = vmul.f32 %v11518_v8, %v2044_v52  ;;  %v7233_v36 = vpop.f32.mrb[55].mxu0  ;;  %7749 = vmatprep.mubr.msk.f32.mxu1 %vm8600_vm2, %v13460_v11 }
 0x347   :  { %v3536_v53 = vmax.f32 %v3344_v56, %v3360_v21  ;;  %v3105_v54 = vadd.f32 %v11536_v45, %v2842_v43  ;;  %v11944_v49 = vpop.permute.xlu1 %8290 }
 0x348   :  { %v8292_v33 = vunpack.i.l.bf16 %v11944_v49  ;;  %v8286_v2 = vpop.permute.xlu0 %8285  ;;  %v2049_v37 = vpop.f32.mrb[56].mxu0 }
 0x349   :  { %v11953_v23 = vmax.f32 %v3535_v41, %v3536_v53  ;;  %v3361_v52 = vmax.f32 %v3105_v54, 0.0  ;;  %v8287_v56 = vunpack.i.l.bf16 %v8286_v2  ;;  %v7236_v21 = vpop.f32.mrb[57].mxu0  ;;  %v8288_v43 = vunpack.i.h.bf16 %v8286_v2 }
 0x34a   :  { %v2843_v40 = vmul.f32 %v11518_v8, %v2049_v37  ;;  %v4417_v53 = vsel %vm4387_vm4, %v4335_v46, %v8292_v33  ;;  %v3091_v54 = vadd.f32 %v11536_v45, %v2828_v39  ;;  %v3092_v21 = vadd.f32 %v11536_v45, %v2829_v38 }
 0x34b   :  { %v3537_v27 = vmax.f32 %v3345_v14, %v3361_v52  ;;  %v4498_v7 = vsel %vm4469_vm5, %v4416_v32, %v8287_v56  ;;  %v11962_v36 = vpack.i.bf16 %v11953_v23, %v11725_v10  ;;  %v3346_v14 = vmax.f32 %v3090_v3, 0.0 }
 0x34c   :  { %v3106_v44 = vadd.f32 %v11536_v45, %v2843_v40  ;;  %7750 = vmatmul.mubr.f32.gmra.mrb[228].mxu1 %v4498_v7  ;;  %v2054_v41 = vpop.f32.mrb[58].mxu0  ;;  %v4499_v2 = vsel %vm4469_vm5, %v4417_v53, %v8288_v43  ;;  %v8296_v39 = vpop.permute.xlu0 %8295  ;;  %v3347_v56 = vmax.f32 %v3091_v54, 0.0  ;;  %v3348_v54 = vmax.f32 %v3092_v21, 0.0 }
 0x34d   :  { %v2844_v17 = vmul.f32 %v11518_v8, %v2054_v41  ;;  %8335 = vrot.lane.b32.xlu0 %v11962_v36, %s8603_s2  ;;  %8330 = vrot.lane.b32.xlu1 %v11962_v36, %s8604_s28  ;;  %v7239_v58 = vpop.f32.mrb[59].mxu0  ;;  %v8297_v1 = vunpack.i.l.bf16 %v8296_v39  ;;  %v2831_v41 = vmul.f32 %v11518_v8, %v11809_v20  ;;  %v8293_v20 = vunpack.i.h.bf16 %v11944_v49 }
 0x34e   :  { %v3362_v24 = vmax.f32 %v3106_v44, 0.0  ;;  %7752 = vmatprep.mubr.msk.f32.mxu1 %vm8600_vm2, %v13460_v11  ;;  %v3093_v44 = vadd.f32 %v11536_v45, %v2830_v28  ;;  %v8298_v58 = vunpack.i.h.bf16 %v8296_v39  ;;  %v2832_v39 = vmul.f32 %v11518_v8, %v11822_v62 }
 0x34f   :  { %v3107_v33 = vadd.f32 %v11536_v45, %v2844_v17  ;;  %v3094_v28 = vadd.f32 %v11536_v45, %v2831_v41 }
 0x350   :  { %v3538_v37 = vmax.f32 %v3346_v14, %v3362_v24  ;;  %7753 = vmatmul.mubr.f32.gmra.mrb[230].mxu1 %v4499_v2  ;;  %v2059_v52 = vpop.f32.mrb[60].mxu0  ;;  %v3349_v2 = vmax.f32 %v3093_v44, 0.0  ;;  %v4337_v49 = vsel %vm4313_vm3, %v11133_v55, %v8298_v58 }
 0x351   :  { %v3363_v40 = vmax.f32 %v3107_v33, 0.0  ;;  %v2845_v3 = vmul.f32 %v11518_v8, %v2059_v52  ;;  %8340 = vrot.lane.b32.xlu1 %v11574_v25, %s8602_s19  ;;  %v7242_v32 = vpop.f32.mrb[61].mxu0  ;;  %7755 = vmatprep.mubr.msk.f32.mxu1 %vm8600_vm2, %v13460_v11  ;;  %v4336_v33 = vsel %vm4313_vm3, %v11089_v9, %v8297_v1  ;;  %v3350_v58 = vmax.f32 %v3094_v28, 0.0 }
 0x352   :  { %v11986_v43 = vmax.f32 %v3537_v27, %v3538_v37  ;;  %v4418_v1 = vsel %vm4387_vm4, %v4336_v33, %v8293_v20 }
 0x353   :  { %v3539_v46 = vmax.f32 %v3347_v56, %v3363_v40  ;;  %v3108_v7 = vadd.f32 %v11536_v45, %v2845_v3 }
 0x354   :  { %v2064_v53 = vpop.f32.mrb[62].mxu0 }
 0x355   :  { %v3364_v38 = vmax.f32 %v3108_v7, 0.0  ;;  %v2846_v25 = vmul.f32 %v11518_v8, %v2064_v53  ;;  %v7245_v17 = vpop.f32.mrb[63].mxu0 }
 0x357   :  { %v3540_v14 = vmax.f32 %v3348_v54, %v3364_v38  ;;  %v3109_v27 = vadd.f32 %v11536_v45, %v2846_v25  ;;  %v11994_v24 = vpop.permute.xlu0 %8305  ;;  %v3095_v38 = vadd.f32 %v11536_v45, %v2832_v39  ;;  %v2833_v25 = vmul.f32 %v11518_v8, %v11834_v57 }
 0x358   :  { %v8307_v37 = vunpack.i.l.bf16 %v11994_v24  ;;  %v8301_v52 = vpop.permute.xlu1 %8300  ;;  %v2069_v56 = vpop.f32.mrb[64].mxu0  ;;  %v2834_v57 = vmul.f32 %v11518_v8, %v11846_v26 }
 0x359   :  { %v12003_v21 = vmax.f32 %v3539_v46, %v3540_v14  ;;  %v3365_v40 = vmax.f32 %v3109_v27, 0.0  ;;  %v8302_v3 = vunpack.i.l.bf16 %v8301_v52  ;;  %v7248_v32 = vpop.f32.mrb[65].mxu0  ;;  %v8303_v7 = vunpack.i.h.bf16 %v8301_v52 }
 0x35a   :  { %v2847_v9 = vmul.f32 %v11518_v8, %v2069_v56  ;;  %v4419_v54 = vsel %vm4387_vm4, %v4337_v49, %v8307_v37  ;;  %v3351_v52 = vmax.f32 %v3095_v38, 0.0  ;;  %v3096_v56 = vadd.f32 %v11536_v45, %v2833_v25 }
 0x35b   :  { %v3541_v44 = vmax.f32 %v3349_v2, %v3365_v40  ;;  %v4500_v41 = vsel %vm4469_vm5, %v4418_v1, %v8302_v3  ;;  %v12012_v53 = vpack.i.bf16 %v12003_v21, %v11986_v43  ;;  %v4501_v33 = vsel %vm4469_vm5, %v4419_v54, %v8303_v7  ;;  %v12043_v1 = vld [vmem:[%s13399_s3] ss:$0 sm:$0xff] }
 0x35c   :  { %v3110_v62 = vadd.f32 %v11536_v45, %v2847_v9  ;;  %7756 = vmatmul.mubr.f32.gmra.mrb[232].mxu1 %v4500_v41  ;;  %v2074_v46 = vpop.f32.mrb[66].mxu0  ;;  %v8311_v20 = vpop.permute.xlu1 %8310  ;;  %v3097_v9 = vadd.f32 %v11536_v45, %v2834_v57  ;;  %v3352_v49 = vmax.f32 %v3096_v56, 0.0 }
 0x35d   :  { %v2848_v55 = vmul.f32 %v11518_v8, %v2074_v46  ;;  %8350 = vrot.lane.b32.xlu1 %v12012_v53, %s8603_s2  ;;  %8345 = vrot.lane.b32.xlu0 %v12012_v53, %s8604_s28  ;;  %v7251_v17 = vpop.f32.mrb[67].mxu0  ;;  %v8312_v26 = vunpack.i.l.bf16 %v8311_v20  ;;  %v8313_v46 = vunpack.i.h.bf16 %v8311_v20 }
 0x35e   :  { %v3366_v14 = vmax.f32 %v3110_v62, 0.0  ;;  %7758 = vmatprep.mubr.msk.f32.mxu1 %vm8600_vm2, %v13460_v11  ;;  %v3353_v17 = vmax.f32 %v3097_v9, 0.0 }
 0x35f   :  { %v3111_v27 = vadd.f32 %v11536_v45, %v2848_v55  ;;  %v4338_v55 = vsel %vm4313_vm3, %v11163_v12, %v8312_v26 }
 0x360   :  { %v3542_v2 = vmax.f32 %v3350_v58, %v3366_v14  ;;  %7759 = vmatmul.mubr.f32.gmra.mrb[234].mxu1 %v4501_v33  ;;  %v2079_v37 = vpop.f32.mrb[68].mxu0  ;;  %v8308_v14 = vunpack.i.h.bf16 %v11994_v24 }
 0x361   :  { %v3367_v39 = vmax.f32 %v3111_v27, 0.0  ;;  %v2849_v28 = vmul.f32 %v11518_v8, %v2079_v37  ;;  %8355 = vrot.lane.b32.xlu0 %v11648_v50, %s8602_s19  ;;  %v7254_v40 = vpop.f32.mrb[69].mxu0  ;;  %7761 = vmatprep.mubr.msk.f32.mxu1 %vm8600_vm2, %v13460_v11  ;;  %v2835_v8 = vmul.f32 %v12043_v1, %v11857_v30  ;;  %v12056_v30 = vld [vmem:[%s13400_s4] ss:$0 sm:$0xff] }
 0x362   :  { %v12036_v3 = vmax.f32 %v3541_v44, %v3542_v2 }
 0x363   :  { %v3543_v32 = vmax.f32 %v3351_v52, %v3367_v39  ;;  %v3112_v7 = vadd.f32 %v11536_v45, %v2849_v28  ;;  %v3098_v58 = vadd.f32 %v12056_v30, %v2835_v8  ;;  %v4420_v39 = vsel %vm4387_vm4, %v4338_v55, %v8308_v14  ;;  %v13497_v28 = vld [vmem:[#allocation7_spill] sm:$0xff] }
 0x364   :  { %v2084_v50 = vpop.f32.mrb[70].mxu0  ;;  %v4339_v24 = vsel %vm4313_vm3, %v13497_v28, %v8313_v46 }
 0x365   :  { %v3368_v41 = vmax.f32 %v3112_v7, 0.0  ;;  %v2850_v44 = vmul.f32 %v12043_v1, %v2084_v50  ;;  %v7257_v62 = vpop.f32.mrb[71].mxu0  ;;  %v2837_v50 = vmul.f32 %v12043_v1, %v11882_v35  ;;  %v2838_v35 = vmul.f32 %v12043_v1, %v11889_v60 }
 0x367   :  { %v3544_v54 = vmax.f32 %v3352_v49, %v3368_v41  ;;  %v3113_v38 = vadd.f32 %v11536_v45, %v2850_v44  ;;  %v12049_v25 = vpop.permute.xlu1 %8320  ;;  %v2836_v45 = vmul.f32 %v12043_v1, %v11870_v5  ;;  %v3354_v44 = vmax.f32 %v3098_v58, 0.0 }
 0x368   :  { %v8322_v27 = vunpack.i.l.bf16 %v12049_v25  ;;  %v8316_v33 = vpop.permute.xlu0 %8315  ;;  %v2089_v57 = vpop.f32.mrb[72].mxu0  ;;  %v3100_v14 = vadd.f32 %v12056_v30, %v2837_v50 }
 0x369   :  { %v12063_v2 = vmax.f32 %v3543_v32, %v3544_v54  ;;  %v3369_v12 = vmax.f32 %v3113_v38, 0.0  ;;  %v8317_v20 = vunpack.i.l.bf16 %v8316_v33  ;;  %v7260_v37 = vpop.f32.mrb[73].mxu0  ;;  %v8318_v52 = vunpack.i.h.bf16 %v8316_v33 }
 0x36a   :  { %v2851_v56 = vmul.f32 %v12043_v1, %v2089_v57  ;;  %v4421_v9 = vsel %vm4387_vm4, %v4339_v24, %v8322_v27  ;;  %v3099_v8 = vadd.f32 %v12056_v30, %v2836_v45  ;;  %v3356_v37 = vmax.f32 %v3100_v14, 0.0  ;;  %v13500_v14 = vld [vmem:[#allocation9_spill] sm:$0xff] }
 0x36b   :  { %13496 = vst [vmem:[#allocation26_spill] sm:$0xff] %v12063_v2  ;;  %v3545_v40 = vmax.f32 %v3353_v17, %v3369_v12  ;;  %v4502_v26 = vsel %vm4469_vm5, %v4420_v39, %v8317_v20  ;;  %v12072_v7 = vpack.i.bf16 %v12063_v2, %v12036_v3  ;;  %v4503_v54 = vsel %vm4469_vm5, %v4421_v9, %v8318_v52 }
 0x36c   :  { %v3114_v5 = vadd.f32 %v12056_v30, %v2851_v56  ;;  %7762 = vmatmul.mubr.f32.gmra.mrb[236].mxu1 %v4502_v26  ;;  %v2094_v32 = vpop.f32.mrb[74].mxu0  ;;  %v3355_v17 = vmax.f32 %v3099_v8, 0.0  ;;  %v3101_v12 = vadd.f32 %v12056_v30, %v2838_v35  ;;  %v2839_v52 = vmul.f32 %v12043_v1, %v11894_v61 }
 0x36d   :  { %v2852_v49 = vmul.f32 %v12043_v1, %v2094_v32  ;;  %8365 = vrot.lane.b32.xlu0 %v12072_v7, %s8603_s2  ;;  %8360 = vrot.lane.b32.xlu1 %v12072_v7, %s8604_s28  ;;  %v7263_v41 = vpop.f32.mrb[75].mxu0 }
 0x36e   :  { %v3370_v62 = vmax.f32 %v3114_v5, 0.0  ;;  %7764 = vmatprep.mubr.msk.f32.mxu1 %vm8600_vm2, %v13460_v11  ;;  %v3357_v26 = vmax.f32 %v3101_v12, 0.0  ;;  %v3102_v5 = vadd.f32 %v12056_v30, %v2839_v52 }
 0x36f   :  { %v3115_v46 = vadd.f32 %v12056_v30, %v2852_v49 }
 0x370   :  { %v3546_v38 = vmax.f32 %v3354_v44, %v3370_v62  ;;  %7765 = vmatmul.mubr.f32.gmra.mrb[238].mxu1 %v4503_v54  ;;  %v2099_v55 = vpop.f32.mrb[76].mxu0  ;;  %v3358_v62 = vmax.f32 %v3102_v5, 0.0 }
 0x371   :  { %v3371_v27 = vmax.f32 %v3115_v46, 0.0  ;;  %v2853_v58 = vmul.f32 %v12043_v1, %v2099_v55  ;;  %8370 = vrot.lane.b32.xlu1 %v11711_v31, %s8602_s19  ;;  %v7266_v33 = vpop.f32.mrb[77].mxu0  ;;  %7767 = vmatprep.mubr.msk.f32.mxu1 %vm8600_vm2, %v13460_v11 }
 0x372   :  { %v12096_v57 = vmax.f32 %v3545_v40, %v3546_v38 }
 0x373   :  { %v3547_v45 = vmax.f32 %v3355_v17, %v3371_v27  ;;  %v3116_v60 = vadd.f32 %v12056_v30, %v2853_v58  ;;  %v5034_v27 = vmul.f32 %v11741_v0, %v13500_v14 }
 0x374   :  { %13498 = vst [vmem:[#allocation7_spill] sm:$0xff] %v12096_v57  ;;  %v2104_v20 = vpop.f32.mrb[78].mxu0 }
 0x375   :  { %v3372_v56 = vmax.f32 %v3116_v60, 0.0  ;;  %v2854_v39 = vmul.f32 %v12043_v1, %v2104_v20  ;;  %v7269_v31 = vpop.f32.mrb[79].mxu0  ;;  %v5105_v60 = vadd.f32 %v11756_v16, %v5034_v27 }
 0x377   :  { %v3548_v28 = vmax.f32 %v3356_v37, %v3372_v56  ;;  %v3117_v24 = vadd.f32 %v12056_v30, %v2854_v39 }
 0x378   :  { %v2109_v40 = vpop.f32.mrb[80].mxu0 }
 0x379   :  { %v12105_v32 = vmax.f32 %v3547_v45, %v3548_v28  ;;  %v3373_v9 = vmax.f32 %v3117_v24, 0.0  ;;  %v2855_v8 = vmul.f32 %v12043_v1, %v2109_v40  ;;  %v7272_v50 = vpop.f32.mrb[81].mxu0 }
 0x37b   :  { %13499 = vst [vmem:[#allocation27_spill] sm:$0xff] %v12105_v32  ;;  %v3549_v49 = vmax.f32 %v3357_v26, %v3373_v9  ;;  %v3118_v61 = vadd.f32 %v12056_v30, %v2855_v8  ;;  %v12111_v41 = vpack.i.bf16 %v12105_v32, %v12096_v57  ;;  %v4341_v57 = vsel %vm4313_vm3, %v11255_v19, %v13488_v6 }
 0x37c   :  { %v2114_v44 = vpop.f32.mrb[82].mxu0 }
 0x37d   :  { %v3374_v46 = vmax.f32 %v3118_v61, 0.0  ;;  %8380 = vrot.lane.b32.xlu1 %v12111_v41, %s8603_s2  ;;  %8375 = vrot.lane.b32.xlu0 %v12111_v41, %s8604_s28  ;;  %v7275_v54 = vpop.f32.mrb[83].mxu0 }
 0x37f   :  { %v3550_v35 = vmax.f32 %v3358_v62, %v3374_v46 }
 0x380   :  { %v12117_v38 = vpop.f32.mrb[84].mxu0 }
 0x381   :  { %v12119_v55 = vmax.f32 %v3549_v49, %v3550_v35  ;;  %8385 = vrot.lane.b32.xlu0 %v11962_v36, %s8602_s19  ;;  %v7278_v17 = vpop.f32.mrb[85].mxu0  ;;  %v5169_v36 = vmax.f32 %v5105_v60, 0.0  ;;  %v13501_v49 = vmax.f32 %v11825_v42, %v11860_v47 }
 0x384   :  { %v12125_v58 = vpop.f32.mrb[86].mxu0 }
 0x385   :  { %v7281_v33 = vpop.f32.mrb[87].mxu0 }
 0x386   :  { %v4712_v45 = vpop.f32.mrb[204].mxu1 }
 0x387   :  { %v5042_v12 = vmul.f32 %v11741_v0, %v4712_v45  ;;  %v7715_v20 = vpop.f32.mrb[205].mxu1 }
 0x388   :  { %v12129_v37 = vpop.f32.mrb[88].mxu0 }
 0x389   :  { %v7284_v52 = vpop.f32.mrb[89].mxu0  ;;  %v5113_v56 = vadd.f32 %v11756_v16, %v5042_v12 }
 0x38a   :  { %v4717_v39 = vpop.f32.mrb[206].mxu1 }
 0x38b   :  { %v5177_v31 = vmax.f32 %v5113_v56, 0.0  ;;  %v7718_v28 = vpop.f32.mrb[207].mxu1 }
 0x38c   :  { %v12132_v24 = vpop.f32.mrb[90].mxu0 }
 0x38d   :  { %v7287_v26 = vpop.f32.mrb[91].mxu0  ;;  %v5233_v40 = vmax.f32 %v5169_v36, %v5177_v31 }
 0x38e   :  { %v12134_v5 = vpop.f32.mrb[208].mxu1 }
 0x38f   :  { %v5261_v9 = vmax.f32 %v11909_v4, %v5233_v40  ;;  %v7721_v8 = vpop.f32.mrb[209].mxu1 }
 0x390   :  { %v12137_v0 = vpop.f32.mrb[92].mxu0  ;;  %v8326_v8 = vpop.permute.xlu0 %8325 }
 0x391   :  { %v7290_v50 = vpop.f32.mrb[93].mxu0  ;;  %v12142_v16 = vpack.i.bf16 %v13501_v49, %v5261_v9  ;;  %v8328_v32 = vunpack.i.h.bf16 %v8326_v8 }
 0x393   :  { %v4342_v19 = vsel %vm4313_vm3, 0.0, %v8328_v32 }
 0x394   :  { %v12144_v61 = vpop.f32.mrb[94].mxu0 }
 0x395   :  { %v7293_v44 = vpop.f32.mrb[95].mxu0 }
 0x396   :  { %v12146_v62 = vpop.f32.mrb[210].mxu1 }
 0x397   :  { %v7724_v46 = vpop.f32.mrb[211].mxu1 }
 0x398   :  { %v12148_v54 = vpop.f32.mrb[96].mxu0 }
 0x399   :  { %v7296_v35 = vpop.f32.mrb[97].mxu0 }
 0x39a   :  { %v12150_v17 = vpop.f32.mrb[212].mxu1  ;;  %v8327_v35 = vunpack.i.l.bf16 %v8326_v8 }
 0x39b   :  { %v7727_v4 = vpop.f32.mrb[213].mxu1 }
 0x39c   :  { %v12152_v14 = vpop.f32.mrb[98].mxu0 }
 0x39d   :  { %v7299_v27 = vpop.f32.mrb[99].mxu0 }
 0x3a0   :  { %v12154_v33 = vpop.f32.mrb[100].mxu0 }
 0x3a1   :  { %v7302_v42 = vpop.f32.mrb[101].mxu0 }
 0x3a4   :  { %v12156_v47 = vpop.f32.mrb[102].mxu0 }
 0x3a5   :  { %v7305_v45 = vpop.f32.mrb[103].mxu0 }
 0x3a6   :  { %v12158_v60 = vpop.f32.mrb[214].mxu1 }
 0x3a7   :  { %v7730_v12 = vpop.f32.mrb[215].mxu1 }
 0x3a8   :  { %v12160_v20 = vpop.f32.mrb[104].mxu0 }
 0x3a9   :  { %v7308_v52 = vpop.f32.mrb[105].mxu0 }
 0x3aa   :  { %v12162_v56 = vpop.f32.mrb[216].mxu1 }
 0x3ab   :  { %v7733_v39 = vpop.f32.mrb[217].mxu1 }
 0x3ac   :  { %v12164_v36 = vpop.f32.mrb[106].mxu0  ;;  %v13502_v39 = vld [vmem:[#allocation23_spill] sm:$0xff] }
 0x3ad   :  { %v7311_v31 = vpop.f32.mrb[107].mxu0 }
 0x3ae   :  { %v4340_v31 = vsel %vm4313_vm3, %v13502_v39, %v8327_v35 }
 0x3b0   :  { %v12166_v28 = vpop.f32.mrb[108].mxu0 }
 0x3b1   :  { %v7314_v26 = vpop.f32.mrb[109].mxu0 }
 0x3b2   :  { %v8323_v26 = vunpack.i.h.bf16 %v12049_v25  ;;  %v2857_v25 = vmul.f32 %v12043_v1, %v12125_v58 }
 0x3b4   :  { %v12168_v40 = vpop.f32.mrb[110].mxu0 }
 0x3b5   :  { %v7317_v9 = vpop.f32.mrb[111].mxu0  ;;  %v12170_v50 = vpop.f32.mrb[218].mxu1 }
 0x3b6   :  { %v7736_v49 = vpop.f32.mrb[219].mxu1 }
 0x3b8   :  { %v12172_v44 = vpop.f32.mrb[112].mxu0 }
 0x3b9   :  { %v7320_v46 = vpop.f32.mrb[113].mxu0 }
 0x3ba   :  { %v12174_v4 = vpop.f32.mrb[220].mxu1  ;;  %v2856_v46 = vmul.f32 %v12043_v1, %v12117_v38 }
 0x3bb   :  { %v7739_v27 = vpop.f32.mrb[221].mxu1 }
 0x3bc   :  { %v12176_v42 = vpop.f32.mrb[114].mxu0  ;;  %v4422_v27 = vsel %vm4387_vm4, %v4340_v31, %v8323_v26  ;;  %v3119_v38 = vadd.f32 %v12056_v30, %v2856_v46  ;;  %v3120_v26 = vadd.f32 %v12056_v30, %v2857_v25 }
 0x3bd   :  { %v7323_v45 = vpop.f32.mrb[115].mxu0 }
 0x3be   :  { %v3375_v46 = vmax.f32 %v3119_v38, 0.0 }
 0x3bf   :  { %v12178_v12 = vpop.permute.xlu0 %8335  ;;  %v8331_v52 = vpop.permute.xlu1 %8330 }
 0x3c0   :  { %v8337_v9 = vunpack.i.l.bf16 %v12178_v12  ;;  %v2198_v49 = vpop.f32.mrb[116].mxu0  ;;  %v8332_v63 = vunpack.i.l.bf16 %v8331_v52  ;;  %v8333_v31 = vunpack.i.h.bf16 %v8331_v52  ;;  %v2859_v52 = vmul.f32 %v12043_v1, %v12132_v24 }
 0x3c1   :  { %v7326_v13 = vpop.f32.mrb[117].mxu0 }
 0x3c2   :  { %v4504_v45 = vsel %vm4469_vm5, %v4422_v27, %v8332_v63  ;;  %v4423_v39 = vsel %vm4387_vm4, %v4341_v57, %v8337_v9  ;;  %v2858_v63 = vmul.f32 %v12043_v1, %v12129_v37  ;;  %v4424_v37 = vsel %vm4387_vm4, %v4342_v19, %v10337_v15 }
 0x3c3   :  { %7768 = vmatmul.mubr.f32.gmra.mrb[240].mxu1 %v4504_v45  ;;  %v8341_v8 = vpop.permute.xlu1 %8340  ;;  %v4505_v57 = vsel %vm4469_vm5, %v4423_v39, %v10937_v22  ;;  %v4506_v38 = vsel %vm4469_vm5, %v4424_v37, %v8333_v31  ;;  %v8338_v19 = vunpack.i.h.bf16 %v12178_v12  ;;  %v3122_v31 = vadd.f32 %v12056_v30, %v2859_v52 }
 0x3c4   :  { %v2202_v35 = vpop.f32.mrb[118].mxu0  ;;  %7770 = vmatprep.mubr.msk.f32.mxu1 %vm8600_vm2, %v13460_v11  ;;  %v8342_v27 = vunpack.i.l.bf16 %v8341_v8  ;;  %v3121_v32 = vadd.f32 %v12056_v30, %v2858_v63 }
 0x3c5   :  { %v2872_v13 = vmul.f32 %v12043_v1, %v2202_v35  ;;  %v7329_v49 = vpop.f32.mrb[119].mxu0 }
 0x3c6   :  { %v4343_v63 = vsel %vm4313_vm3, %v11475_v51, %v8342_v27  ;;  %v3377_v24 = vmax.f32 %v3121_v32, 0.0 }
 0x3c7   :  { %v3135_v58 = vadd.f32 %v12056_v30, %v2872_v13  ;;  %7771 = vmatmul.mubr.f32.gmra.mrb[242].mxu1 %v4505_v57  ;;  %v3376_v13 = vmax.f32 %v3120_v26, 0.0  ;;  %v4425_v27 = vsel %vm4387_vm4, %v4343_v63, %v8338_v19 }
 0x3c8   :  { %v2207_v9 = vpop.f32.mrb[120].mxu0  ;;  %7773 = vmatprep.mubr.msk.f32.mxu1 %vm8600_vm2, %v13460_v11 }
 0x3c9   :  { %v3391_v45 = vmax.f32 %v3135_v58, 0.0  ;;  %v2873_v35 = vmul.f32 %v12043_v1, %v2207_v9  ;;  %v7332_v49 = vpop.f32.mrb[121].mxu0  ;;  %v8343_v58 = vunpack.i.h.bf16 %v8341_v8  ;;  %v2860_v8 = vmul.f32 %v12043_v1, %v12137_v0 }
 0x3cb   :  { %v3551_v25 = vmax.f32 %v3375_v46, %v3391_v45  ;;  %v3136_v39 = vadd.f32 %v12056_v30, %v2873_v35  ;;  %7774 = vmatmul.mubr.f32.gmra.mrb[244].mxu1 %v4506_v38  ;;  %v8605_v46 = vmov 0   ;;  %v4344_v12 = vsel %vm4313_vm3, %v11524_v34, %v8343_v58 }
 0x3cc   :  { %v2212_v57 = vpop.f32.mrb[122].mxu0  ;;  %7776 = vmatprep.mubr.msk.f32.mxu1 %vm8600_vm2, %v13460_v11  ;;  %8564 = vset.pattern.permute.xlu0 %v8605_v46  ;;  %v2861_v58 = vmul.f32 %v12043_v1, %v12144_v61 }
 0x3cd   :  { %v3392_v9 = vmax.f32 %v3136_v39, 0.0  ;;  %v2874_v49 = vmul.f32 %v12043_v1, %v2212_v57  ;;  %v7335_v2 = vpop.f32.mrb[123].mxu0 }
 0x3cf   :  { %v3552_v26 = vmax.f32 %v3376_v13, %v3392_v9  ;;  %v3137_v45 = vadd.f32 %v12056_v30, %v2874_v49  ;;  %v12225_v2 = vpop.permute.xlu1 %8350  ;;  %v8346_v35 = vpop.permute.xlu0 %8345  ;;  %v8606_v49 = vmov 1  }
 0x3d0   :  { %v8352_v37 = vunpack.i.l.bf16 %v12225_v2  ;;  %v8347_v39 = vunpack.i.l.bf16 %v8346_v35  ;;  %v2217_v51 = vpop.f32.mrb[124].mxu0  ;;  %v8348_v13 = vunpack.i.h.bf16 %v8346_v35  ;;  %8565 = vset.pattern.permute.xlu1 %v8606_v49 }
 0x3d1   :  { %v12231_v32 = vmax.f32 %v3551_v25, %v3552_v26  ;;  %v3393_v52 = vmax.f32 %v3137_v45, 0.0  ;;  %v2875_v0 = vmul.f32 %v12043_v1, %v2217_v51  ;;  %v7338_v38 = vpop.f32.mrb[125].mxu0  ;;  %v3123_v25 = vadd.f32 %v12056_v30, %v2860_v8 }
 0x3d2   :  { %v4507_v57 = vsel %vm4469_vm5, %v4425_v27, %v8347_v39  ;;  %v4426_v9 = vsel %vm4387_vm4, %v4344_v12, %v8352_v37  ;;  %v3378_v26 = vmax.f32 %v3122_v31, 0.0  ;;  %v2862_v8 = vmul.f32 %v12043_v1, %v12148_v54 }
 0x3d3   :  { %v3553_v46 = vmax.f32 %v3377_v24, %v3393_v52  ;;  %v3138_v63 = vadd.f32 %v12056_v30, %v2875_v0  ;;  %7777 = vmatmul.mubr.f32.gmra.mrb[246].mxu1 %v4507_v57  ;;  %v12240_v34 = vpack.i.bf16 %v12231_v32, %v12119_v55  ;;  %v8356_v37 = vpop.permute.xlu0 %8355  ;;  %v4508_v61 = vsel %vm4469_vm5, %v4426_v9, %v8348_v13 }
 0x3d4   :  { %v2222_v19 = vpop.f32.mrb[126].mxu0  ;;  %7779 = vmatprep.mubr.msk.f32.mxu1 %vm8600_vm2, %v13460_v11  ;;  %v3379_v31 = vmax.f32 %v3123_v25, 0.0  ;;  %v3124_v27 = vadd.f32 %v12056_v30, %v2861_v58  ;;  %v8357_v0 = vunpack.i.l.bf16 %v8356_v37  ;;  %v3125_v57 = vadd.f32 %v12056_v30, %v2862_v8 }
 0x3d5   :  { %v3394_v45 = vmax.f32 %v3138_v63, 0.0  ;;  %v2876_v24 = vmul.f32 %v12043_v1, %v2222_v19  ;;  %8395 = vrot.lane.b32.xlu0 %v12240_v34, %s8603_s2  ;;  %8390 = vrot.lane.b32.xlu1 %v12240_v34, %s8604_s28  ;;  %v7341_v35 = vpop.f32.mrb[127].mxu0  ;;  %v2863_v9 = vmul.f32 %v12043_v1, %v12152_v14  ;;  %v8358_v58 = vunpack.i.h.bf16 %v8356_v37 }
 0x3d6   :  { %v4345_v35 = vsel %vm4313_vm3, %v11559_v59, %v8357_v0  ;;  %v2864_v14 = vmul.f32 %v12043_v1, %v12154_v33  ;;  %v5473_v0 = vld [vmem:[%s13403_s11] sm:$0xff]  ;;  %v5474_v33 = vld [vmem:[%s13403_s11 + $0x8] sm:$0xff] }
 0x3d7   :  { %v3554_v39 = vmax.f32 %v3378_v26, %v3394_v45  ;;  %v3139_v51 = vadd.f32 %v12056_v30, %v2876_v24  ;;  %7780 = vmatmul.mubr.f32.gmra.mrb[248].mxu1 %v4508_v61  ;;  %v8353_v61 = vunpack.i.h.bf16 %v12225_v2  ;;  %v3126_v8 = vadd.f32 %v12056_v30, %v2863_v9 }
 0x3d8   :  { %v2227_v12 = vpop.f32.mrb[128].mxu0  ;;  %7782 = vmatprep.mubr.msk.f32.mxu1 %vm8600_vm2, %v13460_v11  ;;  %v4346_v2 = vsel %vm4313_vm3, %v11603_v29, %v8358_v58 }
 0x3d9   :  { %v12259_v52 = vmax.f32 %v3553_v46, %v3554_v39  ;;  %v3395_v38 = vmax.f32 %v3139_v51, 0.0  ;;  %v2877_v54 = vmul.f32 %v12043_v1, %v2227_v12  ;;  %8400 = vrot.lane.b32.xlu1 %v12012_v53, %s8602_s19  ;;  %v7344_v13 = vpop.f32.mrb[129].mxu0  ;;  %v3380_v46 = vmax.f32 %v3124_v27, 0.0 }
 0x3da   :  { %v3381_v53 = vmax.f32 %v3125_v57, 0.0  ;;  %v4427_v59 = vsel %vm4387_vm4, %v4345_v35, %v8353_v61  ;;  %v3382_v35 = vmax.f32 %v3126_v8, 0.0  ;;  %v2865_v61 = vmul.f32 %v12043_v1, %v12156_v47 }
 0x3db   :  { %v3555_v63 = vmax.f32 %v3379_v31, %v3395_v38  ;;  %v3140_v25 = vadd.f32 %v12056_v30, %v2877_v54 }
 0x3dc   :  { %v2232_v19 = vpop.f32.mrb[130].mxu0 }
 0x3dd   :  { %v3396_v26 = vmax.f32 %v3140_v25, 0.0  ;;  %v2878_v45 = vmul.f32 %v12043_v1, %v2232_v19  ;;  %v7347_v24 = vpop.f32.mrb[131].mxu0  ;;  %v7955_v25 = vpack.c.bf16 %v5474_v33, %v5473_v0 }
 0x3df   :  { %v3556_v39 = vmax.f32 %v3380_v46, %v3396_v26  ;;  %v3141_v37 = vadd.f32 %v12056_v30, %v2878_v45  ;;  %v12276_v51 = vpop.permute.xlu0 %8365  ;;  %v8361_v31 = vpop.permute.xlu1 %8360  ;;  %7956 = vmatpush3.bf16.msra.mxu1 %v7955_v25  ;;  %v2867_v25 = vmul.f32 %v12043_v1, %v12164_v36 }
 0x3e0   :  { %v8367_v27 = vunpack.i.l.bf16 %v12276_v51  ;;  %v8362_v12 = vunpack.i.l.bf16 %v8361_v31  ;;  %v2237_v38 = vpop.f32.mrb[132].mxu0  ;;  %v8363_v19 = vunpack.i.h.bf16 %v8361_v31 }
 0x3e1   :  { %v12288_v54 = vmax.f32 %v3555_v63, %v3556_v39  ;;  %v3397_v13 = vmax.f32 %v3141_v37, 0.0  ;;  %v2879_v57 = vmul.f32 %v12043_v1, %v2237_v38  ;;  %v7350_v9 = vpop.f32.mrb[133].mxu0  ;;  %v3127_v63 = vadd.f32 %v12056_v30, %v2864_v14 }
 0x3e2   :  { %v4509_v46 = vsel %vm4469_vm5, %v4427_v59, %v8362_v12  ;;  %v4428_v29 = vsel %vm4387_vm4, %v4346_v2, %v8367_v27  ;;  %v2866_v14 = vmul.f32 %v12043_v1, %v12160_v20  ;;  %v13503_v27 = vmov 0.0|0.0  }
 0x3e3   :  { %v3557_v58 = vmax.f32 %v3381_v53, %v3397_v13  ;;  %v3142_v26 = vadd.f32 %v12056_v30, %v2879_v57  ;;  %7783 = vmatmul.mubr.f32.gmra.mrb[250].mxu1 %v4509_v46  ;;  %v12296_v45 = vpack.i.bf16 %v12288_v54, %v12259_v52  ;;  %v4510_v31 = vsel %vm4469_vm5, %v4428_v29, %v8363_v19  ;;  %v8371_v12 = vpop.permute.xlu1 %8370 }
 0x3e4   :  { %v2242_v24 = vpop.f32.mrb[134].mxu0  ;;  %7785 = vmatprep.mubr.msk.f32.mxu1 %vm8600_vm2, %v13460_v11  ;;  %7957 = vmatprep.subr.bf16.mxu1 %v13503_v27  ;;  %v3383_v38 = vmax.f32 %v3127_v63, 0.0  ;;  %v3128_v2 = vadd.f32 %v12056_v30, %v2865_v61  ;;  %v3129_v57 = vadd.f32 %v12056_v30, %v2866_v14  ;;  %v8372_v9 = vunpack.i.l.bf16 %v8371_v12 }
 0x3e5   :  { %v3398_v39 = vmax.f32 %v3142_v26, 0.0  ;;  %v2880_v53 = vmul.f32 %v12043_v1, %v2242_v24  ;;  %8410 = vrot.lane.b32.xlu1 %v12296_v45, %s8603_s2  ;;  %8405 = vrot.lane.b32.xlu0 %v12296_v45, %s8604_s28  ;;  %v7353_v37 = vpop.f32.mrb[135].mxu0  ;;  %v8373_v29 = vunpack.i.h.bf16 %v8371_v12 }
 0x3e6   :  { %v3385_v61 = vmax.f32 %v3129_v57, 0.0 }
 0x3e7   :  { %v3558_v8 = vmax.f32 %v3382_v35, %v3398_v39  ;;  %v3143_v47 = vadd.f32 %v12056_v30, %v2880_v53  ;;  %7786 = vmatmul.mubr.f32.gmra.mrb[252].mxu1 %v4510_v31  ;;  %v3130_v39 = vadd.f32 %v12056_v30, %v2867_v25  ;;  %v8368_v53 = vunpack.i.h.bf16 %v12276_v51 }
 0x3e8   :  { %v2247_v59 = vpop.f32.mrb[136].mxu0  ;;  %7788 = vmatprep.mubr.msk.f32.mxu1 %vm8600_vm2, %v13460_v11  ;;  %v4348_v12 = vsel %vm4313_vm3, %v11677_v18, %v8373_v29 }
 0x3e9   :  { %v12316_v0 = vmax.f32 %v3557_v58, %v3558_v8  ;;  %v3399_v33 = vmax.f32 %v3143_v47, 0.0  ;;  %v2881_v20 = vmul.f32 %v12043_v1, %v2247_v59  ;;  %8415 = vrot.lane.b32.xlu0 %v12072_v7, %s8602_s19  ;;  %v7356_v13 = vpop.f32.mrb[137].mxu0  ;;  %v3384_v58 = vmax.f32 %v3128_v2, 0.0 }
 0x3ea   :  { %v4347_v7 = vsel %vm4313_vm3, %v11633_v48, %v8372_v9  ;;  %v2868_v8 = vmul.f32 %v12043_v1, %v12166_v28  ;;  %v3386_v29 = vmax.f32 %v3130_v39, 0.0 }
 0x3eb   :  { %v3559_v19 = vmax.f32 %v3383_v38, %v3399_v33  ;;  %v3144_v46 = vadd.f32 %v12056_v30, %v2881_v20  ;;  %v4429_v20 = vsel %vm4387_vm4, %v4347_v7, %v8368_v53 }
 0x3ec   :  { %v2252_v26 = vpop.f32.mrb[138].mxu0 }
 0x3ed   :  { %v3400_v63 = vmax.f32 %v3144_v46, 0.0  ;;  %v2882_v24 = vmul.f32 %v12043_v1, %v2252_v26  ;;  %v7359_v35 = vpop.f32.mrb[139].mxu0  ;;  %v2869_v26 = vmul.f32 %v12043_v1, %v12168_v40  ;;  %v2870_v40 = vmul.f32 %v12043_v1, %v12172_v44 }
 0x3ef   :  { %v3560_v37 = vmax.f32 %v3384_v58, %v3400_v63  ;;  %v3145_v36 = vadd.f32 %v12056_v30, %v2882_v24  ;;  %v12331_v14 = vpop.permute.xlu1 %8380  ;;  %v8376_v31 = vpop.permute.xlu0 %8375  ;;  %v3133_v44 = vadd.f32 %v12056_v30, %v2870_v40  ;;  %v13505_v40 = vld [vmem:[#allocation3_spill] sm:$0xff] }
 0x3f0   :  { %v8382_v47 = vunpack.i.l.bf16 %v12331_v14  ;;  %v8377_v38 = vunpack.i.l.bf16 %v8376_v31  ;;  %v2257_v48 = vpop.f32.mrb[140].mxu0  ;;  %v8378_v57 = vunpack.i.h.bf16 %v8376_v31 }
 0x3f1   :  { %v12338_v59 = vmax.f32 %v3559_v19, %v3560_v37  ;;  %v3401_v2 = vmax.f32 %v3145_v36, 0.0  ;;  %v2883_v51 = vmul.f32 %v12043_v1, %v2257_v48  ;;  %v7362_v33 = vpop.f32.mrb[141].mxu0  ;;  %v3131_v19 = vadd.f32 %v12056_v30, %v2868_v8 }
 0x3f2   :  { %v4430_v13 = vsel %vm4387_vm4, %v4348_v12, %v8382_v47  ;;  %v4511_v28 = vsel %vm4469_vm5, %v4429_v20, %v8377_v38  ;;  %v3132_v37 = vadd.f32 %v12056_v30, %v2869_v26 }
 0x3f3   :  { %v3561_v9 = vmax.f32 %v3385_v61, %v3401_v2  ;;  %v3146_v18 = vadd.f32 %v12056_v30, %v2883_v51  ;;  %7789 = vmatmul.mubr.f32.gmra.mrb[254].mxu1 %v4511_v28  ;;  %v12347_v25 = vpack.i.bf16 %v12338_v59, %v12316_v0  ;;  %v4512_v35 = vsel %vm4469_vm5, %v4430_v13, %v8378_v57 }
 0x3f4   :  { %v2262_v46 = vpop.f32.mrb[142].mxu0  ;;  %7791 = vmatprep.mubr.msk.f32.mxu1 %vm8600_vm2, %v13460_v11  ;;  %v3387_v39 = vmax.f32 %v3131_v19, 0.0  ;;  %v3388_v2 = vmax.f32 %v3132_v37, 0.0  ;;  %v2871_v51 = vmul.f32 %v12043_v1, %v12176_v42 }
 0x3f5   :  { %v3402_v58 = vmax.f32 %v3146_v18, 0.0  ;;  %v2884_v63 = vmul.f32 %v12043_v1, %v2262_v46  ;;  %8425 = vrot.lane.b32.xlu0 %v12347_v25, %s8603_s2  ;;  %8420 = vrot.lane.b32.xlu1 %v12347_v25, %s8604_s28  ;;  %v7365_v24 = vpop.f32.mrb[143].mxu0 }
 0x3f6   :  { %v3134_v18 = vadd.f32 %v12056_v30, %v2871_v51 }
 0x3f7   :  { %v3562_v61 = vmax.f32 %v3386_v29, %v3402_v58  ;;  %v3147_v7 = vadd.f32 %v12056_v30, %v2884_v63  ;;  %7792 = vmatmul.mubr.f32.gmra.mrb[0].mxu1 %v4512_v35 }
 0x3f8   :  { %v2267_v53 = vpop.f32.mrb[144].mxu0  ;;  %7794 = vmatprep.mubr.msk.f32.mxu1 %vm8600_vm2, %v13460_v11  ;;  %v3390_v24 = vmax.f32 %v3134_v18, 0.0 }
 0x3f9   :  { %v12366_v36 = vmax.f32 %v3561_v9, %v3562_v61  ;;  %v3403_v31 = vmax.f32 %v3147_v7, 0.0  ;;  %v2885_v8 = vmul.f32 %v12043_v1, %v2267_v53  ;;  %8430 = vrot.lane.b32.xlu1 %v12111_v41, %s8602_s19  ;;  %v7368_v12 = vpop.f32.mrb[145].mxu0  ;;  %v3389_v9 = vmax.f32 %v3133_v44, 0.0  ;;  %v13506_v53 = vld [vmem:[#allocation4_spill] sm:$0xff]  ;;  %v13507_v44 = vld [vmem:[#allocation5_spill] sm:$0xff] }
 0x3fa   :  { %v8464_v37 = vpack.i.bf16 %v13506_v53, %v13505_v40 }
 0x3fb   :  { %v3563_v47 = vmax.f32 %v3387_v39, %v3403_v31  ;;  %v3148_v38 = vadd.f32 %v12056_v30, %v2885_v8 }
 0x3fc   :  { %v2272_v48 = vpop.f32.mrb[146].mxu0 }
 0x3fd   :  { %v3404_v33 = vmax.f32 %v3148_v38, 0.0  ;;  %v2886_v20 = vmul.f32 %v12043_v1, %v2272_v48  ;;  %v7371_v13 = vpop.f32.mrb[147].mxu0  ;;  %v13508_v48 = vld [vmem:[#allocation6_spill] sm:$0xff] }
 0x3fe   :  { %v13510_v13 = vld [vmem:[#allocation10_spill] sm:$0xff] }
 0x3ff   :  { %v3564_v57 = vmax.f32 %v3388_v2, %v3404_v33  ;;  %v3149_v28 = vadd.f32 %v12056_v30, %v2886_v20  ;;  %v8484_v2 = vpack.i.bf16 %v13508_v48, %v13507_v44  ;;  %v13509_v20 = vld [vmem:[#allocation8_spill] sm:$0xff] }
 0x400   :  { %v2277_v41 = vpop.f32.mrb[148].mxu0 }
 0x401   :  { %v12378_v19 = vmax.f32 %v3563_v47, %v3564_v57  ;;  %v3405_v46 = vmax.f32 %v3149_v28, 0.0  ;;  %v2887_v29 = vmul.f32 %v12043_v1, %v2277_v41  ;;  %v7374_v26 = vpop.f32.mrb[149].mxu0  ;;  %v13504_v1 = vld [vmem:[#allocation2_spill] sm:$0xff]  ;;  %v8494_v57 = vpack.i.bf16 %v13510_v13, %v13509_v20 }
 0x403   :  { %v3565_v58 = vmax.f32 %v3389_v9, %v3405_v46  ;;  %v3150_v42 = vadd.f32 %v12056_v30, %v2887_v29  ;;  %v8439_v63 = vpack.i.bf16 %v12378_v19, %v12366_v36 }
 0x405   :  { %v3406_v35 = vmax.f32 %v3150_v42, 0.0  ;;  %8440 = vrot.lane.b32.xlu1 %v8439_v63, %s8603_s2  ;;  %8435 = vrot.lane.b32.xlu0 %v8439_v63, %s8604_s28 }
 0x407   :  { %v3566_v61 = vmax.f32 %v3390_v24, %v3406_v35  ;;  %v13511_v35 = vld [vmem:[#allocation12_spill] sm:$0xff] }
 0x409   :  { %v12386_v7 = vmax.f32 %v3565_v58, %v3566_v61  ;;  %8445 = vrot.lane.b32.xlu0 %v12240_v34, %s8602_s19  ;;  %v12404_v34 = vld [vmem:[%s13401_s6] ss:$0 sm:$0xff] }
 0x40a   :  { %v5043_v12 = vmul.f32 %v12404_v34, %v12134_v5  ;;  %v5044_v9 = vmul.f32 %v12404_v34, %v12146_v62  ;;  %v5045_v26 = vmul.f32 %v12404_v34, %v12150_v17 }
 0x40b   :  { %v8454_v39 = vpack.i.bf16 %v13504_v1, %v12386_v7 }
 0x40d   :  { %8455 = vrot.lane.b32.xlu0 %v8454_v39, %s8603_s2  ;;  %8450 = vrot.lane.b32.xlu1 %v8454_v39, %s8604_s28 }
 0x40f   :  { %v12394_v30 = vpop.f32.mrb[222].mxu1 }
 0x410   :  { %v7742_v31 = vpop.f32.mrb[223].mxu1 }
 0x411   :  { %8465 = vrot.lane.b32.xlu0 %v8464_v37, %s8604_s28  ;;  %8460 = vrot.lane.b32.xlu1 %v12296_v45, %s8602_s19  ;;  %v12416_v45 = vld [vmem:[%s13402_s7] ss:$0 sm:$0xff] }
 0x412   :  { %v5114_v51 = vadd.f32 %v12416_v45, %v5043_v12  ;;  %v5115_v29 = vadd.f32 %v12416_v45, %v5044_v9 }
 0x413   :  { %v4761_v8 = vpop.f32.mrb[224].mxu1 }
 0x414   :  { %v7745_v47 = vpop.f32.mrb[225].mxu1  ;;  %v5178_v28 = vmax.f32 %v5114_v51, 0.0  ;;  %v5179_v31 = vmax.f32 %v5115_v29, 0.0  ;;  %v5116_v8 = vadd.f32 %v12416_v45, %v5045_v26  ;;  %v13513_v51 = vld [vmem:[#allocation16_spill] sm:$0xff]  ;;  %v13515_v26 = vld [vmem:[#allocation18_spill] sm:$0xff] }
 0x415   :  { %8475 = vrot.lane.b32.xlu0 %v12347_v25, %s8602_s19  ;;  %8470 = vrot.lane.b32.xlu1 %v8464_v37, %s8603_s2 }
 0x417   :  { %v4765_v38 = vpop.f32.mrb[226].mxu1 }
 0x418   :  { %v5051_v33 = vmul.f32 %v12404_v34, %v4765_v38  ;;  %v7748_v5 = vpop.f32.mrb[227].mxu1 }
 0x419   :  { %8485 = vrot.lane.b32.xlu0 %v8484_v2, %s8603_s2  ;;  %8480 = vrot.lane.b32.xlu1 %v8484_v2, %s8604_s28 }
 0x41a   :  { %v5122_v25 = vadd.f32 %v12416_v45, %v5051_v33  ;;  %v13514_v33 = vld [vmem:[#allocation17_spill] sm:$0xff] }
 0x41b   :  { %v8524_v5 = vpack.i.bf16 %v13514_v33, %v13513_v51 }
 0x41c   :  { %v5186_v41 = vmax.f32 %v5122_v25, 0.0  ;;  %v5180_v25 = vmax.f32 %v5116_v8, 0.0 }
 0x41d   :  { %8495 = vrot.lane.b32.xlu0 %v8494_v57, %s8604_s28  ;;  %8490 = vrot.lane.b32.xlu1 %v8439_v63, %s8602_s19  ;;  %v13512_v63 = vld [vmem:[#allocation15_spill] sm:$0xff] }
 0x41e   :  { %v12429_v18 = vmax.f32 %v5178_v28, %v5186_v41  ;;  %v8514_v61 = vpack.i.bf16 %v13512_v63, %v13511_v35 }
 0x41f   :  { %v4770_v46 = vpop.f32.mrb[228].mxu1 }
 0x420   :  { %v5052_v58 = vmul.f32 %v12404_v34, %v4770_v46  ;;  %v7751_v42 = vpop.f32.mrb[229].mxu1  ;;  %v5046_v46 = vmul.f32 %v12404_v34, %v12158_v60 }
 0x421   :  { %8505 = vrot.lane.b32.xlu0 %v8454_v39, %s8602_s19  ;;  %8500 = vrot.lane.b32.xlu1 %v8494_v57, %s8603_s2 }
 0x422   :  { %v5123_v62 = vadd.f32 %v12416_v45, %v5052_v58  ;;  %v13516_v58 = vld [vmem:[#allocation19_spill] sm:$0xff] }
 0x423   :  { %v4775_v24 = vpop.f32.mrb[230].mxu1  ;;  %v8544_v42 = vpack.i.bf16 %v13516_v58, %v13515_v26 }
 0x424   :  { %v5187_v12 = vmax.f32 %v5123_v62, 0.0  ;;  %v5053_v47 = vmul.f32 %v12404_v34, %v4775_v24  ;;  %v7754_v17 = vpop.f32.mrb[231].mxu1  ;;  %v5117_v62 = vadd.f32 %v12416_v45, %v5046_v46  ;;  %v5047_v24 = vmul.f32 %v12404_v34, %v12162_v56 }
 0x425   :  { %8515 = vrot.lane.b32.xlu0 %v8514_v61, %s8603_s2  ;;  %8510 = vrot.lane.b32.xlu1 %v8514_v61, %s8604_s28 }
 0x426   :  { %v12444_v39 = vmax.f32 %v5179_v31, %v5187_v12  ;;  %v5124_v38 = vadd.f32 %v12416_v45, %v5053_v47  ;;  %v5181_v31 = vmax.f32 %v5117_v62, 0.0  ;;  %v5118_v8 = vadd.f32 %v12416_v45, %v5047_v24 }
 0x428   :  { %v5188_v9 = vmax.f32 %v5124_v38, 0.0  ;;  %v13517_v38 = vld [vmem:[#allocation20_spill] sm:$0xff] }
 0x429   :  { %8525 = vrot.lane.b32.xlu0 %v8524_v5, %s8604_s28  ;;  %8520 = vrot.lane.b32.xlu1 %v8464_v37, %s8602_s19 }
 0x42a   :  { %v12453_v41 = vmax.f32 %v5180_v25, %v5188_v9  ;;  %v5182_v25 = vmax.f32 %v5118_v8, 0.0  ;;  %v13519_v8 = vld [vmem:[#allocation22_spill] sm:$0xff] }
 0x42d   :  { %8535 = vrot.lane.b32.xlu0 %v8484_v2, %s8602_s19  ;;  %8530 = vrot.lane.b32.xlu1 %v8524_v5, %s8603_s2 }
 0x42f   :  { %v4780_v29 = vpop.f32.mrb[232].mxu1 }
 0x430   :  { %v5054_v37 = vmul.f32 %v12404_v34, %v4780_v29  ;;  %v7757_v61 = vpop.f32.mrb[233].mxu1  ;;  %v13518_v29 = vld [vmem:[#allocation21_spill] sm:$0xff] }
 0x431   :  { %8545 = vrot.lane.b32.xlu0 %v8544_v42, %s8603_s2  ;;  %8540 = vrot.lane.b32.xlu1 %v8544_v42, %s8604_s28  ;;  %v5049_v61 = vmul.f32 %v12404_v34, %v12174_v4 }
 0x432   :  { %v5125_v60 = vadd.f32 %v12416_v45, %v5054_v37 }
 0x433   :  { %v4785_v2 = vpop.f32.mrb[234].mxu1 }
 0x434   :  { %v5189_v12 = vmax.f32 %v5125_v60, 0.0  ;;  %v5055_v47 = vmul.f32 %v12404_v34, %v4785_v2  ;;  %v7760_v17 = vpop.f32.mrb[235].mxu1  ;;  %v8386_v60 = vpop.permute.xlu0 %8385 }
 0x435   :  { %4242 = vrot.lane.b32.xlu0 %v13517_v38, %s8604_s28  ;;  %8550 = vrot.lane.b32.xlu1 %v8494_v57, %s8602_s19  ;;  %v5048_v57 = vmul.f32 %v12404_v34, %v12170_v50 }
 0x436   :  { %v12473_v56 = vmax.f32 %v5181_v31, %v5189_v12  ;;  %v5126_v5 = vadd.f32 %v12416_v45, %v5055_v47  ;;  %v8387_v12 = vunpack.i.l.bf16 %v8386_v60 }
 0x437   :  { %v5119_v37 = vadd.f32 %v12416_v45, %v5048_v57 }
 0x438   :  { %v5190_v46 = vmax.f32 %v5126_v5, 0.0  ;;  %v5120_v5 = vadd.f32 %v12416_v45, %v5049_v61 }
 0x439   :  { %4244 = vrot.lane.b32.xlu0 %v13518_v29, %s8604_s28  ;;  %4047 = vrot.lane.b32.xlu1 %v13517_v38, %s8603_s2  ;;  %v5183_v17 = vmax.f32 %v5119_v37, 0.0 }
 0x43a   :  { %v12482_v62 = vmax.f32 %v5182_v25, %v5190_v46  ;;  %v5184_v61 = vmax.f32 %v5120_v5, 0.0  ;;  %v5314_v5 = vld [vmem:[%s13404_s1] sm:$0xff] }
 0x43d   :  { %4049 = vrot.lane.b32.xlu0 %v13518_v29, %s8603_s2  ;;  %3840 = vrot.lane.b32.xlu1 %v13511_v35, %s8602_s19 }
 0x43f   :  { %v4790_v24 = vpop.f32.mrb[236].mxu1 }
 0x440   :  { %v5056_v2 = vmul.f32 %v12404_v34, %v4790_v24  ;;  %v7763_v31 = vpop.f32.mrb[237].mxu1 }
 0x441   :  { %4051 = vrot.lane.b32.xlu0 %v13519_v8, %s8603_s2  ;;  %4246 = vrot.lane.b32.xlu1 %v13519_v8, %s8604_s28 }
 0x442   :  { %v5127_v50 = vadd.f32 %v12416_v45, %v5056_v2  ;;  %v13520_v2 = vld [vmem:[#allocation13_spill] sm:$0xff] }
 0x443   :  { %v4795_v47 = vpop.f32.mrb[238].mxu1  ;;  %v4349_v31 = vsel %vm4313_vm3, %v13520_v2, %v8387_v12 }
 0x444   :  { %v5191_v25 = vmax.f32 %v5127_v50, 0.0  ;;  %v5057_v4 = vmul.f32 %v12404_v34, %v4795_v47  ;;  %v7766_v46 = vpop.f32.mrb[239].mxu1  ;;  %v8383_v50 = vunpack.i.h.bf16 %v12331_v14  ;;  %v8388_v14 = vunpack.i.h.bf16 %v8386_v60 }
 0x445   :  { %3844 = vrot.lane.b32.xlu0 %v13513_v51, %s8602_s19  ;;  %3842 = vrot.lane.b32.xlu1 %v13512_v63, %s8602_s19 }
 0x446   :  { %v12505_v57 = vmax.f32 %v5183_v17, %v5191_v25  ;;  %v5128_v24 = vadd.f32 %v12416_v45, %v5057_v4  ;;  %v4431_v12 = vsel %vm4387_vm4, %v4349_v31, %v8383_v50  ;;  %v4350_v4 = vsel %vm4313_vm3, %v11725_v10, %v13488_v6 }
 0x447   :  { %v8396_v37 = vpop.permute.xlu0 %8395  ;;  %v8391_v28 = vpop.permute.xlu1 %8390  ;;  %v4351_v60 = vsel %vm4313_vm3, 0.0, %v8388_v14 }
 0x448   :  { %v5192_v47 = vmax.f32 %v5128_v24, 0.0  ;;  %v8397_v46 = vunpack.i.l.bf16 %v8396_v37  ;;  %v8392_v9 = vunpack.i.l.bf16 %v8391_v28  ;;  %v5264_v17 = vmax.f32 %v12482_v62, %v12505_v57  ;;  %v5400_v62 = vld [vmem:[%s13405_s10 + $0x1b8] sm:$0xff] }
 0x449   :  { %8555 = vrot.lane.b32.xlu0 %v8544_v42, %s8602_s19  ;;  %3846 = vrot.lane.b32.xlu1 %v13514_v33, %s8602_s19  ;;  %v8559_v24 = vpack.i.bf16 %v13518_v29, %v13517_v38  ;;  %v8393_v31 = vunpack.i.h.bf16 %v8391_v28 }
 0x44a   :  { %v12516_v25 = vmax.f32 %v5184_v61, %v5192_v47  ;;  %v4513_v42 = vsel %vm4469_vm5, %v4431_v12, %v8392_v9  ;;  %v4432_v2 = vsel %vm4387_vm4, %v4350_v4, %v8397_v46  ;;  %v4433_v9 = vsel %vm4387_vm4, %v4351_v60, %v10337_v15 }
 0x44b   :  { %7795 = vmatmul.mubr.f32.gmra.mrb[2].mxu1 %v4513_v42  ;;  %v8401_v61 = vpop.permute.xlu1 %8400  ;;  %v4514_v10 = vsel %vm4469_vm5, %v4432_v2, %v10937_v22  ;;  %v4515_v28 = vsel %vm4469_vm5, %v4433_v9, %v8393_v31  ;;  %v8398_v46 = vunpack.i.h.bf16 %v8396_v37 }
 0x44c   :  { %7797 = vmatprep.mubr.msk.f32.mxu1 %vm8600_vm2, %v13460_v11  ;;  %v8402_v50 = vunpack.i.l.bf16 %v8401_v61 }
 0x44d   :  { %5318 = vperm.xlu0 %8564, %v5314_v5   ;;  %8560 = vrot.lane.b32.xlu1 %v8559_v24, %s8602_s19 }
 0x44e   :  { %v4352_v47 = vsel %vm4313_vm3, %v11953_v23, %v8402_v50 }
 0x44f   :  { %7798 = vmatmul.mubr.f32.gmra.mrb[4].mxu1 %v4514_v10 }
 0x450   :  { %7800 = vmatprep.mubr.msk.f32.mxu1 %vm8600_vm2, %v13460_v11 }
 0x451   :  { %8567 = vrot.lane.b32.xlu0 %v12142_v16, %s8603_s2  ;;  %5327 = vperm.xlu1 %8565, %v5314_v5   ;;  %v8403_v16 = vunpack.i.h.bf16 %v8401_v61 }
 0x452   :  { %8586 = vset.pattern.permute.xlu0 %v8606_v49  ;;  %v4434_v49 = vsel %vm4387_vm4, %v4352_v47, %v8398_v46 }
 0x453   :  { %7801 = vmatmul.mubr.f32.gmra.mrb[6].mxu1 %v4515_v28  ;;  %v4353_v42 = vsel %vm4313_vm3, %v11986_v43, %v8403_v16 }
 0x454   :  { %7803 = vmatprep.mubr.msk.f32.mxu1 %vm8600_vm2, %v13460_v11 }
 0x455   :  { %3856 = vrot.lane.b32.xlu1 %v13519_v8, %s8602_s19 }
 0x457   :  { %v8411_v12 = vpop.permute.xlu1 %8410  ;;  %v8406_v5 = vpop.permute.xlu0 %8405 }
 0x458   :  { %v8412_v14 = vunpack.i.l.bf16 %v8411_v12  ;;  %v8407_v4 = vunpack.i.l.bf16 %v8406_v5  ;;  %v8408_v24 = vunpack.i.h.bf16 %v8406_v5  ;;  %v8413_v10 = vunpack.i.h.bf16 %v8411_v12 }
 0x45a   :  { %v4516_v2 = vsel %vm4469_vm5, %v4434_v49, %v8407_v4  ;;  %v4435_v60 = vsel %vm4387_vm4, %v4353_v42, %v8412_v14  ;;  %v5476_v42 = vld [vmem:[%s13403_s11 + $0x18] sm:$0xff] }
 0x45b   :  { %7804 = vmatmul.mubr.f32.gmra.mrb[8].mxu1 %v4516_v2  ;;  %v4517_v23 = vsel %vm4469_vm5, %v4435_v60, %v8408_v24  ;;  %v8416_v37 = vpop.permute.xlu0 %8415  ;;  %v5361_v2 = vld [vmem:[%s13405_s10 + $0x80] sm:$0xff]  ;;  %v5362_v60 = vld [vmem:[%s13405_s10 + $0x88] sm:$0xff] }
 0x45c   :  { %7806 = vmatprep.mubr.msk.f32.mxu1 %vm8600_vm2, %v13460_v11  ;;  %v8417_v31 = vunpack.i.l.bf16 %v8416_v37  ;;  %v8418_v61 = vunpack.i.h.bf16 %v8416_v37  ;;  %v13521_v37 = vld [vmem:[#allocation26_spill] sm:$0xff] }
 0x45e   :  { %v4354_v43 = vsel %vm4313_vm3, %v12003_v21, %v8417_v31  ;;  %v4355_v46 = vsel %vm4313_vm3, %v12036_v3, %v8418_v61  ;;  %v5475_v3 = vld [vmem:[%s13403_s11 + $0x10] sm:$0xff]  ;;  %v7960_v61 = vpack.c.bf16 %v5362_v60, %v5361_v2 }
 0x45f   :  { %7807 = vmatmul.mubr.f32.gmra.mrb[10].mxu1 %v4517_v23  ;;  %v4436_v47 = vsel %vm4387_vm4, %v4354_v43, %v8413_v10  ;;  %v7958_v24 = vpack.c.bf16 %v5476_v42, %v5475_v3 }
 0x460   :  { %7809 = vmatprep.mubr.msk.f32.mxu1 %vm8600_vm2, %v13460_v11 }
 0x461   :  { %7959 = vmatpush3.bf16.msra.mxu1 %v7958_v24 }
 0x462   :  { %7961 = vmatprep.subr.bf16.mxu1 %v7960_v61 }
 0x467   :  { %v8426_v9 = vpop.permute.xlu0 %8425  ;;  %v8421_v50 = vpop.permute.xlu1 %8420 }
 0x468   :  { %v8427_v28 = vunpack.i.l.bf16 %v8426_v9  ;;  %v8422_v16 = vunpack.i.l.bf16 %v8421_v50  ;;  %v8423_v5 = vunpack.i.h.bf16 %v8421_v50  ;;  %v8428_v43 = vunpack.i.h.bf16 %v8426_v9  ;;  %v13523_v9 = vld [vmem:[#allocation27_spill] sm:$0xff] }
 0x46a   :  { %v4518_v14 = vsel %vm4469_vm5, %v4436_v47, %v8422_v16  ;;  %v4437_v4 = vsel %vm4387_vm4, %v4355_v46, %v8427_v28  ;;  %v13522_v46 = vld [vmem:[#allocation7_spill] sm:$0xff] }
 0x46b   :  { %7810 = vmatmul.mubr.f32.gmra.mrb[12].mxu1 %v4518_v14  ;;  %v4519_v21 = vsel %vm4469_vm5, %v4437_v4, %v8423_v5  ;;  %v8431_v12 = vpop.permute.xlu1 %8430 }
 0x46c   :  { %7812 = vmatprep.mubr.msk.f32.mxu1 %vm8600_vm2, %v13460_v11  ;;  %v8432_v49 = vunpack.i.l.bf16 %v8431_v12  ;;  %v8433_v23 = vunpack.i.h.bf16 %v8431_v12 }
 0x46e   :  { %v4356_v31 = vsel %vm4313_vm3, %v13521_v37, %v8432_v49  ;;  %v4357_v5 = vsel %vm4313_vm3, %v13522_v46, %v8433_v23 }
 0x46f   :  { %7813 = vmatmul.mubr.f32.gmra.mrb[14].mxu1 %v4519_v21  ;;  %v4438_v47 = vsel %vm4387_vm4, %v4356_v31, %v8428_v43  ;;  %v4359_v43 = vsel %vm4313_vm3, %v12119_v55, %v13488_v6 }
 0x470   :  { %7815 = vmatprep.mubr.msk.f32.mxu1 %vm8600_vm2, %v13460_v11 }
 0x477   :  { %v8441_v10 = vpop.permute.xlu1 %8440  ;;  %v8436_v50 = vpop.permute.xlu0 %8435 }
 0x478   :  { %v8442_v28 = vunpack.i.l.bf16 %v8441_v10  ;;  %v8437_v16 = vunpack.i.l.bf16 %v8436_v50  ;;  %v8438_v14 = vunpack.i.h.bf16 %v8436_v50  ;;  %v8443_v24 = vunpack.i.h.bf16 %v8441_v10 }
 0x47a   :  { %v4520_v4 = vsel %vm4469_vm5, %v4438_v47, %v8437_v16  ;;  %v4439_v21 = vsel %vm4387_vm4, %v4357_v5, %v8442_v28 }
 0x47b   :  { %v8446_v12 = vpop.permute.xlu0 %8445  ;;  %7816 = vmatmul.mubr.f32.gmra.mrb[16].mxu1 %v4520_v4  ;;  %v4521_v42 = vsel %vm4469_vm5, %v4439_v21, %v8438_v14 }
 0x47c   :  { %v8447_v49 = vunpack.i.l.bf16 %v8446_v12  ;;  %7818 = vmatprep.mubr.msk.f32.mxu1 %vm8600_vm2, %v13460_v11  ;;  %v8448_v61 = vunpack.i.h.bf16 %v8446_v12 }
 0x47e   :  { %v4358_v3 = vsel %vm4313_vm3, %v13523_v9, %v8447_v49  ;;  %v4360_v46 = vsel %vm4313_vm3, 0.0, %v8448_v61 }
 0x47f   :  { %7819 = vmatmul.mubr.f32.gmra.mrb[18].mxu1 %v4521_v42  ;;  %v8456_v2 = vpop.permute.xlu0 %8455  ;;  %v8451_v60 = vpop.permute.xlu1 %8450  ;;  %v4440_v31 = vsel %vm4387_vm4, %v4358_v3, %v8443_v24  ;;  %v4442_v12 = vsel %vm4387_vm4, %v4360_v46, %v10337_v15 }
 0x480   :  { %v8457_v23 = vunpack.i.l.bf16 %v8456_v2  ;;  %v8452_v37 = vunpack.i.l.bf16 %v8451_v60  ;;  %7821 = vmatprep.mubr.msk.f32.mxu1 %vm8600_vm2, %v13460_v11  ;;  %v8453_v5 = vunpack.i.h.bf16 %v8451_v60  ;;  %v8458_v49 = vunpack.i.h.bf16 %v8456_v2 }
 0x482   :  { %v4522_v50 = vsel %vm4469_vm5, %v4440_v31, %v8452_v37  ;;  %v4441_v28 = vsel %vm4387_vm4, %v4359_v43, %v8457_v23  ;;  %v4524_v3 = vsel %vm4469_vm5, %v4442_v12, %v8453_v5  ;;  %v5050_v12 = vmul.f32 %v12404_v34, %v12394_v30 }
 0x483   :  { %v8466_v10 = vpop.permute.xlu0 %8465  ;;  %v8461_v16 = vpop.permute.xlu1 %8460  ;;  %7822 = vmatmul.mubr.f32.gmra.mrb[20].mxu1 %v4522_v50  ;;  %v4523_v14 = vsel %vm4469_vm5, %v4441_v28, %v10937_v22 }
 0x484   :  { %v8462_v47 = vunpack.i.l.bf16 %v8461_v16  ;;  %7824 = vmatprep.mubr.msk.f32.mxu1 %vm8600_vm2, %v13460_v11  ;;  %v8463_v9 = vunpack.i.h.bf16 %v8461_v16  ;;  %v8467_v37 = vunpack.i.l.bf16 %v8466_v10  ;;  %v8468_v28 = vunpack.i.h.bf16 %v8466_v10 }
 0x486   :  { %v4361_v55 = vsel %vm4313_vm3, %v12231_v32, %v8462_v47  ;;  %v4362_v32 = vsel %vm4313_vm3, %v12259_v52, %v8463_v9 }
 0x487   :  { %v8476_v4 = vpop.permute.xlu0 %8475  ;;  %v8471_v21 = vpop.permute.xlu1 %8470  ;;  %7825 = vmatmul.mubr.f32.gmra.mrb[22].mxu1 %v4523_v14  ;;  %v4443_v23 = vsel %vm4387_vm4, %v4361_v55, %v8458_v49 }
 0x488   :  { %7827 = vmatprep.mubr.msk.f32.mxu1 %vm8600_vm2, %v13460_v11  ;;  %v8472_v42 = vunpack.i.l.bf16 %v8471_v21  ;;  %v8477_v31 = vunpack.i.l.bf16 %v8476_v4  ;;  %v4525_v61 = vsel %vm4469_vm5, %v4443_v23, %v8467_v37  ;;  %v8473_v16 = vunpack.i.h.bf16 %v8471_v21 }
 0x489   :  { %v8478_v47 = vunpack.i.h.bf16 %v8476_v4  ;;  %v5121_v23 = vadd.f32 %v12416_v45, %v5050_v12 }
 0x48a   :  { %v4444_v2 = vsel %vm4387_vm4, %v4362_v32, %v8472_v42  ;;  %v4363_v46 = vsel %vm4313_vm3, %v12288_v54, %v8477_v31 }
 0x48b   :  { %v8486_v24 = vpop.permute.xlu0 %8485  ;;  %v8481_v60 = vpop.permute.xlu1 %8480  ;;  %7828 = vmatmul.mubr.f32.gmra.mrb[24].mxu1 %v4524_v3  ;;  %v4526_v52 = vsel %vm4469_vm5, %v4444_v2, %v8468_v28  ;;  %v4445_v10 = vsel %vm4387_vm4, %v4363_v46, %v8473_v16  ;;  %v4364_v4 = vsel %vm4313_vm3, %v12316_v0, %v8478_v47  ;;  %v5185_v46 = vmax.f32 %v5121_v23, 0.0 }
 0x48c   :  { %7830 = vmatprep.mubr.msk.f32.mxu1 %vm8600_vm2, %v13460_v11  ;;  %v8482_v5 = vunpack.i.l.bf16 %v8481_v60  ;;  %v8487_v14 = vunpack.i.l.bf16 %v8486_v24  ;;  %v8483_v54 = vunpack.i.h.bf16 %v8481_v60  ;;  %v8488_v31 = vunpack.i.h.bf16 %v8486_v24 }
 0x48e   :  { %v4527_v9 = vsel %vm4469_vm5, %v4445_v10, %v8482_v5  ;;  %v4446_v3 = vsel %vm4387_vm4, %v4364_v4, %v8487_v14 }
 0x48f   :  { %v12622_v43 = vpop.permute.xlu0 %8495  ;;  %v8491_v50 = vpop.permute.xlu1 %8490  ;;  %7831 = vmatmul.mubr.f32.gmra.mrb[26].mxu1 %v4525_v61  ;;  %v4528_v2 = vsel %vm4469_vm5, %v4446_v3, %v8483_v54 }
 0x490   :  { %7833 = vmatprep.mubr.msk.f32.mxu1 %vm8600_vm2, %v13460_v11  ;;  %v8492_v49 = vunpack.i.l.bf16 %v8491_v50  ;;  %v8493_v60 = vunpack.i.h.bf16 %v8491_v50  ;;  %v8498_v4 = vunpack.i.h.bf16 %v12622_v43 }
 0x492   :  { %v4365_v30 = vsel %vm4313_vm3, %v12338_v59, %v8492_v49  ;;  %v4366_v24 = vsel %vm4313_vm3, %v12366_v36, %v8493_v60 }
 0x493   :  { %v8501_v55 = vpop.permute.xlu1 %8500  ;;  %7834 = vmatmul.mubr.f32.gmra.mrb[28].mxu1 %v4526_v52  ;;  %v8506_v21 = vpop.permute.xlu0 %8505  ;;  %v4447_v59 = vsel %vm4387_vm4, %v4365_v30, %v8488_v31  ;;  %v13524_v30 = vmax.f32 %v12453_v41, %v12473_v56 }
 0x494   :  { %7836 = vmatprep.mubr.msk.f32.mxu1 %vm8600_vm2, %v13460_v11  ;;  %v8502_v28 = vunpack.i.l.bf16 %v8501_v55  ;;  %v8503_v3 = vunpack.i.h.bf16 %v8501_v55  ;;  %v8508_v31 = vunpack.i.h.bf16 %v8506_v21 }
 0x496   :  { %v4800_v42 = vpop.f32.mrb[240].mxu1  ;;  %v4448_v12 = vsel %vm4387_vm4, %v4366_v24, %v8502_v28 }
 0x497   :  { %7837 = vmatmul.mubr.f32.gmra.mrb[30].mxu1 %v4527_v9  ;;  %v5058_v37 = vmul.f32 %v12404_v34, %v4800_v42  ;;  %v7769_v32 = vpop.f32.mrb[241].mxu1  ;;  %v12644_v0 = vpop.permute.xlu1 %8510  ;;  %v8497_v34 = vunpack.i.l.bf16 %v12622_v43 }
 0x498   :  { %7839 = vmatprep.mubr.msk.f32.mxu1 %vm8600_vm2, %v13460_v11  ;;  %v8516_v16 = vpop.permute.xlu0 %8515  ;;  %v8512_v23 = vunpack.i.l.bf16 %v12644_v0  ;;  %v4530_v32 = vsel %vm4469_vm5, %v4448_v12, %v8498_v4 }
 0x499   :  { %v5129_v61 = vadd.f32 %v12416_v45, %v5058_v37  ;;  %v8507_v45 = vunpack.i.l.bf16 %v8506_v21  ;;  %v4529_v14 = vsel %vm4469_vm5, %v4447_v59, %v8497_v34  ;;  %v8517_v43 = vunpack.i.l.bf16 %v8516_v16 }
 0x49a   :  { %v4805_v47 = vpop.f32.mrb[242].mxu1  ;;  %v8513_v21 = vunpack.i.h.bf16 %v12644_v0  ;;  %v8518_v24 = vunpack.i.h.bf16 %v8516_v16 }
 0x49b   :  { %7840 = vmatmul.mubr.f32.gmra.mrb[32].mxu1 %v4528_v2  ;;  %v5193_v5 = vmax.f32 %v5129_v61, 0.0  ;;  %v7772_v52 = vpop.f32.mrb[243].mxu1  ;;  %v8521_v49 = vpop.permute.xlu1 %8520  ;;  %v4367_v42 = vsel %vm4313_vm3, %v12378_v19, %v8507_v45  ;;  %v4368_v19 = vsel %vm4313_vm3, %v12386_v7, %v13488_v6  ;;  %v4369_v47 = vsel %vm4313_vm3, 0.0, %v8508_v31 }
 0x49c   :  { %7842 = vmatprep.mubr.msk.f32.mxu1 %vm8600_vm2, %v13460_v11  ;;  %v8526_v36 = vpop.permute.xlu0 %8525  ;;  %v4450_v56 = vsel %vm4387_vm4, %v4368_v19, %v8517_v43  ;;  %v8522_v28 = vunpack.i.l.bf16 %v8521_v49  ;;  %v4451_v52 = vsel %vm4387_vm4, %v4369_v47, %v10337_v15  ;;  %v8523_v0 = vunpack.i.h.bf16 %v8521_v49 }
 0x49d   :  { %v5241_v50 = vmax.f32 %v5185_v46, %v5193_v5  ;;  %v4532_v7 = vsel %vm4469_vm5, %v4450_v56, %v10937_v22  ;;  %v8527_v4 = vunpack.i.l.bf16 %v8526_v36 }
 0x49e   :  { %v12656_v10 = vpop.f32.mrb[244].mxu1  ;;  %v4370_v5 = vsel %vm4313_vm3, %v13504_v1, %v8522_v28 }
 0x49f   :  { %7843 = vmatmul.mubr.f32.gmra.mrb[34].mxu1 %v4529_v14  ;;  %v5265_v54 = vmax.f32 %v12516_v25, %v5241_v50  ;;  %v7775_v9 = vpop.f32.mrb[245].mxu1  ;;  %v4449_v25 = vsel %vm4387_vm4, %v4367_v42, %v8503_v3  ;;  %v8531_v55 = vpop.permute.xlu1 %8530  ;;  %v4533_v50 = vsel %vm4469_vm5, %v4451_v52, %v8513_v21  ;;  %v4452_v12 = vsel %vm4387_vm4, %v4370_v5, %v8518_v24 }
 0x4a0   :  { %7845 = vmatprep.mubr.msk.f32.mxu1 %vm8600_vm2, %v13460_v11  ;;  %v4531_v41 = vsel %vm4469_vm5, %v4449_v25, %v8512_v23  ;;  %v8536_v61 = vpop.permute.xlu0 %8535  ;;  %v8532_v14 = vunpack.i.l.bf16 %v8531_v55  ;;  %v4534_v3 = vsel %vm4469_vm5, %v4452_v12, %v8527_v4  ;;  %v8528_v42 = vunpack.i.h.bf16 %v8526_v36 }
 0x4a1   :  { %v8571_v37 = vpack.i.bf16 %v13524_v30, %v5265_v54  ;;  %v4371_v54 = vsel %vm4313_vm3, %v13505_v40, %v8523_v0  ;;  %v8537_v9 = vunpack.i.l.bf16 %v8536_v61  ;;  %v8533_v23 = vunpack.i.h.bf16 %v8531_v55 }
 0x4a2   :  { %v4453_v16 = vsel %vm4387_vm4, %v4371_v54, %v8532_v14  ;;  %v8538_v30 = vunpack.i.h.bf16 %v8536_v61 }
 0x4a3   :  { %7846 = vmatmul.mubr.f32.gmra.mrb[36].mxu1 %v4530_v32  ;;  %8572 = vrot.lane.b32.xlu1 %v8571_v37, %s8603_s2  ;;  %v8541_v46 = vpop.permute.xlu1 %8540  ;;  %v4372_v37 = vsel %vm4313_vm3, %v13506_v53, %v8537_v9  ;;  %v4535_v40 = vsel %vm4469_vm5, %v4453_v16, %v8528_v42  ;;  %v4377_v9 = vsel %vm4313_vm3, %v13511_v35, %v13488_v6 }
 0x4a4   :  { %7848 = vmatprep.mubr.msk.f32.mxu1 %vm8600_vm2, %v13460_v11  ;;  %v8546_v45 = vpop.permute.xlu0 %8545  ;;  %v8542_v32 = vunpack.i.l.bf16 %v8541_v46  ;;  %v4454_v36 = vsel %vm4387_vm4, %v4372_v37, %v8533_v23  ;;  %v4373_v56 = vsel %vm4313_vm3, %v13507_v44, %v8538_v30  ;;  %v8543_v53 = vunpack.i.h.bf16 %v8541_v46 }
 0x4a5   :  { %v8547_v25 = vunpack.i.l.bf16 %v8546_v45 }
 0x4a6   :  { %v12676_v60 = vpop.f32.mrb[246].mxu1 }
 0x4a7   :  { %v7778_v2 = vpop.f32.mrb[247].mxu1  ;;  %7849 = vmatmul.mubr.f32.gmra.mrb[38].mxu1 %v4531_v41  ;;  %v8551_v1 = vpop.permute.xlu1 %8550  ;;  %v4455_v28 = vsel %vm4387_vm4, %v4373_v56, %v8547_v25 }
 0x4a8   :  { %7851 = vmatprep.mubr.msk.f32.mxu1 %vm8600_vm2, %v13460_v11  ;;  %v4243_v49 = vpop.permute.xlu0 %4242  ;;  %v8552_v41 = vunpack.i.l.bf16 %v8551_v1  ;;  %v4536_v2 = vsel %vm4469_vm5, %v4454_v36, %v8542_v32  ;;  %v8553_v21 = vunpack.i.h.bf16 %v8551_v1  ;;  %v4537_v44 = vsel %vm4469_vm5, %v4455_v28, %v8543_v53 }
 0x4aa   :  { %v12684_v59 = vpop.f32.mrb[248].mxu1  ;;  %v4375_v24 = vsel %vm4313_vm3, %v13509_v20, %v8553_v21 }
 0x4ab   :  { %v7781_v34 = vpop.f32.mrb[249].mxu1  ;;  %7852 = vmatmul.mubr.f32.gmra.mrb[40].mxu1 %v4532_v7  ;;  %v4048_v31 = vpop.permute.xlu1 %4047  ;;  %v4374_v7 = vsel %vm4313_vm3, %v13508_v48, %v8552_v41 }
 0x4ac   :  { %7854 = vmatprep.mubr.msk.f32.mxu1 %vm8600_vm2, %v13460_v11  ;;  %v4245_v55 = vpop.permute.xlu0 %4244  ;;  %v8548_v34 = vunpack.i.h.bf16 %v8546_v45  ;;  %v4457_v48 = vsel %vm4387_vm4, %v4375_v24, %v4048_v31 }
 0x4ad   :  { %v4539_v14 = vsel %vm4469_vm5, %v4457_v48, %v4245_v55  ;;  %v5321_v55 = vlaneseq }
 0x4ae   :  { %v4456_v52 = vsel %vm4387_vm4, %v4374_v7, %v8548_v34 }
 0x4af   :  { %7855 = vmatmul.mubr.f32.gmra.mrb[42].mxu1 %v4533_v50  ;;  %v3841_v5 = vpop.permute.xlu1 %3840  ;;  %v4538_v0 = vsel %vm4469_vm5, %v4456_v52, %v4243_v49  ;;  %v5322_v28 = vshrl.u32 %v5321_v55, 7  ;;  %v5366_v55 = vld [vmem:[%s13405_s10 + $0xa8] sm:$0xff] }
 0x4b0   :  { %7857 = vmatprep.mubr.msk.f32.mxu1 %vm8600_vm2, %v13460_v11  ;;  %v4050_v46 = vpop.permute.xlu0 %4049  ;;  %v4376_v12 = vsel %vm4313_vm3, %v13510_v13, %v3841_v5 }
 0x4b1   :  { %v4458_v1 = vsel %vm4387_vm4, %v4376_v12, %v4050_v46  ;;  %v5323_v34 = vsub.s32 0, %v5322_v28  ;;  %v5332_v5 = vsub.s32 1, %v5322_v28 }
 0x4b3   :  { %7858 = vmatmul.mubr.f32.gmra.mrb[44].mxu1 %v4534_v3  ;;  %v4247_v50 = vpop.permute.xlu1 %4246 }
 0x4b4   :  { %7860 = vmatprep.mubr.msk.f32.mxu1 %vm8600_vm2, %v13460_v11  ;;  %v4052_v45 = vpop.permute.xlu0 %4051  ;;  %v4540_v3 = vsel %vm4469_vm5, %v4458_v1, %v4247_v50 }
 0x4b5   :  { %v4459_v13 = vsel %vm4387_vm4, %v4377_v9, %v4052_v45 }
 0x4b6   :  { %v12706_v43 = vpop.f32.mrb[250].mxu1  ;;  %v4541_v30 = vsel %vm4469_vm5, %v4459_v13, %v10937_v22 }
 0x4b7   :  { %v7784_v19 = vpop.f32.mrb[251].mxu1  ;;  %7861 = vmatmul.mubr.f32.gmra.mrb[46].mxu1 %v4535_v40  ;;  %v3843_v54 = vpop.permute.xlu1 %3842 }
 0x4b8   :  { %7863 = vmatprep.mubr.msk.f32.mxu1 %vm8600_vm2, %v13460_v11  ;;  %v3845_v49 = vpop.permute.xlu0 %3844  ;;  %v4378_v23 = vsel %vm4313_vm3, 0.0, %v3843_v54 }
 0x4b9   :  { %v4460_v35 = vsel %vm4387_vm4, %v4378_v23, %v10337_v15  ;;  %v4379_v37 = vsel %vm4313_vm3, %v13512_v63, %v3845_v49  ;;  %v4386_v23 = vsel %vm4313_vm3, %v13519_v8, %v13488_v6  ;;  %v5363_v8 = vld [vmem:[%s13405_s10 + $0x90] sm:$0xff] }
 0x4ba   :  { %v12714_v61 = vpop.f32.mrb[252].mxu1  ;;  %v4542_v25 = vsel %vm4469_vm5, %v4460_v35, %v10937_v22  ;;  %v4461_v31 = vsel %vm4387_vm4, %v4379_v37, %v10337_v15  ;;  %v4468_v37 = vsel %vm4387_vm4, %v4386_v23, %v10337_v15  ;;  %v5376_v23 = vld [vmem:[%s13405_s10 + $0xf8] sm:$0xff] }
 0x4bb   :  { %v7787_v47 = vpop.f32.mrb[253].mxu1  ;;  %7864 = vmatmul.mubr.f32.gmra.mrb[48].mxu1 %v4536_v2  ;;  %v3847_v40 = vpop.permute.xlu1 %3846  ;;  %v4543_v63 = vsel %vm4469_vm5, %v4461_v31, %v10937_v22  ;;  %v4550_v6 = vsel %vm4469_vm5, %v4468_v37, %v10937_v22 }
 0x4bc   :  { %7866 = vmatprep.mubr.msk.f32.mxu1 %vm8600_vm2, %v13460_v11  ;;  %v8556_v32 = vpop.permute.xlu0 %8555  ;;  %v4380_v41 = vsel %vm4313_vm3, %v13513_v51, %v3847_v40  ;;  %v5346_v40 = vld [vmem:[%s13405_s10 + $0x8] sm:$0xff] }
 0x4bd   :  { %v8557_v19 = vunpack.i.l.bf16 %v8556_v32  ;;  %v4462_v36 = vsel %vm4387_vm4, %v4380_v41, %v10337_v15  ;;  %v8558_v56 = vunpack.i.h.bf16 %v8556_v32  ;;  %v5345_v32 = vld [vmem:[%s13405_s10] sm:$0xff] }
 0x4be   :  { %v4544_v51 = vsel %vm4469_vm5, %v4462_v36, %v10937_v22  ;;  %v5365_v36 = vld [vmem:[%s13405_s10 + $0xa0] sm:$0xff] }
 0x4bf   :  { %7867 = vmatmul.mubr.f32.gmra.mrb[50].mxu1 %v4537_v44  ;;  %v4381_v53 = vsel %vm4313_vm3, %v13514_v33, %v8557_v19  ;;  %v8561_v2 = vpop.permute.xlu1 %8560  ;;  %v4382_v21 = vsel %vm4313_vm3, %v13515_v26, %v8558_v56  ;;  %v5315_v26 = vld [vmem:[%s13406_s8] sm:$0x3]  ;;  %v7962_v19 = vpack.c.bf16 %v5346_v40, %v5345_v32  ;;  %v13525_v56 = vld [vmem:[#allocation24_spill] sm:$0xff]  ;;  %v5360_v40 = vld [vmem:[%s13405_s10 + $0x78] sm:$0xff] }
 0x4c0   :  { %7869 = vmatprep.mubr.msk.f32.mxu1 %vm8600_vm2, %v13460_v11  ;;  %v4463_v47 = vsel %vm4387_vm4, %v4381_v53, %v10337_v15  ;;  %v8562_v7 = vunpack.i.l.bf16 %v8561_v2  ;;  %v4464_v46 = vsel %vm4387_vm4, %v4382_v21, %v10337_v15  ;;  %v8563_v52 = vunpack.i.h.bf16 %v8561_v2  ;;  %v13526_v53 = vld [vmem:[#allocation25_spill] sm:$0xff]  ;;  %v5349_v21 = vld [vmem:[%s13405_s10 + $0x20] sm:$0xff]  ;;  %v5359_v32 = vld [vmem:[%s13405_s10 + $0x70] sm:$0xff] }
 0x4c1   :  { %v4545_v33 = vsel %vm4469_vm5, %v4463_v47, %v10937_v22  ;;  %v5324_v48 = vrot.slane %v5315_v26, %v5323_v34  ;;  %v5333_v50 = vrot.slane %v5315_v26, %v5332_v5  ;;  %v13527_v2 = vmax.f32 %v13525_v56, %v13526_v53  ;;  %v5368_v34 = vld [vmem:[%s13405_s10 + $0xb8] sm:$0xff]  ;;  %v5370_v26 = vld [vmem:[%s13405_s10 + $0xc8] sm:$0xff]  ;;  %v5379_v56 = vld [vmem:[%s13405_s10 + $0x110] sm:$0xff] }
 0x4c2   :  { %v4383_v24 = vsel %vm4313_vm3, %v13516_v58, %v8562_v7  ;;  %v7968_v47 = vpack.c.bf16 %v5366_v55, %v5365_v36  ;;  %v5350_v7 = vld [vmem:[%s13405_s10 + $0x28] sm:$0xff] }
 0x4c3   :  { %7870 = vmatmul.mubr.f32.gmra.mrb[52].mxu1 %v4538_v0  ;;  %v4546_v0 = vsel %vm4469_vm5, %v4464_v46, %v10937_v22  ;;  %v4465_v45 = vsel %vm4387_vm4, %v4383_v24, %v10337_v15  ;;  %v7970_v5 = vpack.c.bf16 %v5350_v7, %v5349_v21  ;;  %v5351_v46 = vld [vmem:[%s13405_s10 + $0x30] sm:$0xff]  ;;  %v5369_v24 = vld [vmem:[%s13405_s10 + $0xc0] sm:$0xff]  ;;  %v13528_v53 = vld [vmem:[#allocation11_spill] sm:$0xff] }
 0x4c4   :  { %7872 = vmatprep.mubr.msk.f32.mxu1 %vm8600_vm2, %v13460_v11  ;;  %v5397_v21 = vld [vmem:[%s13405_s10 + $0x1a0] sm:$0xff]  ;;  %v5398_v7 = vld [vmem:[%s13405_s10 + $0x1a8] sm:$0xff] }
 0x4c6   :  { %v12735_v4 = vpop.f32.mrb[254].mxu1 }
 0x4c7   :  { %v7790_v20 = vpop.f32.mrb[255].mxu1  ;;  %7873 = vmatmul.mubr.f32.gmra.mrb[54].mxu1 %v4539_v14  ;;  %v4384_v14 = vsel %vm4313_vm3, %v13517_v38, %v8563_v52  ;;  %v5352_v52 = vld [vmem:[%s13405_s10 + $0x38] sm:$0xff] }
 0x4c8   :  { %7875 = vmatprep.mubr.msk.f32.mxu1 %vm8600_vm2, %v13460_v11  ;;  %v4547_v20 = vsel %vm4469_vm5, %v4465_v45, %v10937_v22  ;;  %v4466_v9 = vsel %vm4387_vm4, %v4384_v14, %v10337_v15  ;;  %v5354_v45 = vld [vmem:[%s13405_s10 + $0x48] sm:$0xff]  ;;  %v5371_v14 = vld [vmem:[%s13405_s10 + $0xd0] sm:$0xff] }
 0x4c9   :  { %v4548_v38 = vsel %vm4469_vm5, %v4466_v9, %v10937_v22  ;;  %v5373_v9 = vld [vmem:[%s13405_s10 + $0xe0] sm:$0xff] }
 0x4ca   :  { %v12744_v16 = vpop.f32.mrb[0].mxu1 }
 0x4cb   :  { %v7793_v42 = vpop.f32.mrb[1].mxu1  ;;  %7876 = vmatmul.mubr.f32.gmra.mrb[56].mxu1 %v4540_v3 }
 0x4cc   :  { %7878 = vmatprep.mubr.msk.f32.mxu1 %vm8600_vm2, %v13460_v11  ;;  %v5319_v12 = vpop.permute.xlu0 %5318  ;;  %v6222_v42 = vld [vmem:[%s13407_s9] ss:$0 sm:$0xff] }
 0x4cd   :  { %v5325_v1 = vmul.f32 %v5324_v48, %v5319_v12  ;;  %v7976_v48 = vpack.c.bf16 %v5370_v26, %v5369_v24  ;;  %v5399_v24 = vld [vmem:[%s13405_s10 + $0x1b0] sm:$0xff] }
 0x4ce   :  { %v5383_v26 = vld [vmem:[%s13405_s10 + $0x130] sm:$0xff] }
 0x4cf   :  { %7879 = vmatmul.mubr.f32.gmra.mrb[58].mxu1 %v4541_v30 }
 0x4d0   :  { %7881 = vmatprep.mubr.msk.f32.mxu1 %vm8600_vm2, %v13460_v11  ;;  %v5328_v44 = vpop.permute.xlu1 %5327  ;;  %v12823_v35 = vpop.permute.xlu0 %8567 }
 0x4d1   :  { %v5334_v54 = vmul.f32 %v5333_v50, %v5328_v44  ;;  %v5353_v50 = vld [vmem:[%s13405_s10 + $0x40] sm:$0xff] }
 0x4d2   :  { %v7978_v12 = vpack.c.bf16 %v5354_v45, %v5353_v50  ;;  %v5402_v50 = vld [vmem:[%s13405_s10 + $0x1c8] sm:$0xff] }
 0x4d3   :  { %7882 = vmatmul.mubr.f32.gmra.mrb[60].mxu1 %v4542_v25  ;;  %v5335_v13 = vadd.f32 %v5334_v54, %v5325_v1  ;;  %v5364_v25 = vld [vmem:[%s13405_s10 + $0x98] sm:$0xff]  ;;  %v5355_v1 = vld [vmem:[%s13405_s10 + $0x50] sm:$0xff] }
 0x4d4   :  { %7884 = vmatprep.mubr.msk.f32.mxu1 %vm8600_vm2, %v13460_v11  ;;  %v3857_v58 = vpop.permute.xlu1 %3856  ;;  %v7964_v41 = vpack.c.bf16 %v5364_v25, %v5363_v8  ;;  %v5356_v54 = vld [vmem:[%s13405_s10 + $0x58] sm:$0xff]  ;;  %v5394_v8 = vld [vmem:[%s13405_s10 + $0x188] sm:$0xff]  ;;  %v7990_v25 = vpack.c.bf16 %v5360_v40, %v5359_v32  ;;  %v13031_v40 = vld [vmem:[%s13402_s7] ss:$0 sm:$0xff] }
 0x4d5   :  { %v4385_v3 = vsel %vm4313_vm3, %v13518_v29, %v3857_v58  ;;  %v5343_v30 = vadd.f32 %v6222_v42, %v5335_v13  ;;  %v5372_v58 = vld [vmem:[%s13405_s10 + $0xd8] sm:$0xff]  ;;  %v5358_v42 = vld [vmem:[%s13405_s10 + $0x68] sm:$0xff] }
 0x4d6   :  { %v4467_v49 = vsel %vm4387_vm4, %v4385_v3, %v10337_v15  ;;  %v8569_v15 = vunpack.i.l.bf16 %v12823_v35  ;;  %v5374_v3 = vld [vmem:[%s13405_s10 + $0xe8] sm:$0xff] }
 0x4d7   :  { %7885 = vmatmul.mubr.f32.gmra.mrb[62].mxu1 %v4543_v63  ;;  %v4549_v29 = vsel %vm4469_vm5, %v4467_v49, %v10937_v22  ;;  %v5344_v31 = vmax.f32 %v5343_v30, 0.0  ;;  %v5347_v22 = vld [vmem:[%s13405_s10 + $0x10] sm:$0xff]  ;;  %v5348_v63 = vld [vmem:[%s13405_s10 + $0x18] sm:$0xff]  ;;  %v7984_v13 = vpack.c.bf16 %v5374_v3, %v5373_v9  ;;  %v5357_v49 = vld [vmem:[%s13405_s10 + $0x60] sm:$0xff] }
 0x4d8   :  { %7887 = vmatprep.mubr.msk.f32.mxu1 %vm8600_vm2, %v13460_v11  ;;  %v7966_v28 = vpack.c.bf16 %v5348_v63, %v5347_v22  ;;  %v7986_v30 = vpack.c.bf16 %v5358_v42, %v5357_v49  ;;  %v5395_v22 = vld [vmem:[%s13405_s10 + $0x190] sm:$0xff]  ;;  %v5396_v63 = vld [vmem:[%s13405_s10 + $0x198] sm:$0xff] }
 0x4d9   :  { %v7996_v55 = vpack.c.bf16 %v5396_v63, %v5395_v22  ;;  %v5404_v9 = vld [vmem:[%s13405_s10 + $0x1d8] sm:$0xff]  ;;  %v5407_v63 = vld [vmem:[%s13405_s10 + $0x1f0] sm:$0xff] }
 0x4db   :  { %7888 = vmatmul.mubr.f32.gmra.mrb[64].mxu1 %v4544_v51  ;;  %v5307_v51 = vsel %vm4387_vm4, %v13527_v2, %v8569_v15  ;;  %v13529_v2 = vld [vmem:[#allocation14_spill] sm:$0xff] }
 0x4dc   :  { %7890 = vmatprep.mubr.msk.f32.mxu1 %vm8600_vm2, %v13460_v11 }
 0x4df   :  { %7891 = vmatmul.mubr.f32.gmra.mrb[66].mxu1 %v4545_v33  ;;  %v5367_v33 = vld [vmem:[%s13405_s10 + $0xb0] sm:$0xff] }
 0x4e0   :  { %7893 = vmatprep.mubr.msk.f32.mxu1 %vm8600_vm2, %v13460_v11  ;;  %v7972_v44 = vpack.c.bf16 %v5368_v34, %v5367_v33 }
 0x4e3   :  { %7894 = vmatmul.mubr.f32.gmra.mrb[68].mxu1 %v4546_v0  ;;  %v7974_v0 = vpack.c.bf16 %v5352_v52, %v5351_v46  ;;  %v5381_v46 = vld [vmem:[%s13405_s10 + $0x120] sm:$0xff]  ;;  %v5382_v52 = vld [vmem:[%s13405_s10 + $0x128] sm:$0xff] }
 0x4e4   :  { %7896 = vmatprep.mubr.msk.f32.mxu1 %vm8600_vm2, %v13460_v11  ;;  %v8002_v57 = vpack.c.bf16 %v5382_v52, %v5381_v46 }
 0x4e7   :  { %7897 = vmatmul.mubr.f32.gmra.mrb[70].mxu1 %v4547_v20  ;;  %v7980_v20 = vpack.c.bf16 %v5372_v58, %v5371_v14 }
 0x4e8   :  { %7899 = vmatprep.mubr.msk.f32.mxu1 %vm8600_vm2, %v13460_v11 }
 0x4eb   :  { %7900 = vmatmul.mubr.f32.gmra.mrb[72].mxu1 %v4548_v38  ;;  %v7982_v38 = vpack.c.bf16 %v5356_v54, %v5355_v1  ;;  %v5386_v1 = vld [vmem:[%s13405_s10 + $0x148] sm:$0xff]  ;;  %v5403_v54 = vld [vmem:[%s13405_s10 + $0x1d0] sm:$0xff] }
 0x4ec   :  { %7902 = vmatprep.mubr.msk.f32.mxu1 %vm8600_vm2, %v13460_v11 }
 0x4ef   :  { %7903 = vmatmul.mubr.f32.gmra.mrb[74].mxu1 %v4549_v29  ;;  %v5375_v29 = vld [vmem:[%s13405_s10 + $0xf0] sm:$0xff] }
 0x4f0   :  { %7905 = vmatprep.mubr.msk.f32.mxu1 %vm8600_vm2, %v13460_v11  ;;  %v7988_v37 = vpack.c.bf16 %v5376_v23, %v5375_v29  ;;  %v8012_v29 = vpack.c.bf16 %v5404_v9, %v5403_v54  ;;  %v5387_v23 = vld [vmem:[%s13405_s10 + $0x150] sm:$0xff]  ;;  %v5425_v54 = vld [vmem:[%s13405_s10 + $0x280] sm:$0xff] }
 0x4f1   :  { %v5409_v9 = vld [vmem:[%s13405_s10 + $0x200] sm:$0xff] }
 0x4f3   :  { %7906 = vmatmul.mubr.f32.gmra.mrb[76].mxu1 %v4550_v6  ;;  %v5393_v6 = vld [vmem:[%s13405_s10 + $0x180] sm:$0xff] }
 0x4f4   :  { %7916 = vmatprep.mubr.msk.f32.mxu1 %vm8600_vm2, %v13460_v11  ;;  %v7992_v15 = vpack.c.bf16 %v5394_v8, %v5393_v6 }
 0x4f7   :  { %7917 = vmatmul.mubr.msk.f32.vlgmr.msra.gmra.mrb[78].mxu1 %vm4313_vm3, %v5344_v31  ;;  %v5377_v31 = vld [vmem:[%s13405_s10 + $0x100] sm:$0xff] }
 0x4f8   :  { %7963 = vmatpush3.bf16.msra.mxu1 %v7962_v19  ;;  %5614 = vmatprep.mubr.f32.mxu1 %v5307_v51  ;;  %v5378_v19 = vld [vmem:[%s13405_s10 + $0x108] sm:$0xff]  ;;  %v13530_v51 = vmax.f32 %v13528_v53, %v13529_v2 }
 0x4f9   :  { %7965 = vmatprep.subr.bf16.mxu1 %v7964_v41  ;;  %v8570_v41 = vunpack.i.h.bf16 %v12823_v35  ;;  %v7994_v36 = vpack.c.bf16 %v5378_v19, %v5377_v31  ;;  %v5380_v35 = vld [vmem:[%s13405_s10 + $0x118] sm:$0xff]  ;;  %v5389_v19 = vld [vmem:[%s13405_s10 + $0x160] sm:$0xff] }
 0x4fa   :  { %v7998_v34 = vpack.c.bf16 %v5380_v35, %v5379_v56 }
 0x4fc   :  { %7967 = vmatpush3.bf16.msra.mxu1 %v7966_v28  ;;  %v5306_v28 = vsel %vm4387_vm4, %v13530_v51, %v8570_v41  ;;  %v5390_v41 = vld [vmem:[%s13405_s10 + $0x168] sm:$0xff]  ;;  %v5391_v51 = vld [vmem:[%s13405_s10 + $0x170] sm:$0xff] }
 0x4fd   :  { %7969 = vmatprep.subr.bf16.mxu1 %v7968_v47  ;;  %v8018_v53 = vpack.c.bf16 %v5390_v41, %v5389_v19  ;;  %v5430_v19 = vld [vmem:[%s13405_s10 + $0x2a8] sm:$0xff] }
 0x500   :  { %7971 = vmatpush3.bf16.msra.mxu1 %v7970_v5 }
 0x501   :  { %7973 = vmatprep.subr.bf16.mxu1 %v7972_v44  ;;  %v8000_v44 = vpack.c.bf16 %v5398_v7, %v5397_v21 }
 0x504   :  { %7975 = vmatpush3.bf16.msra.mxu1 %v7974_v0  ;;  %v5384_v0 = vld [vmem:[%s13405_s10 + $0x138] sm:$0xff] }
 0x505   :  { %7977 = vmatprep.subr.bf16.mxu1 %v7976_v48  ;;  %v5401_v48 = vld [vmem:[%s13405_s10 + $0x1c0] sm:$0xff]  ;;  %v8006_v58 = vpack.c.bf16 %v5384_v0, %v5383_v26 }
 0x508   :  { %7979 = vmatpush3.bf16.msra.mxu1 %v7978_v12  ;;  %v8008_v12 = vpack.c.bf16 %v5402_v50, %v5401_v48  ;;  %v13531_v50 = vmax.f32 %v12429_v18, %v12444_v39  ;;  %v5426_v18 = vld [vmem:[%s13405_s10 + $0x288] sm:$0xff] }
 0x509   :  { %7981 = vmatprep.subr.bf16.mxu1 %v7980_v20  ;;  %v5385_v20 = vld [vmem:[%s13405_s10 + $0x140] sm:$0xff]  ;;  %v8024_v39 = vpack.c.bf16 %v5426_v18, %v5425_v54  ;;  %v5420_v54 = vld [vmem:[%s13405_s10 + $0x258] sm:$0xff] }
 0x50a   :  { %v8010_v42 = vpack.c.bf16 %v5386_v1, %v5385_v20  ;;  %v5437_v18 = vld [vmem:[%s13405_s10 + $0x2e0] sm:$0xff] }
 0x50c   :  { %7983 = vmatpush3.bf16.msra.mxu1 %v7982_v38  ;;  %v13012_v38 = vld [vmem:[%s13401_s6] ss:$0 sm:$0xff] }
 0x50d   :  { %7985 = vmatprep.subr.bf16.mxu1 %v7984_v13  ;;  %v5059_v13 = vmul.f32 %v13012_v38, %v12656_v10  ;;  %v5406_v10 = vld [vmem:[%s13405_s10 + $0x1e8] sm:$0xff]  ;;  %v5062_v1 = vmul.f32 %v13012_v38, %v12706_v43 }
 0x50f   :  { %v5130_v6 = vadd.f32 %v13031_v40, %v5059_v13  ;;  %v5133_v43 = vadd.f32 %v13031_v40, %v5062_v1  ;;  %v5419_v1 = vld [vmem:[%s13405_s10 + $0x250] sm:$0xff] }
 0x510   :  { %7987 = vmatpush3.bf16.msra.mxu1 %v7986_v30  ;;  %v5388_v30 = vld [vmem:[%s13405_s10 + $0x158] sm:$0xff] }
 0x511   :  { %7989 = vmatprep.subr.bf16.mxu1 %v7988_v37  ;;  %v5405_v37 = vld [vmem:[%s13405_s10 + $0x1e0] sm:$0xff]  ;;  %v5194_v56 = vmax.f32 %v5130_v6, 0.0  ;;  %v5412_v6 = vld [vmem:[%s13405_s10 + $0x218] sm:$0xff] }
 0x512   :  { %v8016_v31 = vpack.c.bf16 %v5406_v10, %v5405_v37 }
 0x514   :  { %7991 = vmatpush3.bf16.msra.mxu1 %v7990_v25 }
 0x515   :  { %7993 = vmatprep.subr.bf16.mxu1 %v7992_v15  ;;  %v12958_v47 = vpop.permute.xlu1 %8572  ;;  %v8014_v15 = vpack.c.bf16 %v5388_v30, %v5387_v23  ;;  %v5063_v23 = vmul.f32 %v13012_v38, %v12714_v61  ;;  %v5429_v61 = vld [vmem:[%s13405_s10 + $0x2a0] sm:$0xff] }
 0x516   :  { %v8574_v33 = vunpack.i.l.bf16 %v12958_v47  ;;  %v8575_v52 = vunpack.i.h.bf16 %v12958_v47 }
 0x517   :  { %5615 = vmatmul.mubr.f32.vlgmr.msra.gmra.mrb[80].mxu1 %v5306_v28  ;;  %v5392_v28 = vld [vmem:[%s13405_s10 + $0x178] sm:$0xff]  ;;  %v5134_v41 = vadd.f32 %v13031_v40, %v5063_v23  ;;  %v5422_v23 = vld [vmem:[%s13405_s10 + $0x268] sm:$0xff] }
 0x518   :  { %7995 = vmatpush3.bf16.msra.mxu1 %v7994_v36  ;;  %v5309_v5 = vsel %vm4387_vm4, %v5264_v17, %v8574_v33  ;;  %v8004_v17 = vpack.c.bf16 %v5400_v62, %v5399_v24  ;;  %v5408_v36 = vld [vmem:[%s13405_s10 + $0x1f8] sm:$0xff] }
 0x519   :  { %7997 = vmatprep.subr.bf16.mxu1 %v7996_v55  ;;  %5684 = vmatprep.mubr.f32.mxu1 %v5309_v5  ;;  %v5060_v55 = vmul.f32 %v13012_v38, %v12676_v60  ;;  %v8020_v2 = vpack.c.bf16 %v5408_v36, %v5407_v63  ;;  %v5061_v60 = vmul.f32 %v13012_v38, %v12684_v59 }
 0x51b   :  { %v5131_v33 = vadd.f32 %v13031_v40, %v5060_v55  ;;  %v8032_v55 = vpack.c.bf16 %v5430_v19, %v5429_v61 }
 0x51c   :  { %7999 = vmatpush3.bf16.msra.mxu1 %v7998_v34 }
 0x51d   :  { %8001 = vmatprep.subr.bf16.mxu1 %v8000_v44  ;;  %v8022_v44 = vpack.c.bf16 %v5392_v28, %v5391_v51  ;;  %v5195_v62 = vmax.f32 %v5131_v33, 0.0  ;;  %v5431_v28 = vld [vmem:[%s13405_s10 + $0x2b0] sm:$0xff]  ;;  %v5198_v33 = vmax.f32 %v5134_v41, 0.0 }
 0x51e   :  { %v12995_v45 = vpop.f32.mrb[2].mxu1 }
 0x51f   :  { %v7796_v14 = vpop.f32.mrb[3].mxu1 }
 0x520   :  { %8003 = vmatpush3.bf16.msra.mxu1 %v8002_v57  ;;  %v5132_v57 = vadd.f32 %v13031_v40, %v5061_v60  ;;  %v5308_v14 = vsel %vm4387_vm4, %v13531_v50, %v8575_v52  ;;  %v5433_v52 = vld [vmem:[%s13405_s10 + $0x2c0] sm:$0xff]  ;;  %v5436_v50 = vld [vmem:[%s13405_s10 + $0x2d8] sm:$0xff] }
 0x521   :  { %8005 = vmatprep.subr.bf16.mxu1 %v8004_v17 }
 0x522   :  { %v4849_v3 = vpop.f32.mrb[4].mxu1 }
 0x523   :  { %v7799_v49 = vpop.f32.mrb[5].mxu1  ;;  %v5410_v3 = vld [vmem:[%s13405_s10 + $0x208] sm:$0xff] }
 0x524   :  { %8007 = vmatpush3.bf16.msra.mxu1 %v8006_v58  ;;  %v5196_v58 = vmax.f32 %v5132_v57, 0.0  ;;  %v8026_v13 = vpack.c.bf16 %v5410_v3, %v5409_v9  ;;  %v5417_v57 = vld [vmem:[%s13405_s10 + $0x240] sm:$0xff]  ;;  %v8046_v3 = vpack.c.bf16 %v5420_v54, %v5419_v1 }
 0x525   :  { %8009 = vmatprep.subr.bf16.mxu1 %v8008_v12 }
 0x526   :  { %v4853_v32 = vpop.f32.mrb[6].mxu1 }
 0x527   :  { %v5067_v8 = vmul.f32 %v13012_v38, %v4853_v32  ;;  %v7802_v25 = vpop.f32.mrb[7].mxu1  ;;  %v5411_v32 = vld [vmem:[%s13405_s10 + $0x210] sm:$0xff] }
 0x528   :  { %8011 = vmatpush3.bf16.msra.mxu1 %v8010_v42  ;;  %v5427_v42 = vld [vmem:[%s13405_s10 + $0x290] sm:$0xff] }
 0x529   :  { %8013 = vmatprep.subr.bf16.mxu1 %v8012_v29  ;;  %v5138_v22 = vadd.f32 %v13031_v40, %v5067_v8  ;;  %v5428_v29 = vld [vmem:[%s13405_s10 + $0x298] sm:$0xff]  ;;  %v8030_v8 = vpack.c.bf16 %v5412_v6, %v5411_v32 }
 0x52a   :  { %v8028_v10 = vpack.c.bf16 %v5428_v29, %v5427_v42  ;;  %v5421_v29 = vld [vmem:[%s13405_s10 + $0x260] sm:$0xff] }
 0x52b   :  { %v5202_v35 = vmax.f32 %v5138_v22, 0.0  ;;  %v8050_v32 = vpack.c.bf16 %v5422_v23, %v5421_v29 }
 0x52c   :  { %8015 = vmatpush3.bf16.msra.mxu1 %v8014_v15  ;;  %v5197_v15 = vmax.f32 %v5133_v43, 0.0 }
 0x52d   :  { %8017 = vmatprep.subr.bf16.mxu1 %v8016_v31  ;;  %v13056_v21 = vmax.f32 %v5194_v56, %v5202_v35  ;;  %v5413_v56 = vld [vmem:[%s13405_s10 + $0x220] sm:$0xff]  ;;  %v5414_v35 = vld [vmem:[%s13405_s10 + $0x228] sm:$0xff] }
 0x52e   :  { %v4858_v7 = vpop.f32.mrb[8].mxu1 }
 0x52f   :  { %v5068_v34 = vmul.f32 %v13012_v38, %v4858_v7  ;;  %v7805_v5 = vpop.f32.mrb[9].mxu1  ;;  %v5432_v7 = vld [vmem:[%s13405_s10 + $0x2b8] sm:$0xff] }
 0x530   :  { %8019 = vmatpush3.bf16.msra.mxu1 %v8018_v53  ;;  %v8034_v53 = vpack.c.bf16 %v5414_v35, %v5413_v56  ;;  %v8036_v5 = vpack.c.bf16 %v5432_v7, %v5431_v28 }
 0x531   :  { %v5139_v46 = vadd.f32 %v13031_v40, %v5068_v34  ;;  %8021 = vmatprep.subr.bf16.mxu1 %v8020_v2 }
 0x532   :  { %v4863_v24 = vpop.f32.mrb[10].mxu1 }
 0x533   :  { %v5203_v17 = vmax.f32 %v5139_v46, 0.0  ;;  %v5069_v26 = vmul.f32 %v13012_v38, %v4863_v24  ;;  %v7808_v0 = vpop.f32.mrb[11].mxu1  ;;  %v5416_v46 = vld [vmem:[%s13405_s10 + $0x238] sm:$0xff] }
 0x534   :  { %8023 = vmatpush3.bf16.msra.mxu1 %v8022_v44  ;;  %v5415_v44 = vld [vmem:[%s13405_s10 + $0x230] sm:$0xff] }
 0x535   :  { %v13066_v59 = vmax.f32 %v5195_v62, %v5203_v17  ;;  %v5140_v48 = vadd.f32 %v13031_v40, %v5069_v26  ;;  %8025 = vmatprep.subr.bf16.mxu1 %v8024_v39  ;;  %v8038_v24 = vpack.c.bf16 %v5416_v46, %v5415_v44  ;;  %v5434_v62 = vld [vmem:[%s13405_s10 + $0x2c8] sm:$0xff] }
 0x536   :  { %v5418_v17 = vld [vmem:[%s13405_s10 + $0x248] sm:$0xff]  ;;  %v8040_v0 = vpack.c.bf16 %v5434_v62, %v5433_v52 }
 0x537   :  { %v5266_v47 = vmax.f32 %v13056_v21, %v13066_v59  ;;  %v5204_v12 = vmax.f32 %v5140_v48, 0.0  ;;  %5685 = vmatmul.mubr.f32.vlgmr.msra.gmra.mrb[82].mxu1 %v5308_v14  ;;  %v5435_v48 = vld [vmem:[%s13405_s10 + $0x2d0] sm:$0xff]  ;;  %v8042_v14 = vpack.c.bf16 %v5418_v17, %v5417_v57  ;;  %v5438_v39 = vld [vmem:[%s13405_s10 + $0x2e8] sm:$0xff]  ;;  %v5461_v21 = vld [vmem:[%s13405_s10 + $0x3a0] sm:$0xff] }
 0x538   :  { %8027 = vmatpush3.bf16.msra.mxu1 %v8026_v13  ;;  %v8048_v42 = vpack.c.bf16 %v5438_v39, %v5437_v18  ;;  %v5457_v18 = vld [vmem:[%s13405_s10 + $0x380] sm:$0xff]  ;;  %v5458_v39 = vld [vmem:[%s13405_s10 + $0x388] sm:$0xff] }
 0x539   :  { %v13075_v20 = vmax.f32 %v5196_v58, %v5204_v12  ;;  %8029 = vmatprep.subr.bf16.mxu1 %v8028_v10  ;;  %v5064_v58 = vmul.f32 %v13012_v38, %v12735_v4  ;;  %v8044_v12 = vpack.c.bf16 %v5436_v50, %v5435_v48  ;;  %v5065_v4 = vmul.f32 %v13012_v38, %v12744_v16  ;;  %v5462_v59 = vld [vmem:[%s13405_s10 + $0x3a8] sm:$0xff] }
 0x53b   :  { %v5135_v13 = vadd.f32 %v13031_v40, %v5064_v58 }
 0x53c   :  { %8031 = vmatpush3.bf16.msra.mxu1 %v8030_v8 }
 0x53d   :  { %8033 = vmatprep.subr.bf16.mxu1 %v8032_v55  ;;  %v5199_v6 = vmax.f32 %v5135_v13, 0.0 }
 0x53e   :  { %v4868_v49 = vpop.f32.mrb[12].mxu1 }
 0x53f   :  { %v5070_v30 = vmul.f32 %v13012_v38, %v4868_v49  ;;  %v7811_v37 = vpop.f32.mrb[13].mxu1 }
 0x540   :  { %8035 = vmatpush3.bf16.msra.mxu1 %v8034_v53  ;;  %v5066_v37 = vmul.f32 %v13012_v38, %v12995_v45  ;;  %v5439_v45 = vld [vmem:[%s13405_s10 + $0x2f0] sm:$0xff] }
 0x541   :  { %v5141_v25 = vadd.f32 %v13031_v40, %v5070_v30  ;;  %8037 = vmatprep.subr.bf16.mxu1 %v8036_v5  ;;  %v5136_v30 = vadd.f32 %v13031_v40, %v5065_v4  ;;  %v5423_v53 = vld [vmem:[%s13405_s10 + $0x270] sm:$0xff] }
 0x542   :  { %v4873_v31 = vpop.f32.mrb[14].mxu1  ;;  %v5137_v41 = vadd.f32 %v13031_v40, %v5066_v37 }
 0x543   :  { %v5205_v22 = vmax.f32 %v5141_v25, 0.0  ;;  %v5071_v63 = vmul.f32 %v13012_v38, %v4873_v31  ;;  %v7814_v36 = vpop.f32.mrb[15].mxu1  ;;  %v5200_v19 = vmax.f32 %v5136_v30, 0.0 }
 0x544   :  { %8039 = vmatpush3.bf16.msra.mxu1 %v8038_v24  ;;  %v5201_v44 = vmax.f32 %v5137_v41, 0.0 }
 0x545   :  { %v13122_v2 = vmax.f32 %v5197_v15, %v5205_v22  ;;  %v5142_v51 = vadd.f32 %v13031_v40, %v5071_v63  ;;  %8041 = vmatprep.subr.bf16.mxu1 %v8040_v0  ;;  %v5440_v63 = vld [vmem:[%s13405_s10 + $0x2f8] sm:$0xff] }
 0x546   :  { %v8052_v35 = vpack.c.bf16 %v5440_v63, %v5439_v45 }
 0x547   :  { %v5267_v60 = vmax.f32 %v13075_v20, %v13122_v2  ;;  %v5206_v34 = vmax.f32 %v5142_v51, 0.0  ;;  %v5424_v51 = vld [vmem:[%s13405_s10 + $0x278] sm:$0xff]  ;;  %v8056_v20 = vpack.c.bf16 %v5458_v39, %v5457_v18 }
 0x548   :  { %8043 = vmatpush3.bf16.msra.mxu1 %v8042_v14  ;;  %v8054_v7 = vpack.c.bf16 %v5424_v51, %v5423_v53 }
 0x549   :  { %v13151_v26 = vmax.f32 %v5198_v33, %v5206_v34  ;;  %8045 = vmatprep.subr.bf16.mxu1 %v8044_v12 }
 0x54c   :  { %8047 = vmatpush3.bf16.msra.mxu1 %v8046_v3 }
 0x54d   :  { %8049 = vmatprep.subr.bf16.mxu1 %v8048_v42 }
 0x54e   :  { %v4878_v9 = vpop.f32.mrb[16].mxu1 }
 0x54f   :  { %v5072_v43 = vmul.f32 %v13012_v38, %v4878_v9  ;;  %v7817_v49 = vpop.f32.mrb[17].mxu1 }
 0x550   :  { %8051 = vmatpush3.bf16.msra.mxu1 %v8050_v32 }
 0x551   :  { %v5143_v16 = vadd.f32 %v13031_v40, %v5072_v43  ;;  %8053 = vmatprep.subr.bf16.mxu1 %v8052_v35 }
 0x552   :  { %v4883_v10 = vpop.f32.mrb[18].mxu1 }
 0x553   :  { %v5207_v8 = vmax.f32 %v5143_v16, 0.0  ;;  %v5073_v25 = vmul.f32 %v13012_v38, %v4883_v10  ;;  %v7820_v15 = vpop.f32.mrb[19].mxu1 }
 0x554   :  { %8055 = vmatpush3.bf16.msra.mxu1 %v8054_v7 }
 0x555   :  { %v13188_v31 = vmax.f32 %v5199_v6, %v5207_v8  ;;  %v5144_v61 = vadd.f32 %v13031_v40, %v5073_v25  ;;  %8057 = vmatprep.subr.bf16.mxu1 %v8056_v20 }
 0x556   :  { %v4888_v22 = vpop.f32.mrb[20].mxu1 }
 0x557   :  { %v5208_v36 = vmax.f32 %v5144_v61, 0.0  ;;  %v5074_v55 = vmul.f32 %v13012_v38, %v4888_v22  ;;  %v7823_v56 = vpop.f32.mrb[21].mxu1  ;;  %v5268_v28 = vmax.f32 %v13151_v26, %v13188_v31  ;;  %v8064_v26 = vpack.c.bf16 %v5462_v59, %v5461_v21  ;;  %v5445_v31 = vld [vmem:[%s13405_s10 + $0x320] sm:$0xff] }
 0x559   :  { %v5248_v33 = vmax.f32 %v5200_v19, %v5208_v36  ;;  %v5145_v34 = vadd.f32 %v13031_v40, %v5074_v55 }
 0x55a   :  { %v4893_v5 = vpop.f32.mrb[22].mxu1 }
 0x55b   :  { %v5209_v46 = vmax.f32 %v5145_v34, 0.0  ;;  %v7826_v52 = vpop.f32.mrb[23].mxu1 }
 0x55d   :  { %v5249_v24 = vmax.f32 %v5201_v44, %v5209_v46 }
 0x55e   :  { %v4897_v62 = vpop.f32.mrb[24].mxu1 }
 0x55f   :  { %v5269_v57 = vmax.f32 %v5248_v33, %v5249_v24  ;;  %v7829_v17 = vpop.f32.mrb[25].mxu1  ;;  %v5075_v42 = vmul.f32 %v13012_v38, %v4897_v62 }
 0x561   :  { %v8576_v0 = vpack.i.bf16 %v5267_v60, %v5269_v57  ;;  %v5146_v16 = vadd.f32 %v13031_v40, %v5075_v42 }
 0x562   :  { %v4902_v48 = vpop.f32.mrb[26].mxu1 }
 0x563   :  { %8577 = vrot.lane.b32.xlu0 %v8576_v0, %s8603_s2  ;;  %v7832_v50 = vpop.f32.mrb[27].mxu1  ;;  %v5076_v30 = vmul.f32 %v13012_v38, %v4902_v48  ;;  %v5210_v25 = vmax.f32 %v5146_v16, 0.0 }
 0x565   :  { %v5147_v15 = vadd.f32 %v13031_v40, %v5076_v30 }
 0x566   :  { %v4907_v14 = vpop.f32.mrb[28].mxu1 }
 0x567   :  { %v7835_v58 = vpop.f32.mrb[29].mxu1  ;;  %v5077_v6 = vmul.f32 %v13012_v38, %v4907_v14  ;;  %v5211_v55 = vmax.f32 %v5147_v15, 0.0 }
 0x569   :  { %v5148_v63 = vadd.f32 %v13031_v40, %v5077_v6 }
 0x56a   :  { %v4912_v12 = vpop.f32.mrb[30].mxu1 }
 0x56b   :  { %v7838_v1 = vpop.f32.mrb[31].mxu1  ;;  %v5078_v56 = vmul.f32 %v13012_v38, %v4912_v12  ;;  %v5212_v34 = vmax.f32 %v5148_v63, 0.0 }
 0x56d   :  { %v5149_v46 = vadd.f32 %v13031_v40, %v5078_v56 }
 0x56e   :  { %v4917_v54 = vpop.f32.mrb[32].mxu1 }
 0x56f   :  { %v7841_v4 = vpop.f32.mrb[33].mxu1  ;;  %v5079_v5 = vmul.f32 %v13012_v38, %v4917_v54  ;;  %v5213_v14 = vmax.f32 %v5149_v46, 0.0 }
 0x571   :  { %v5150_v48 = vadd.f32 %v13031_v40, %v5079_v5 }
 0x572   :  { %v4922_v2 = vpop.f32.mrb[34].mxu1 }
 0x573   :  { %v7844_v60 = vpop.f32.mrb[35].mxu1  ;;  %v5080_v58 = vmul.f32 %v13012_v38, %v4922_v2  ;;  %v5214_v4 = vmax.f32 %v5150_v48, 0.0 }
 0x576   :  { %v4927_v9 = vpop.f32.mrb[36].mxu1 }
 0x577   :  { %v7847_v3 = vpop.f32.mrb[37].mxu1  ;;  %v5081_v20 = vmul.f32 %v13012_v38, %v4927_v9 }
 0x578   :  { %v5151_v3 = vadd.f32 %v13031_v40, %v5080_v58 }
 0x579   :  { %v5152_v16 = vadd.f32 %v13031_v40, %v5081_v20 }
 0x57a   :  { %v4932_v13 = vpop.f32.mrb[38].mxu1 }
 0x57b   :  { %v7850_v43 = vpop.f32.mrb[39].mxu1  ;;  %v5216_v15 = vmax.f32 %v5152_v16, 0.0 }
 0x57e   :  { %v4937_v49 = vpop.f32.mrb[40].mxu1 }
 0x57f   :  { %v7853_v29 = vpop.f32.mrb[41].mxu1 }
 0x582   :  { %v4941_v23 = vpop.f32.mrb[42].mxu1 }
 0x583   :  { %v5083_v37 = vmul.f32 %v13012_v38, %v4941_v23  ;;  %v7856_v10 = vpop.f32.mrb[43].mxu1 }
 0x584   :  { %v5082_v10 = vmul.f32 %v13012_v38, %v4932_v13 }
 0x585   :  { %v5154_v32 = vadd.f32 %v13031_v40, %v5083_v37  ;;  %v5215_v37 = vmax.f32 %v5151_v3, 0.0  ;;  %v5442_v3 = vld [vmem:[%s13405_s10 + $0x308] sm:$0xff] }
 0x586   :  { %v4946_v8 = vpop.f32.mrb[44].mxu1 }
 0x587   :  { %v5218_v61 = vmax.f32 %v5154_v32, 0.0  ;;  %v5084_v19 = vmul.f32 %v13012_v38, %v4946_v8  ;;  %v7859_v41 = vpop.f32.mrb[45].mxu1 }
 0x589   :  { %v13226_v22 = vmax.f32 %v5210_v25, %v5218_v61  ;;  %v5155_v45 = vadd.f32 %v13031_v40, %v5084_v19  ;;  %v5153_v19 = vadd.f32 %v13031_v40, %v5082_v10 }
 0x58a   :  { %v4951_v36 = vpop.f32.mrb[46].mxu1 }
 0x58b   :  { %v5219_v35 = vmax.f32 %v5155_v45, 0.0  ;;  %v5085_v53 = vmul.f32 %v13012_v38, %v4951_v36  ;;  %v7862_v51 = vpop.f32.mrb[47].mxu1 }
 0x58d   :  { %v13232_v7 = vmax.f32 %v5211_v55, %v5219_v35  ;;  %v5156_v33 = vadd.f32 %v13031_v40, %v5085_v53  ;;  %v5217_v35 = vmax.f32 %v5153_v19, 0.0  ;;  %v5447_v19 = vld [vmem:[%s13405_s10 + $0x330] sm:$0xff] }
 0x58e   :  { %v4956_v44 = vpop.f32.mrb[48].mxu1 }
 0x58f   :  { %v5270_v52 = vmax.f32 %v13226_v22, %v13232_v7  ;;  %v5220_v24 = vmax.f32 %v5156_v33, 0.0  ;;  %v5086_v62 = vmul.f32 %v13012_v38, %v4956_v44  ;;  %v7865_v57 = vpop.f32.mrb[49].mxu1  ;;  %v5840_v22 = vld [vmem:[%s13408_s13 + $0x8] sm:$0xff] }
 0x591   :  { %v5252_v17 = vmax.f32 %v5212_v34, %v5220_v24  ;;  %v5157_v0 = vadd.f32 %v13031_v40, %v5086_v62 }
 0x592   :  { %v4961_v50 = vpop.f32.mrb[50].mxu1 }
 0x593   :  { %v5221_v12 = vmax.f32 %v5157_v0, 0.0  ;;  %v5087_v1 = vmul.f32 %v13012_v38, %v4961_v50  ;;  %v7868_v54 = vpop.f32.mrb[51].mxu1 }
 0x595   :  { %v5253_v18 = vmax.f32 %v5213_v14, %v5221_v12  ;;  %v5158_v39 = vadd.f32 %v13031_v40, %v5087_v1 }
 0x596   :  { %v4966_v60 = vpop.f32.mrb[52].mxu1 }
 0x597   :  { %v5271_v43 = vmax.f32 %v5252_v17, %v5253_v18  ;;  %v5222_v49 = vmax.f32 %v5158_v39, 0.0  ;;  %v5088_v42 = vmul.f32 %v13012_v38, %v4966_v60  ;;  %v7871_v29 = vpop.f32.mrb[53].mxu1  ;;  %v5441_v60 = vld [vmem:[%s13405_s10 + $0x300] sm:$0xff] }
 0x598   :  { %v8058_v16 = vpack.c.bf16 %v5442_v3, %v5441_v60 }
 0x599   :  { %v13248_v23 = vmax.f32 %v5214_v4, %v5222_v49  ;;  %v5159_v2 = vadd.f32 %v13031_v40, %v5088_v42  ;;  %v5459_v49 = vld [vmem:[%s13405_s10 + $0x390] sm:$0xff]  ;;  %v5460_v42 = vld [vmem:[%s13405_s10 + $0x398] sm:$0xff] }
 0x59a   :  { %v4971_v30 = vpop.f32.mrb[54].mxu1  ;;  %v8060_v10 = vpack.c.bf16 %v5460_v42, %v5459_v49 }
 0x59b   :  { %v5223_v32 = vmax.f32 %v5159_v2, 0.0  ;;  %v5089_v9 = vmul.f32 %v13012_v38, %v4971_v30  ;;  %v7874_v6 = vpop.f32.mrb[55].mxu1 }
 0x59c   :  { %v5463_v6 = vld [vmem:[%s13405_s10 + $0x3b0] sm:$0xff] }
 0x59d   :  { %v13254_v8 = vmax.f32 %v5215_v37, %v5223_v32  ;;  %v5160_v25 = vadd.f32 %v13031_v40, %v5089_v9  ;;  %v5443_v32 = vld [vmem:[%s13405_s10 + $0x310] sm:$0xff]  ;;  %v5444_v9 = vld [vmem:[%s13405_s10 + $0x318] sm:$0xff] }
 0x59e   :  { %v4976_v61 = vpop.f32.mrb[56].mxu1 }
 0x59f   :  { %v5224_v41 = vmax.f32 %v5160_v25, 0.0  ;;  %v5090_v45 = vmul.f32 %v13012_v38, %v4976_v61  ;;  %v7877_v63 = vpop.f32.mrb[57].mxu1  ;;  %v5272_v36 = vmax.f32 %v13248_v23, %v13254_v8  ;;  %v5464_v25 = vld [vmem:[%s13405_s10 + $0x3b8] sm:$0xff] }
 0x5a0   :  { %v8068_v61 = vpack.c.bf16 %v5464_v25, %v5463_v6  ;;  %v5466_v63 = vld [vmem:[%s13405_s10 + $0x3c8] sm:$0xff] }
 0x5a1   :  { %v5256_v13 = vmax.f32 %v5216_v15, %v5224_v41  ;;  %v5161_v55 = vadd.f32 %v13031_v40, %v5090_v45  ;;  %v5448_v41 = vld [vmem:[%s13405_s10 + $0x338] sm:$0xff]  ;;  %v5465_v45 = vld [vmem:[%s13405_s10 + $0x3c0] sm:$0xff] }
 0x5a2   :  { %v4981_v56 = vpop.f32.mrb[58].mxu1 }
 0x5a3   :  { %v5225_v53 = vmax.f32 %v5161_v55, 0.0  ;;  %v7880_v51 = vpop.f32.mrb[59].mxu1  ;;  %v8072_v55 = vpack.c.bf16 %v5466_v63, %v5465_v45  ;;  %v5449_v56 = vld [vmem:[%s13405_s10 + $0x340] sm:$0xff] }
 0x5a4   :  { %v5468_v51 = vld [vmem:[%s13405_s10 + $0x3d8] sm:$0xff] }
 0x5a5   :  { %v5257_v33 = vmax.f32 %v5217_v35, %v5225_v53  ;;  %v5450_v35 = vld [vmem:[%s13405_s10 + $0x348] sm:$0xff]  ;;  %v5467_v53 = vld [vmem:[%s13405_s10 + $0x3d0] sm:$0xff] }
 0x5a6   :  { %v4985_v34 = vpop.f32.mrb[60].mxu1 }
 0x5a7   :  { %v5273_v5 = vmax.f32 %v5256_v13, %v5257_v33  ;;  %v7883_v44 = vpop.f32.mrb[61].mxu1  ;;  %v8070_v13 = vpack.c.bf16 %v5448_v41, %v5447_v19  ;;  %v8074_v33 = vpack.c.bf16 %v5450_v35, %v5449_v56  ;;  %v8076_v34 = vpack.c.bf16 %v5468_v51, %v5467_v53 }
 0x5a8   :  { %v5452_v44 = vld [vmem:[%s13405_s10 + $0x358] sm:$0xff] }
 0x5a9   :  { %v8581_v46 = vpack.i.bf16 %v5271_v43, %v5273_v5  ;;  %v5451_v5 = vld [vmem:[%s13405_s10 + $0x350] sm:$0xff] }
 0x5aa   :  { %v4989_v24 = vpop.f32.mrb[62].mxu1 }
 0x5ab   :  { %8582 = vrot.lane.b32.xlu1 %v8581_v46, %s8603_s2  ;;  %v7886_v38 = vpop.f32.mrb[63].mxu1  ;;  %v5469_v46 = vld [vmem:[%s13405_s10 + $0x3e0] sm:$0xff]  ;;  %v5470_v24 = vld [vmem:[%s13405_s10 + $0x3e8] sm:$0xff] }
 0x5ae   :  { %v4993_v62 = vpop.f32.mrb[64].mxu1 }
 0x5af   :  { %v7889_v57 = vpop.f32.mrb[65].mxu1 }
 0x5b0   :  { %v8078_v57 = vpack.c.bf16 %v5452_v44, %v5451_v5 }
 0x5b2   :  { %v4997_v17 = vpop.f32.mrb[66].mxu1 }
 0x5b3   :  { %v7892_v0 = vpop.f32.mrb[67].mxu1 }
 0x5b4   :  { %v8080_v0 = vpack.c.bf16 %v5470_v24, %v5469_v46 }
 0x5b6   :  { %v5001_v48 = vpop.f32.mrb[68].mxu1 }
 0x5b7   :  { %v7895_v50 = vpop.f32.mrb[69].mxu1  ;;  %v5453_v48 = vld [vmem:[%s13405_s10 + $0x360] sm:$0xff] }
 0x5b8   :  { %v5454_v50 = vld [vmem:[%s13405_s10 + $0x368] sm:$0xff] }
 0x5ba   :  { %v5005_v40 = vpop.f32.mrb[70].mxu1 }
 0x5bb   :  { %v7898_v14 = vpop.f32.mrb[71].mxu1  ;;  %v5471_v40 = vld [vmem:[%s13405_s10 + $0x3f0] sm:$0xff] }
 0x5bc   :  { %v5472_v14 = vld [vmem:[%s13405_s10 + $0x3f8] sm:$0xff] }
 0x5be   :  { %v5009_v58 = vpop.f32.mrb[72].mxu1 }
 0x5bf   :  { %v7901_v12 = vpop.f32.mrb[73].mxu1 }
 0x5c0   :  { %v8082_v12 = vpack.c.bf16 %v5454_v50, %v5453_v48 }
 0x5c2   :  { %v5013_v1 = vpop.f32.mrb[74].mxu1 }
 0x5c3   :  { %v7904_v54 = vpop.f32.mrb[75].mxu1  ;;  %v8084_v1 = vpack.c.bf16 %v5472_v14, %v5471_v40 }
 0x5c4   :  { %v5455_v54 = vld [vmem:[%s13405_s10 + $0x370] sm:$0xff] }
 0x5c6   :  { %v5017_v18 = vpop.f32.mrb[76].mxu1 }
 0x5c7   :  { %v7907_v39 = vpop.f32.mrb[77].mxu1  ;;  %v5456_v18 = vld [vmem:[%s13405_s10 + $0x378] sm:$0xff] }
 0x5c8   :  { %v8086_v39 = vpack.c.bf16 %v5456_v18, %v5455_v54 }
 0x5ca   :  { %v5546_v4 = vpop.f32.mrb[78].mxu1 }
 0x5cb   :  { %v7918_v20 = vpop.f32.mrb[79].mxu1 }
 0x5d5   :  { %v8578_v43 = vpop.permute.xlu0 %8577 }
 0x5d6   :  { %v8580_v29 = vunpack.i.h.bf16 %v8578_v43  ;;  %v8579_v2 = vunpack.i.l.bf16 %v8578_v43 }
 0x5d8   :  { %v5310_v30 = vsel %vm4387_vm4, %v5266_v47, %v8580_v29  ;;  %v5311_v37 = vsel %vm4387_vm4, %v5268_v28, %v8579_v2  ;;  %v8062_v47 = vpack.c.bf16 %v5444_v9, %v5443_v32  ;;  %v5446_v28 = vld [vmem:[%s13405_s10 + $0x328] sm:$0xff] }
 0x5d9   :  { %5754 = vmatprep.mubr.f32.mxu1 %v5311_v37  ;;  %v8066_v15 = vpack.c.bf16 %v5446_v28, %v5445_v31 }
 0x5da   :  { %5755 = vmatmul.mubr.f32.vlgmr.msra.gmra.mrb[84].mxu1 %v5310_v30 }
 0x5db   :  { %8059 = vmatpush3.bf16.msra.mxu1 %v8058_v16  ;;  %v5839_v16 = vld [vmem:[%s13408_s13] sm:$0xff] }
 0x5dc   :  { %8061 = vmatprep.subr.bf16.mxu1 %v8060_v10  ;;  %v8089_v7 = vpack.c.bf16 %v5840_v22, %v5839_v16 }
 0x5df   :  { %8063 = vmatpush3.bf16.msra.mxu1 %v8062_v47 }
 0x5e0   :  { %8065 = vmatprep.subr.bf16.mxu1 %v8064_v26  ;;  %v6225_v26 = vld [vmem:[%s13410_s14] ss:$0 sm:$0xff] }
 0x5e3   :  { %8067 = vmatpush3.bf16.msra.mxu1 %v8066_v15 }
 0x5e4   :  { %8069 = vmatprep.subr.bf16.mxu1 %v8068_v61 }
 0x5e7   :  { %8071 = vmatpush3.bf16.msra.mxu1 %v8070_v13 }
 0x5e8   :  { %8073 = vmatprep.subr.bf16.mxu1 %v8072_v55 }
 0x5ea   :  { %v6651_v38 = vpop.f32.mrb[80].mxu1 }
 0x5eb   :  { %v6652_v62 = vpop.f32.mrb[81].mxu1  ;;  %8075 = vmatpush3.bf16.msra.mxu1 %v8074_v33 }
 0x5ec   :  { %v6653_v17 = vadd.f32 %v6652_v62, %v6651_v38  ;;  %8077 = vmatprep.subr.bf16.mxu1 %v8076_v34 }
 0x5ee   :  { %v5617_v58 = vadd.f32 %v6653_v17, %v5546_v4 }
 0x5ef   :  { %8079 = vmatpush3.bf16.msra.mxu1 %v8078_v57 }
 0x5f0   :  { %8081 = vmatprep.subr.bf16.mxu1 %v8080_v0 }
 0x5f3   :  { %8083 = vmatpush3.bf16.msra.mxu1 %v8082_v12 }
 0x5f4   :  { %8085 = vmatprep.subr.bf16.mxu1 %v8084_v1 }
 0x5f7   :  { %8087 = vmatpush3.bf16.msra.mxu1 %v8086_v39 }
 0x5f8   :  { %8088 = vmatprep.subr.bf16.mxu1 %v13503_v27 }
 0x60a   :  { %v6686_v20 = vpop.f32.mrb[82].mxu1 }
 0x60b   :  { %v6687_v4 = vpop.f32.mrb[83].mxu1 }
 0x60c   :  { %v6688_v60 = vadd.f32 %v6687_v4, %v6686_v20 }
 0x60e   :  { %v5687_v3 = vadd.f32 %v6688_v60, %v5617_v58 }
 0x61d   :  { %v8583_v43 = vpop.permute.xlu1 %8582 }
 0x61e   :  { %v8585_v49 = vunpack.i.h.bf16 %v8583_v43  ;;  %v8584_v42 = vunpack.i.l.bf16 %v8583_v43 }
 0x620   :  { %v5312_v29 = vsel %vm4387_vm4, %v5270_v52, %v8585_v49  ;;  %v5313_v2 = vsel %vm4387_vm4, %v5272_v36, %v8584_v42  ;;  %v5841_v52 = vld [vmem:[%s13408_s13 + $0x10] sm:$0xff] }
 0x621   :  { %5824 = vmatprep.mubr.f32.mxu1 %v5313_v2 }
 0x622   :  { %5825 = vmatmul.mubr.f32.vlgmr.msra.gmra.mrb[86].mxu1 %v5312_v29 }
 0x623   :  { %7927 = vmatprep.mubr.msk.f32.mxu1 %vm8600_vm2, %v13460_v11  ;;  %8090 = vmatpush3.bf16.msra.mxu1 %v8089_v7  ;;  %v5842_v11 = vld [vmem:[%s13408_s13 + $0x18] sm:$0xff] }
 0x624   :  { %8091 = vmatprep.subr.bf16.mxu1 %v13503_v27  ;;  %v8092_v23 = vpack.c.bf16 %v5842_v11, %v5841_v52  ;;  %v6224_v27 = vld [vmem:[%s13409_s12] ss:$0 sm:$0xff] }
 0x627   :  { %8093 = vmatpush3.bf16.msra.mxu1 %v8092_v23 }
 0x6ad   :  { %v6721_v8 = vpop.f32.mrb[84].mxu1 }
 0x6ae   :  { %v6722_v36 = vpop.f32.mrb[85].mxu1 }
 0x6af   :  { %v6723_v30 = vadd.f32 %v6722_v36, %v6721_v8 }
 0x6b1   :  { %v5757_v37 = vadd.f32 %v6723_v30, %v5687_v3 }
 0x6f5   :  { %v6756_v10 = vpop.f32.mrb[86].mxu1 }
 0x6f6   :  { %v6757_v32 = vpop.f32.mrb[87].mxu1 }
 0x6f7   :  { %v6758_v9 = vadd.f32 %v6757_v32, %v6756_v10 }
 0x6f9   :  { %v5827_v21 = vadd.f32 %v6758_v9, %v5757_v37 }
 0x6fb   :  { %v5837_v59 = vadd.f32 %v6224_v27, %v5827_v21 }
 0x6fd   :  { %v5838_v47 = vmax.f32 %v5837_v59, 0.0 }
 0x6ff   :  { %7928 = vmatmul.mubr.msk.f32.vlgmr.msra.gmra.mrb[88].mxu1 %vm4313_vm3, %v5838_v47 }
 0x7d2   :  { %v5919_v31 = vpop.f32.mrb[88].mxu1 }
 0x7d3   :  { %v5920_v28 = vadd.f32 %v6225_v26, %v5919_v31  ;;  %v7929_v6 = vpop.f32.mrb[89].mxu1 }
 0x7d5   :  { %5923 = vst.msk [vmem:[%s13411_s15] sm:$0xff] %vm340_vm1, %v5920_v28 }

</bundles_post_ra>
